<compile_context>
chip_gen: v6e
topology: v6e:2x2x1
jax: 0.10.0
libtpu: 0.0.40
codegen_flags: <defaults>
</compile_context>

<pallas_src>
import functools

import jax
import jax.numpy as jnp
from jax.experimental import pallas as pl
from jax.experimental.pallas import tpu as pltpu

SIZE = 64
BOTTLE = 75
LATENT_PAD = 128           # latent padded to one full lane tile inside the kernel
FACTOR = 2
HID = 128 * FACTOR         # 256
ALPHA = 0.2                # LeakyReLU negative slope (explicit in the module)


# ----------------------------------------------------------------------------
# Per-generation tiling configuration
# ----------------------------------------------------------------------------
@functools.cache
def _chip_config():
    """Returns (tn_cap, keep_grid_ge2, vmem_limit_bytes)."""
    big_vmem = False
    try:
        big_vmem = pltpu.get_tpu_info().vmem_capacity_bytes >= 96 * 1024 * 1024
    except Exception:
        try:
            kind = jax.devices()[0].device_kind.lower()
            big_vmem = ("v5" in kind) or ("v6" in kind)
        except Exception:
            big_vmem = False
    if big_vmem:
        # v5e / v6e: 128 MiB physical VMEM, single TensorCore.
        # Big slabs => fewer grid steps (~0.35 us each) and longer DMA bursts.
        return 2048, False, 64 * 1024 * 1024
    # v7x (64 MiB VMEM, 2 TCs) or unknown: keep grid_n >= 2 so the "parallel"
    # axis can shard the weight stream across cores; leave VMEM headroom.
    return 1024, True, 40 * 1024 * 1024


# ----------------------------------------------------------------------------
# Pallas kernels
# ----------------------------------------------------------------------------
def _linear_kernel(x_ref, w_ref, b_ref, o_ref, *, alpha):
    """One (M, tn) output tile; the grid tiles N only (weights streamed).

    x_ref: (M, K) resident activation, w_ref: (K, tn) weight slab,
    b_ref: (1, tn) f32 bias slice, o_ref: (M, tn).
    """
    y = jnp.dot(x_ref[...], w_ref[...], preferred_element_type=jnp.float32)
    y = y + b_ref[...]                       # f32 epilogue (v5e has no bf16 VPU)
    y = jnp.where(y > 0, y, alpha * y)       # LeakyReLU (alpha=1.0 => identity)
    o_ref[...] = y.astype(o_ref.dtype)


def _bottleneck_kernel(h_ref, we_ref, be_ref, wm_ref, bm_ref, wl_ref, bl_ref,
                       eps_ref, wfb_ref, bfb_ref, wd_ref, bd_ref,
                       mean_ref, logvar_ref, y_ref):
    """Fused middle of the network (all f32, everything resident in VMEM):

       e      = LeakyReLU(h @ We + be)          # encoder tail 512 -> 256
       mean   = e @ Wm + bm                     # width padded to 128 lanes
       logvar = e @ Wl + bl
       z      = eps * exp(0.5*logvar) + mean    # eps zero-padded past lane 75
       y0     = z @ Wfb + bfb                   # from_bottle (no activation)
       y      = LeakyReLU(y0 @ Wd + bd)         # decoder head 256 -> 512
    """
    h = h_ref[...].astype(jnp.float32)
    e = jnp.dot(h, we_ref[...], preferred_element_type=jnp.float32) + be_ref[...]
    e = jnp.where(e > 0, e, ALPHA * e)

    mean = jnp.dot(e, wm_ref[...], preferred_element_type=jnp.float32) + bm_ref[...]
    logvar = jnp.dot(e, wl_ref[...], preferred_element_type=jnp.float32) + bl_ref[...]
    z = eps_ref[...] * jnp.exp(0.5 * logvar) + mean

    y = jnp.dot(z, wfb_ref[...], preferred_element_type=jnp.float32) + bfb_ref[...]
    y = jnp.dot(y, wd_ref[...], preferred_element_type=jnp.float32) + bd_ref[...]
    y = jnp.where(y > 0, y, ALPHA * y)

    mean_ref[...] = mean[:, :BOTTLE]          # only the valid 75 lanes
    logvar_ref[...] = logvar[:, :BOTTLE]
    y_ref[...] = y.astype(y_ref.dtype)


# ----------------------------------------------------------------------------
# Wrappers around pallas_call
# ----------------------------------------------------------------------------
def pallas_linear(x, w, b, *, leaky=True, alpha=ALPHA, out_dtype=None):
    """x: (M, K), w: (K, N), b: (N,)  ->  (M, N).  N-tiled, weight-streaming."""
    M, K = x.shape
    K2, N = w.shape
    assert K == K2
    out_dtype = x.dtype if out_dtype is None else out_dtype

    # Design assumption: the full (M, K) activation and the (M, tn) output tile
    # stay resident in VMEM.  Valid for the small-batch, weight-bound regime.
    # For large B, add an M grid axis and tile the output (tm, tn) instead.
    assert M * K * x.dtype.itemsize <= 4 * 1024 * 1024, (
        "pallas_linear keeps the activation resident; tile M for large batches")

    tn_cap, keep_grid_ge2, vmem_limit = _chip_config()
    tn = min(tn_cap, N)
    if keep_grid_ge2 and N >= 256 and (N // 2) % 128 == 0:
        tn = min(tn, N // 2)                  # grid_n >= 2 => megacore can shard
    if N % tn != 0 or tn % 128 != 0:
        tn = N                                # fall back to one lane-dense tile
    grid_n = N // tn

    # Triple-buffer the weight stream when the grid is deep enough and the
    # slabs fit comfortably: per-step compute is ~0 at small M, so extra depth
    # keeps the DMA engine back-to-back.
    slab_bytes = K * tn * w.dtype.itemsize
    if grid_n >= 3 and 3 * slab_bytes <= vmem_limit // 2:
        w_spec = pl.BlockSpec((K, tn), lambda j: (0, j),
                              pipeline_mode=pl.Buffered(3))
    else:
        w_spec = pl.BlockSpec((K, tn), lambda j: (0, j))

    cost = pl.CostEstimate(
        flops=2 * M * K * N,
        transcendentals=0,
        bytes_accessed=int(K * N * w.dtype.itemsize
                           + M * K * x.dtype.itemsize
                           + M * N * jnp.dtype(out_dtype).itemsize
                           + N * 4),
    )

    kernel = functools.partial(_linear_kernel, alpha=alpha if leaky else 1.0)
    return pl.pallas_call(
        kernel,
        out_shape=jax.ShapeDtypeStruct((M, N), out_dtype),
        grid_spec=pltpu.PrefetchScalarGridSpec(
            num_scalar_prefetch=0,
            grid=(grid_n,),
            in_specs=[
                pl.BlockSpec((M, K), lambda j: (0, 0)),   # activation: resident
                w_spec,                                   # weight slab stream
                pl.BlockSpec((1, tn), lambda j: (0, j)),  # bias slice (tiny DMA)
            ],
            out_specs=pl.BlockSpec((M, tn), lambda j: (0, j)),
        ),
        compiler_params=pltpu.CompilerParams(
            dimension_semantics=("parallel",),            # megacore shards N (v7x)
            vmem_limit_bytes=vmem_limit,
        ),
        cost_estimate=cost,
    )(x, w, b.reshape(1, N))


def pallas_bottleneck(h, params, eps):
    """Fused encoder-tail / to_mean / to_log / resample / from_bottle /
    decoder-head in one kernel launch."""
    B = h.shape[0]
    we, be = params["enc_tail"]
    wm, bm = params["to_mean"]        # padded to 128 columns
    wl, bl = params["to_log"]         # padded to 128 columns
    wfb, bfb = params["from_bottle"]  # padded to 128 rows (zeros)
    wd, bd = params["dec_head"]

    eps_p = jnp.pad(eps.astype(jnp.float32),
                    ((0, 0), (0, LATENT_PAD - BOTTLE)))   # zero-padded lanes

    args = (h, we, be.reshape(1, -1), wm, bm.reshape(1, -1),
            wl, bl.reshape(1, -1), eps_p, wfb, bfb.reshape(1, -1),
            wd, bd.reshape(1, -1))

    flops = 2 * B * (512 * 256 + 256 * LATENT_PAD * 2
                     + LATENT_PAD * 256 + 256 * 512)
    bytes_accessed = int(sum(a.size * a.dtype.itemsize for a in args)
                         + B * (2 * BOTTLE * 4 + 512 * 2))
    cost = pl.CostEstimate(flops=flops, transcendentals=B * LATENT_PAD,
                           bytes_accessed=bytes_accessed)

    return pl.pallas_call(
        _bottleneck_kernel,
        out_shape=(
            jax.ShapeDtypeStruct((B, BOTTLE), jnp.float32),     # mean
            jax.ShapeDtypeStruct((B, BOTTLE), jnp.float32),     # logvar
            jax.ShapeDtypeStruct((B, 256 * FACTOR), jnp.bfloat16),  # decoder-head out
        ),
        cost_estimate=cost,
    )(*args)


# ----------------------------------------------------------------------------
# Parameter construction (PyTorch-style U(-1/sqrt(in), 1/sqrt(in)))
# ----------------------------------------------------------------------------
def _init_linear(key, fan_in, fan_out, w_dtype=jnp.float32):
    kw, kb = jax.random.split(key)
    bound = 1.0 / jnp.sqrt(jnp.float32(fan_in))
    w = jax.random.uniform(kw, (fan_in, fan_out), jnp.float32, -bound, bound)
    b = jax.random.uniform(kb, (fan_out,), jnp.float32, -bound, bound)
    return w.astype(w_dtype), b


def make_params(key):
    size2 = SIZE * SIZE  # 4096
    enc_dims = [size2, 1024 * FACTOR, 512 * FACTOR, 256 * FACTOR, 128 * FACTOR]
    dec_dims = [128 * FACTOR, 256 * FACTOR, 512 * FACTOR, 1024 * FACTOR, size2]

    keys = iter(jax.random.split(key, 11))
    params = {}

    # 3 wide streaming encoder layers: weights stored/streamed in bf16.
    params["encoder"] = [
        _init_linear(next(keys), enc_dims[i], enc_dims[i + 1], jnp.bfloat16)
        for i in range(3)
    ]
    # Encoder tail (512 -> 256) lives in the fused kernel; kept in f32 for
    # tighter mean/logvar parity with the reference.
    params["enc_tail"] = _init_linear(next(keys), enc_dims[3], enc_dims[4])

    # Bottleneck layers (tiny, f32), zero-padded to a full 128-lane tile.
    wm, bm = _init_linear(next(keys), HID, BOTTLE)
    wl, bl = _init_linear(next(keys), HID, BOTTLE)
    wfb, bfb = _init_linear(next(keys), BOTTLE, HID)
    pad = LATENT_PAD - BOTTLE
    params["to_mean"] = (jnp.pad(wm, ((0, 0), (0, pad))), jnp.pad(bm, (0, pad)))
    params["to_log"] = (jnp.pad(wl, ((0, 0), (0, pad))), jnp.pad(bl, (0, pad)))
    params["from_bottle"] = (jnp.pad(wfb, ((0, pad), (0, 0))), bfb)

    # Decoder head (256 -> 512) also fused, f32.
    params["dec_head"] = _init_linear(next(keys), dec_dims[0], dec_dims[1])

    # 3 wide streaming decoder layers, bf16.
    params["decoder"] = [
        _init_linear(next(keys), dec_dims[i], dec_dims[i + 1], jnp.bfloat16)
        for i in range(1, 4)
    ]
    return params


# ----------------------------------------------------------------------------
# Forward pass (mirrors VAE_FC.forward)
# ----------------------------------------------------------------------------
def vae_fc_forward(params, x, eps):
    B = x.shape[0]
    # torch.flatten(x, start_dim=1); inter-layer activations carried in bf16
    h = x.reshape(B, -1).astype(jnp.bfloat16)

    # encoder (first 3 wide layers): Linear + LeakyReLU(0.2), weight streaming
    for w, b in params["encoder"]:
        h = pallas_linear(h, w, b, leaky=True, out_dtype=jnp.bfloat16)

    # fused: encoder tail + to_mean + to_log + resample + from_bottle + dec head
    # (torch uses torch.cuda.FloatTensor(...).normal_(); eps is an explicit
    #  input here with a fixed PRNG key for determinism)
    mean, logvar, y = pallas_bottleneck(h, params, eps)

    # decoder (last 3 wide layers): Linear + LeakyReLU(0.2); the final layer
    # also has LeakyReLU, exactly as in the PyTorch module. Final output in f32.
    dec = params["decoder"]
    for i, (w, b) in enumerate(dec):
        last = i == len(dec) - 1
        y = pallas_linear(y, w, b, leaky=True,
                          out_dtype=jnp.float32 if last else jnp.bfloat16)

    y = y.reshape(-1, 1, SIZE, SIZE)
    return y, mean, logvar


# ----------------------------------------------------------------------------
# Main
# ----------------------------------------------------------------------------
if __name__ == "__main__":
    key = jax.random.PRNGKey(0)
    kx, keps, kparam = jax.random.split(key, 3)

    B = 2
    x = jax.random.normal(kx, (B, 1, SIZE, SIZE), jnp.float32)  # NCHW
    eps = jax.random.normal(keps, (B, BOTTLE), jnp.float32)
    params = make_params(kparam)

    y, mean, logvar = vae_fc_forward(params, x, eps)
    jax.block_until_ready((y, mean, logvar))

    assert y.shape == (B, 1, SIZE, SIZE)
    assert mean.shape == (B, BOTTLE)
    assert logvar.shape == (B, BOTTLE)
    print("KERNEL_OK")
</pallas_src>

<mosaic_0001>
module attributes {stable_mosaic.version = 11 : i64} {
  func.func @_linear_kernel(%arg0: i32, %arg1: memref<2x4096xbf16, #tpu.memory_space<vmem>>, %arg2: memref<4096x1024xbf16, #tpu.memory_space<vmem>>, %arg3: memref<1x1024xf32, #tpu.memory_space<vmem>>, %arg4: memref<2x1024xbf16, #tpu.memory_space<vmem>>) attributes {dimension_semantics = [#tpu.dimension_semantics<parallel>], iteration_bounds = array<i64: 2>, scalar_prefetch = 0 : i64, scratch_operands = 0 : i64, tpu.core_type = #tpu.core_type<tc>, window_params = [{pipeline_mode = #tpu.pipeline_mode<synchronous>, transform_indices = @transform_0, window_bounds = array<i64: 2, 4096>}, {transform_indices = @transform_1, window_bounds = array<i64: 4096, 1024>}, {transform_indices = @transform_2, window_bounds = array<i64: 1, 1024>}, {transform_indices = @transform_3, window_bounds = array<i64: 2, 1024>}]} {
    %c0 = arith.constant 0 : index
    %c0_0 = arith.constant 0 : index
    %0 = vector.load %arg1[%c0, %c0_0] : memref<2x4096xbf16, #tpu.memory_space<vmem>>, vector<2x4096xbf16>
    %c0_1 = arith.constant 0 : index
    %c0_2 = arith.constant 0 : index
    %1 = vector.load %arg2[%c0_1, %c0_2] : memref<4096x1024xbf16, #tpu.memory_space<vmem>>, vector<4096x1024xbf16>
    %cst = arith.constant dense<0.000000e+00> : vector<2x1024xf32>
    %2 = tpu.matmul %0, %1, %cst {dimension_numbers = #tpu.dot_dimension_numbers<[1], [0], [0], [1], [0, 0, 1, 1], [], []>} : vector<2x4096xbf16>, vector<4096x1024xbf16>, vector<2x1024xf32> -> vector<2x1024xf32>
    %c0_3 = arith.constant 0 : index
    %c0_4 = arith.constant 0 : index
    %3 = vector.load %arg3[%c0_3, %c0_4] : memref<1x1024xf32, #tpu.memory_space<vmem>>, vector<1x1024xf32>
    %4 = vector.broadcast %3 : vector<1x1024xf32> to vector<2x1024xf32>
    %5 = arith.addf %2, %4 : vector<2x1024xf32>
    %cst_5 = arith.constant 0.000000e+00 : f32
    %6 = vector.broadcast %cst_5 : f32 to vector<2x1024xf32>
    %7 = arith.cmpf ogt, %5, %6 : vector<2x1024xf32>
    %cst_6 = arith.constant 2.000000e-01 : f32
    %8 = vector.broadcast %cst_6 : f32 to vector<2x1024xf32>
    %9 = arith.mulf %8, %5 : vector<2x1024xf32>
    %10 = arith.select %7, %5, %9 : vector<2x1024xi1>, vector<2x1024xf32>
    %11 = arith.truncf %10 : vector<2x1024xf32> to vector<2x1024xbf16>
    %c0_7 = arith.constant 0 : index
    %c0_8 = arith.constant 0 : index
    %12 = vector.load %arg4[%c0_7, %c0_8] : memref<2x1024xbf16, #tpu.memory_space<vmem>>, vector<2x1024xbf16>
    tpu.vector_store %arg4[%c0_7, %c0_8], %11 {strides = array<i32>} : memref<2x1024xbf16, #tpu.memory_space<vmem>>, vector<2x1024xbf16>,
    return
  }
  func.func @transform_0(%arg0: i32) -> (i32, i32) {
    %c0_i32 = arith.constant 0 : i32
    %c0_i32_0 = arith.constant 0 : i32
    %c0_i32_1 = arith.constant 0 : i32
    return %c0_i32, %c0_i32_0 : i32, i32
  }
  func.func @transform_1(%arg0: i32) -> (i32, i32) {
    %c0_i32 = arith.constant 0 : i32
    %c0_i32_0 = arith.constant 0 : i32
    return %c0_i32, %arg0 : i32, i32
  }
  func.func @transform_2(%arg0: i32) -> (i32, i32) {
    %c0_i32 = arith.constant 0 : i32
    %c0_i32_0 = arith.constant 0 : i32
    return %c0_i32, %arg0 : i32, i32
  }
  func.func @transform_3(%arg0: i32) -> (i32, i32) {
    %c0_i32 = arith.constant 0 : i32
    %c0_i32_0 = arith.constant 0 : i32
    return %c0_i32, %arg0 : i32, i32
  }
}

</mosaic_0001>

<bundles_post_ra>
// kernel: tpu_custom_call.1
= control target key start
LH: loop header
LB: loop body
LE: loop exit
PB: predicated region body
PF: predicated region fallthrough
CT: control target
= control target key end

     0   :  { %8 = vsyncpa [#allocation3], 0  ;;  %s20732_s0 = inlined_call_operand.hbm [shape: bf16[2,4096], index: 0, kind: input, shape index: {}]   ;;  %s20733_s1 = inlined_call_operand.hbm [shape: bf16[4096,2048], index: 1, kind: input, shape index: {}]   ;;  %s20734_s2 = inlined_call_operand.hbm [shape: f32[1,2048], index: 2, kind: input, shape index: {}]   ;;  %s20735_s3 = inlined_call_operand.hbm [shape: bf16[2,2048], index: 3, kind: output, shape index: {}]  }
   0x1   :  { %9 = vsyncpa [#allocation6], 0 }
   0x2   :  { %11 = vsyncpa [#allocation6 + $0x1], 0 }
   0x3   :  { %12 = vsyncpa [#allocation4], 0 }
   0x4   :  { %14 = vsyncpa [#allocation4 + $0x1], 0  ;;  %s17966_s12 = smov 0   ;;  %s17968_s13 = smov 0  }
   0x5   :  { %s17970_s14 = smov 0   ;;  %s17972_s15 = smov 0  }
   0x6 LB: > { %s17987_s16 = sadd.s32 1, %s17936_s15   ;;  %s48_s17 = sadd.s32 1, %s17932_s14  ;;  %s17936_s15 = sphi %s17972_s15, %s20755_s15   ;;  %s17932_s14 = sphi %s17970_s14, %s20754_s14   ;;  %s17928_s13 = sphi %s17968_s13, %s20753_s13   ;;  %s17924_s12 = sphi %s17966_s12, %s20752_s12  }
   0x7   : > { %s45_s18 = ssub.s32 %s17936_s15, %s17987_s16  ;;  %p55_p0 = scmp.ne.s32.totalorder %s17932_s14, %s17928_s13 }
   0x8   : > { %p46_p1 = scmp.eq.s32.totalorder %s45_s18, 0  ;;  %p56_p2 = scmp.eq.s32.totalorder %s17936_s15, 0 }
   0x9   : > { %p17739_p4 = scmp.lt.s32.totalorder %s17936_s15, 2  ;;  %s148_s20 = sand.u32 1, %s17936_s15  }
   0xa   : > { %s17998_s19 = scalar_select %p46_p1, %s17932_s14, %s48_s17  }
   0xb   : > { %p57_p5 = por %p56_p2, %p55_p0  ;;  %s150_s21 = sand.u32 1, %s17932_s14  }
   0xc   : > { %s15642_s22 = sshll.u32 %s150_s21, 14  ;;  %s17710_s23 = sshll.u32 %s17936_s15, 9 }
   0xd   : > { %s18011_s26 = scalar_lea.hbm %s20733_s1, %s17710_s23  ;;  %s152_s27 = scalar_lea.vmem [#allocation5], %s15642_s22 }
   0xe   : > { %s159_s28 = sshll.u32 %s152_s27, 4  ;;  %p18013_p6 = pnand %p17739_p4, %p57_p5  ;;  %s18017_s28 = int_to_ptr.vmem [resolvable:$true] %s159_s28 }
   0xf   : > { %s18019_s30 = scalar_lea.sflag [#allocation6], %s148_s20  ;;  %s17786_s4 = scalar_lea.hbm %s18011_s26, 262144 }
  0x10   : > { %p17787_p7 = scmp.ne.s32.totalorder %s18011_s26, %s17786_s4  ;;  %p20736_p8 = pneg %p18013_p6 }
  0x11   : > { %s17791_s7 = scalar_lea.hbm %s20733_s1, 524288  ;;  %p17792_p11 = scmp.lt.s32.totalorder %s18011_s26, %s20733_s1 }
  0x12   : > { %p17789_p9 = pnand %p20736_p8, %p17787_p7  ;;  %p17793_p12 = scmp.lt.s32.totalorder %s17791_s7, %s17786_s4 }
  0x14   : > { %p17790_p10 = pneg %p17789_p9  ;;  %p17794_p13 = por %p17793_p12, %p17792_p11 }
  0x16   : > { %p17795_p1 = pnand %p17794_p13, %p17790_p10 }
  0x18   : > { %17798 = shalt.err (!%p17795_p1)
}
  0x19   : > { %s17799_s10 = scalar_lea.vmem %s18017_s28, 262144  ;;  %s17938_s11 = smov [#allocation5]  }
  0x1a   : > { %p17800_p2 = scmp.ne.s32.totalorder %s18017_s28, %s17799_s10  ;;  %s17804_s17 = sshll.u32 %s17938_s11, 4  ;;  %s17805_s17 = int_to_ptr.vmem [resolvable:$false] %s17804_s17 }
  0x1b   : > { %s17806_s18 = scalar_lea.vmem %s17805_s17, 524288  ;;  %p17807_p7 = scmp.lt.s32.totalorder %s18017_s28, %s17805_s17 }
  0x1c   : > { %p17802_p4 = pnand %p17800_p2, %p20736_p8  ;;  %p17808_p9 = scmp.lt.s32.totalorder %s17806_s18, %s17799_s10 }
  0x1e   : > { %p17803_p5 = pneg %p17802_p4  ;;  %p17809_p3 = por %p17808_p9, %p17807_p7 }
  0x20   : > { %p17810_p11 = pnand %p17809_p3, %p17803_p5 }
  0x22   : > { %17813 = shalt.err (!%p17810_p11)
}
  0x23   : > { %s17939_s20 = smov 1024   ;;  %s17940_s22 = smov 512  }
  0x24   : > { %s17941_s23 = smov 32   ;;  %s18047_s24 = sadd.s32 4294967295, %s17936_s15  }
  0x25   : > { %17730 = dma.hbm_to_vmem [thread:$0]  (!%p18013_p6), %s18011_s26, 262144, %s18017_s28, %s18019_s30, %s17939_s20, %s17940_s22, %s17941_s23  }
  0x26   : > { %s15638_s25 = sadd.s32 4294967294, %s17936_s15   ;;  %p61_p3 = scmp.ne.s32.totalorder %s17928_s13, %s17924_s12 }
  0x27   : > { %p20738_p10 = scmp.eq.s32.totalorder %s18047_s24, 0  ;;  %p111_p12 = scmp.eq.s32.totalorder %s18047_s24, 1 }
  0x28   : > { %p117_p13 = scmp.eq.s32.totalorder %s15638_s25, 1  ;;  %p15639_p1 = scmp.ge.s32.totalorder %s17936_s15, 1 }
  0x29   : > { %p18057_p2 = por %p20738_p10, %p61_p3  ;;  %p18064_p4 = por %p111_p12, %p55_p0 }
  0x2a   : > { %p18068_p5 = por %p117_p13, %p61_p3  ;;  %p124_p7 = scmp.lt.s32.totalorder %s17936_s15, 3 }
  0x2b   : > { %s20741_s27 = scalar_select %p18057_p2, 1, 0 }
  0x2c   : > { %s20742_s26 = scalar_select %p18064_p4, 1, 0 }
  0x2d   : > { %s20743_s28 = scalar_select %p18068_p5, 1, 0 }
  0x2e   : > { %p18073_p9 = pnand %p15639_p1, %p124_p7  ;;  %s17942_s5 = smov [#allocation2]  }
  0x2f   : > { %s137_s6 = sshll.u32 %s17942_s5, 4  ;;  %s15645_s7 = sshll.u32 %s150_s21, 3  ;;  %s138_s6 = int_to_ptr.vmem [resolvable:$true] %s137_s6 }
  0x30   : > { %p17723_p11 = pneg %p18073_p9  ;;  %s17711_s8 = sshll.u32 %s17936_s15, 7 }
  0x31   : > { %s173_s9 = scalar_lea.vmem [#allocation7], %s15645_s7  ;;  %s18087_s18 = scalar_lea.hbm %s20734_s2, %s17711_s8 }
  0x32   : > { %s181_s10 = sshll.u32 %s173_s9, 4  ;;  %p17724_p0 = pnand %p17723_p11, %p20738_p10  ;;  %s18089_s10 = int_to_ptr.vmem [resolvable:$true] %s181_s10 }
  0x33   : > { %s17825_s20 = scalar_lea.vmem %s138_s6, 512  ;;  %p17833_p7 = scmp.lt.s32.totalorder %s138_s6, %s138_s6 }
  0x34   : > { %p17816_p3 = pneg %p17724_p0  ;;  %p17826_p12 = scmp.ne.s32.totalorder %s138_s6, %s17825_s20 }
  0x35   : > { %p17834_p8 = scmp.lt.s32.totalorder %s17825_s20, %s17825_s20 }
  0x36   : > { %p17828_p13 = pnand %p17826_p12, %p17816_p3 }
  0x37   : > { %p17835_p5 = por %p17834_p8, %p17833_p7 }
  0x38   : > { %p17829_p1 = pneg %p17828_p13 }
  0x3a   : > { %p17836_p4 = pnand %p17835_p5, %p17829_p1 }
  0x3c   : > { %17839 = shalt.err (!%p17836_p4)
}
  0x3d   : > { %17726 = dma.hbm_to_vmem [thread:$0]  (!%p17724_p0), %s20732_s0, 512, %s138_s6, [#allocation3]  }
  0x3e   : > { %s17840_s23 = scalar_lea.hbm %s18087_s18, 128  ;;  %p20745_p10 = pneg %p18013_p6 }
  0x3f   : > { %p17841_p11 = scmp.ne.s32.totalorder %s18087_s18, %s17840_s23  ;;  %s17845_s7 = scalar_lea.hbm %s20734_s2, 256 }
  0x40   : > { %p17846_p8 = scmp.lt.s32.totalorder %s18087_s18, %s20734_s2  ;;  %p17847_p4 = scmp.lt.s32.totalorder %s17845_s7, %s17840_s23 }
  0x41   : > { %p17843_p2 = pnand %p17841_p11, %p20745_p10 }
  0x42   : > { %p17848_p5 = por %p17847_p4, %p17846_p8 }
  0x43   : > { %p17844_p3 = pneg %p17843_p2 }
  0x45   : > { %p17849_p12 = pnand %p17848_p5, %p17844_p3 }
  0x47   : > { %17852 = shalt.err (!%p17849_p12)
}
  0x48   : > { %s17853_s6 = scalar_lea.vmem %s18089_s10, 128  ;;  %s17943_s11 = smov [#allocation7]  }
  0x49   : > { %p17854_p0 = scmp.ne.s32.totalorder %s18089_s10, %s17853_s6  ;;  %s17858_s17 = sshll.u32 %s17943_s11, 4  ;;  %s17859_s17 = int_to_ptr.vmem [resolvable:$false] %s17858_s17 }
  0x4a   : > { %s17860_s20 = scalar_lea.vmem %s17859_s17, 256  ;;  %p17861_p1 = scmp.lt.s32.totalorder %s18089_s10, %s17859_s17 }
  0x4b   : > { %p17856_p2 = pnand %p17854_p0, %p20745_p10  ;;  %p17862_p7 = scmp.lt.s32.totalorder %s17860_s20, %s17853_s6 }
  0x4d   : > { %p17857_p13 = pneg %p17856_p2  ;;  %p17863_p11 = por %p17862_p7, %p17861_p1 }
  0x4f   : > { %p17864_p8 = pnand %p17863_p11, %p17857_p13 }
  0x51   : > { %17867 = shalt.err (!%p17864_p8)
}
  0x52   : > { %17733 = dma.hbm_to_vmem [thread:$0]  (!%p18013_p6), %s18087_s18, 128, %s18089_s10, %s18019_s30  }
  0x53   : > { %190 = sbr.rel (%p18073_p9) target bundleno = 2373 (0x945), region = 32  ;;  %p20746_p3 = scmp.eq.s32.totalorder (!%p18073_p9), %s18047_s24, 0 }
  0x58   : > { %17911 = dma.done.wait (%p20746_p3), [#allocation3], 512   ;;  %p20747_p4 = pmov %p20746_p3 }
  0x59   : > { %s196_s21 = sand.u32 1, %s18047_s24   ;;  %s18125_s22 = sand.u32 1, %s17928_s13  }
  0x5a   : > { %17913 = vsyncadd (%p20747_p4), [#allocation3], 4294966784  ;;  %s15650_s29 = sshll.u32 %s18125_s22, 14  ;;  %s197_s23 = scalar_lea.sflag [#allocation6], %s196_s21 }
  0x5b   : > { %s18128_s25 = scalar_lea.vmem [#allocation5], %s15650_s29  ;;  %p20748_p6 = scmp.ne.s32.totalorder %s20741_s27, 0 }
  0x5d   : > { %17915 = dma.done.wait (%p20748_p6), %s197_s23, 262272  }
  0x5e   : > { %17917 = vsyncadd (%p20748_p6), %s197_s23, 4294705024  ;;  %v300_v0 = vld [vmem:[%s18128_s25 + $0x1c0] sm:$0xff]  ;;  %v2294_v32 = vlaneseq  ;;  %v17944_v33 = vmov 1966171168   ;;  %s15651_s30 = sshll.u32 %s18125_s22, 3  ;;  %s17712_s4 = sshll.u32 %s18047_s24, 7 }
  0x5f   : > { %v304_v1 = vld [vmem:[%s18128_s25 + $0x1e0] sm:$0xff]  ;;  %v2340_v34 = vunpack.c.l.s4 %v17944_v33  ;;  %s18511_s27 = scalar_lea.vmem [#allocation7], %s15651_s30  ;;  %s236_s10 = scalar_lea.vmem [#allocation8], %s15651_s30 }
  0x60   : > { %v428_v2 = vld [vmem:[%s18128_s25 + $0x5c0] sm:$0xff]  ;;  %v15710_v3 = vcombine.high %v300_v0, %v304_v1  ;;  %v15709_v5 = vcombine.low %v300_v0, %v304_v1  ;;  %v18156_v43 = vshrl.u32 %v2294_v32, 7  ;;  %s15536_s18 = sshll.u32 %s236_s10, 4  ;;  %s15534_s8 = scalar_lea.hbm %s20735_s3, %s17712_s4  ;;  %s15537_s18 = int_to_ptr.vmem [resolvable:$true] %s15536_s18 }
  0x61   : > { %v432_v4 = vld [vmem:[%s18128_s25 + $0x5e0] sm:$0xff]  ;;  %v2341_v44 = vunpack.c.0.s8 %v2340_v34  ;;  %s15522_s9 = scalar_lea.sflag [#allocation4], %s18125_s22  ;;  %s17868_s6 = scalar_lea.vmem %s15537_s18, 128 }
  0x62   : > { %v292_v6 = vld [vmem:[%s18128_s25 + $0x180] sm:$0xff]  ;;  %v15838_v8 = vcombine.high %v428_v2, %v432_v4  ;;  %v15837_v9 = vcombine.low %v428_v2, %v432_v4  ;;  %12806 = vmatprep.subr.bf16.mxu0 %v15710_v3  ;;  %p17869_p9 = scmp.ne.s32.totalorder %s15537_s18, %s17868_s6  ;;  %p20749_p5 = scmp.ne.s32.totalorder %s20742_s26, 0 }
  0x63   : > { %v296_v7 = vld [vmem:[%s18128_s25 + $0x1a0] sm:$0xff]  ;;  %12807 = vmatpush1.bf16.msra.mxu0 %v15709_v5  ;;  %v18163_v53 = vsub.s32 %v2341_v44, %v18156_v43  ;;  %s17945_s24 = smov [#allocation8]  }
  0x64   : > { %v15702_v10 = vcombine.high %v292_v6, %v296_v7  ;;  %v420_v11 = vld [vmem:[%s18128_s25 + $0x580] sm:$0xff]  ;;  %12847 = vmatprep.subr.bf16.mxu1 %v15838_v8  ;;  %v15701_v18 = vcombine.low %v292_v6, %v296_v7  ;;  %p17870_p12 = pnand %p17869_p9, %p20749_p5  ;;  %s17872_s11 = sshll.u32 %s17945_s24, 4  ;;  %s17873_s11 = int_to_ptr.vmem [resolvable:$false] %s17872_s11 }
  0x65   : > { %v424_v12 = vld [vmem:[%s18128_s25 + $0x5a0] sm:$0xff]  ;;  %12848 = vmatpush1.bf16.msra.mxu1 %v15837_v9  ;;  %s17874_s17 = scalar_lea.vmem %s17873_s11, 256  ;;  %p17875_p10 = scmp.lt.s32.totalorder %s15537_s18, %s17873_s11 }
  0x66   : > { %v284_v13 = vld [vmem:[%s18128_s25 + $0x140] sm:$0xff]  ;;  %v15830_v14 = vcombine.high %v420_v11, %v424_v12  ;;  %12808 = vmatprep.subr.bf16.mxu0 %v15702_v10  ;;  %v15829_v19 = vcombine.low %v420_v11, %v424_v12  ;;  %p17871_p0 = pneg %p17870_p12  ;;  %p17876_p2 = scmp.lt.s32.totalorder %s17874_s17, %s17868_s6 }
  0x67   : > { %v288_v15 = vld [vmem:[%s18128_s25 + $0x160] sm:$0xff]  ;;  %12809 = vmatpush1.bf16.msra.mxu0 %v15701_v18 }
  0x68   : > { %v412_v16 = vld [vmem:[%s18128_s25 + $0x540] sm:$0xff]  ;;  %v15694_v20 = vcombine.high %v284_v13, %v288_v15  ;;  %12849 = vmatprep.subr.bf16.mxu1 %v15830_v14  ;;  %v15693_v26 = vcombine.low %v284_v13, %v288_v15  ;;  %p17877_p13 = por %p17876_p2, %p17875_p10 }
  0x69   : > { %v416_v17 = vld [vmem:[%s18128_s25 + $0x560] sm:$0xff]  ;;  %12850 = vmatpush1.bf16.msra.mxu1 %v15829_v19 }
  0x6a   : > { %v15822_v21 = vcombine.high %v412_v16, %v416_v17  ;;  %v276_v22 = vld [vmem:[%s18128_s25 + $0x100] sm:$0xff]  ;;  %12810 = vmatprep.subr.bf16.mxu0 %v15694_v20  ;;  %v15821_v27 = vcombine.low %v412_v16, %v416_v17  ;;  %p17878_p1 = pnand %p17877_p13, %p17871_p0 }
  0x6b   : > { %v280_v23 = vld [vmem:[%s18128_s25 + $0x120] sm:$0xff]  ;;  %12811 = vmatpush1.bf16.msra.mxu0 %v15693_v26 }
  0x6c   : > { %v404_v24 = vld [vmem:[%s18128_s25 + $0x500] sm:$0xff]  ;;  %v15686_v28 = vcombine.high %v276_v22, %v280_v23  ;;  %12851 = vmatprep.subr.bf16.mxu1 %v15822_v21  ;;  %v15685_v37 = vcombine.low %v276_v22, %v280_v23 }
  0x6d   : > { %v408_v25 = vld [vmem:[%s18128_s25 + $0x520] sm:$0xff]  ;;  %12852 = vmatpush1.bf16.msra.mxu1 %v15821_v27 }
  0x6e   : > { %v15814_v29 = vcombine.high %v404_v24, %v408_v25  ;;  %v268_v30 = vld [vmem:[%s18128_s25 + $0xc0] sm:$0xff]  ;;  %12812 = vmatprep.subr.bf16.mxu0 %v15686_v28  ;;  %v15813_v38 = vcombine.low %v404_v24, %v408_v25 }
  0x6f   : > { %v272_v31 = vld [vmem:[%s18128_s25 + $0xe0] sm:$0xff]  ;;  %12813 = vmatpush1.bf16.msra.mxu0 %v15685_v37 }
  0x70   : > { %v396_v35 = vld [vmem:[%s18128_s25 + $0x4c0] sm:$0xff]  ;;  %v15678_v39 = vcombine.high %v268_v30, %v272_v31  ;;  %12853 = vmatprep.subr.bf16.mxu1 %v15814_v29  ;;  %v15677_v47 = vcombine.low %v268_v30, %v272_v31 }
  0x71   : > { %v400_v36 = vld [vmem:[%s18128_s25 + $0x4e0] sm:$0xff]  ;;  %12854 = vmatpush1.bf16.msra.mxu1 %v15813_v38 }
  0x72   : > { %v15806_v40 = vcombine.high %v396_v35, %v400_v36  ;;  %v260_v41 = vld [vmem:[%s18128_s25 + $0x80] sm:$0xff]  ;;  %12814 = vmatprep.subr.bf16.mxu0 %v15678_v39  ;;  %v15805_v48 = vcombine.low %v396_v35, %v400_v36 }
  0x73   : > { %v264_v42 = vld [vmem:[%s18128_s25 + $0xa0] sm:$0xff]  ;;  %12815 = vmatpush1.bf16.msra.mxu0 %v15677_v47 }
  0x74   : > { %v388_v45 = vld [vmem:[%s18128_s25 + $0x480] sm:$0xff]  ;;  %v15670_v49 = vcombine.high %v260_v41, %v264_v42  ;;  %12855 = vmatprep.subr.bf16.mxu1 %v15806_v40  ;;  %v15669_v56 = vcombine.low %v260_v41, %v264_v42 }
  0x75   : > { %v392_v46 = vld [vmem:[%s18128_s25 + $0x4a0] sm:$0xff]  ;;  %12856 = vmatpush1.bf16.msra.mxu1 %v15805_v48 }
  0x76   : > { %v15798_v50 = vcombine.high %v388_v45, %v392_v46  ;;  %v252_v51 = vld [vmem:[%s18128_s25 + $0x40] sm:$0xff]  ;;  %12816 = vmatprep.subr.bf16.mxu0 %v15670_v49  ;;  %v15797_v57 = vcombine.low %v388_v45, %v392_v46 }
  0x77   : > { %v256_v52 = vld [vmem:[%s18128_s25 + $0x60] sm:$0xff]  ;;  %12817 = vmatpush1.bf16.msra.mxu0 %v15669_v56 }
  0x78   : > { %v380_v54 = vld [vmem:[%s18128_s25 + $0x440] sm:$0xff]  ;;  %v15662_v58 = vcombine.high %v252_v51, %v256_v52  ;;  %12857 = vmatprep.subr.bf16.mxu1 %v15798_v50  ;;  %v15661_v2 = vcombine.low %v252_v51, %v256_v52 }
  0x79   : > { %v384_v55 = vld [vmem:[%s18128_s25 + $0x460] sm:$0xff]  ;;  %12858 = vmatpush1.bf16.msra.mxu1 %v15797_v57 }
  0x7a   : > { %v18167_v59 = vld [vmem:[#allocation2] sm:$0xff]  ;;  %v15790_v60 = vcombine.high %v380_v54, %v384_v55  ;;  %12818 = vmatprep.subr.bf16.mxu0 %v15662_v58  ;;  %v15789_v4 = vcombine.low %v380_v54, %v384_v55 }
  0x7b   : > { %v244_v61 = vld [vmem:[%s18128_s25] sm:$0xff]  ;;  %v18173_v63 = vrot.slane %v18167_v59, %v18163_v53  ;;  %12819 = vmatpush1.bf16.msra.mxu0 %v15661_v2 }
  0x7c   : > { %v248_v62 = vld [vmem:[%s18128_s25 + $0x20] sm:$0xff]  ;;  %12859 = vmatprep.subr.bf16.mxu1 %v15790_v60 }
  0x7d   : > { %v372_v0 = vld [vmem:[%s18128_s25 + $0x400] sm:$0xff]  ;;  %v2353_v3 = vcombine.high %v18173_v63, %v18173_v63  ;;  %v15654_v5 = vcombine.high %v244_v61, %v248_v62  ;;  %v15653_v12 = vcombine.low %v244_v61, %v248_v62  ;;  %12860 = vmatpush1.bf16.msra.mxu1 %v15789_v4 }
  0x7e   : > { %v376_v1 = vld [vmem:[%s18128_s25 + $0x420] sm:$0xff] }
  0x7f   : > { %v15782_v6 = vcombine.high %v372_v0, %v376_v1  ;;  %v364_v7 = vld [vmem:[%s18128_s25 + $0x3c0] sm:$0xff]  ;;  %v18182_v9 = vrot.slane %v2353_v3, %v18163_v53  ;;  %12820 = vmatprep.subr.bf16.mxu0 %v15654_v5  ;;  %v15781_v14 = vcombine.low %v372_v0, %v376_v1  ;;  %v2338_v1 = vcombine.high %v18167_v59, %v18167_v59 }
  0x80   : > { %v368_v8 = vld [vmem:[%s18128_s25 + $0x3e0] sm:$0xff]  ;;  %12821 = vmatpush1.bf16.msra.mxu0 %v15653_v12 }
  0x81   : > { %v492_v10 = vld [vmem:[%s18128_s25 + $0x7c0] sm:$0xff]  ;;  %12838 = vmatprep.mubr.bf16.mxu0 %v18182_v9  ;;  %v18189_v13 = vcombine.high %v18182_v9, %v18182_v9  ;;  %v15774_v15 = vcombine.high %v364_v7, %v368_v8  ;;  %12861 = vmatprep.subr.bf16.mxu1 %v15782_v6  ;;  %v15773_v21 = vcombine.low %v364_v7, %v368_v8 }
  0x82   : > { %v496_v11 = vld [vmem:[%s18128_s25 + $0x7e0] sm:$0xff]  ;;  %12862 = vmatpush1.bf16.msra.mxu1 %v15781_v14 }
  0x83   : > { %v15902_v16 = vcombine.high %v492_v10, %v496_v11  ;;  %v356_v17 = vld [vmem:[%s18128_s25 + $0x380] sm:$0xff]  ;;  %12879 = vmatprep.mubr.bf16.mxu1 %v18189_v13  ;;  %12822 = vmatprep.subr.bf16.mxu0 %v15774_v15  ;;  %v15901_v22 = vcombine.low %v492_v10, %v496_v11  ;;  %v18223_v11 = vrot.slane %v2338_v1, %v18163_v53 }
  0x84   : > { %v360_v18 = vld [vmem:[%s18128_s25 + $0x3a0] sm:$0xff]  ;;  %12823 = vmatpush2.bf16.msra.mxu0 %v15773_v21 }
  0x85   : > { %v484_v19 = vld [vmem:[%s18128_s25 + $0x780] sm:$0xff]  ;;  %v15766_v23 = vcombine.high %v356_v17, %v360_v18  ;;  %12863 = vmatprep.subr.bf16.mxu1 %v15902_v16  ;;  %v15765_v29 = vcombine.low %v356_v17, %v360_v18 }
  0x86   : > { %v488_v20 = vld [vmem:[%s18128_s25 + $0x7a0] sm:$0xff]  ;;  %12864 = vmatpush2.bf16.msra.mxu1 %v15901_v22  ;;  %v18233_v22 = vrot.slane %v18173_v63, %v18163_v53 }
  0x87   : > { %v15894_v24 = vcombine.high %v484_v19, %v488_v20  ;;  %v348_v25 = vld [vmem:[%s18128_s25 + $0x340] sm:$0xff]  ;;  %12824 = vmatprep.subr.bf16.mxu0 %v15766_v23  ;;  %v15893_v30 = vcombine.low %v484_v19, %v488_v20  ;;  %v2354_v20 = vcombine.high %v18223_v11, %v18223_v11 }
  0x88   : > { %v352_v26 = vld [vmem:[%s18128_s25 + $0x360] sm:$0xff]  ;;  %12825 = vmatpush2.bf16.msra.mxu0 %v15765_v29  ;;  %v18244_v63 = vcombine.high %v18233_v22, %v18233_v22 }
  0x89   : > { %v476_v27 = vld [vmem:[%s18128_s25 + $0x740] sm:$0xff]  ;;  %v15758_v31 = vcombine.high %v348_v25, %v352_v26  ;;  %12865 = vmatprep.subr.bf16.mxu1 %v15894_v24  ;;  %v15757_v37 = vcombine.low %v348_v25, %v352_v26 }
  0x8a   : > { %v480_v28 = vld [vmem:[%s18128_s25 + $0x760] sm:$0xff]  ;;  %12866 = vmatpush2.bf16.msra.mxu1 %v15893_v30  ;;  %v18240_v30 = vrot.slane %v2354_v20, %v18163_v53 }
  0x8b   : > { %v15886_v32 = vcombine.high %v476_v27, %v480_v28  ;;  %v340_v33 = vld [vmem:[%s18128_s25 + $0x300] sm:$0xff]  ;;  %12826 = vmatprep.subr.bf16.mxu0 %v15758_v31  ;;  %v15885_v38 = vcombine.low %v476_v27, %v480_v28 }
  0x8c   : > { %v344_v34 = vld [vmem:[%s18128_s25 + $0x320] sm:$0xff]  ;;  %12827 = vmatpush2.bf16.msra.mxu0 %v15757_v37 }
  0x8d   : > { %v468_v35 = vld [vmem:[%s18128_s25 + $0x700] sm:$0xff]  ;;  %v15750_v39 = vcombine.high %v340_v33, %v344_v34  ;;  %12867 = vmatprep.subr.bf16.mxu1 %v15886_v32  ;;  %v15749_v46 = vcombine.low %v340_v33, %v344_v34 }
  0x8e   : > { %v472_v36 = vld [vmem:[%s18128_s25 + $0x720] sm:$0xff]  ;;  %12868 = vmatpush2.bf16.msra.mxu1 %v15885_v38 }
  0x8f   : > { %v15878_v40 = vcombine.high %v468_v35, %v472_v36  ;;  %v332_v41 = vld [vmem:[%s18128_s25 + $0x2c0] sm:$0xff]  ;;  %12828 = vmatprep.subr.bf16.mxu0 %v15750_v39  ;;  %v15877_v47 = vcombine.low %v468_v35, %v472_v36  ;;  %v18253_v39 = vcombine.high %v18240_v30, %v18240_v30 }
  0x90   : > { %v336_v42 = vld [vmem:[%s18128_s25 + $0x2e0] sm:$0xff]  ;;  %12829 = vmatpush2.bf16.msra.mxu0 %v15749_v46 }
  0x91   : > { %v460_v44 = vld [vmem:[%s18128_s25 + $0x6c0] sm:$0xff]  ;;  %v15742_v48 = vcombine.high %v332_v41, %v336_v42  ;;  %12869 = vmatprep.subr.bf16.mxu1 %v15878_v40  ;;  %v15741_v55 = vcombine.low %v332_v41, %v336_v42 }
  0x92   : > { %v464_v45 = vld [vmem:[%s18128_s25 + $0x6e0] sm:$0xff]  ;;  %12870 = vmatpush2.bf16.msra.mxu1 %v15877_v47 }
  0x93   : > { %v15870_v49 = vcombine.high %v460_v44, %v464_v45  ;;  %v324_v50 = vld [vmem:[%s18128_s25 + $0x280] sm:$0xff]  ;;  %12830 = vmatprep.subr.bf16.mxu0 %v15742_v48  ;;  %v15869_v56 = vcombine.low %v460_v44, %v464_v45 }
  0x94   : > { %v328_v51 = vld [vmem:[%s18128_s25 + $0x2a0] sm:$0xff]  ;;  %12831 = vmatpush2.bf16.msra.mxu0 %v15741_v55 }
  0x95   : > { %v452_v52 = vld [vmem:[%s18128_s25 + $0x680] sm:$0xff]  ;;  %v15734_v57 = vcombine.high %v324_v50, %v328_v51  ;;  %12871 = vmatprep.subr.bf16.mxu1 %v15870_v49  ;;  %v15733_v2 = vcombine.low %v324_v50, %v328_v51 }
  0x96   : > { %v456_v54 = vld [vmem:[%s18128_s25 + $0x6a0] sm:$0xff]  ;;  %12872 = vmatpush2.bf16.msra.mxu1 %v15869_v56 }
  0x97   : > { %v15862_v58 = vcombine.high %v452_v52, %v456_v54  ;;  %v316_v60 = vld [vmem:[%s18128_s25 + $0x240] sm:$0xff]  ;;  %12832 = vmatprep.subr.bf16.mxu0 %v15734_v57  ;;  %v15861_v3 = vcombine.low %v452_v52, %v456_v54 }
  0x98   : > { %v320_v61 = vld [vmem:[%s18128_s25 + $0x260] sm:$0xff]  ;;  %12833 = vmatpush2.bf16.msra.mxu0 %v15733_v2 }
  0x99   : > { %v444_v62 = vld [vmem:[%s18128_s25 + $0x640] sm:$0xff]  ;;  %v15726_v4 = vcombine.high %v316_v60, %v320_v61  ;;  %12873 = vmatprep.subr.bf16.mxu1 %v15862_v58  ;;  %v15725_v59 = vcombine.low %v316_v60, %v320_v61 }
  0x9a   : > { %v448_v0 = vld [vmem:[%s18128_s25 + $0x660] sm:$0xff]  ;;  %12874 = vmatpush2.bf16.msra.mxu1 %v15861_v3 }
  0x9b   : > { %v15854_v5 = vcombine.high %v444_v62, %v448_v0  ;;  %v308_v6 = vld [vmem:[%s18128_s25 + $0x200] sm:$0xff]  ;;  %12834 = vmatprep.subr.bf16.mxu0 %v15726_v4  ;;  %v15853_v12 = vcombine.low %v444_v62, %v448_v0 }
  0x9c   : > { %v312_v7 = vld [vmem:[%s18128_s25 + $0x220] sm:$0xff]  ;;  %12835 = vmatpush2.bf16.msra.mxu0 %v15725_v59 }
  0x9d   : > { %v436_v8 = vld [vmem:[%s18128_s25 + $0x600] sm:$0xff]  ;;  %v15718_v14 = vcombine.high %v308_v6, %v312_v7  ;;  %12875 = vmatprep.subr.bf16.mxu1 %v15854_v5  ;;  %v15717_v21 = vcombine.low %v308_v6, %v312_v7 }
  0x9e   : > { %v440_v10 = vld [vmem:[%s18128_s25 + $0x620] sm:$0xff]  ;;  %12876 = vmatpush2.bf16.msra.mxu1 %v15853_v12 }
  0x9f   : > { %v15846_v15 = vcombine.high %v436_v8, %v440_v10  ;;  %v556_v16 = vld [vmem:[%s18128_s25 + $0x9c0] sm:$0xff]  ;;  %12836 = vmatprep.subr.bf16.mxu0 %v15718_v14  ;;  %v15845_v23 = vcombine.low %v436_v8, %v440_v10 }
  0xa0   : > { %v560_v17 = vld [vmem:[%s18128_s25 + $0x9e0] sm:$0xff]  ;;  %12837 = vmatpush2.bf16.msra.mxu0 %v15717_v21 }
  0xa1   : > { %v684_v18 = vld [vmem:[%s18128_s25 + $0xdc0] sm:$0xff]  ;;  %v15966_v24 = vcombine.high %v556_v16, %v560_v17  ;;  %12877 = vmatprep.subr.bf16.mxu1 %v15846_v15  ;;  %v15965_v31 = vcombine.low %v556_v16, %v560_v17 }
  0xa2   : > { %v688_v19 = vld [vmem:[%s18128_s25 + $0xde0] sm:$0xff]  ;;  %12878 = vmatpush2.bf16.msra.mxu1 %v15845_v23 }
  0xa3   : > { %v16094_v25 = vcombine.high %v684_v18, %v688_v19  ;;  %v548_v26 = vld [vmem:[%s18128_s25 + $0x980] sm:$0xff]  ;;  %12888 = vmatprep.subr.bf16.mxu0 %v15966_v24  ;;  %v16093_v32 = vcombine.low %v684_v18, %v688_v19  ;;  %12839 = vmatmul.mubr.bf16.vlgmr.msra.gmra.mxu0 %v18233_v22 }
  0xa4   : > { %v552_v27 = vld [vmem:[%s18128_s25 + $0x9a0] sm:$0xff]  ;;  %12889 = vmatpush1.bf16.msra.mxu0 %v15965_v31  ;;  %12920 = vmatprep.mubr.bf16.mxu0 %v18240_v30 }
  0xa5   : > { %v676_v28 = vld [vmem:[%s18128_s25 + $0xd80] sm:$0xff]  ;;  %v15958_v33 = vcombine.high %v548_v26, %v552_v27  ;;  %12929 = vmatprep.subr.bf16.mxu1 %v16094_v25  ;;  %12880 = vmatmul.mubr.bf16.vlgmr.msra.gmra.mxu1 %v18244_v63  ;;  %v15957_v40 = vcombine.low %v548_v26, %v552_v27 }
  0xa6   : > { %v680_v29 = vld [vmem:[%s18128_s25 + $0xda0] sm:$0xff]  ;;  %12930 = vmatpush1.bf16.msra.mxu1 %v16093_v32  ;;  %12961 = vmatprep.mubr.bf16.mxu1 %v18253_v39 }
  0xa7   : > { %v16086_v34 = vcombine.high %v676_v28, %v680_v29  ;;  %v540_v35 = vld [vmem:[%s18128_s25 + $0x940] sm:$0xff]  ;;  %12890 = vmatprep.subr.bf16.mxu0 %v15958_v33  ;;  %v16085_v41 = vcombine.low %v676_v28, %v680_v29 }
  0xa8   : > { %v544_v36 = vld [vmem:[%s18128_s25 + $0x960] sm:$0xff]  ;;  %12891 = vmatpush1.bf16.msra.mxu0 %v15957_v40 }
  0xa9   : > { %v668_v37 = vld [vmem:[%s18128_s25 + $0xd40] sm:$0xff]  ;;  %v15950_v42 = vcombine.high %v540_v35, %v544_v36  ;;  %12931 = vmatprep.subr.bf16.mxu1 %v16086_v34  ;;  %v15949_v49 = vcombine.low %v540_v35, %v544_v36 }
  0xaa   : > { %v672_v38 = vld [vmem:[%s18128_s25 + $0xd60] sm:$0xff]  ;;  %12932 = vmatpush1.bf16.msra.mxu1 %v16085_v41 }
  0xab   : > { %v16078_v44 = vcombine.high %v668_v37, %v672_v38  ;;  %v532_v45 = vld [vmem:[%s18128_s25 + $0x900] sm:$0xff]  ;;  %12892 = vmatprep.subr.bf16.mxu0 %v15950_v42  ;;  %v16077_v50 = vcombine.low %v668_v37, %v672_v38 }
  0xac   : > { %v536_v46 = vld [vmem:[%s18128_s25 + $0x920] sm:$0xff]  ;;  %12893 = vmatpush1.bf16.msra.mxu0 %v15949_v49 }
  0xad   : > { %v660_v47 = vld [vmem:[%s18128_s25 + $0xd00] sm:$0xff]  ;;  %v15942_v51 = vcombine.high %v532_v45, %v536_v46  ;;  %12933 = vmatprep.subr.bf16.mxu1 %v16078_v44  ;;  %v15941_v58 = vcombine.low %v532_v45, %v536_v46 }
  0xae   : > { %v664_v48 = vld [vmem:[%s18128_s25 + $0xd20] sm:$0xff]  ;;  %12934 = vmatpush1.bf16.msra.mxu1 %v16077_v50 }
  0xaf   : > { %v16070_v52 = vcombine.high %v660_v47, %v664_v48  ;;  %v524_v54 = vld [vmem:[%s18128_s25 + $0x8c0] sm:$0xff]  ;;  %12894 = vmatprep.subr.bf16.mxu0 %v15942_v51  ;;  %v16069_v60 = vcombine.low %v660_v47, %v664_v48 }
  0xb0   : > { %v528_v55 = vld [vmem:[%s18128_s25 + $0x8e0] sm:$0xff]  ;;  %12895 = vmatpush1.bf16.msra.mxu0 %v15941_v58 }
  0xb1   : > { %v652_v56 = vld [vmem:[%s18128_s25 + $0xcc0] sm:$0xff]  ;;  %v15934_v61 = vcombine.high %v524_v54, %v528_v55  ;;  %12935 = vmatprep.subr.bf16.mxu1 %v16070_v52  ;;  %v15933_v4 = vcombine.low %v524_v54, %v528_v55 }
  0xb2   : > { %v656_v57 = vld [vmem:[%s18128_s25 + $0xce0] sm:$0xff]  ;;  %12936 = vmatpush1.bf16.msra.mxu1 %v16069_v60 }
  0xb3   : > { %v16062_v62 = vcombine.high %v652_v56, %v656_v57  ;;  %v516_v0 = vld [vmem:[%s18128_s25 + $0x880] sm:$0xff]  ;;  %12896 = vmatprep.subr.bf16.mxu0 %v15934_v61  ;;  %v16061_v5 = vcombine.low %v652_v56, %v656_v57 }
  0xb4   : > { %v520_v1 = vld [vmem:[%s18128_s25 + $0x8a0] sm:$0xff]  ;;  %12897 = vmatpush1.bf16.msra.mxu0 %v15933_v4 }
  0xb5   : > { %v644_v2 = vld [vmem:[%s18128_s25 + $0xc80] sm:$0xff]  ;;  %v15926_v6 = vcombine.high %v516_v0, %v520_v1  ;;  %12937 = vmatprep.subr.bf16.mxu1 %v16062_v62  ;;  %v15925_v14 = vcombine.low %v516_v0, %v520_v1 }
  0xb6   : > { %v648_v3 = vld [vmem:[%s18128_s25 + $0xca0] sm:$0xff]  ;;  %12938 = vmatpush1.bf16.msra.mxu1 %v16061_v5 }
  0xb7   : > { %v16054_v7 = vcombine.high %v644_v2, %v648_v3  ;;  %v508_v8 = vld [vmem:[%s18128_s25 + $0x840] sm:$0xff]  ;;  %12898 = vmatprep.subr.bf16.mxu0 %v15926_v6  ;;  %v16053_v15 = vcombine.low %v644_v2, %v648_v3 }
  0xb8   : > { %v512_v10 = vld [vmem:[%s18128_s25 + $0x860] sm:$0xff]  ;;  %12899 = vmatpush1.bf16.msra.mxu0 %v15925_v14 }
  0xb9   : > { %v636_v59 = vld [vmem:[%s18128_s25 + $0xc40] sm:$0xff]  ;;  %v15918_v16 = vcombine.high %v508_v8, %v512_v10  ;;  %12939 = vmatprep.subr.bf16.mxu1 %v16054_v7  ;;  %v15917_v23 = vcombine.low %v508_v8, %v512_v10 }
  0xba   : > { %v640_v12 = vld [vmem:[%s18128_s25 + $0xc60] sm:$0xff]  ;;  %12940 = vmatpush1.bf16.msra.mxu1 %v16053_v15 }
  0xbb   : > { %v16046_v17 = vcombine.high %v636_v59, %v640_v12  ;;  %v500_v18 = vld [vmem:[%s18128_s25 + $0x800] sm:$0xff]  ;;  %12900 = vmatprep.subr.bf16.mxu0 %v15918_v16  ;;  %v16045_v24 = vcombine.low %v636_v59, %v640_v12 }
  0xbc   : > { %v504_v19 = vld [vmem:[%s18128_s25 + $0x820] sm:$0xff]  ;;  %12901 = vmatpush1.bf16.msra.mxu0 %v15917_v23 }
  0xbd   : > { %v628_v20 = vld [vmem:[%s18128_s25 + $0xc00] sm:$0xff]  ;;  %v15910_v25 = vcombine.high %v500_v18, %v504_v19  ;;  %12941 = vmatprep.subr.bf16.mxu1 %v16046_v17  ;;  %v15909_v32 = vcombine.low %v500_v18, %v504_v19 }
  0xbe   : > { %v632_v21 = vld [vmem:[%s18128_s25 + $0xc20] sm:$0xff]  ;;  %12942 = vmatpush1.bf16.msra.mxu1 %v16045_v24 }
  0xbf   : > { %v16038_v26 = vcombine.high %v628_v20, %v632_v21  ;;  %v620_v27 = vld [vmem:[%s18128_s25 + $0xbc0] sm:$0xff]  ;;  %12902 = vmatprep.subr.bf16.mxu0 %v15910_v25  ;;  %v16037_v33 = vcombine.low %v628_v20, %v632_v21  ;;  %v18306_v25 = vld [vmem:[#allocation2 + $0x8] sm:$0xff] }
  0xc0   : > { %v624_v28 = vld [vmem:[%s18128_s25 + $0xbe0] sm:$0xff]  ;;  %12903 = vmatpush1.bf16.msra.mxu0 %v15909_v32 }
  0xc1   : > { %v748_v29 = vld [vmem:[%s18128_s25 + $0xfc0] sm:$0xff]  ;;  %v16030_v34 = vcombine.high %v620_v27, %v624_v28  ;;  %12943 = vmatprep.subr.bf16.mxu1 %v16038_v26  ;;  %v16029_v41 = vcombine.low %v620_v27, %v624_v28 }
  0xc2   : > { %v752_v31 = vld [vmem:[%s18128_s25 + $0xfe0] sm:$0xff]  ;;  %12944 = vmatpush1.bf16.msra.mxu1 %v16037_v33 }
  0xc3   : > { %v16158_v35 = vcombine.high %v748_v29, %v752_v31  ;;  %v612_v36 = vld [vmem:[%s18128_s25 + $0xb80] sm:$0xff]  ;;  %12904 = vmatprep.subr.bf16.mxu0 %v16030_v34  ;;  %v16157_v42 = vcombine.low %v748_v29, %v752_v31  ;;  %v18314_v34 = vrot.slane %v18306_v25, %v18163_v53 }
  0xc4   : > { %v616_v37 = vld [vmem:[%s18128_s25 + $0xba0] sm:$0xff]  ;;  %12905 = vmatpush2.bf16.msra.mxu0 %v16029_v41 }
  0xc5   : > { %v740_v38 = vld [vmem:[%s18128_s25 + $0xf80] sm:$0xff]  ;;  %v16022_v44 = vcombine.high %v612_v36, %v616_v37  ;;  %12945 = vmatprep.subr.bf16.mxu1 %v16158_v35  ;;  %v16021_v50 = vcombine.low %v612_v36, %v616_v37 }
  0xc6   : > { %v744_v40 = vld [vmem:[%s18128_s25 + $0xfa0] sm:$0xff]  ;;  %12946 = vmatpush2.bf16.msra.mxu1 %v16157_v42 }
  0xc7   : > { %v16150_v45 = vcombine.high %v740_v38, %v744_v40  ;;  %v604_v46 = vld [vmem:[%s18128_s25 + $0xb40] sm:$0xff]  ;;  %12906 = vmatprep.subr.bf16.mxu0 %v16022_v44  ;;  %v16149_v51 = vcombine.low %v740_v38, %v744_v40 }
  0xc8   : > { %v608_v47 = vld [vmem:[%s18128_s25 + $0xb60] sm:$0xff]  ;;  %12907 = vmatpush2.bf16.msra.mxu0 %v16021_v50 }
  0xc9   : > { %v732_v48 = vld [vmem:[%s18128_s25 + $0xf40] sm:$0xff]  ;;  %v16014_v52 = vcombine.high %v604_v46, %v608_v47  ;;  %12947 = vmatprep.subr.bf16.mxu1 %v16150_v45  ;;  %v16013_v60 = vcombine.low %v604_v46, %v608_v47  ;;  %v2402_v45 = vcombine.high %v18314_v34, %v18314_v34  ;;  %v18324_v47 = vrot.slane %v18223_v11, %v18163_v53 }
  0xca   : > { %v736_v49 = vld [vmem:[%s18128_s25 + $0xf60] sm:$0xff]  ;;  %12948 = vmatpush2.bf16.msra.mxu1 %v16149_v51 }
  0xcb   : > { %v16142_v54 = vcombine.high %v732_v48, %v736_v49  ;;  %v596_v55 = vld [vmem:[%s18128_s25 + $0xb00] sm:$0xff]  ;;  %12908 = vmatprep.subr.bf16.mxu0 %v16014_v52  ;;  %v16141_v61 = vcombine.low %v732_v48, %v736_v49  ;;  %v18335_v11 = vcombine.high %v18324_v47, %v18324_v47 }
  0xcc   : > { %v600_v56 = vld [vmem:[%s18128_s25 + $0xb20] sm:$0xff]  ;;  %12909 = vmatpush2.bf16.msra.mxu0 %v16013_v60 }
  0xcd   : > { %v724_v57 = vld [vmem:[%s18128_s25 + $0xf00] sm:$0xff]  ;;  %v16006_v62 = vcombine.high %v596_v55, %v600_v56  ;;  %12949 = vmatprep.subr.bf16.mxu1 %v16142_v54  ;;  %v16005_v5 = vcombine.low %v596_v55, %v600_v56  ;;  %v18331_v56 = vrot.slane %v2402_v45, %v18163_v53 }
  0xce   : > { %v728_v58 = vld [vmem:[%s18128_s25 + $0xf20] sm:$0xff]  ;;  %12950 = vmatpush2.bf16.msra.mxu1 %v16141_v61 }
  0xcf   : > { %v16134_v0 = vcombine.high %v724_v57, %v728_v58  ;;  %v588_v1 = vld [vmem:[%s18128_s25 + $0xac0] sm:$0xff]  ;;  %12910 = vmatprep.subr.bf16.mxu0 %v16006_v62  ;;  %v16133_v6 = vcombine.low %v724_v57, %v728_v58 }
  0xd0   : > { %v592_v2 = vld [vmem:[%s18128_s25 + $0xae0] sm:$0xff]  ;;  %12911 = vmatpush2.bf16.msra.mxu0 %v16005_v5 }
  0xd1   : > { %v716_v3 = vld [vmem:[%s18128_s25 + $0xec0] sm:$0xff]  ;;  %v15998_v7 = vcombine.high %v588_v1, %v592_v2  ;;  %12951 = vmatprep.subr.bf16.mxu1 %v16134_v0  ;;  %v15997_v15 = vcombine.low %v588_v1, %v592_v2 }
  0xd2   : > { %v720_v4 = vld [vmem:[%s18128_s25 + $0xee0] sm:$0xff]  ;;  %12952 = vmatpush2.bf16.msra.mxu1 %v16133_v6 }
  0xd3   : > { %v16126_v8 = vcombine.high %v716_v3, %v720_v4  ;;  %v580_v10 = vld [vmem:[%s18128_s25 + $0xa80] sm:$0xff]  ;;  %12912 = vmatprep.subr.bf16.mxu0 %v15998_v7  ;;  %v16125_v16 = vcombine.low %v716_v3, %v720_v4  ;;  %v18344_v3 = vcombine.high %v18331_v56, %v18331_v56 }
  0xd4   : > { %v584_v59 = vld [vmem:[%s18128_s25 + $0xaa0] sm:$0xff]  ;;  %12913 = vmatpush2.bf16.msra.mxu0 %v15997_v15 }
  0xd5   : > { %v708_v12 = vld [vmem:[%s18128_s25 + $0xe80] sm:$0xff]  ;;  %v15990_v17 = vcombine.high %v580_v10, %v584_v59  ;;  %12953 = vmatprep.subr.bf16.mxu1 %v16126_v8  ;;  %v15989_v24 = vcombine.low %v580_v10, %v584_v59 }
  0xd6   : > { %v712_v14 = vld [vmem:[%s18128_s25 + $0xea0] sm:$0xff]  ;;  %12954 = vmatpush2.bf16.msra.mxu1 %v16125_v16 }
  0xd7   : > { %v16118_v18 = vcombine.high %v708_v12, %v712_v14  ;;  %v572_v19 = vld [vmem:[%s18128_s25 + $0xa40] sm:$0xff]  ;;  %12914 = vmatprep.subr.bf16.mxu0 %v15990_v17  ;;  %v16117_v26 = vcombine.low %v708_v12, %v712_v14 }
  0xd8   : > { %v576_v20 = vld [vmem:[%s18128_s25 + $0xa60] sm:$0xff]  ;;  %12915 = vmatpush2.bf16.msra.mxu0 %v15989_v24 }
  0xd9   : > { %v700_v21 = vld [vmem:[%s18128_s25 + $0xe40] sm:$0xff]  ;;  %v15982_v27 = vcombine.high %v572_v19, %v576_v20  ;;  %12955 = vmatprep.subr.bf16.mxu1 %v16118_v18  ;;  %v15981_v35 = vcombine.low %v572_v19, %v576_v20 }
  0xda   : > { %v704_v23 = vld [vmem:[%s18128_s25 + $0xe60] sm:$0xff]  ;;  %12956 = vmatpush2.bf16.msra.mxu1 %v16117_v26 }
  0xdb   : > { %v16110_v28 = vcombine.high %v700_v21, %v704_v23  ;;  %v564_v29 = vld [vmem:[%s18128_s25 + $0xa00] sm:$0xff]  ;;  %12916 = vmatprep.subr.bf16.mxu0 %v15982_v27  ;;  %v16109_v36 = vcombine.low %v700_v21, %v704_v23 }
  0xdc   : > { %v568_v31 = vld [vmem:[%s18128_s25 + $0xa20] sm:$0xff]  ;;  %12917 = vmatpush2.bf16.msra.mxu0 %v15981_v35 }
  0xdd   : > { %v692_v32 = vld [vmem:[%s18128_s25 + $0xe00] sm:$0xff]  ;;  %v15974_v37 = vcombine.high %v564_v29, %v568_v31  ;;  %12957 = vmatprep.subr.bf16.mxu1 %v16110_v28  ;;  %v15973_v46 = vcombine.low %v564_v29, %v568_v31 }
  0xde   : > { %v696_v33 = vld [vmem:[%s18128_s25 + $0xe20] sm:$0xff]  ;;  %12958 = vmatpush2.bf16.msra.mxu1 %v16109_v36 }
  0xdf   : > { %v16102_v38 = vcombine.high %v692_v32, %v696_v33  ;;  %v812_v40 = vld [vmem:[%s18128_s25 + $0x11c0] sm:$0xff]  ;;  %12918 = vmatprep.subr.bf16.mxu0 %v15974_v37  ;;  %v16101_v48 = vcombine.low %v692_v32, %v696_v33 }
  0xe0   : > { %v816_v41 = vld [vmem:[%s18128_s25 + $0x11e0] sm:$0xff]  ;;  %12919 = vmatpush2.bf16.msra.mxu0 %v15973_v46 }
  0xe1   : > { %v940_v42 = vld [vmem:[%s18128_s25 + $0x15c0] sm:$0xff]  ;;  %v16222_v49 = vcombine.high %v812_v40, %v816_v41  ;;  %12959 = vmatprep.subr.bf16.mxu1 %v16102_v38  ;;  %v16221_v57 = vcombine.low %v812_v40, %v816_v41 }
  0xe2   : > { %v944_v44 = vld [vmem:[%s18128_s25 + $0x15e0] sm:$0xff]  ;;  %12960 = vmatpush2.bf16.msra.mxu1 %v16101_v48 }
  0xe3   : > { %v16350_v50 = vcombine.high %v940_v42, %v944_v44  ;;  %v804_v51 = vld [vmem:[%s18128_s25 + $0x1180] sm:$0xff]  ;;  %12970 = vmatprep.subr.bf16.mxu0 %v16222_v49  ;;  %v16349_v58 = vcombine.low %v940_v42, %v944_v44  ;;  %12921 = vmatmul.mubr.bf16.vlgmr.msra.gmra.mxu0 %v18324_v47 }
  0xe4   : > { %v808_v52 = vld [vmem:[%s18128_s25 + $0x11a0] sm:$0xff]  ;;  %12971 = vmatpush1.bf16.msra.mxu0 %v16221_v57  ;;  %13002 = vmatprep.mubr.bf16.mxu0 %v18331_v56 }
  0xe5   : > { %v932_v54 = vld [vmem:[%s18128_s25 + $0x1580] sm:$0xff]  ;;  %v16214_v60 = vcombine.high %v804_v51, %v808_v52  ;;  %13011 = vmatprep.subr.bf16.mxu1 %v16350_v50  ;;  %12962 = vmatmul.mubr.bf16.vlgmr.msra.gmra.mxu1 %v18335_v11  ;;  %v16213_v4 = vcombine.low %v804_v51, %v808_v52 }
  0xe6   : > { %v936_v55 = vld [vmem:[%s18128_s25 + $0x15a0] sm:$0xff]  ;;  %13012 = vmatpush1.bf16.msra.mxu1 %v16349_v58  ;;  %13043 = vmatprep.mubr.bf16.mxu1 %v18344_v3 }
  0xe7   : > { %v16342_v61 = vcombine.high %v932_v54, %v936_v55  ;;  %v796_v62 = vld [vmem:[%s18128_s25 + $0x1140] sm:$0xff]  ;;  %12972 = vmatprep.subr.bf16.mxu0 %v16214_v60  ;;  %v16341_v5 = vcombine.low %v932_v54, %v936_v55 }
  0xe8   : > { %v800_v0 = vld [vmem:[%s18128_s25 + $0x1160] sm:$0xff]  ;;  %12973 = vmatpush1.bf16.msra.mxu0 %v16213_v4 }
  0xe9   : > { %v924_v1 = vld [vmem:[%s18128_s25 + $0x1540] sm:$0xff]  ;;  %v16206_v6 = vcombine.high %v796_v62, %v800_v0  ;;  %13013 = vmatprep.subr.bf16.mxu1 %v16342_v61  ;;  %v16205_v14 = vcombine.low %v796_v62, %v800_v0 }
  0xea   : > { %v928_v2 = vld [vmem:[%s18128_s25 + $0x1560] sm:$0xff]  ;;  %13014 = vmatpush1.bf16.msra.mxu1 %v16341_v5 }
  0xeb   : > { %v16334_v7 = vcombine.high %v924_v1, %v928_v2  ;;  %v788_v8 = vld [vmem:[%s18128_s25 + $0x1100] sm:$0xff]  ;;  %12974 = vmatprep.subr.bf16.mxu0 %v16206_v6  ;;  %v16333_v15 = vcombine.low %v924_v1, %v928_v2 }
  0xec   : > { %v792_v10 = vld [vmem:[%s18128_s25 + $0x1120] sm:$0xff]  ;;  %12975 = vmatpush1.bf16.msra.mxu0 %v16205_v14 }
  0xed   : > { %v916_v59 = vld [vmem:[%s18128_s25 + $0x1500] sm:$0xff]  ;;  %v16198_v16 = vcombine.high %v788_v8, %v792_v10  ;;  %13015 = vmatprep.subr.bf16.mxu1 %v16334_v7  ;;  %v16197_v23 = vcombine.low %v788_v8, %v792_v10 }
  0xee   : > { %v920_v12 = vld [vmem:[%s18128_s25 + $0x1520] sm:$0xff]  ;;  %13016 = vmatpush1.bf16.msra.mxu1 %v16333_v15 }
  0xef   : > { %v16326_v17 = vcombine.high %v916_v59, %v920_v12  ;;  %v780_v18 = vld [vmem:[%s18128_s25 + $0x10c0] sm:$0xff]  ;;  %12976 = vmatprep.subr.bf16.mxu0 %v16198_v16  ;;  %v16325_v24 = vcombine.low %v916_v59, %v920_v12 }
  0xf0   : > { %v784_v19 = vld [vmem:[%s18128_s25 + $0x10e0] sm:$0xff]  ;;  %12977 = vmatpush1.bf16.msra.mxu0 %v16197_v23 }
  0xf1   : > { %v908_v20 = vld [vmem:[%s18128_s25 + $0x14c0] sm:$0xff]  ;;  %v16190_v26 = vcombine.high %v780_v18, %v784_v19  ;;  %13017 = vmatprep.subr.bf16.mxu1 %v16326_v17  ;;  %v16189_v33 = vcombine.low %v780_v18, %v784_v19 }
  0xf2   : > { %v912_v21 = vld [vmem:[%s18128_s25 + $0x14e0] sm:$0xff]  ;;  %13018 = vmatpush1.bf16.msra.mxu1 %v16325_v24 }
  0xf3   : > { %v16318_v27 = vcombine.high %v908_v20, %v912_v21  ;;  %v772_v28 = vld [vmem:[%s18128_s25 + $0x1080] sm:$0xff]  ;;  %12978 = vmatprep.subr.bf16.mxu0 %v16190_v26  ;;  %v16317_v35 = vcombine.low %v908_v20, %v912_v21 }
  0xf4   : > { %v776_v29 = vld [vmem:[%s18128_s25 + $0x10a0] sm:$0xff]  ;;  %12979 = vmatpush1.bf16.msra.mxu0 %v16189_v33 }
  0xf5   : > { %v900_v31 = vld [vmem:[%s18128_s25 + $0x1480] sm:$0xff]  ;;  %v16182_v36 = vcombine.high %v772_v28, %v776_v29  ;;  %13019 = vmatprep.subr.bf16.mxu1 %v16318_v27  ;;  %v16181_v44 = vcombine.low %v772_v28, %v776_v29 }
  0xf6   : > { %v904_v32 = vld [vmem:[%s18128_s25 + $0x14a0] sm:$0xff]  ;;  %13020 = vmatpush1.bf16.msra.mxu1 %v16317_v35 }
  0xf7   : > { %v16310_v37 = vcombine.high %v900_v31, %v904_v32  ;;  %v764_v38 = vld [vmem:[%s18128_s25 + $0x1040] sm:$0xff]  ;;  %12980 = vmatprep.subr.bf16.mxu0 %v16182_v36  ;;  %v16309_v45 = vcombine.low %v900_v31, %v904_v32 }
  0xf8   : > { %v768_v40 = vld [vmem:[%s18128_s25 + $0x1060] sm:$0xff]  ;;  %12981 = vmatpush1.bf16.msra.mxu0 %v16181_v44 }
  0xf9   : > { %v892_v41 = vld [vmem:[%s18128_s25 + $0x1440] sm:$0xff]  ;;  %v16174_v46 = vcombine.high %v764_v38, %v768_v40  ;;  %13021 = vmatprep.subr.bf16.mxu1 %v16310_v37  ;;  %v16173_v54 = vcombine.low %v764_v38, %v768_v40 }
  0xfa   : > { %v896_v42 = vld [vmem:[%s18128_s25 + $0x1460] sm:$0xff]  ;;  %13022 = vmatpush1.bf16.msra.mxu1 %v16309_v45 }
  0xfb   : > { %v16302_v48 = vcombine.high %v892_v41, %v896_v42  ;;  %v756_v49 = vld [vmem:[%s18128_s25 + $0x1000] sm:$0xff]  ;;  %12982 = vmatprep.subr.bf16.mxu0 %v16174_v46  ;;  %v16301_v55 = vcombine.low %v892_v41, %v896_v42 }
  0xfc   : > { %v760_v50 = vld [vmem:[%s18128_s25 + $0x1020] sm:$0xff]  ;;  %12983 = vmatpush1.bf16.msra.mxu0 %v16173_v54 }
  0xfd   : > { %v884_v51 = vld [vmem:[%s18128_s25 + $0x1400] sm:$0xff]  ;;  %v16166_v57 = vcombine.high %v756_v49, %v760_v50  ;;  %13023 = vmatprep.subr.bf16.mxu1 %v16302_v48  ;;  %v16165_v1 = vcombine.low %v756_v49, %v760_v50 }
  0xfe   : > { %v888_v52 = vld [vmem:[%s18128_s25 + $0x1420] sm:$0xff]  ;;  %13024 = vmatpush1.bf16.msra.mxu1 %v16301_v55 }
  0xff   : > { %v16294_v58 = vcombine.high %v884_v51, %v888_v52  ;;  %v876_v60 = vld [vmem:[%s18128_s25 + $0x13c0] sm:$0xff]  ;;  %12984 = vmatprep.subr.bf16.mxu0 %v16166_v57  ;;  %v16293_v2 = vcombine.low %v884_v51, %v888_v52 }
 0x100   : > { %v880_v61 = vld [vmem:[%s18128_s25 + $0x13e0] sm:$0xff]  ;;  %12985 = vmatpush1.bf16.msra.mxu0 %v16165_v1 }
 0x101   : > { %v1004_v62 = vld [vmem:[%s18128_s25 + $0x17c0] sm:$0xff]  ;;  %v16286_v4 = vcombine.high %v876_v60, %v880_v61  ;;  %13025 = vmatprep.subr.bf16.mxu1 %v16294_v58  ;;  %v16285_v59 = vcombine.low %v876_v60, %v880_v61 }
 0x102   : > { %v1008_v0 = vld [vmem:[%s18128_s25 + $0x17e0] sm:$0xff]  ;;  %13026 = vmatpush1.bf16.msra.mxu1 %v16293_v2 }
 0x103   : > { %v16414_v5 = vcombine.high %v1004_v62, %v1008_v0  ;;  %v868_v6 = vld [vmem:[%s18128_s25 + $0x1380] sm:$0xff]  ;;  %12986 = vmatprep.subr.bf16.mxu0 %v16286_v4  ;;  %v16413_v12 = vcombine.low %v1004_v62, %v1008_v0  ;;  %v2387_v62 = vcombine.high %v18306_v25, %v18306_v25 }
 0x104   : > { %v872_v7 = vld [vmem:[%s18128_s25 + $0x13a0] sm:$0xff]  ;;  %12987 = vmatpush2.bf16.msra.mxu0 %v16285_v59 }
 0x105   : > { %v996_v8 = vld [vmem:[%s18128_s25 + $0x1780] sm:$0xff]  ;;  %v16278_v14 = vcombine.high %v868_v6, %v872_v7  ;;  %13027 = vmatprep.subr.bf16.mxu1 %v16414_v5  ;;  %v16277_v20 = vcombine.low %v868_v6, %v872_v7 }
 0x106   : > { %v1000_v10 = vld [vmem:[%s18128_s25 + $0x17a0] sm:$0xff]  ;;  %13028 = vmatpush2.bf16.msra.mxu1 %v16413_v12 }
 0x107   : > { %v16406_v15 = vcombine.high %v996_v8, %v1000_v10  ;;  %v860_v16 = vld [vmem:[%s18128_s25 + $0x1340] sm:$0xff]  ;;  %12988 = vmatprep.subr.bf16.mxu0 %v16278_v14  ;;  %v16405_v21 = vcombine.low %v996_v8, %v1000_v10  ;;  %v18404_v10 = vrot.slane %v2387_v62, %v18163_v53 }
 0x108   : > { %v864_v17 = vld [vmem:[%s18128_s25 + $0x1360] sm:$0xff]  ;;  %12989 = vmatpush2.bf16.msra.mxu0 %v16277_v20 }
 0x109   : > { %v988_v18 = vld [vmem:[%s18128_s25 + $0x1740] sm:$0xff]  ;;  %v16270_v23 = vcombine.high %v860_v16, %v864_v17  ;;  %13029 = vmatprep.subr.bf16.mxu1 %v16406_v15  ;;  %v16269_v31 = vcombine.low %v860_v16, %v864_v17 }
 0x10a   : > { %v992_v19 = vld [vmem:[%s18128_s25 + $0x1760] sm:$0xff]  ;;  %13030 = vmatpush2.bf16.msra.mxu1 %v16405_v21  ;;  %v18414_v21 = vrot.slane %v18314_v34, %v18163_v53 }
 0x10b   : > { %v16398_v24 = vcombine.high %v988_v18, %v992_v19  ;;  %v852_v26 = vld [vmem:[%s18128_s25 + $0x1300] sm:$0xff]  ;;  %12990 = vmatprep.subr.bf16.mxu0 %v16270_v23  ;;  %v16397_v32 = vcombine.low %v988_v18, %v992_v19  ;;  %v2403_v19 = vcombine.high %v18404_v10, %v18404_v10 }
 0x10c   : > { %v856_v27 = vld [vmem:[%s18128_s25 + $0x1320] sm:$0xff]  ;;  %12991 = vmatpush2.bf16.msra.mxu0 %v16269_v31  ;;  %v18425_v34 = vcombine.high %v18414_v21, %v18414_v21 }
 0x10d   : > { %v980_v28 = vld [vmem:[%s18128_s25 + $0x1700] sm:$0xff]  ;;  %v16262_v33 = vcombine.high %v852_v26, %v856_v27  ;;  %13031 = vmatprep.subr.bf16.mxu1 %v16398_v24  ;;  %v16261_v41 = vcombine.low %v852_v26, %v856_v27 }
 0x10e   : > { %v984_v29 = vld [vmem:[%s18128_s25 + $0x1720] sm:$0xff]  ;;  %13032 = vmatpush2.bf16.msra.mxu1 %v16397_v32  ;;  %v18421_v32 = vrot.slane %v2403_v19, %v18163_v53 }
 0x10f   : > { %v16390_v35 = vcombine.high %v980_v28, %v984_v29  ;;  %v844_v36 = vld [vmem:[%s18128_s25 + $0x12c0] sm:$0xff]  ;;  %12992 = vmatprep.subr.bf16.mxu0 %v16262_v33  ;;  %v16389_v42 = vcombine.low %v980_v28, %v984_v29 }
 0x110   : > { %v848_v37 = vld [vmem:[%s18128_s25 + $0x12e0] sm:$0xff]  ;;  %12993 = vmatpush2.bf16.msra.mxu0 %v16261_v41 }
 0x111   : > { %v972_v38 = vld [vmem:[%s18128_s25 + $0x16c0] sm:$0xff]  ;;  %v16254_v44 = vcombine.high %v844_v36, %v848_v37  ;;  %13033 = vmatprep.subr.bf16.mxu1 %v16390_v35  ;;  %v16253_v51 = vcombine.low %v844_v36, %v848_v37 }
 0x112   : > { %v976_v40 = vld [vmem:[%s18128_s25 + $0x16e0] sm:$0xff]  ;;  %13034 = vmatpush2.bf16.msra.mxu1 %v16389_v42 }
 0x113   : > { %v16382_v45 = vcombine.high %v972_v38, %v976_v40  ;;  %v836_v46 = vld [vmem:[%s18128_s25 + $0x1280] sm:$0xff]  ;;  %12994 = vmatprep.subr.bf16.mxu0 %v16254_v44  ;;  %v16381_v52 = vcombine.low %v972_v38, %v976_v40  ;;  %v18434_v44 = vcombine.high %v18421_v32, %v18421_v32 }
 0x114   : > { %v840_v48 = vld [vmem:[%s18128_s25 + $0x12a0] sm:$0xff]  ;;  %12995 = vmatpush2.bf16.msra.mxu0 %v16253_v51 }
 0x115   : > { %v964_v49 = vld [vmem:[%s18128_s25 + $0x1680] sm:$0xff]  ;;  %v16246_v54 = vcombine.high %v836_v46, %v840_v48  ;;  %13035 = vmatprep.subr.bf16.mxu1 %v16382_v45  ;;  %v16245_v0 = vcombine.low %v836_v46, %v840_v48 }
 0x116   : > { %v968_v50 = vld [vmem:[%s18128_s25 + $0x16a0] sm:$0xff]  ;;  %13036 = vmatpush2.bf16.msra.mxu1 %v16381_v52 }
 0x117   : > { %v16374_v55 = vcombine.high %v964_v49, %v968_v50  ;;  %v828_v57 = vld [vmem:[%s18128_s25 + $0x1240] sm:$0xff]  ;;  %12996 = vmatprep.subr.bf16.mxu0 %v16246_v54  ;;  %v16373_v1 = vcombine.low %v964_v49, %v968_v50 }
 0x118   : > { %v832_v58 = vld [vmem:[%s18128_s25 + $0x1260] sm:$0xff]  ;;  %12997 = vmatpush2.bf16.msra.mxu0 %v16245_v0 }
 0x119   : > { %v956_v60 = vld [vmem:[%s18128_s25 + $0x1640] sm:$0xff]  ;;  %v16238_v2 = vcombine.high %v828_v57, %v832_v58  ;;  %13037 = vmatprep.subr.bf16.mxu1 %v16374_v55  ;;  %v16237_v25 = vcombine.low %v828_v57, %v832_v58 }
 0x11a   : > { %v960_v61 = vld [vmem:[%s18128_s25 + $0x1660] sm:$0xff]  ;;  %13038 = vmatpush2.bf16.msra.mxu1 %v16373_v1 }
 0x11b   : > { %v16366_v4 = vcombine.high %v956_v60, %v960_v61  ;;  %v820_v5 = vld [vmem:[%s18128_s25 + $0x1200] sm:$0xff]  ;;  %12998 = vmatprep.subr.bf16.mxu0 %v16238_v2  ;;  %v16365_v59 = vcombine.low %v956_v60, %v960_v61 }
 0x11c   : > { %v824_v6 = vld [vmem:[%s18128_s25 + $0x1220] sm:$0xff]  ;;  %12999 = vmatpush2.bf16.msra.mxu0 %v16237_v25 }
 0x11d   : > { %v948_v7 = vld [vmem:[%s18128_s25 + $0x1600] sm:$0xff]  ;;  %v16230_v12 = vcombine.high %v820_v5, %v824_v6  ;;  %13039 = vmatprep.subr.bf16.mxu1 %v16366_v4  ;;  %v16229_v20 = vcombine.low %v820_v5, %v824_v6 }
 0x11e   : > { %v952_v8 = vld [vmem:[%s18128_s25 + $0x1620] sm:$0xff]  ;;  %13040 = vmatpush2.bf16.msra.mxu1 %v16365_v59 }
 0x11f   : > { %v16358_v14 = vcombine.high %v948_v7, %v952_v8  ;;  %v1068_v15 = vld [vmem:[%s18128_s25 + $0x19c0] sm:$0xff]  ;;  %13000 = vmatprep.subr.bf16.mxu0 %v16230_v12  ;;  %v16357_v23 = vcombine.low %v948_v7, %v952_v8 }
 0x120   : > { %v1072_v16 = vld [vmem:[%s18128_s25 + $0x19e0] sm:$0xff]  ;;  %13001 = vmatpush2.bf16.msra.mxu0 %v16229_v20 }
 0x121   : > { %v1196_v17 = vld [vmem:[%s18128_s25 + $0x1dc0] sm:$0xff]  ;;  %v16478_v24 = vcombine.high %v1068_v15, %v1072_v16  ;;  %13041 = vmatprep.subr.bf16.mxu1 %v16358_v14  ;;  %v16477_v33 = vcombine.low %v1068_v15, %v1072_v16 }
 0x122   : > { %v1200_v18 = vld [vmem:[%s18128_s25 + $0x1de0] sm:$0xff]  ;;  %13042 = vmatpush2.bf16.msra.mxu1 %v16357_v23 }
 0x123   : > { %v16606_v26 = vcombine.high %v1196_v17, %v1200_v18  ;;  %v1060_v27 = vld [vmem:[%s18128_s25 + $0x1980] sm:$0xff]  ;;  %13052 = vmatprep.subr.bf16.mxu0 %v16478_v24  ;;  %v16605_v35 = vcombine.low %v1196_v17, %v1200_v18  ;;  %13003 = vmatmul.mubr.bf16.vlgmr.msra.gmra.mxu0 %v18414_v21 }
 0x124   : > { %v1064_v28 = vld [vmem:[%s18128_s25 + $0x19a0] sm:$0xff]  ;;  %13053 = vmatpush1.bf16.msra.mxu0 %v16477_v33  ;;  %13084 = vmatprep.mubr.bf16.mxu0 %v18421_v32 }
 0x125   : > { %v1188_v29 = vld [vmem:[%s18128_s25 + $0x1d80] sm:$0xff]  ;;  %v16470_v36 = vcombine.high %v1060_v27, %v1064_v28  ;;  %13093 = vmatprep.subr.bf16.mxu1 %v16606_v26  ;;  %13044 = vmatmul.mubr.bf16.vlgmr.msra.gmra.mxu1 %v18425_v34  ;;  %v16469_v45 = vcombine.low %v1060_v27, %v1064_v28 }
 0x126   : > { %v1192_v31 = vld [vmem:[%s18128_s25 + $0x1da0] sm:$0xff]  ;;  %13094 = vmatpush1.bf16.msra.mxu1 %v16605_v35  ;;  %13125 = vmatprep.mubr.bf16.mxu1 %v18434_v44 }
 0x127   : > { %v16598_v37 = vcombine.high %v1188_v29, %v1192_v31  ;;  %v1052_v38 = vld [vmem:[%s18128_s25 + $0x1940] sm:$0xff]  ;;  %13054 = vmatprep.subr.bf16.mxu0 %v16470_v36  ;;  %v16597_v46 = vcombine.low %v1188_v29, %v1192_v31 }
 0x128   : > { %v1056_v40 = vld [vmem:[%s18128_s25 + $0x1960] sm:$0xff]  ;;  %13055 = vmatpush1.bf16.msra.mxu0 %v16469_v45 }
 0x129   : > { %v1180_v41 = vld [vmem:[%s18128_s25 + $0x1d40] sm:$0xff]  ;;  %v16462_v48 = vcombine.high %v1052_v38, %v1056_v40  ;;  %13095 = vmatprep.subr.bf16.mxu1 %v16598_v37  ;;  %v16461_v55 = vcombine.low %v1052_v38, %v1056_v40 }
 0x12a   : > { %v1184_v42 = vld [vmem:[%s18128_s25 + $0x1d60] sm:$0xff]  ;;  %13096 = vmatpush1.bf16.msra.mxu1 %v16597_v46 }
 0x12b   : > { %v16590_v49 = vcombine.high %v1180_v41, %v1184_v42  ;;  %v1044_v50 = vld [vmem:[%s18128_s25 + $0x1900] sm:$0xff]  ;;  %13056 = vmatprep.subr.bf16.mxu0 %v16462_v48  ;;  %v16589_v57 = vcombine.low %v1180_v41, %v1184_v42 }
 0x12c   : > { %v1048_v51 = vld [vmem:[%s18128_s25 + $0x1920] sm:$0xff]  ;;  %13057 = vmatpush1.bf16.msra.mxu0 %v16461_v55 }
 0x12d   : > { %v1172_v52 = vld [vmem:[%s18128_s25 + $0x1d00] sm:$0xff]  ;;  %v16454_v58 = vcombine.high %v1044_v50, %v1048_v51  ;;  %13097 = vmatprep.subr.bf16.mxu1 %v16590_v49  ;;  %v16453_v2 = vcombine.low %v1044_v50, %v1048_v51 }
 0x12e   : > { %v1176_v54 = vld [vmem:[%s18128_s25 + $0x1d20] sm:$0xff]  ;;  %13098 = vmatpush1.bf16.msra.mxu1 %v16589_v57 }
 0x12f   : > { %v16582_v60 = vcombine.high %v1172_v52, %v1176_v54  ;;  %v1036_v61 = vld [vmem:[%s18128_s25 + $0x18c0] sm:$0xff]  ;;  %13058 = vmatprep.subr.bf16.mxu0 %v16454_v58  ;;  %v16581_v4 = vcombine.low %v1172_v52, %v1176_v54 }
 0x130   : > { %v1040_v62 = vld [vmem:[%s18128_s25 + $0x18e0] sm:$0xff]  ;;  %13059 = vmatpush1.bf16.msra.mxu0 %v16453_v2 }
 0x131   : > { %v1164_v0 = vld [vmem:[%s18128_s25 + $0x1cc0] sm:$0xff]  ;;  %v16446_v5 = vcombine.high %v1036_v61, %v1040_v62  ;;  %13099 = vmatprep.subr.bf16.mxu1 %v16582_v60  ;;  %v16445_v12 = vcombine.low %v1036_v61, %v1040_v62 }
 0x132   : > { %v1168_v1 = vld [vmem:[%s18128_s25 + $0x1ce0] sm:$0xff]  ;;  %13100 = vmatpush1.bf16.msra.mxu1 %v16581_v4 }
 0x133   : > { %v16574_v6 = vcombine.high %v1164_v0, %v1168_v1  ;;  %v1028_v7 = vld [vmem:[%s18128_s25 + $0x1880] sm:$0xff]  ;;  %13060 = vmatprep.subr.bf16.mxu0 %v16446_v5  ;;  %v16573_v14 = vcombine.low %v1164_v0, %v1168_v1 }
 0x134   : > { %v1032_v8 = vld [vmem:[%s18128_s25 + $0x18a0] sm:$0xff]  ;;  %13061 = vmatpush1.bf16.msra.mxu0 %v16445_v12 }
 0x135   : > { %v1156_v25 = vld [vmem:[%s18128_s25 + $0x1c80] sm:$0xff]  ;;  %v16438_v15 = vcombine.high %v1028_v7, %v1032_v8  ;;  %13101 = vmatprep.subr.bf16.mxu1 %v16574_v6  ;;  %v16437_v23 = vcombine.low %v1028_v7, %v1032_v8 }
 0x136   : > { %v1160_v59 = vld [vmem:[%s18128_s25 + $0x1ca0] sm:$0xff]  ;;  %13102 = vmatpush1.bf16.msra.mxu1 %v16573_v14 }
 0x137   : > { %v16566_v16 = vcombine.high %v1156_v25, %v1160_v59  ;;  %v1020_v17 = vld [vmem:[%s18128_s25 + $0x1840] sm:$0xff]  ;;  %13062 = vmatprep.subr.bf16.mxu0 %v16438_v15  ;;  %v16565_v24 = vcombine.low %v1156_v25, %v1160_v59 }
 0x138   : > { %v1024_v18 = vld [vmem:[%s18128_s25 + $0x1860] sm:$0xff]  ;;  %13063 = vmatpush1.bf16.msra.mxu0 %v16437_v23 }
 0x139   : > { %v1148_v19 = vld [vmem:[%s18128_s25 + $0x1c40] sm:$0xff]  ;;  %v16430_v26 = vcombine.high %v1020_v17, %v1024_v18  ;;  %13103 = vmatprep.subr.bf16.mxu1 %v16566_v16  ;;  %v16429_v35 = vcombine.low %v1020_v17, %v1024_v18 }
 0x13a   : > { %v1152_v20 = vld [vmem:[%s18128_s25 + $0x1c60] sm:$0xff]  ;;  %13104 = vmatpush1.bf16.msra.mxu1 %v16565_v24 }
 0x13b   : > { %v16558_v27 = vcombine.high %v1148_v19, %v1152_v20  ;;  %v1012_v28 = vld [vmem:[%s18128_s25 + $0x1800] sm:$0xff]  ;;  %13064 = vmatprep.subr.bf16.mxu0 %v16430_v26  ;;  %v16557_v36 = vcombine.low %v1148_v19, %v1152_v20 }
 0x13c   : > { %v1016_v29 = vld [vmem:[%s18128_s25 + $0x1820] sm:$0xff]  ;;  %13065 = vmatpush1.bf16.msra.mxu0 %v16429_v35 }
 0x13d   : > { %v1140_v31 = vld [vmem:[%s18128_s25 + $0x1c00] sm:$0xff]  ;;  %v16422_v37 = vcombine.high %v1012_v28, %v1016_v29  ;;  %13105 = vmatprep.subr.bf16.mxu1 %v16558_v27  ;;  %v16421_v46 = vcombine.low %v1012_v28, %v1016_v29 }
 0x13e   : > { %v1144_v33 = vld [vmem:[%s18128_s25 + $0x1c20] sm:$0xff]  ;;  %13106 = vmatpush1.bf16.msra.mxu1 %v16557_v36 }
 0x13f   : > { %v16550_v38 = vcombine.high %v1140_v31, %v1144_v33  ;;  %v1132_v40 = vld [vmem:[%s18128_s25 + $0x1bc0] sm:$0xff]  ;;  %13066 = vmatprep.subr.bf16.mxu0 %v16422_v37  ;;  %v16549_v48 = vcombine.low %v1140_v31, %v1144_v33 }
 0x140   : > { %v1136_v41 = vld [vmem:[%s18128_s25 + $0x1be0] sm:$0xff]  ;;  %13067 = vmatpush1.bf16.msra.mxu0 %v16421_v46 }
 0x141   : > { %v1260_v42 = vld [vmem:[%s18128_s25 + $0x1fc0] sm:$0xff]  ;;  %v16542_v49 = vcombine.high %v1132_v40, %v1136_v41  ;;  %13107 = vmatprep.subr.bf16.mxu1 %v16550_v38  ;;  %v16541_v57 = vcombine.low %v1132_v40, %v1136_v41 }
 0x142   : > { %v1264_v45 = vld [vmem:[%s18128_s25 + $0x1fe0] sm:$0xff]  ;;  %13108 = vmatpush1.bf16.msra.mxu1 %v16549_v48 }
 0x143   : > { %v16670_v50 = vcombine.high %v1260_v42, %v1264_v45  ;;  %v1124_v51 = vld [vmem:[%s18128_s25 + $0x1b80] sm:$0xff]  ;;  %13068 = vmatprep.subr.bf16.mxu0 %v16542_v49  ;;  %v16669_v58 = vcombine.low %v1260_v42, %v1264_v45  ;;  %v18487_v49 = vld [vmem:[#allocation2 + $0x10] sm:$0xff] }
 0x144   : > { %v1128_v52 = vld [vmem:[%s18128_s25 + $0x1ba0] sm:$0xff]  ;;  %13069 = vmatpush2.bf16.msra.mxu0 %v16541_v57 }
 0x145   : > { %v1252_v54 = vld [vmem:[%s18128_s25 + $0x1f80] sm:$0xff]  ;;  %v16534_v60 = vcombine.high %v1124_v51, %v1128_v52  ;;  %13109 = vmatprep.subr.bf16.mxu1 %v16670_v50  ;;  %v16533_v4 = vcombine.low %v1124_v51, %v1128_v52 }
 0x146   : > { %v1256_v55 = vld [vmem:[%s18128_s25 + $0x1fa0] sm:$0xff]  ;;  %13110 = vmatpush2.bf16.msra.mxu1 %v16669_v58 }
 0x147   : > { %v16662_v61 = vcombine.high %v1252_v54, %v1256_v55  ;;  %v1116_v62 = vld [vmem:[%s18128_s25 + $0x1b40] sm:$0xff]  ;;  %13070 = vmatprep.subr.bf16.mxu0 %v16534_v60  ;;  %v16661_v5 = vcombine.low %v1252_v54, %v1256_v55  ;;  %v18496_v60 = vrot.slane %v18487_v49, %v18163_v53 }
 0x148   : > { %v1120_v0 = vld [vmem:[%s18128_s25 + $0x1b60] sm:$0xff]  ;;  %13071 = vmatpush2.bf16.msra.mxu0 %v16533_v4 }
 0x149   : > { %v1244_v1 = vld [vmem:[%s18128_s25 + $0x1f40] sm:$0xff]  ;;  %v16526_v6 = vcombine.high %v1116_v62, %v1120_v0  ;;  %13111 = vmatprep.subr.bf16.mxu1 %v16662_v61  ;;  %v16525_v14 = vcombine.low %v1116_v62, %v1120_v0 }
 0x14a   : > { %v1248_v2 = vld [vmem:[%s18128_s25 + $0x1f60] sm:$0xff]  ;;  %13112 = vmatpush2.bf16.msra.mxu1 %v16661_v5 }
 0x14b   : > { %v16654_v7 = vcombine.high %v1244_v1, %v1248_v2  ;;  %v1108_v8 = vld [vmem:[%s18128_s25 + $0x1b00] sm:$0xff]  ;;  %13072 = vmatprep.subr.bf16.mxu0 %v16526_v6  ;;  %v16653_v15 = vcombine.low %v1244_v1, %v1248_v2 }
 0x14c   : > { %v1112_v25 = vld [vmem:[%s18128_s25 + $0x1b20] sm:$0xff]  ;;  %13073 = vmatpush2.bf16.msra.mxu0 %v16525_v14 }
 0x14d   : > { %v1236_v59 = vld [vmem:[%s18128_s25 + $0x1f00] sm:$0xff]  ;;  %v16518_v16 = vcombine.high %v1108_v8, %v1112_v25  ;;  %13113 = vmatprep.subr.bf16.mxu1 %v16654_v7  ;;  %v16517_v24 = vcombine.low %v1108_v8, %v1112_v25  ;;  %v2451_v7 = vcombine.high %v18496_v60, %v18496_v60  ;;  %v2296_v25 = vsub.s32 0, %v18156_v43 }
 0x14e   : > { %v1240_v12 = vld [vmem:[%s18128_s25 + $0x1f20] sm:$0xff]  ;;  %13114 = vmatpush2.bf16.msra.mxu1 %v16653_v15 }
 0x14f   : > { %v16646_v17 = vcombine.high %v1236_v59, %v1240_v12  ;;  %v1100_v18 = vld [vmem:[%s18128_s25 + $0x1ac0] sm:$0xff]  ;;  %13074 = vmatprep.subr.bf16.mxu0 %v16518_v16  ;;  %v16645_v26 = vcombine.low %v1236_v59, %v1240_v12  ;;  %v18507_v59 = vrot.slane %v18404_v10, %v18163_v53 }
 0x150   : > { %v1104_v19 = vld [vmem:[%s18128_s25 + $0x1ae0] sm:$0xff]  ;;  %13075 = vmatpush2.bf16.msra.mxu0 %v16517_v24 }
 0x151   : > { %v1228_v20 = vld [vmem:[%s18128_s25 + $0x1ec0] sm:$0xff]  ;;  %v16510_v27 = vcombine.high %v1100_v18, %v1104_v19  ;;  %13115 = vmatprep.subr.bf16.mxu1 %v16646_v17  ;;  %v16509_v36 = vcombine.low %v1100_v18, %v1104_v19  ;;  %v2300_v17 = vsub.s32 1, %v18156_v43 }
 0x152   : > { %v1232_v23 = vld [vmem:[%s18128_s25 + $0x1ee0] sm:$0xff]  ;;  %13116 = vmatpush2.bf16.msra.mxu1 %v16645_v26  ;;  %v18524_v26 = vcombine.high %v18507_v59, %v18507_v59 }
 0x153   : > { %v16638_v28 = vcombine.high %v1228_v20, %v1232_v23  ;;  %v1092_v29 = vld [vmem:[%s18128_s25 + $0x1a80] sm:$0xff]  ;;  %13076 = vmatprep.subr.bf16.mxu0 %v16510_v27  ;;  %v16637_v37 = vcombine.low %v1228_v20, %v1232_v23  ;;  %v18520_v23 = vrot.slane %v2451_v7, %v18163_v53 }
 0x154   : > { %v1096_v31 = vld [vmem:[%s18128_s25 + $0x1aa0] sm:$0xff]  ;;  %13077 = vmatpush2.bf16.msra.mxu0 %v16509_v36 }
 0x155   : > { %v1220_v33 = vld [vmem:[%s18128_s25 + $0x1e80] sm:$0xff]  ;;  %v16502_v38 = vcombine.high %v1092_v29, %v1096_v31  ;;  %13117 = vmatprep.subr.bf16.mxu1 %v16638_v28  ;;  %v16501_v48 = vcombine.low %v1092_v29, %v1096_v31 }
 0x156   : > { %v1224_v35 = vld [vmem:[%s18128_s25 + $0x1ea0] sm:$0xff]  ;;  %13118 = vmatpush2.bf16.msra.mxu1 %v16637_v37 }
 0x157   : > { %v16630_v40 = vcombine.high %v1220_v33, %v1224_v35  ;;  %v1084_v41 = vld [vmem:[%s18128_s25 + $0x1a40] sm:$0xff]  ;;  %13078 = vmatprep.subr.bf16.mxu0 %v16502_v38  ;;  %v16629_v50 = vcombine.low %v1220_v33, %v1224_v35 }
 0x158   : > { %v1088_v42 = vld [vmem:[%s18128_s25 + $0x1a60] sm:$0xff]  ;;  %13079 = vmatpush2.bf16.msra.mxu0 %v16501_v48 }
 0x159   : > { %v1212_v45 = vld [vmem:[%s18128_s25 + $0x1e40] sm:$0xff]  ;;  %v16494_v51 = vcombine.high %v1084_v41, %v1088_v42  ;;  %13119 = vmatprep.subr.bf16.mxu1 %v16630_v40  ;;  %v16493_v61 = vcombine.low %v1084_v41, %v1088_v42  ;;  %v18533_v41 = vcombine.high %v18520_v23, %v18520_v23 }
 0x15a   : > { %v1216_v46 = vld [vmem:[%s18128_s25 + $0x1e60] sm:$0xff]  ;;  %13120 = vmatpush2.bf16.msra.mxu1 %v16629_v50 }
 0x15b   : > { %v16622_v52 = vcombine.high %v1212_v45, %v1216_v46  ;;  %v1076_v54 = vld [vmem:[%s18128_s25 + $0x1a00] sm:$0xff]  ;;  %13080 = vmatprep.subr.bf16.mxu0 %v16494_v51  ;;  %v16621_v62 = vcombine.low %v1212_v45, %v1216_v46 }
 0x15c   : > { %v1080_v55 = vld [vmem:[%s18128_s25 + $0x1a20] sm:$0xff]  ;;  %13081 = vmatpush2.bf16.msra.mxu0 %v16493_v61 }
 0x15d   : > { %v1204_v57 = vld [vmem:[%s18128_s25 + $0x1e00] sm:$0xff]  ;;  %v16486_v0 = vcombine.high %v1076_v54, %v1080_v55  ;;  %13121 = vmatprep.subr.bf16.mxu1 %v16622_v52  ;;  %v16485_v8 = vcombine.low %v1076_v54, %v1080_v55 }
 0x15e   : > { %v1208_v58 = vld [vmem:[%s18128_s25 + $0x1e20] sm:$0xff]  ;;  %13122 = vmatpush2.bf16.msra.mxu1 %v16621_v62 }
 0x15f   : > { %v16614_v1 = vcombine.high %v1204_v57, %v1208_v58  ;;  %v1324_v2 = vld [vmem:[%s18128_s25 + $0x21c0] sm:$0xff]  ;;  %13082 = vmatprep.subr.bf16.mxu0 %v16486_v0  ;;  %v16613_v12 = vcombine.low %v1204_v57, %v1208_v58 }
 0x160   : > { %v1328_v4 = vld [vmem:[%s18128_s25 + $0x21e0] sm:$0xff]  ;;  %13083 = vmatpush2.bf16.msra.mxu0 %v16485_v8 }
 0x161   : > { %v1452_v5 = vld [vmem:[%s18128_s25 + $0x25c0] sm:$0xff]  ;;  %v16734_v15 = vcombine.high %v1324_v2, %v1328_v4  ;;  %13123 = vmatprep.subr.bf16.mxu1 %v16614_v1  ;;  %v16733_v27 = vcombine.low %v1324_v2, %v1328_v4 }
 0x162   : > { %v1456_v6 = vld [vmem:[%s18128_s25 + $0x25e0] sm:$0xff]  ;;  %13124 = vmatpush2.bf16.msra.mxu1 %v16613_v12 }
 0x163   : > { %v2292_v14 = vld [vmem:[%s18511_s27] sm:$0xff]  ;;  %v16862_v16 = vcombine.high %v1452_v5, %v1456_v6  ;;  %13134 = vmatprep.subr.bf16.mxu0 %v16734_v15  ;;  %v16861_v28 = vcombine.low %v1452_v5, %v1456_v6  ;;  %v12840_v37 = vpop.f32.mrf.mxu0  ;;  %13085 = vmatmul.mubr.bf16.vlgmr.msra.gmra.mxu0 %v18507_v59 }
 0x164   : > { %v1316_v18 = vld [vmem:[%s18128_s25 + $0x2180] sm:$0xff]  ;;  %v2297_v24 = vrot.slane %v2292_v14, %v2296_v25  ;;  %v2301_v31 = vrot.slane %v2292_v14, %v2300_v17  ;;  %13135 = vmatpush1.bf16.msra.mxu0 %v16733_v27  ;;  %13166 = vmatprep.mubr.bf16.mxu0 %v18520_v23 }
 0x165   : > { %v1320_v19 = vld [vmem:[%s18128_s25 + $0x21a0] sm:$0xff]  ;;  %13175 = vmatprep.subr.bf16.mxu1 %v16862_v16  ;;  %v12881_v45 = vpop.f32.mrf.mxu1  ;;  %13126 = vmatmul.mubr.bf16.vlgmr.msra.gmra.mxu1 %v18524_v26  ;;  %v12842_v48 = vpop.f32.mrf.mxu0 }
 0x166   : > { %v1444_v20 = vld [vmem:[%s18128_s25 + $0x2580] sm:$0xff]  ;;  %v16726_v29 = vcombine.high %v1316_v18, %v1320_v19  ;;  %v12841_v42 = vadd.f32 %v12840_v37, %v2297_v24  ;;  %v16725_v46 = vcombine.low %v1316_v18, %v1320_v19  ;;  %13176 = vmatpush1.bf16.msra.mxu1 %v16861_v28  ;;  %v12843_v54 = vadd.f32 %v12842_v48, %v2301_v31 }
 0x167   : > { %v1448_v10 = vld [vmem:[%s18128_s25 + $0x25a0] sm:$0xff]  ;;  %v12883_v55 = vpop.f32.mrf.mxu1  ;;  %v12844_v62 = vpop.f32.mrf.mxu0  ;;  %13207 = vmatprep.mubr.bf16.mxu1 %v18533_v41 }
 0x168   : > { %v16854_v33 = vcombine.high %v1444_v20, %v1448_v10  ;;  %v1308_v35 = vld [vmem:[%s18128_s25 + $0x2140] sm:$0xff]  ;;  %13136 = vmatprep.subr.bf16.mxu0 %v16726_v29  ;;  %v16853_v50 = vcombine.low %v1444_v20, %v1448_v10  ;;  %v18536_v52 = vadd.f32 %v12881_v45, %v12841_v42  ;;  %v18544_v2 = vadd.f32 %v12883_v55, %v12843_v54 }
 0x169   : > { %v1312_v36 = vld [vmem:[%s18128_s25 + $0x2160] sm:$0xff]  ;;  %v12885_v4 = vpop.f32.mrf.mxu1  ;;  %13137 = vmatpush1.bf16.msra.mxu0 %v16725_v46  ;;  %v12845_v6 = vpop.f32.mrf.mxu0 }
 0x16a   : > { %v1436_v38 = vld [vmem:[%s18128_s25 + $0x2540] sm:$0xff]  ;;  %v16718_v51 = vcombine.high %v1308_v35, %v1312_v36  ;;  %13177 = vmatprep.subr.bf16.mxu1 %v16854_v33  ;;  %v16717_v5 = vcombine.low %v1308_v35, %v1312_v36 }
 0x16b   : > { %v1440_v40 = vld [vmem:[%s18128_s25 + $0x2560] sm:$0xff]  ;;  %13178 = vmatpush1.bf16.msra.mxu1 %v16853_v50  ;;  %v12886_v25 = vpop.f32.mrf.mxu1 }
 0x16c   : > { %v16846_v57 = vcombine.high %v1436_v38, %v1440_v40  ;;  %v1300_v58 = vld [vmem:[%s18128_s25 + $0x2100] sm:$0xff]  ;;  %13138 = vmatprep.subr.bf16.mxu0 %v16718_v51  ;;  %v16845_v7 = vcombine.low %v1436_v38, %v1440_v40 }
 0x16d   : > { %v1304_v61 = vld [vmem:[%s18128_s25 + $0x2120] sm:$0xff]  ;;  %13139 = vmatpush1.bf16.msra.mxu0 %v16717_v5 }
 0x16e   : > { %v1428_v0 = vld [vmem:[%s18128_s25 + $0x2500] sm:$0xff]  ;;  %v16710_v8 = vcombine.high %v1300_v58, %v1304_v61  ;;  %13179 = vmatprep.subr.bf16.mxu1 %v16846_v57  ;;  %v16709_v18 = vcombine.low %v1300_v58, %v1304_v61 }
 0x16f   : > { %v1432_v1 = vld [vmem:[%s18128_s25 + $0x2520] sm:$0xff]  ;;  %13180 = vmatpush1.bf16.msra.mxu1 %v16845_v7 }
 0x170   : > { %v16838_v12 = vcombine.high %v1428_v0, %v1432_v1  ;;  %v1292_v14 = vld [vmem:[%s18128_s25 + $0x20c0] sm:$0xff]  ;;  %13140 = vmatprep.subr.bf16.mxu0 %v16710_v8  ;;  %v16837_v19 = vcombine.low %v1428_v0, %v1432_v1 }
 0x171   : > { %v1296_v15 = vld [vmem:[%s18128_s25 + $0x20e0] sm:$0xff]  ;;  %13141 = vmatpush1.bf16.msra.mxu0 %v16709_v18 }
 0x172   : > { %v1420_v16 = vld [vmem:[%s18128_s25 + $0x24c0] sm:$0xff]  ;;  %v16702_v20 = vcombine.high %v1292_v14, %v1296_v15  ;;  %13181 = vmatprep.subr.bf16.mxu1 %v16838_v12  ;;  %v16701_v31 = vcombine.low %v1292_v14, %v1296_v15 }
 0x173   : > { %v1424_v17 = vld [vmem:[%s18128_s25 + $0x24e0] sm:$0xff]  ;;  %13182 = vmatpush1.bf16.msra.mxu1 %v16837_v19 }
 0x174   : > { %v16830_v10 = vcombine.high %v1420_v16, %v1424_v17  ;;  %v1284_v24 = vld [vmem:[%s18128_s25 + $0x2080] sm:$0xff]  ;;  %13142 = vmatprep.subr.bf16.mxu0 %v16702_v20  ;;  %v16829_v33 = vcombine.low %v1420_v16, %v1424_v17 }
 0x175   : > { %v1288_v27 = vld [vmem:[%s18128_s25 + $0x20a0] sm:$0xff]  ;;  %13143 = vmatpush1.bf16.msra.mxu0 %v16701_v31 }
 0x176   : > { %v1412_v28 = vld [vmem:[%s18128_s25 + $0x2480] sm:$0xff]  ;;  %v16694_v35 = vcombine.high %v1284_v24, %v1288_v27  ;;  %13183 = vmatprep.subr.bf16.mxu1 %v16830_v10  ;;  %v16693_v45 = vcombine.low %v1284_v24, %v1288_v27 }
 0x177   : > { %v1416_v29 = vld [vmem:[%s18128_s25 + $0x24a0] sm:$0xff]  ;;  %13184 = vmatpush1.bf16.msra.mxu1 %v16829_v33 }
 0x178   : > { %v16822_v36 = vcombine.high %v1412_v28, %v1416_v29  ;;  %v1276_v37 = vld [vmem:[%s18128_s25 + $0x2040] sm:$0xff]  ;;  %13144 = vmatprep.subr.bf16.mxu0 %v16694_v35  ;;  %v16821_v46 = vcombine.low %v1412_v28, %v1416_v29 }
 0x179   : > { %v1280_v38 = vld [vmem:[%s18128_s25 + $0x2060] sm:$0xff]  ;;  %13145 = vmatpush1.bf16.msra.mxu0 %v16693_v45 }
 0x17a   : > { %v1404_v40 = vld [vmem:[%s18128_s25 + $0x2440] sm:$0xff]  ;;  %v16686_v48 = vcombine.high %v1276_v37, %v1280_v38  ;;  %13185 = vmatprep.subr.bf16.mxu1 %v16822_v36  ;;  %v16685_v58 = vcombine.low %v1276_v37, %v1280_v38 }
 0x17b   : > { %v1408_v42 = vld [vmem:[%s18128_s25 + $0x2460] sm:$0xff]  ;;  %13186 = vmatpush1.bf16.msra.mxu1 %v16821_v46 }
 0x17c   : > { %v16814_v50 = vcombine.high %v1404_v40, %v1408_v42  ;;  %v1268_v51 = vld [vmem:[%s18128_s25 + $0x2000] sm:$0xff]  ;;  %13146 = vmatprep.subr.bf16.mxu0 %v16686_v48  ;;  %v16813_v61 = vcombine.low %v1404_v40, %v1408_v42 }
 0x17d   : > { %v1272_v54 = vld [vmem:[%s18128_s25 + $0x2020] sm:$0xff]  ;;  %13147 = vmatpush1.bf16.msra.mxu0 %v16685_v58 }
 0x17e   : > { %v1396_v55 = vld [vmem:[%s18128_s25 + $0x2400] sm:$0xff]  ;;  %v16678_v62 = vcombine.high %v1268_v51, %v1272_v54  ;;  %13187 = vmatprep.subr.bf16.mxu1 %v16814_v50  ;;  %v16677_v7 = vcombine.low %v1268_v51, %v1272_v54 }
 0x17f   : > { %v1400_v57 = vld [vmem:[%s18128_s25 + $0x2420] sm:$0xff]  ;;  %13188 = vmatpush1.bf16.msra.mxu1 %v16813_v61 }
 0x180   : > { %v16806_v0 = vcombine.high %v1396_v55, %v1400_v57  ;;  %v1388_v1 = vld [vmem:[%s18128_s25 + $0x23c0] sm:$0xff]  ;;  %13148 = vmatprep.subr.bf16.mxu0 %v16678_v62  ;;  %v16805_v8 = vcombine.low %v1396_v55, %v1400_v57 }
 0x181   : > { %v1392_v4 = vld [vmem:[%s18128_s25 + $0x23e0] sm:$0xff]  ;;  %13149 = vmatpush1.bf16.msra.mxu0 %v16677_v7 }
 0x182   : > { %v1516_v5 = vld [vmem:[%s18128_s25 + $0x27c0] sm:$0xff]  ;;  %v16798_v25 = vcombine.high %v1388_v1, %v1392_v4  ;;  %13189 = vmatprep.subr.bf16.mxu1 %v16806_v0  ;;  %v16797_v18 = vcombine.low %v1388_v1, %v1392_v4 }
 0x183   : > { %v1520_v6 = vld [vmem:[%s18128_s25 + $0x27e0] sm:$0xff]  ;;  %13190 = vmatpush1.bf16.msra.mxu1 %v16805_v8 }
 0x184   : > { %v16926_v12 = vcombine.high %v1516_v5, %v1520_v6  ;;  %v1380_v14 = vld [vmem:[%s18128_s25 + $0x2380] sm:$0xff]  ;;  %13150 = vmatprep.subr.bf16.mxu0 %v16798_v25  ;;  %v16925_v19 = vcombine.low %v1516_v5, %v1520_v6 }
 0x185   : > { %v1384_v15 = vld [vmem:[%s18128_s25 + $0x23a0] sm:$0xff]  ;;  %13151 = vmatpush2.bf16.msra.mxu0 %v16797_v18  ;;  %v2436_v18 = vcombine.high %v18487_v49, %v18487_v49 }
 0x186   : > { %v1508_v16 = vld [vmem:[%s18128_s25 + $0x2780] sm:$0xff]  ;;  %v16790_v20 = vcombine.high %v1380_v14, %v1384_v15  ;;  %13191 = vmatprep.subr.bf16.mxu1 %v16926_v12  ;;  %v16789_v31 = vcombine.low %v1380_v14, %v1384_v15 }
 0x187   : > { %v1512_v17 = vld [vmem:[%s18128_s25 + $0x27a0] sm:$0xff]  ;;  %13192 = vmatpush2.bf16.msra.mxu1 %v16925_v19 }
 0x188   : > { %v16918_v10 = vcombine.high %v1508_v16, %v1512_v17  ;;  %v1372_v24 = vld [vmem:[%s18128_s25 + $0x2340] sm:$0xff]  ;;  %13152 = vmatprep.subr.bf16.mxu0 %v16790_v20  ;;  %v16917_v33 = vcombine.low %v1508_v16, %v1512_v17 }
 0x189   : > { %v1376_v27 = vld [vmem:[%s18128_s25 + $0x2360] sm:$0xff]  ;;  %13153 = vmatpush2.bf16.msra.mxu0 %v16789_v31 }
 0x18a   : > { %v1500_v28 = vld [vmem:[%s18128_s25 + $0x2740] sm:$0xff]  ;;  %v16782_v35 = vcombine.high %v1372_v24, %v1376_v27  ;;  %13193 = vmatprep.subr.bf16.mxu1 %v16918_v10  ;;  %v16781_v45 = vcombine.low %v1372_v24, %v1376_v27 }
 0x18b   : > { %v1504_v29 = vld [vmem:[%s18128_s25 + $0x2760] sm:$0xff]  ;;  %13194 = vmatpush2.bf16.msra.mxu1 %v16917_v33  ;;  %v18597_v33 = vrot.slane %v2436_v18, %v18163_v53 }
 0x18c   : > { %v16910_v36 = vcombine.high %v1500_v28, %v1504_v29  ;;  %v1364_v37 = vld [vmem:[%s18128_s25 + $0x2300] sm:$0xff]  ;;  %13154 = vmatprep.subr.bf16.mxu0 %v16782_v35  ;;  %v16909_v46 = vcombine.low %v1500_v28, %v1504_v29 }
 0x18d   : > { %v1368_v38 = vld [vmem:[%s18128_s25 + $0x2320] sm:$0xff]  ;;  %13155 = vmatpush2.bf16.msra.mxu0 %v16781_v45 }
 0x18e   : > { %v1492_v40 = vld [vmem:[%s18128_s25 + $0x2700] sm:$0xff]  ;;  %v16774_v48 = vcombine.high %v1364_v37, %v1368_v38  ;;  %13195 = vmatprep.subr.bf16.mxu1 %v16910_v36  ;;  %v16773_v58 = vcombine.low %v1364_v37, %v1368_v38 }
 0x18f   : > { %v1496_v42 = vld [vmem:[%s18128_s25 + $0x2720] sm:$0xff]  ;;  %13196 = vmatpush2.bf16.msra.mxu1 %v16909_v46  ;;  %v2452_v46 = vcombine.high %v18597_v33, %v18597_v33 }
 0x190   : > { %v16902_v50 = vcombine.high %v1492_v40, %v1496_v42  ;;  %v1356_v51 = vld [vmem:[%s18128_s25 + $0x22c0] sm:$0xff]  ;;  %13156 = vmatprep.subr.bf16.mxu0 %v16774_v48  ;;  %v16901_v61 = vcombine.low %v1492_v40, %v1496_v42 }
 0x191   : > { %v1360_v54 = vld [vmem:[%s18128_s25 + $0x22e0] sm:$0xff]  ;;  %13157 = vmatpush2.bf16.msra.mxu0 %v16773_v58 }
 0x192   : > { %v1484_v55 = vld [vmem:[%s18128_s25 + $0x26c0] sm:$0xff]  ;;  %v16766_v62 = vcombine.high %v1356_v51, %v1360_v54  ;;  %13197 = vmatprep.subr.bf16.mxu1 %v16902_v50  ;;  %v16765_v7 = vcombine.low %v1356_v51, %v1360_v54  ;;  %v18607_v50 = vrot.slane %v18496_v60, %v18163_v53 }
 0x193   : > { %v1488_v57 = vld [vmem:[%s18128_s25 + $0x26e0] sm:$0xff]  ;;  %13198 = vmatpush2.bf16.msra.mxu1 %v16901_v61 }
 0x194   : > { %v16894_v0 = vcombine.high %v1484_v55, %v1488_v57  ;;  %v1348_v1 = vld [vmem:[%s18128_s25 + $0x2280] sm:$0xff]  ;;  %13158 = vmatprep.subr.bf16.mxu0 %v16766_v62  ;;  %v16893_v8 = vcombine.low %v1484_v55, %v1488_v57  ;;  %v18618_v60 = vcombine.high %v18607_v50, %v18607_v50 }
 0x195   : > { %v1352_v4 = vld [vmem:[%s18128_s25 + $0x22a0] sm:$0xff]  ;;  %13159 = vmatpush2.bf16.msra.mxu0 %v16765_v7 }
 0x196   : > { %v1476_v5 = vld [vmem:[%s18128_s25 + $0x2680] sm:$0xff]  ;;  %v16758_v25 = vcombine.high %v1348_v1, %v1352_v4  ;;  %13199 = vmatprep.subr.bf16.mxu1 %v16894_v0  ;;  %v16757_v19 = vcombine.low %v1348_v1, %v1352_v4  ;;  %v18614_v0 = vrot.slane %v2452_v46, %v18163_v53 }
 0x197   : > { %v1480_v6 = vld [vmem:[%s18128_s25 + $0x26a0] sm:$0xff]  ;;  %13200 = vmatpush2.bf16.msra.mxu1 %v16893_v8 }
 0x198   : > { %v16886_v12 = vcombine.high %v1476_v5, %v1480_v6  ;;  %v1340_v14 = vld [vmem:[%s18128_s25 + $0x2240] sm:$0xff]  ;;  %13160 = vmatprep.subr.bf16.mxu0 %v16758_v25  ;;  %v16885_v20 = vcombine.low %v1476_v5, %v1480_v6 }
 0x199   : > { %v1344_v15 = vld [vmem:[%s18128_s25 + $0x2260] sm:$0xff]  ;;  %13161 = vmatpush2.bf16.msra.mxu0 %v16757_v19 }
 0x19a   : > { %v1468_v16 = vld [vmem:[%s18128_s25 + $0x2640] sm:$0xff]  ;;  %v16750_v10 = vcombine.high %v1340_v14, %v1344_v15  ;;  %13201 = vmatprep.subr.bf16.mxu1 %v16886_v12  ;;  %v16749_v49 = vcombine.low %v1340_v14, %v1344_v15  ;;  %v18627_v15 = vcombine.high %v18614_v0, %v18614_v0 }
 0x19b   : > { %v1472_v17 = vld [vmem:[%s18128_s25 + $0x2660] sm:$0xff]  ;;  %13202 = vmatpush2.bf16.msra.mxu1 %v16885_v20 }
 0x19c   : > { %v16878_v24 = vcombine.high %v1468_v16, %v1472_v17  ;;  %v1332_v27 = vld [vmem:[%s18128_s25 + $0x2200] sm:$0xff]  ;;  %13162 = vmatprep.subr.bf16.mxu0 %v16750_v10  ;;  %v16877_v35 = vcombine.low %v1468_v16, %v1472_v17 }
 0x19d   : > { %v1336_v28 = vld [vmem:[%s18128_s25 + $0x2220] sm:$0xff]  ;;  %13163 = vmatpush2.bf16.msra.mxu0 %v16749_v49 }
 0x19e   : > { %v1460_v29 = vld [vmem:[%s18128_s25 + $0x2600] sm:$0xff]  ;;  %v16742_v36 = vcombine.high %v1332_v27, %v1336_v28  ;;  %13203 = vmatprep.subr.bf16.mxu1 %v16878_v24  ;;  %v16741_v48 = vcombine.low %v1332_v27, %v1336_v28 }
 0x19f   : > { %v1464_v31 = vld [vmem:[%s18128_s25 + $0x2620] sm:$0xff]  ;;  %13204 = vmatpush2.bf16.msra.mxu1 %v16877_v35 }
 0x1a0   : > { %v16870_v37 = vcombine.high %v1460_v29, %v1464_v31  ;;  %v1580_v38 = vld [vmem:[%s18128_s25 + $0x29c0] sm:$0xff]  ;;  %13164 = vmatprep.subr.bf16.mxu0 %v16742_v36  ;;  %v16869_v51 = vcombine.low %v1460_v29, %v1464_v31 }
 0x1a1   : > { %v1584_v40 = vld [vmem:[%s18128_s25 + $0x29e0] sm:$0xff]  ;;  %13165 = vmatpush2.bf16.msra.mxu0 %v16741_v48 }
 0x1a2   : > { %v1708_v42 = vld [vmem:[%s18128_s25 + $0x2dc0] sm:$0xff]  ;;  %v16990_v54 = vcombine.high %v1580_v38, %v1584_v40  ;;  %13205 = vmatprep.subr.bf16.mxu1 %v16870_v37  ;;  %v16989_v1 = vcombine.low %v1580_v38, %v1584_v40 }
 0x1a3   : > { %v1712_v45 = vld [vmem:[%s18128_s25 + $0x2de0] sm:$0xff]  ;;  %13206 = vmatpush2.bf16.msra.mxu1 %v16869_v51  ;;  %v12922_v25 = vpop.f32.mrf.mxu0 }
 0x1a4   : > { %v17118_v55 = vcombine.high %v1708_v42, %v1712_v45  ;;  %v1572_v57 = vld [vmem:[%s18128_s25 + $0x2980] sm:$0xff]  ;;  %13216 = vmatprep.subr.bf16.mxu0 %v16990_v54  ;;  %v17117_v4 = vcombine.low %v1708_v42, %v1712_v45  ;;  %13167 = vmatmul.mubr.bf16.vlgmr.msra.gmra.mxu0 %v18607_v50  ;;  %v12923_v16 = vadd.f32 %v12922_v25, %v18536_v52 }
 0x1a5   : > { %v1576_v58 = vld [vmem:[%s18128_s25 + $0x29a0] sm:$0xff]  ;;  %v12963_v17 = vpop.f32.mrf.mxu1  ;;  %13217 = vmatpush1.bf16.msra.mxu0 %v16989_v1  ;;  %v12924_v19 = vpop.f32.mrf.mxu0  ;;  %13248 = vmatprep.mubr.bf16.mxu0 %v18614_v0 }
 0x1a6   : > { %v1700_v61 = vld [vmem:[%s18128_s25 + $0x2d80] sm:$0xff]  ;;  %v16982_v5 = vcombine.high %v1572_v57, %v1576_v58  ;;  %13257 = vmatprep.subr.bf16.mxu1 %v17118_v55  ;;  %13208 = vmatmul.mubr.bf16.vlgmr.msra.gmra.mxu1 %v18618_v60  ;;  %v16981_v18 = vcombine.low %v1572_v57, %v1576_v58  ;;  %v18631_v24 = vadd.f32 %v12963_v17, %v12923_v16 }
 0x1a7   : > { %v1704_v62 = vld [vmem:[%s18128_s25 + $0x2da0] sm:$0xff]  ;;  %13258 = vmatpush1.bf16.msra.mxu1 %v17117_v4  ;;  %v12925_v27 = vadd.f32 %v12924_v19, %v18544_v2  ;;  %v12965_v28 = vpop.f32.mrf.mxu1  ;;  %v12926_v49 = vpop.f32.mrf.mxu0  ;;  %13289 = vmatprep.mubr.bf16.mxu1 %v18627_v15 }
 0x1a8   : > { %v17110_v6 = vcombine.high %v1700_v61, %v1704_v62  ;;  %v1564_v7 = vld [vmem:[%s18128_s25 + $0x2940] sm:$0xff]  ;;  %13218 = vmatprep.subr.bf16.mxu0 %v16982_v5  ;;  %v17109_v20 = vcombine.low %v1700_v61, %v1704_v62 }
 0x1a9   : > { %v1568_v8 = vld [vmem:[%s18128_s25 + $0x2960] sm:$0xff]  ;;  %v18640_v37 = vadd.f32 %v12965_v28, %v12925_v27  ;;  %v12967_v38 = vpop.f32.mrf.mxu1  ;;  %13219 = vmatpush1.bf16.msra.mxu0 %v16981_v18  ;;  %v12927_v40 = vpop.f32.mrf.mxu0 }
 0x1aa   : > { %v1692_v12 = vld [vmem:[%s18128_s25 + $0x2d40] sm:$0xff]  ;;  %v16974_v10 = vcombine.high %v1564_v7, %v1568_v8  ;;  %13259 = vmatprep.subr.bf16.mxu1 %v17110_v6  ;;  %v16973_v2 = vcombine.low %v1564_v7, %v1568_v8 }
 0x1ab   : > { %v1696_v14 = vld [vmem:[%s18128_s25 + $0x2d60] sm:$0xff]  ;;  %13260 = vmatpush1.bf16.msra.mxu1 %v17109_v20  ;;  %v12968_v46 = vpop.f32.mrf.mxu1 }
 0x1ac   : > { %v17102_v52 = vcombine.high %v1692_v12, %v1696_v14  ;;  %v1556_v29 = vld [vmem:[%s18128_s25 + $0x2900] sm:$0xff]  ;;  %13220 = vmatprep.subr.bf16.mxu0 %v16974_v10  ;;  %v17101_v42 = vcombine.low %v1692_v12, %v1696_v14 }
 0x1ad   : > { %v1560_v31 = vld [vmem:[%s18128_s25 + $0x2920] sm:$0xff]  ;;  %13221 = vmatpush1.bf16.msra.mxu0 %v16973_v2 }
 0x1ae   : > { %v1684_v35 = vld [vmem:[%s18128_s25 + $0x2d00] sm:$0xff]  ;;  %v16966_v45 = vcombine.high %v1556_v29, %v1560_v31  ;;  %13261 = vmatprep.subr.bf16.mxu1 %v17102_v52  ;;  %v16965_v58 = vcombine.low %v1556_v29, %v1560_v31 }
 0x1af   : > { %v1688_v36 = vld [vmem:[%s18128_s25 + $0x2d20] sm:$0xff]  ;;  %13262 = vmatpush1.bf16.msra.mxu1 %v17101_v42 }
 0x1b0   : > { %v17094_v48 = vcombine.high %v1684_v35, %v1688_v36  ;;  %v1548_v51 = vld [vmem:[%s18128_s25 + $0x28c0] sm:$0xff]  ;;  %13222 = vmatprep.subr.bf16.mxu0 %v16966_v45  ;;  %v17093_v61 = vcombine.low %v1684_v35, %v1688_v36 }
 0x1b1   : > { %v1552_v54 = vld [vmem:[%s18128_s25 + $0x28e0] sm:$0xff]  ;;  %13223 = vmatpush1.bf16.msra.mxu0 %v16965_v58 }
 0x1b2   : > { %v1676_v55 = vld [vmem:[%s18128_s25 + $0x2cc0] sm:$0xff]  ;;  %v16958_v62 = vcombine.high %v1548_v51, %v1552_v54  ;;  %13263 = vmatprep.subr.bf16.mxu1 %v17094_v48  ;;  %v16957_v8 = vcombine.low %v1548_v51, %v1552_v54 }
 0x1b3   : > { %v1680_v57 = vld [vmem:[%s18128_s25 + $0x2ce0] sm:$0xff]  ;;  %13264 = vmatpush1.bf16.msra.mxu1 %v17093_v61 }
 0x1b4   : > { %v17086_v1 = vcombine.high %v1676_v55, %v1680_v57  ;;  %v1540_v4 = vld [vmem:[%s18128_s25 + $0x2880] sm:$0xff]  ;;  %13224 = vmatprep.subr.bf16.mxu0 %v16958_v62  ;;  %v17085_v25 = vcombine.low %v1676_v55, %v1680_v57 }
 0x1b5   : > { %v1544_v5 = vld [vmem:[%s18128_s25 + $0x28a0] sm:$0xff]  ;;  %13225 = vmatpush1.bf16.msra.mxu0 %v16957_v8 }
 0x1b6   : > { %v1668_v6 = vld [vmem:[%s18128_s25 + $0x2c80] sm:$0xff]  ;;  %v16950_v12 = vcombine.high %v1540_v4, %v1544_v5  ;;  %13265 = vmatprep.subr.bf16.mxu1 %v17086_v1  ;;  %v16949_v20 = vcombine.low %v1540_v4, %v1544_v5 }
 0x1b7   : > { %v1672_v7 = vld [vmem:[%s18128_s25 + $0x2ca0] sm:$0xff]  ;;  %13266 = vmatpush1.bf16.msra.mxu1 %v17085_v25 }
 0x1b8   : > { %v17078_v14 = vcombine.high %v1668_v6, %v1672_v7  ;;  %v1532_v16 = vld [vmem:[%s18128_s25 + $0x2840] sm:$0xff]  ;;  %13226 = vmatprep.subr.bf16.mxu0 %v16950_v12  ;;  %v17077_v10 = vcombine.low %v1668_v6, %v1672_v7 }
 0x1b9   : > { %v1536_v17 = vld [vmem:[%s18128_s25 + $0x2860] sm:$0xff]  ;;  %13227 = vmatpush1.bf16.msra.mxu0 %v16949_v20 }
 0x1ba   : > { %v1660_v18 = vld [vmem:[%s18128_s25 + $0x2c40] sm:$0xff]  ;;  %v16942_v27 = vcombine.high %v1532_v16, %v1536_v17  ;;  %13267 = vmatprep.subr.bf16.mxu1 %v17078_v14  ;;  %v16941_v35 = vcombine.low %v1532_v16, %v1536_v17 }
 0x1bb   : > { %v1664_v19 = vld [vmem:[%s18128_s25 + $0x2c60] sm:$0xff]  ;;  %13268 = vmatpush1.bf16.msra.mxu1 %v17077_v10 }
 0x1bc   : > { %v17070_v28 = vcombine.high %v1660_v18, %v1664_v19  ;;  %v1524_v52 = vld [vmem:[%s18128_s25 + $0x2800] sm:$0xff]  ;;  %13228 = vmatprep.subr.bf16.mxu0 %v16942_v27  ;;  %v17069_v36 = vcombine.low %v1660_v18, %v1664_v19 }
 0x1bd   : > { %v1528_v29 = vld [vmem:[%s18128_s25 + $0x2820] sm:$0xff]  ;;  %13229 = vmatpush1.bf16.msra.mxu0 %v16941_v35 }
 0x1be   : > { %v1652_v31 = vld [vmem:[%s18128_s25 + $0x2c00] sm:$0xff]  ;;  %v16934_v38 = vcombine.high %v1524_v52, %v1528_v29  ;;  %13269 = vmatprep.subr.bf16.mxu1 %v17070_v28  ;;  %v16933_v48 = vcombine.low %v1524_v52, %v1528_v29 }
 0x1bf   : > { %v1656_v49 = vld [vmem:[%s18128_s25 + $0x2c20] sm:$0xff]  ;;  %13270 = vmatpush1.bf16.msra.mxu1 %v17069_v36 }
 0x1c0   : > { %v17062_v2 = vcombine.high %v1652_v31, %v1656_v49  ;;  %v1644_v40 = vld [vmem:[%s18128_s25 + $0x2bc0] sm:$0xff]  ;;  %13230 = vmatprep.subr.bf16.mxu0 %v16934_v38  ;;  %v17061_v51 = vcombine.low %v1652_v31, %v1656_v49 }
 0x1c1   : > { %v1648_v42 = vld [vmem:[%s18128_s25 + $0x2be0] sm:$0xff]  ;;  %13231 = vmatpush1.bf16.msra.mxu0 %v16933_v48 }
 0x1c2   : > { %v1772_v45 = vld [vmem:[%s18128_s25 + $0x2fc0] sm:$0xff]  ;;  %v17054_v54 = vcombine.high %v1644_v40, %v1648_v42  ;;  %13271 = vmatprep.subr.bf16.mxu1 %v17062_v2  ;;  %v17053_v1 = vcombine.low %v1644_v40, %v1648_v42 }
 0x1c3   : > { %v1776_v46 = vld [vmem:[%s18128_s25 + $0x2fe0] sm:$0xff]  ;;  %13272 = vmatpush1.bf16.msra.mxu1 %v17061_v51 }
 0x1c4   : > { %v17182_v55 = vcombine.high %v1772_v45, %v1776_v46  ;;  %v1636_v57 = vld [vmem:[%s18128_s25 + $0x2b80] sm:$0xff]  ;;  %13232 = vmatprep.subr.bf16.mxu0 %v17054_v54  ;;  %v17181_v4 = vcombine.low %v1772_v45, %v1776_v46 }
 0x1c5   : > { %v1640_v58 = vld [vmem:[%s18128_s25 + $0x2ba0] sm:$0xff]  ;;  %13233 = vmatpush2.bf16.msra.mxu0 %v17053_v1 }
 0x1c6   : > { %v1764_v61 = vld [vmem:[%s18128_s25 + $0x2f80] sm:$0xff]  ;;  %v17046_v5 = vcombine.high %v1636_v57, %v1640_v58  ;;  %13273 = vmatprep.subr.bf16.mxu1 %v17182_v55  ;;  %v17045_v14 = vcombine.low %v1636_v57, %v1640_v58 }
 0x1c7   : > { %v1768_v62 = vld [vmem:[%s18128_s25 + $0x2fa0] sm:$0xff]  ;;  %13274 = vmatpush2.bf16.msra.mxu1 %v17181_v4 }
 0x1c8   : > { %v17174_v6 = vcombine.high %v1764_v61, %v1768_v62  ;;  %v1628_v7 = vld [vmem:[%s18128_s25 + $0x2b40] sm:$0xff]  ;;  %13234 = vmatprep.subr.bf16.mxu0 %v17046_v5  ;;  %v17173_v16 = vcombine.low %v1764_v61, %v1768_v62 }
 0x1c9   : > { %v1632_v8 = vld [vmem:[%s18128_s25 + $0x2b60] sm:$0xff]  ;;  %13235 = vmatpush2.bf16.msra.mxu0 %v17045_v14 }
 0x1ca   : > { %v1756_v25 = vld [vmem:[%s18128_s25 + $0x2f40] sm:$0xff]  ;;  %v17038_v17 = vcombine.high %v1628_v7, %v1632_v8  ;;  %13275 = vmatprep.subr.bf16.mxu1 %v17174_v6  ;;  %v17037_v28 = vcombine.low %v1628_v7, %v1632_v8  ;;  %v18686_v7 = vld [vmem:[#allocation2 + $0x18] sm:$0xff] }
 0x1cb   : > { %v1760_v12 = vld [vmem:[%s18128_s25 + $0x2f60] sm:$0xff]  ;;  %13276 = vmatpush2.bf16.msra.mxu1 %v17173_v16 }
 0x1cc   : > { %v17166_v18 = vcombine.high %v1756_v25, %v1760_v12  ;;  %v1620_v19 = vld [vmem:[%s18128_s25 + $0x2b00] sm:$0xff]  ;;  %13236 = vmatprep.subr.bf16.mxu0 %v17038_v17  ;;  %v17165_v52 = vcombine.low %v1756_v25, %v1760_v12 }
 0x1cd   : > { %v1624_v20 = vld [vmem:[%s18128_s25 + $0x2b20] sm:$0xff]  ;;  %13237 = vmatpush2.bf16.msra.mxu0 %v17037_v28 }
 0x1ce   : > { %v1748_v10 = vld [vmem:[%s18128_s25 + $0x2f00] sm:$0xff]  ;;  %v17030_v29 = vcombine.high %v1620_v19, %v1624_v20  ;;  %13277 = vmatprep.subr.bf16.mxu1 %v17166_v18  ;;  %v17029_v2 = vcombine.low %v1620_v19, %v1624_v20  ;;  %v18694_v19 = vrot.slane %v18686_v7, %v18163_v53 }
 0x1cf   : > { %v1752_v27 = vld [vmem:[%s18128_s25 + $0x2f20] sm:$0xff]  ;;  %13278 = vmatpush2.bf16.msra.mxu1 %v17165_v52 }
 0x1d0   : > { %v17158_v31 = vcombine.high %v1748_v10, %v1752_v27  ;;  %v1612_v49 = vld [vmem:[%s18128_s25 + $0x2ac0] sm:$0xff]  ;;  %13238 = vmatprep.subr.bf16.mxu0 %v17030_v29  ;;  %v17157_v40 = vcombine.low %v1748_v10, %v1752_v27 }
 0x1d1   : > { %v1616_v35 = vld [vmem:[%s18128_s25 + $0x2ae0] sm:$0xff]  ;;  %13239 = vmatpush2.bf16.msra.mxu0 %v17029_v2 }
 0x1d2   : > { %v1740_v36 = vld [vmem:[%s18128_s25 + $0x2ec0] sm:$0xff]  ;;  %v17022_v42 = vcombine.high %v1612_v49, %v1616_v35  ;;  %13279 = vmatprep.subr.bf16.mxu1 %v17158_v31  ;;  %v17021_v55 = vcombine.low %v1612_v49, %v1616_v35  ;;  %v2500_v35 = vcombine.high %v18694_v19, %v18694_v19 }
 0x1d3   : > { %v1744_v38 = vld [vmem:[%s18128_s25 + $0x2ee0] sm:$0xff]  ;;  %13280 = vmatpush2.bf16.msra.mxu1 %v17157_v40 }
 0x1d4   : > { %v17150_v45 = vcombine.high %v1740_v36, %v1744_v38  ;;  %v1604_v46 = vld [vmem:[%s18128_s25 + $0x2a80] sm:$0xff]  ;;  %13240 = vmatprep.subr.bf16.mxu0 %v17022_v42  ;;  %v17149_v57 = vcombine.low %v1740_v36, %v1744_v38  ;;  %v18704_v38 = vrot.slane %v18597_v33, %v18163_v53 }
 0x1d5   : > { %v1608_v48 = vld [vmem:[%s18128_s25 + $0x2aa0] sm:$0xff]  ;;  %13241 = vmatpush2.bf16.msra.mxu0 %v17021_v55 }
 0x1d6   : > { %v1732_v51 = vld [vmem:[%s18128_s25 + $0x2e80] sm:$0xff]  ;;  %v17014_v58 = vcombine.high %v1604_v46, %v1608_v48  ;;  %13281 = vmatprep.subr.bf16.mxu1 %v17150_v45  ;;  %v17013_v6 = vcombine.low %v1604_v46, %v1608_v48  ;;  %v18715_v33 = vcombine.high %v18704_v38, %v18704_v38 }
 0x1d7   : > { %v1736_v54 = vld [vmem:[%s18128_s25 + $0x2ea0] sm:$0xff]  ;;  %13282 = vmatpush2.bf16.msra.mxu1 %v17149_v57 }
 0x1d8   : > { %v17142_v61 = vcombine.high %v1732_v51, %v1736_v54  ;;  %v1596_v62 = vld [vmem:[%s18128_s25 + $0x2a40] sm:$0xff]  ;;  %13242 = vmatprep.subr.bf16.mxu0 %v17014_v58  ;;  %v17141_v8 = vcombine.low %v1732_v51, %v1736_v54  ;;  %v18711_v54 = vrot.slane %v2500_v35, %v18163_v53 }
 0x1d9   : > { %v1600_v1 = vld [vmem:[%s18128_s25 + $0x2a60] sm:$0xff]  ;;  %13243 = vmatpush2.bf16.msra.mxu0 %v17013_v6 }
 0x1da   : > { %v1724_v4 = vld [vmem:[%s18128_s25 + $0x2e40] sm:$0xff]  ;;  %v17006_v25 = vcombine.high %v1596_v62, %v1600_v1  ;;  %13283 = vmatprep.subr.bf16.mxu1 %v17142_v61  ;;  %v17005_v20 = vcombine.low %v1596_v62, %v1600_v1 }
 0x1db   : > { %v1728_v5 = vld [vmem:[%s18128_s25 + $0x2e60] sm:$0xff]  ;;  %13284 = vmatpush2.bf16.msra.mxu1 %v17141_v8  ;;  %v18724_v8 = vcombine.high %v18711_v54, %v18711_v54 }
 0x1dc   : > { %v17134_v12 = vcombine.high %v1724_v4, %v1728_v5  ;;  %v1588_v14 = vld [vmem:[%s18128_s25 + $0x2a00] sm:$0xff]  ;;  %13244 = vmatprep.subr.bf16.mxu0 %v17006_v25  ;;  %v17133_v10 = vcombine.low %v1724_v4, %v1728_v5 }
 0x1dd   : > { %v1592_v16 = vld [vmem:[%s18128_s25 + $0x2a20] sm:$0xff]  ;;  %13245 = vmatpush2.bf16.msra.mxu0 %v17005_v20 }
 0x1de   : > { %v1716_v17 = vld [vmem:[%s18128_s25 + $0x2e00] sm:$0xff]  ;;  %v16998_v27 = vcombine.high %v1588_v14, %v1592_v16  ;;  %13285 = vmatprep.subr.bf16.mxu1 %v17134_v12  ;;  %v16997_v36 = vcombine.low %v1588_v14, %v1592_v16 }
 0x1df   : > { %v1720_v18 = vld [vmem:[%s18128_s25 + $0x2e20] sm:$0xff]  ;;  %13286 = vmatpush2.bf16.msra.mxu1 %v17133_v10 }
 0x1e0   : > { %v17126_v28 = vcombine.high %v1716_v17, %v1720_v18  ;;  %v1836_v52 = vld [vmem:[%s18128_s25 + $0x31c0] sm:$0xff]  ;;  %13246 = vmatprep.subr.bf16.mxu0 %v16998_v27  ;;  %v17125_v2 = vcombine.low %v1716_v17, %v1720_v18 }
 0x1e1   : > { %v1840_v29 = vld [vmem:[%s18128_s25 + $0x31e0] sm:$0xff]  ;;  %13247 = vmatpush2.bf16.msra.mxu0 %v16997_v36 }
 0x1e2   : > { %v1964_v31 = vld [vmem:[%s18128_s25 + $0x35c0] sm:$0xff]  ;;  %v17246_v40 = vcombine.high %v1836_v52, %v1840_v29  ;;  %13287 = vmatprep.subr.bf16.mxu1 %v17126_v28  ;;  %v17245_v55 = vcombine.low %v1836_v52, %v1840_v29 }
 0x1e3   : > { %v1968_v49 = vld [vmem:[%s18128_s25 + $0x35e0] sm:$0xff]  ;;  %13288 = vmatpush2.bf16.msra.mxu1 %v17125_v2  ;;  %v13004_v4 = vpop.f32.mrf.mxu0 }
 0x1e4   : > { %v17374_v42 = vcombine.high %v1964_v31, %v1968_v49  ;;  %v1828_v45 = vld [vmem:[%s18128_s25 + $0x3180] sm:$0xff]  ;;  %13298 = vmatprep.subr.bf16.mxu0 %v17246_v40  ;;  %v17373_v57 = vcombine.low %v1964_v31, %v1968_v49  ;;  %13249 = vmatmul.mubr.bf16.vlgmr.msra.gmra.mxu0 %v18704_v38  ;;  %v13005_v25 = vadd.f32 %v13004_v4, %v18631_v24 }
 0x1e5   : > { %v1832_v46 = vld [vmem:[%s18128_s25 + $0x31a0] sm:$0xff]  ;;  %v13045_v12 = vpop.f32.mrf.mxu1  ;;  %13299 = vmatpush1.bf16.msra.mxu0 %v17245_v55  ;;  %v13006_v16 = vpop.f32.mrf.mxu0  ;;  %13330 = vmatprep.mubr.bf16.mxu0 %v18711_v54 }
 0x1e6   : > { %v1956_v48 = vld [vmem:[%s18128_s25 + $0x3580] sm:$0xff]  ;;  %v17238_v58 = vcombine.high %v1828_v45, %v1832_v46  ;;  %13339 = vmatprep.subr.bf16.mxu1 %v17374_v42  ;;  %13290 = vmatmul.mubr.bf16.vlgmr.msra.gmra.mxu1 %v18715_v33  ;;  %v17237_v14 = vcombine.low %v1828_v45, %v1832_v46  ;;  %v18728_v20 = vadd.f32 %v13045_v12, %v13005_v25 }
 0x1e7   : > { %v1960_v51 = vld [vmem:[%s18128_s25 + $0x35a0] sm:$0xff]  ;;  %13340 = vmatpush1.bf16.msra.mxu1 %v17373_v57  ;;  %v13007_v10 = vadd.f32 %v13006_v16, %v18640_v37  ;;  %v13047_v27 = vpop.f32.mrf.mxu1  ;;  %v13008_v29 = vpop.f32.mrf.mxu0  ;;  %13371 = vmatprep.mubr.bf16.mxu1 %v18724_v8 }
 0x1e8   : > { %v17366_v61 = vcombine.high %v1956_v48, %v1960_v51  ;;  %v1820_v62 = vld [vmem:[%s18128_s25 + $0x3140] sm:$0xff]  ;;  %13300 = vmatprep.subr.bf16.mxu0 %v17238_v58  ;;  %v17365_v17 = vcombine.low %v1956_v48, %v1960_v51 }
 0x1e9   : > { %v1824_v1 = vld [vmem:[%s18128_s25 + $0x3160] sm:$0xff]  ;;  %v18737_v35 = vadd.f32 %v13047_v27, %v13007_v10  ;;  %v13049_v36 = vpop.f32.mrf.mxu1  ;;  %13301 = vmatpush1.bf16.msra.mxu0 %v17237_v14  ;;  %v13009_v2 = vpop.f32.mrf.mxu0 }
 0x1ea   : > { %v1948_v5 = vld [vmem:[%s18128_s25 + $0x3540] sm:$0xff]  ;;  %v17230_v18 = vcombine.high %v1820_v62, %v1824_v1  ;;  %13341 = vmatprep.subr.bf16.mxu1 %v17366_v61  ;;  %v17229_v37 = vcombine.low %v1820_v62, %v1824_v1 }
 0x1eb   : > { %v1952_v6 = vld [vmem:[%s18128_s25 + $0x3560] sm:$0xff]  ;;  %13342 = vmatpush1.bf16.msra.mxu1 %v17365_v17  ;;  %v13050_v45 = vpop.f32.mrf.mxu1 }
 0x1ec   : > { %v17358_v24 = vcombine.high %v1948_v5, %v1952_v6  ;;  %v1812_v28 = vld [vmem:[%s18128_s25 + $0x3100] sm:$0xff]  ;;  %13302 = vmatprep.subr.bf16.mxu0 %v17230_v18  ;;  %v17357_v40 = vcombine.low %v1948_v5, %v1952_v6 }
 0x1ed   : > { %v1816_v52 = vld [vmem:[%s18128_s25 + $0x3120] sm:$0xff]  ;;  %13303 = vmatpush1.bf16.msra.mxu0 %v17229_v37 }
 0x1ee   : > { %v1940_v31 = vld [vmem:[%s18128_s25 + $0x3500] sm:$0xff]  ;;  %v17222_v42 = vcombine.high %v1812_v28, %v1816_v52  ;;  %13343 = vmatprep.subr.bf16.mxu1 %v17358_v24  ;;  %v17221_v58 = vcombine.low %v1812_v28, %v1816_v52 }
 0x1ef   : > { %v1944_v49 = vld [vmem:[%s18128_s25 + $0x3520] sm:$0xff]  ;;  %13344 = vmatpush1.bf16.msra.mxu1 %v17357_v40 }
 0x1f0   : > { %v17350_v46 = vcombine.high %v1940_v31, %v1944_v49  ;;  %v1804_v48 = vld [vmem:[%s18128_s25 + $0x30c0] sm:$0xff]  ;;  %13304 = vmatprep.subr.bf16.mxu0 %v17222_v42  ;;  %v17349_v61 = vcombine.low %v1940_v31, %v1944_v49 }
 0x1f1   : > { %v1808_v51 = vld [vmem:[%s18128_s25 + $0x30e0] sm:$0xff]  ;;  %13305 = vmatpush1.bf16.msra.mxu0 %v17221_v58 }
 0x1f2   : > { %v1932_v55 = vld [vmem:[%s18128_s25 + $0x34c0] sm:$0xff]  ;;  %v17214_v62 = vcombine.high %v1804_v48, %v1808_v51  ;;  %13345 = vmatprep.subr.bf16.mxu1 %v17350_v46  ;;  %v17213_v12 = vcombine.low %v1804_v48, %v1808_v51 }
 0x1f3   : > { %v1936_v57 = vld [vmem:[%s18128_s25 + $0x34e0] sm:$0xff]  ;;  %13346 = vmatpush1.bf16.msra.mxu1 %v17349_v61 }
 0x1f4   : > { %v17342_v1 = vcombine.high %v1932_v55, %v1936_v57  ;;  %v1796_v4 = vld [vmem:[%s18128_s25 + $0x3080] sm:$0xff]  ;;  %13306 = vmatprep.subr.bf16.mxu0 %v17214_v62  ;;  %v17341_v14 = vcombine.low %v1932_v55, %v1936_v57 }
 0x1f5   : > { %v1800_v5 = vld [vmem:[%s18128_s25 + $0x30a0] sm:$0xff]  ;;  %13307 = vmatpush1.bf16.msra.mxu0 %v17213_v12 }
 0x1f6   : > { %v1924_v6 = vld [vmem:[%s18128_s25 + $0x3480] sm:$0xff]  ;;  %v17206_v16 = vcombine.high %v1796_v4, %v1800_v5  ;;  %13347 = vmatprep.subr.bf16.mxu1 %v17342_v1  ;;  %v17205_v28 = vcombine.low %v1796_v4, %v1800_v5 }
 0x1f7   : > { %v1928_v25 = vld [vmem:[%s18128_s25 + $0x34a0] sm:$0xff]  ;;  %13348 = vmatpush1.bf16.msra.mxu1 %v17341_v14 }
 0x1f8   : > { %v17334_v17 = vcombine.high %v1924_v6, %v1928_v25  ;;  %v1788_v18 = vld [vmem:[%s18128_s25 + $0x3040] sm:$0xff]  ;;  %13308 = vmatprep.subr.bf16.mxu0 %v17206_v16  ;;  %v17333_v52 = vcombine.low %v1924_v6, %v1928_v25 }
 0x1f9   : > { %v1792_v10 = vld [vmem:[%s18128_s25 + $0x3060] sm:$0xff]  ;;  %13309 = vmatpush1.bf16.msra.mxu0 %v17205_v28 }
 0x1fa   : > { %v1916_v27 = vld [vmem:[%s18128_s25 + $0x3440] sm:$0xff]  ;;  %v17198_v29 = vcombine.high %v1788_v18, %v1792_v10  ;;  %13349 = vmatprep.subr.bf16.mxu1 %v17334_v17  ;;  %v17197_v40 = vcombine.low %v1788_v18, %v1792_v10 }
 0x1fb   : > { %v1920_v24 = vld [vmem:[%s18128_s25 + $0x3460] sm:$0xff]  ;;  %13350 = vmatpush1.bf16.msra.mxu1 %v17333_v52 }
 0x1fc   : > { %v17326_v31 = vcombine.high %v1916_v27, %v1920_v24  ;;  %v1780_v49 = vld [vmem:[%s18128_s25 + $0x3000] sm:$0xff]  ;;  %13310 = vmatprep.subr.bf16.mxu0 %v17198_v29  ;;  %v17325_v42 = vcombine.low %v1916_v27, %v1920_v24 }
 0x1fd   : > { %v1784_v36 = vld [vmem:[%s18128_s25 + $0x3020] sm:$0xff]  ;;  %13311 = vmatpush1.bf16.msra.mxu0 %v17197_v40 }
 0x1fe   : > { %v1908_v37 = vld [vmem:[%s18128_s25 + $0x3400] sm:$0xff]  ;;  %v17190_v45 = vcombine.high %v1780_v49, %v1784_v36  ;;  %13351 = vmatprep.subr.bf16.mxu1 %v17326_v31  ;;  %v17189_v58 = vcombine.low %v1780_v49, %v1784_v36 }
 0x1ff   : > { %v1912_v2 = vld [vmem:[%s18128_s25 + $0x3420] sm:$0xff]  ;;  %13352 = vmatpush1.bf16.msra.mxu1 %v17325_v42 }
 0x200   : > { %v17318_v46 = vcombine.high %v1908_v37, %v1912_v2  ;;  %v1900_v48 = vld [vmem:[%s18128_s25 + $0x33c0] sm:$0xff]  ;;  %13312 = vmatprep.subr.bf16.mxu0 %v17190_v45  ;;  %v17317_v61 = vcombine.low %v1908_v37, %v1912_v2 }
 0x201   : > { %v1904_v51 = vld [vmem:[%s18128_s25 + $0x33e0] sm:$0xff]  ;;  %13313 = vmatpush1.bf16.msra.mxu0 %v17189_v58 }
 0x202   : > { %v2028_v55 = vld [vmem:[%s18128_s25 + $0x37c0] sm:$0xff]  ;;  %v17310_v62 = vcombine.high %v1900_v48, %v1904_v51  ;;  %13353 = vmatprep.subr.bf16.mxu1 %v17318_v46  ;;  %v17309_v12 = vcombine.low %v1900_v48, %v1904_v51 }
 0x203   : > { %v2032_v57 = vld [vmem:[%s18128_s25 + $0x37e0] sm:$0xff]  ;;  %13354 = vmatpush1.bf16.msra.mxu1 %v17317_v61 }
 0x204   : > { %v17438_v1 = vcombine.high %v2028_v55, %v2032_v57  ;;  %v1892_v4 = vld [vmem:[%s18128_s25 + $0x3380] sm:$0xff]  ;;  %13314 = vmatprep.subr.bf16.mxu0 %v17310_v62  ;;  %v17437_v14 = vcombine.low %v2028_v55, %v2032_v57 }
 0x205   : > { %v1896_v5 = vld [vmem:[%s18128_s25 + $0x33a0] sm:$0xff]  ;;  %13315 = vmatpush2.bf16.msra.mxu0 %v17309_v12 }
 0x206   : > { %v2020_v6 = vld [vmem:[%s18128_s25 + $0x3780] sm:$0xff]  ;;  %v17302_v16 = vcombine.high %v1892_v4, %v1896_v5  ;;  %13355 = vmatprep.subr.bf16.mxu1 %v17438_v1  ;;  %v17301_v28 = vcombine.low %v1892_v4, %v1896_v5 }
 0x207   : > { %v2024_v25 = vld [vmem:[%s18128_s25 + $0x37a0] sm:$0xff]  ;;  %13356 = vmatpush2.bf16.msra.mxu1 %v17437_v14 }
 0x208   : > { %v17430_v17 = vcombine.high %v2020_v6, %v2024_v25  ;;  %v1884_v18 = vld [vmem:[%s18128_s25 + $0x3340] sm:$0xff]  ;;  %13316 = vmatprep.subr.bf16.mxu0 %v17302_v16  ;;  %v17429_v52 = vcombine.low %v2020_v6, %v2024_v25 }
 0x209   : > { %v1888_v10 = vld [vmem:[%s18128_s25 + $0x3360] sm:$0xff]  ;;  %13317 = vmatpush2.bf16.msra.mxu0 %v17301_v28  ;;  %v2485_v28 = vcombine.high %v18686_v7, %v18686_v7 }
 0x20a   : > { %v2012_v27 = vld [vmem:[%s18128_s25 + $0x3740] sm:$0xff]  ;;  %v17294_v29 = vcombine.high %v1884_v18, %v1888_v10  ;;  %13357 = vmatprep.subr.bf16.mxu1 %v17430_v17  ;;  %v17293_v40 = vcombine.low %v1884_v18, %v1888_v10 }
 0x20b   : > { %v2016_v24 = vld [vmem:[%s18128_s25 + $0x3760] sm:$0xff]  ;;  %13358 = vmatpush2.bf16.msra.mxu1 %v17429_v52 }
 0x20c   : > { %v17422_v31 = vcombine.high %v2012_v27, %v2016_v24  ;;  %v1876_v49 = vld [vmem:[%s18128_s25 + $0x3300] sm:$0xff]  ;;  %13318 = vmatprep.subr.bf16.mxu0 %v17294_v29  ;;  %v17421_v42 = vcombine.low %v2012_v27, %v2016_v24 }
 0x20d   : > { %v1880_v36 = vld [vmem:[%s18128_s25 + $0x3320] sm:$0xff]  ;;  %13319 = vmatpush2.bf16.msra.mxu0 %v17293_v40 }
 0x20e   : > { %v2004_v37 = vld [vmem:[%s18128_s25 + $0x3700] sm:$0xff]  ;;  %v17286_v45 = vcombine.high %v1876_v49, %v1880_v36  ;;  %13359 = vmatprep.subr.bf16.mxu1 %v17422_v31  ;;  %v17285_v58 = vcombine.low %v1876_v49, %v1880_v36 }
 0x20f   : > { %v2008_v2 = vld [vmem:[%s18128_s25 + $0x3720] sm:$0xff]  ;;  %13360 = vmatpush2.bf16.msra.mxu1 %v17421_v42  ;;  %v18790_v42 = vrot.slane %v2485_v28, %v18163_v53 }
 0x210   : > { %v17414_v46 = vcombine.high %v2004_v37, %v2008_v2  ;;  %v1868_v48 = vld [vmem:[%s18128_s25 + $0x32c0] sm:$0xff]  ;;  %13320 = vmatprep.subr.bf16.mxu0 %v17286_v45  ;;  %v17413_v61 = vcombine.low %v2004_v37, %v2008_v2 }
 0x211   : > { %v1872_v51 = vld [vmem:[%s18128_s25 + $0x32e0] sm:$0xff]  ;;  %13321 = vmatpush2.bf16.msra.mxu0 %v17285_v58 }
 0x212   : > { %v1996_v55 = vld [vmem:[%s18128_s25 + $0x36c0] sm:$0xff]  ;;  %v17278_v62 = vcombine.high %v1868_v48, %v1872_v51  ;;  %13361 = vmatprep.subr.bf16.mxu1 %v17414_v46  ;;  %v17277_v12 = vcombine.low %v1868_v48, %v1872_v51 }
 0x213   : > { %v2000_v57 = vld [vmem:[%s18128_s25 + $0x36e0] sm:$0xff]  ;;  %13362 = vmatpush2.bf16.msra.mxu1 %v17413_v61  ;;  %v2501_v61 = vcombine.high %v18790_v42, %v18790_v42 }
 0x214   : > { %v17406_v1 = vcombine.high %v1996_v55, %v2000_v57  ;;  %v1860_v4 = vld [vmem:[%s18128_s25 + $0x3280] sm:$0xff]  ;;  %13322 = vmatprep.subr.bf16.mxu0 %v17278_v62  ;;  %v17405_v14 = vcombine.low %v1996_v55, %v2000_v57 }
 0x215   : > { %v1864_v5 = vld [vmem:[%s18128_s25 + $0x32a0] sm:$0xff]  ;;  %13323 = vmatpush2.bf16.msra.mxu0 %v17277_v12 }
 0x216   : > { %v1988_v6 = vld [vmem:[%s18128_s25 + $0x3680] sm:$0xff]  ;;  %v17270_v16 = vcombine.high %v1860_v4, %v1864_v5  ;;  %13363 = vmatprep.subr.bf16.mxu1 %v17406_v1  ;;  %v17269_v52 = vcombine.low %v1860_v4, %v1864_v5  ;;  %v18800_v1 = vrot.slane %v18694_v19, %v18163_v53 }
 0x217   : > { %v1992_v25 = vld [vmem:[%s18128_s25 + $0x36a0] sm:$0xff]  ;;  %13364 = vmatpush2.bf16.msra.mxu1 %v17405_v14 }
 0x218   : > { %v17398_v17 = vcombine.high %v1988_v6, %v1992_v25  ;;  %v1852_v18 = vld [vmem:[%s18128_s25 + $0x3240] sm:$0xff]  ;;  %13324 = vmatprep.subr.bf16.mxu0 %v17270_v16  ;;  %v17397_v29 = vcombine.low %v1988_v6, %v1992_v25  ;;  %v18811_v19 = vcombine.high %v18800_v1, %v18800_v1 }
 0x219   : > { %v1856_v10 = vld [vmem:[%s18128_s25 + $0x3260] sm:$0xff]  ;;  %13325 = vmatpush2.bf16.msra.mxu0 %v17269_v52 }
 0x21a   : > { %v1980_v27 = vld [vmem:[%s18128_s25 + $0x3640] sm:$0xff]  ;;  %v17262_v31 = vcombine.high %v1852_v18, %v1856_v10  ;;  %13365 = vmatprep.subr.bf16.mxu1 %v17398_v17  ;;  %v17261_v7 = vcombine.low %v1852_v18, %v1856_v10  ;;  %v18807_v17 = vrot.slane %v2501_v61, %v18163_v53 }
 0x21b   : > { %v1984_v24 = vld [vmem:[%s18128_s25 + $0x3660] sm:$0xff]  ;;  %13366 = vmatpush2.bf16.msra.mxu1 %v17397_v29 }
 0x21c   : > { %v17390_v49 = vcombine.high %v1980_v27, %v1984_v24  ;;  %v1844_v36 = vld [vmem:[%s18128_s25 + $0x3200] sm:$0xff]  ;;  %13326 = vmatprep.subr.bf16.mxu0 %v17262_v31  ;;  %v17389_v45 = vcombine.low %v1980_v27, %v1984_v24 }
 0x21d   : > { %v1848_v37 = vld [vmem:[%s18128_s25 + $0x3220] sm:$0xff]  ;;  %13327 = vmatpush2.bf16.msra.mxu0 %v17261_v7 }
 0x21e   : > { %v1972_v2 = vld [vmem:[%s18128_s25 + $0x3600] sm:$0xff]  ;;  %v17254_v46 = vcombine.high %v1844_v36, %v1848_v37  ;;  %13367 = vmatprep.subr.bf16.mxu1 %v17390_v49  ;;  %v17253_v62 = vcombine.low %v1844_v36, %v1848_v37  ;;  %v18820_v36 = vcombine.high %v18807_v17, %v18807_v17 }
 0x21f   : > { %v1976_v40 = vld [vmem:[%s18128_s25 + $0x3620] sm:$0xff]  ;;  %13368 = vmatpush2.bf16.msra.mxu1 %v17389_v45 }
 0x220   : > { %v17382_v48 = vcombine.high %v1972_v2, %v1976_v40  ;;  %v2092_v51 = vld [vmem:[%s18128_s25 + $0x39c0] sm:$0xff]  ;;  %13328 = vmatprep.subr.bf16.mxu0 %v17254_v46  ;;  %v17381_v4 = vcombine.low %v1972_v2, %v1976_v40 }
 0x221   : > { %v2096_v55 = vld [vmem:[%s18128_s25 + $0x39e0] sm:$0xff]  ;;  %13329 = vmatpush2.bf16.msra.mxu0 %v17253_v62 }
 0x222   : > { %v2220_v57 = vld [vmem:[%s18128_s25 + $0x3dc0] sm:$0xff]  ;;  %v17502_v5 = vcombine.high %v2092_v51, %v2096_v55  ;;  %13369 = vmatprep.subr.bf16.mxu1 %v17382_v48  ;;  %v17501_v18 = vcombine.low %v2092_v51, %v2096_v55 }
 0x223   : > { %v2224_v58 = vld [vmem:[%s18128_s25 + $0x3de0] sm:$0xff]  ;;  %13370 = vmatpush2.bf16.msra.mxu1 %v17381_v4  ;;  %v13086_v29 = vpop.f32.mrf.mxu0 }
 0x224   : > { %v17630_v6 = vcombine.high %v2220_v57, %v2224_v58  ;;  %v2084_v25 = vld [vmem:[%s18128_s25 + $0x3980] sm:$0xff]  ;;  %13380 = vmatprep.subr.bf16.mxu0 %v17502_v5  ;;  %v17629_v10 = vcombine.low %v2220_v57, %v2224_v58  ;;  %13331 = vmatmul.mubr.bf16.vlgmr.msra.gmra.mxu0 %v18800_v1  ;;  %v13087_v37 = vadd.f32 %v13086_v29, %v18728_v20 }
 0x225   : > { %v2088_v12 = vld [vmem:[%s18128_s25 + $0x39a0] sm:$0xff]  ;;  %v13127_v2 = vpop.f32.mrf.mxu1  ;;  %13381 = vmatpush1.bf16.msra.mxu0 %v17501_v18  ;;  %v13088_v7 = vpop.f32.mrf.mxu0  ;;  %13412 = vmatprep.mubr.bf16.mxu0 %v18807_v17 }
 0x226   : > { %v2212_v14 = vld [vmem:[%s18128_s25 + $0x3d80] sm:$0xff]  ;;  %v17494_v27 = vcombine.high %v2084_v25, %v2088_v12  ;;  %13421 = vmatprep.subr.bf16.mxu1 %v17630_v6  ;;  %13372 = vmatmul.mubr.bf16.vlgmr.msra.gmra.mxu1 %v18811_v19  ;;  %v17493_v40 = vcombine.low %v2084_v25, %v2088_v12  ;;  %v18824_v48 = vadd.f32 %v13127_v2, %v13087_v37 }
 0x227   : > { %v2216_v16 = vld [vmem:[%s18128_s25 + $0x3da0] sm:$0xff]  ;;  %13422 = vmatpush1.bf16.msra.mxu1 %v17629_v10  ;;  %v13089_v51 = vadd.f32 %v13088_v7, %v18737_v35  ;;  %v13129_v55 = vpop.f32.mrf.mxu1  ;;  %v13090_v61 = vpop.f32.mrf.mxu0  ;;  %13453 = vmatprep.mubr.bf16.mxu1 %v18820_v36 }
 0x228   : > { %v17622_v24 = vcombine.high %v2212_v14, %v2216_v16  ;;  %v2076_v28 = vld [vmem:[%s18128_s25 + $0x3940] sm:$0xff]  ;;  %13382 = vmatprep.subr.bf16.mxu0 %v17494_v27  ;;  %v17621_v45 = vcombine.low %v2212_v14, %v2216_v16 }
 0x229   : > { %v2080_v52 = vld [vmem:[%s18128_s25 + $0x3960] sm:$0xff]  ;;  %v18833_v5 = vadd.f32 %v13129_v55, %v13089_v51  ;;  %v13131_v6 = vpop.f32.mrf.mxu1  ;;  %13383 = vmatpush1.bf16.msra.mxu0 %v17493_v40  ;;  %v13091_v25 = vpop.f32.mrf.mxu0 }
 0x22a   : > { %v2204_v31 = vld [vmem:[%s18128_s25 + $0x3d40] sm:$0xff]  ;;  %v17486_v46 = vcombine.high %v2076_v28, %v2080_v52  ;;  %13423 = vmatprep.subr.bf16.mxu1 %v17622_v24  ;;  %v17485_v35 = vcombine.low %v2076_v28, %v2080_v52 }
 0x22b   : > { %v2208_v49 = vld [vmem:[%s18128_s25 + $0x3d60] sm:$0xff]  ;;  %13424 = vmatpush1.bf16.msra.mxu1 %v17621_v45  ;;  %v13132_v16 = vpop.f32.mrf.mxu1 }
 0x22c   : > { %v17614_v20 = vcombine.high %v2204_v31, %v2208_v49  ;;  %v2068_v57 = vld [vmem:[%s18128_s25 + $0x3900] sm:$0xff]  ;;  %13384 = vmatprep.subr.bf16.mxu0 %v17486_v46  ;;  %v17613_v12 = vcombine.low %v2204_v31, %v2208_v49 }
 0x22d   : > { %v2072_v58 = vld [vmem:[%s18128_s25 + $0x3920] sm:$0xff]  ;;  %13385 = vmatpush1.bf16.msra.mxu0 %v17485_v35 }
 0x22e   : > { %v2196_v62 = vld [vmem:[%s18128_s25 + $0x3d00] sm:$0xff]  ;;  %v17478_v14 = vcombine.high %v2068_v57, %v2072_v58  ;;  %13425 = vmatprep.subr.bf16.mxu1 %v17614_v20  ;;  %v17477_v37 = vcombine.low %v2068_v57, %v2072_v58 }
 0x22f   : > { %v2200_v4 = vld [vmem:[%s18128_s25 + $0x3d20] sm:$0xff]  ;;  %13426 = vmatpush1.bf16.msra.mxu1 %v17613_v12 }
 0x230   : > { %v17606_v18 = vcombine.high %v2196_v62, %v2200_v4  ;;  %v2060_v10 = vld [vmem:[%s18128_s25 + $0x38c0] sm:$0xff]  ;;  %13386 = vmatprep.subr.bf16.mxu0 %v17478_v14  ;;  %v17605_v28 = vcombine.low %v2196_v62, %v2200_v4 }
 0x231   : > { %v2064_v27 = vld [vmem:[%s18128_s25 + $0x38e0] sm:$0xff]  ;;  %13387 = vmatpush1.bf16.msra.mxu0 %v17477_v37 }
 0x232   : > { %v2188_v24 = vld [vmem:[%s18128_s25 + $0x3cc0] sm:$0xff]  ;;  %v17470_v52 = vcombine.high %v2060_v10, %v2064_v27  ;;  %13427 = vmatprep.subr.bf16.mxu1 %v17606_v18  ;;  %v17469_v45 = vcombine.low %v2060_v10, %v2064_v27 }
 0x233   : > { %v2192_v29 = vld [vmem:[%s18128_s25 + $0x3ce0] sm:$0xff]  ;;  %13428 = vmatpush1.bf16.msra.mxu1 %v17605_v28 }
 0x234   : > { %v17598_v31 = vcombine.high %v2188_v24, %v2192_v29  ;;  %v2052_v49 = vld [vmem:[%s18128_s25 + $0x3880] sm:$0xff]  ;;  %13388 = vmatprep.subr.bf16.mxu0 %v17470_v52  ;;  %v17597_v46 = vcombine.low %v2188_v24, %v2192_v29 }
 0x235   : > { %v2056_v2 = vld [vmem:[%s18128_s25 + $0x38a0] sm:$0xff]  ;;  %13389 = vmatpush1.bf16.msra.mxu0 %v17469_v45 }
 0x236   : > { %v2180_v40 = vld [vmem:[%s18128_s25 + $0x3c80] sm:$0xff]  ;;  %v17462_v51 = vcombine.high %v2052_v49, %v2056_v2  ;;  %13429 = vmatprep.subr.bf16.mxu1 %v17598_v31  ;;  %v17461_v62 = vcombine.low %v2052_v49, %v2056_v2 }
 0x237   : > { %v2184_v7 = vld [vmem:[%s18128_s25 + $0x3ca0] sm:$0xff]  ;;  %13430 = vmatpush1.bf16.msra.mxu1 %v17597_v46 }
 0x238   : > { %v17590_v55 = vcombine.high %v2180_v40, %v2184_v7  ;;  %v2044_v20 = vld [vmem:[%s18128_s25 + $0x3840] sm:$0xff]  ;;  %13390 = vmatprep.subr.bf16.mxu0 %v17462_v51  ;;  %v17589_v4 = vcombine.low %v2180_v40, %v2184_v7 }
 0x239   : > { %v2048_v57 = vld [vmem:[%s18128_s25 + $0x3860] sm:$0xff]  ;;  %13391 = vmatpush1.bf16.msra.mxu0 %v17461_v62 }
 0x23a   : > { %v2172_v58 = vld [vmem:[%s18128_s25 + $0x3c40] sm:$0xff]  ;;  %v17454_v6 = vcombine.high %v2044_v20, %v2048_v57  ;;  %13431 = vmatprep.subr.bf16.mxu1 %v17590_v55  ;;  %v17453_v18 = vcombine.low %v2044_v20, %v2048_v57 }
 0x23b   : > { %v2176_v61 = vld [vmem:[%s18128_s25 + $0x3c60] sm:$0xff]  ;;  %13432 = vmatpush1.bf16.msra.mxu1 %v17589_v4 }
 0x23c   : > { %v17582_v35 = vcombine.high %v2172_v58, %v2176_v61  ;;  %v2036_v25 = vld [vmem:[%s18128_s25 + $0x3800] sm:$0xff]  ;;  %13392 = vmatprep.subr.bf16.mxu0 %v17454_v6  ;;  %v17581_v10 = vcombine.low %v2172_v58, %v2176_v61 }
 0x23d   : > { %v2040_v12 = vld [vmem:[%s18128_s25 + $0x3820] sm:$0xff]  ;;  %13393 = vmatpush1.bf16.msra.mxu0 %v17453_v18 }
 0x23e   : > { %v2164_v14 = vld [vmem:[%s18128_s25 + $0x3c00] sm:$0xff]  ;;  %v17446_v27 = vcombine.high %v2036_v25, %v2040_v12  ;;  %13433 = vmatprep.subr.bf16.mxu1 %v17582_v35  ;;  %v17445_v31 = vcombine.low %v2036_v25, %v2040_v12 }
 0x23f   : > { %v2168_v16 = vld [vmem:[%s18128_s25 + $0x3c20] sm:$0xff]  ;;  %13434 = vmatpush1.bf16.msra.mxu1 %v17581_v10 }
 0x240   : > { %v17574_v24 = vcombine.high %v2164_v14, %v2168_v16  ;;  %v2156_v29 = vld [vmem:[%s18128_s25 + $0x3bc0] sm:$0xff]  ;;  %13394 = vmatprep.subr.bf16.mxu0 %v17446_v27  ;;  %v17573_v49 = vcombine.low %v2164_v14, %v2168_v16 }
 0x241   : > { %v2160_v37 = vld [vmem:[%s18128_s25 + $0x3be0] sm:$0xff]  ;;  %13395 = vmatpush1.bf16.msra.mxu0 %v17445_v31 }
 0x242   : > { %v2284_v28 = vld [vmem:[%s18128_s25 + $0x3fc0] sm:$0xff]  ;;  %v17566_v2 = vcombine.high %v2156_v29, %v2160_v37  ;;  %13435 = vmatprep.subr.bf16.mxu1 %v17574_v24  ;;  %v17565_v55 = vcombine.low %v2156_v29, %v2160_v37 }
 0x243   : > { %v2288_v52 = vld [vmem:[%s18128_s25 + $0x3fe0] sm:$0xff]  ;;  %13436 = vmatpush1.bf16.msra.mxu1 %v17573_v49 }
 0x244   : > { %v17694_v40 = vcombine.high %v2284_v28, %v2288_v52  ;;  %v2148_v7 = vld [vmem:[%s18128_s25 + $0x3b80] sm:$0xff]  ;;  %13396 = vmatprep.subr.bf16.mxu0 %v17566_v2  ;;  %v17693_v20 = vcombine.low %v2284_v28, %v2288_v52 }
 0x245   : > { %v2152_v45 = vld [vmem:[%s18128_s25 + $0x3ba0] sm:$0xff]  ;;  %13397 = vmatpush2.bf16.msra.mxu0 %v17565_v55 }
 0x246   : > { %v2276_v46 = vld [vmem:[%s18128_s25 + $0x3f80] sm:$0xff]  ;;  %v17558_v57 = vcombine.high %v2148_v7, %v2152_v45  ;;  %13437 = vmatprep.subr.bf16.mxu1 %v17694_v40  ;;  %v17557_v35 = vcombine.low %v2148_v7, %v2152_v45 }
 0x247   : > { %v2280_v51 = vld [vmem:[%s18128_s25 + $0x3fa0] sm:$0xff]  ;;  %13438 = vmatpush2.bf16.msra.mxu1 %v17693_v20 }
 0x248   : > { %v17686_v58 = vcombine.high %v2276_v46, %v2280_v51  ;;  %v2140_v61 = vld [vmem:[%s18128_s25 + $0x3b40] sm:$0xff]  ;;  %13398 = vmatprep.subr.bf16.mxu0 %v17558_v57  ;;  %v17685_v25 = vcombine.low %v2276_v46, %v2280_v51 }
 0x249   : > { %v2144_v62 = vld [vmem:[%s18128_s25 + $0x3b60] sm:$0xff]  ;;  %13399 = vmatpush2.bf16.msra.mxu0 %v17557_v35 }
 0x24a   : > { %v2268_v4 = vld [vmem:[%s18128_s25 + $0x3f40] sm:$0xff]  ;;  %v17550_v12 = vcombine.high %v2140_v61, %v2144_v62  ;;  %13439 = vmatprep.subr.bf16.mxu1 %v17686_v58  ;;  %v17549_v24 = vcombine.low %v2140_v61, %v2144_v62 }
 0x24b   : > { %v2272_v6 = vld [vmem:[%s18128_s25 + $0x3f60] sm:$0xff]  ;;  %13440 = vmatpush2.bf16.msra.mxu1 %v17685_v25 }
 0x24c   : > { %v17678_v14 = vcombine.high %v2268_v4, %v2272_v6  ;;  %v2132_v16 = vld [vmem:[%s18128_s25 + $0x3b00] sm:$0xff]  ;;  %13400 = vmatprep.subr.bf16.mxu0 %v17550_v12  ;;  %v17677_v29 = vcombine.low %v2268_v4, %v2272_v6 }
 0x24d   : > { %v2136_v18 = vld [vmem:[%s18128_s25 + $0x3b20] sm:$0xff]  ;;  %13401 = vmatpush2.bf16.msra.mxu0 %v17549_v24 }
 0x24e   : > { %v2260_v10 = vld [vmem:[%s18128_s25 + $0x3f00] sm:$0xff]  ;;  %v17542_v37 = vcombine.high %v2132_v16, %v2136_v18  ;;  %13441 = vmatprep.subr.bf16.mxu1 %v17678_v14  ;;  %v17541_v40 = vcombine.low %v2132_v16, %v2136_v18 }
 0x24f   : > { %v2264_v27 = vld [vmem:[%s18128_s25 + $0x3f20] sm:$0xff]  ;;  %13442 = vmatpush2.bf16.msra.mxu1 %v17677_v29 }
 0x250   : > { %v17670_v28 = vcombine.high %v2260_v10, %v2264_v27  ;;  %v2124_v52 = vld [vmem:[%s18128_s25 + $0x3ac0] sm:$0xff]  ;;  %13402 = vmatprep.subr.bf16.mxu0 %v17542_v37  ;;  %v17669_v7 = vcombine.low %v2260_v10, %v2264_v27 }
 0x251   : > { %v2128_v31 = vld [vmem:[%s18128_s25 + $0x3ae0] sm:$0xff]  ;;  %13403 = vmatpush2.bf16.msra.mxu0 %v17541_v40  ;;  %v305_v40 = vld [vmem:[%s18128_s25 + $0x1e8] sm:$0xff] }
 0x252   : > { %v2252_v49 = vld [vmem:[%s18128_s25 + $0x3ec0] sm:$0xff]  ;;  %v17534_v45 = vcombine.high %v2124_v52, %v2128_v31  ;;  %13443 = vmatprep.subr.bf16.mxu1 %v17670_v28  ;;  %v17533_v58 = vcombine.low %v2124_v52, %v2128_v31 }
 0x253   : > { %v2256_v2 = vld [vmem:[%s18128_s25 + $0x3ee0] sm:$0xff]  ;;  %13444 = vmatpush2.bf16.msra.mxu1 %v17669_v7  ;;  %v429_v7 = vld [vmem:[%s18128_s25 + $0x5c8] sm:$0xff] }
 0x254   : > { %v17662_v46 = vcombine.high %v2252_v49, %v2256_v2  ;;  %v2116_v51 = vld [vmem:[%s18128_s25 + $0x3a80] sm:$0xff]  ;;  %13404 = vmatprep.subr.bf16.mxu0 %v17534_v45  ;;  %v17661_v61 = vcombine.low %v2252_v49, %v2256_v2  ;;  %v301_v2 = vld [vmem:[%s18128_s25 + $0x1c8] sm:$0xff] }
 0x255   : > { %v2120_v55 = vld [vmem:[%s18128_s25 + $0x3aa0] sm:$0xff]  ;;  %13405 = vmatpush2.bf16.msra.mxu0 %v17533_v58  ;;  %v433_v45 = vld [vmem:[%s18128_s25 + $0x5e8] sm:$0xff] }
 0x256   : > { %v2244_v20 = vld [vmem:[%s18128_s25 + $0x3e80] sm:$0xff]  ;;  %v17526_v62 = vcombine.high %v2116_v51, %v2120_v55  ;;  %13445 = vmatprep.subr.bf16.mxu1 %v17662_v46  ;;  %v17525_v14 = vcombine.low %v2116_v51, %v2120_v55  ;;  %v18889_v51 = vrot.slane %v18790_v42, %v18163_v53  ;;  %v293_v58 = vld [vmem:[%s18128_s25 + $0x188] sm:$0xff]  ;;  %v15711_v42 = vcombine.low %v301_v2, %v305_v40 }
 0x257   : > { %v2248_v57 = vld [vmem:[%s18128_s25 + $0x3ea0] sm:$0xff]  ;;  %13446 = vmatpush2.bf16.msra.mxu1 %v17661_v61  ;;  %v297_v61 = vld [vmem:[%s18128_s25 + $0x1a8] sm:$0xff] }
 0x258   : > { %v17654_v4 = vcombine.high %v2244_v20, %v2248_v57  ;;  %v2108_v6 = vld [vmem:[%s18128_s25 + $0x3a40] sm:$0xff]  ;;  %13406 = vmatprep.subr.bf16.mxu0 %v17526_v62  ;;  %v17653_v16 = vcombine.low %v2244_v20, %v2248_v57  ;;  %v15712_v20 = vcombine.high %v301_v2, %v305_v40  ;;  %v15840_v57 = vcombine.high %v429_v7, %v433_v45  ;;  %v421_v62 = vld [vmem:[%s18128_s25 + $0x588] sm:$0xff] }
 0x259   : > { %v2112_v35 = vld [vmem:[%s18128_s25 + $0x3a60] sm:$0xff]  ;;  %13407 = vmatpush2.bf16.msra.mxu0 %v17525_v14  ;;  %v285_v14 = vld [vmem:[%s18128_s25 + $0x148] sm:$0xff] }
 0x25a   : > { %v2236_v25 = vld [vmem:[%s18128_s25 + $0x3e40] sm:$0xff]  ;;  %v17518_v18 = vcombine.high %v2108_v6, %v2112_v35  ;;  %13447 = vmatprep.subr.bf16.mxu1 %v17654_v4  ;;  %v17517_v28 = vcombine.low %v2108_v6, %v2112_v35  ;;  %v425_v4 = vld [vmem:[%s18128_s25 + $0x5a8] sm:$0xff]  ;;  %v18897_v6 = vcombine.high %v18889_v51, %v18889_v51  ;;  %v15839_v35 = vcombine.low %v429_v7, %v433_v45 }
 0x25b   : > { %v2240_v12 = vld [vmem:[%s18128_s25 + $0x3e60] sm:$0xff]  ;;  %13448 = vmatpush2.bf16.msra.mxu1 %v17653_v16  ;;  %v289_v16 = vld [vmem:[%s18128_s25 + $0x168] sm:$0xff] }
 0x25c   : > { %v17646_v10 = vcombine.high %v2236_v25, %v2240_v12  ;;  %v2100_v27 = vld [vmem:[%s18128_s25 + $0x3a00] sm:$0xff]  ;;  %13408 = vmatprep.subr.bf16.mxu0 %v17518_v18  ;;  %v17645_v52 = vcombine.low %v2236_v25, %v2240_v12  ;;  %v15704_v25 = vcombine.high %v293_v58, %v297_v61  ;;  %v15832_v12 = vcombine.high %v421_v62, %v425_v4  ;;  %v277_v7 = vld [vmem:[%s18128_s25 + $0x108] sm:$0xff] }
 0x25d   : > { %v2104_v24 = vld [vmem:[%s18128_s25 + $0x3a20] sm:$0xff]  ;;  %13409 = vmatpush2.bf16.msra.mxu0 %v17517_v28  ;;  %v281_v45 = vld [vmem:[%s18128_s25 + $0x128] sm:$0xff] }
 0x25e   : > { %v2228_v29 = vld [vmem:[%s18128_s25 + $0x3e00] sm:$0xff]  ;;  %v17510_v31 = vcombine.high %v2100_v27, %v2104_v24  ;;  %13449 = vmatprep.subr.bf16.mxu1 %v17646_v10  ;;  %v17509_v46 = vcombine.low %v2100_v27, %v2104_v24  ;;  %v413_v10 = vld [vmem:[%s18128_s25 + $0x548] sm:$0xff] }
 0x25f   : > { %v2232_v37 = vld [vmem:[%s18128_s25 + $0x3e20] sm:$0xff]  ;;  %13450 = vmatpush2.bf16.msra.mxu1 %v17645_v52  ;;  %v417_v27 = vld [vmem:[%s18128_s25 + $0x568] sm:$0xff]  ;;  %v15831_v52 = vcombine.low %v421_v62, %v425_v4  ;;  %v15688_v4 = vcombine.high %v277_v7, %v281_v45 }
 0x260   : > { %v17638_v49 = vcombine.high %v2228_v29, %v2232_v37  ;;  %13410 = vmatprep.subr.bf16.mxu0 %v17510_v31  ;;  %v17637_v55 = vcombine.low %v2228_v29, %v2232_v37  ;;  %v15703_v37 = vcombine.low %v293_v58, %v297_v61  ;;  %v15696_v31 = vcombine.high %v285_v14, %v289_v16 }
 0x261   : > { %13411 = vmatpush2.bf16.msra.mxu0 %v17509_v46  ;;  %v15823_v62 = vcombine.low %v413_v10, %v417_v27 }
 0x262   : > { %13451 = vmatprep.subr.bf16.mxu1 %v17638_v49  ;;  %13462 = vmatprep.subr.bf16.mxu0 %v15712_v20  ;;  %v409_v20 = vld [vmem:[%s18128_s25 + $0x528] sm:$0xff] }
 0x263   : > { %13452 = vmatpush2.bf16.msra.mxu1 %v17637_v55  ;;  %v405_v55 = vld [vmem:[%s18128_s25 + $0x508] sm:$0xff] }
 0x264   : > { %13503 = vmatprep.subr.bf16.mxu1 %v15840_v57  ;;  %v13168_v18 = vpop.f32.mrf.mxu0  ;;  %13413 = vmatmul.mubr.bf16.vlgmr.msra.gmra.mxu0 %v18889_v51 }
 0x265   : > { %v13169_v24 = vadd.f32 %v13168_v18, %v18824_v48  ;;  %13463 = vmatpush1.bf16.msra.mxu0 %v15711_v42  ;;  %v15824_v48 = vcombine.high %v413_v10, %v417_v27  ;;  %13494 = vmatprep.mubr.bf16.mxu0 %v18182_v9  ;;  %v397_v18 = vld [vmem:[%s18128_s25 + $0x4c8] sm:$0xff] }
 0x266   : > { %v13209_v29 = vpop.f32.mrf.mxu1  ;;  %13454 = vmatmul.mubr.bf16.vlgmr.msra.gmra.mxu1 %v18897_v6  ;;  %v13170_v28 = vpop.f32.mrf.mxu0  ;;  %13464 = vmatprep.subr.bf16.mxu0 %v15704_v25  ;;  %v269_v25 = vld [vmem:[%s18128_s25 + $0xc8] sm:$0xff] }
 0x267   : > { %13504 = vmatpush1.bf16.msra.mxu1 %v15839_v35  ;;  %v18906_v49 = vadd.f32 %v13209_v29, %v13169_v24  ;;  %v13171_v2 = vadd.f32 %v13170_v28, %v18833_v5  ;;  %13535 = vmatprep.mubr.bf16.mxu1 %v18189_v13  ;;  %v15695_v5 = vcombine.low %v285_v14, %v289_v16  ;;  %v401_v24 = vld [vmem:[%s18128_s25 + $0x4e8] sm:$0xff] }
 0x268   : > { %v13211_v40 = vpop.f32.mrf.mxu1  ;;  %13505 = vmatprep.subr.bf16.mxu1 %v15832_v12  ;;  %v13172_v46 = vpop.f32.mrf.mxu0  ;;  %v15816_v35 = vcombine.high %v405_v55, %v409_v20  ;;  %v273_v12 = vld [vmem:[%s18128_s25 + $0xe8] sm:$0xff]  ;;  %v15687_v29 = vcombine.low %v277_v7, %v281_v45  ;;  %v15815_v14 = vcombine.low %v405_v55, %v409_v20  ;;  %v15808_v10 = vcombine.high %v397_v18, %v401_v24 }
 0x269   : > { %v18915_v57 = vadd.f32 %v13211_v40, %v13171_v2  ;;  %13465 = vmatpush1.bf16.msra.mxu0 %v15703_v37  ;;  %v15680_v16 = vcombine.high %v269_v25, %v273_v12  ;;  %v261_v27 = vld [vmem:[%s18128_s25 + $0x88] sm:$0xff]  ;;  %v15807_v2 = vcombine.low %v397_v18, %v401_v24 }
 0x26a   : > { %v13213_v58 = vpop.f32.mrf.mxu1  ;;  %v13173_v61 = vpop.f32.mrf.mxu0  ;;  %13466 = vmatprep.subr.bf16.mxu0 %v15696_v31  ;;  %v265_v37 = vld [vmem:[%s18128_s25 + $0xa8] sm:$0xff]  ;;  %v15679_v31 = vcombine.low %v269_v25, %v273_v12 }
 0x26b   : > { %13506 = vmatpush1.bf16.msra.mxu1 %v15831_v52  ;;  %v389_v28 = vld [vmem:[%s18128_s25 + $0x488] sm:$0xff]  ;;  %v15672_v40 = vcombine.high %v261_v27, %v265_v37  ;;  %v15671_v20 = vcombine.low %v261_v27, %v265_v37 }
 0x26c   : > { %v13214_v42 = vpop.f32.mrf.mxu1  ;;  %13507 = vmatprep.subr.bf16.mxu1 %v15824_v48  ;;  %v393_v52 = vld [vmem:[%s18128_s25 + $0x4a8] sm:$0xff] }
 0x26d   : > { %13467 = vmatpush1.bf16.msra.mxu0 %v15695_v5  ;;  %v15800_v48 = vcombine.high %v389_v28, %v393_v52  ;;  %v253_v7 = vld [vmem:[%s18128_s25 + $0x48] sm:$0xff]  ;;  %v15799_v58 = vcombine.low %v389_v28, %v393_v52 }
 0x26e   : > { %13468 = vmatprep.subr.bf16.mxu0 %v15688_v4  ;;  %v257_v45 = vld [vmem:[%s18128_s25 + $0x68] sm:$0xff] }
 0x26f   : > { %13508 = vmatpush1.bf16.msra.mxu1 %v15823_v62  ;;  %v381_v46 = vld [vmem:[%s18128_s25 + $0x448] sm:$0xff]  ;;  %v15664_v5 = vcombine.high %v253_v7, %v257_v45  ;;  %v15663_v25 = vcombine.low %v253_v7, %v257_v45 }
 0x270   : > { %13509 = vmatprep.subr.bf16.mxu1 %v15816_v35  ;;  %v385_v55 = vld [vmem:[%s18128_s25 + $0x468] sm:$0xff] }
 0x271   : > { %13469 = vmatpush1.bf16.msra.mxu0 %v15687_v29  ;;  %v15792_v61 = vcombine.high %v381_v46, %v385_v55  ;;  %v245_v62 = vld [vmem:[%s18128_s25 + $0x8] sm:$0xff]  ;;  %v15791_v12 = vcombine.low %v381_v46, %v385_v55 }
 0x272   : > { %13470 = vmatprep.subr.bf16.mxu0 %v15680_v16  ;;  %v249_v4 = vld [vmem:[%s18128_s25 + $0x28] sm:$0xff] }
 0x273   : > { %13510 = vmatpush1.bf16.msra.mxu1 %v15815_v14  ;;  %v373_v42 = vld [vmem:[%s18128_s25 + $0x408] sm:$0xff]  ;;  %v15656_v18 = vcombine.high %v245_v62, %v249_v4  ;;  %v15655_v27 = vcombine.low %v245_v62, %v249_v4 }
 0x274   : > { %13511 = vmatprep.subr.bf16.mxu1 %v15808_v10  ;;  %v377_v35 = vld [vmem:[%s18128_s25 + $0x428] sm:$0xff] }
 0x275   : > { %13471 = vmatpush1.bf16.msra.mxu0 %v15679_v31  ;;  %v15784_v24 = vcombine.high %v373_v42, %v377_v35  ;;  %v365_v29 = vld [vmem:[%s18128_s25 + $0x3c8] sm:$0xff]  ;;  %v15783_v37 = vcombine.low %v373_v42, %v377_v35 }
 0x276   : > { %13472 = vmatprep.subr.bf16.mxu0 %v15672_v40  ;;  %v369_v14 = vld [vmem:[%s18128_s25 + $0x3e8] sm:$0xff] }
 0x277   : > { %13512 = vmatpush1.bf16.msra.mxu1 %v15807_v2  ;;  %v493_v16 = vld [vmem:[%s18128_s25 + $0x7c8] sm:$0xff]  ;;  %v15776_v28 = vcombine.high %v365_v29, %v369_v14  ;;  %v15775_v7 = vcombine.low %v365_v29, %v369_v14 }
 0x278   : > { %13513 = vmatprep.subr.bf16.mxu1 %v15800_v48  ;;  %v497_v10 = vld [vmem:[%s18128_s25 + $0x7e8] sm:$0xff] }
 0x279   : > { %13473 = vmatpush1.bf16.msra.mxu0 %v15671_v20  ;;  %v15904_v52 = vcombine.high %v493_v16, %v497_v10  ;;  %v357_v31 = vld [vmem:[%s18128_s25 + $0x388] sm:$0xff]  ;;  %v15903_v45 = vcombine.low %v493_v16, %v497_v10 }
 0x27a   : > { %13474 = vmatprep.subr.bf16.mxu0 %v15664_v5  ;;  %v361_v2 = vld [vmem:[%s18128_s25 + $0x3a8] sm:$0xff] }
 0x27b   : > { %13514 = vmatpush1.bf16.msra.mxu1 %v15799_v58  ;;  %v485_v40 = vld [vmem:[%s18128_s25 + $0x788] sm:$0xff]  ;;  %v15768_v46 = vcombine.high %v357_v31, %v361_v2  ;;  %v15767_v62 = vcombine.low %v357_v31, %v361_v2 }
 0x27c   : > { %13515 = vmatprep.subr.bf16.mxu1 %v15792_v61  ;;  %v489_v48 = vld [vmem:[%s18128_s25 + $0x7a8] sm:$0xff] }
 0x27d   : > { %13475 = vmatpush1.bf16.msra.mxu0 %v15663_v25  ;;  %v15896_v55 = vcombine.high %v485_v40, %v489_v48  ;;  %v349_v20 = vld [vmem:[%s18128_s25 + $0x348] sm:$0xff]  ;;  %v15895_v4 = vcombine.low %v485_v40, %v489_v48 }
 0x27e   : > { %13476 = vmatprep.subr.bf16.mxu0 %v15656_v18  ;;  %v353_v58 = vld [vmem:[%s18128_s25 + $0x368] sm:$0xff] }
 0x27f   : > { %13516 = vmatpush1.bf16.msra.mxu1 %v15791_v12  ;;  %v477_v5 = vld [vmem:[%s18128_s25 + $0x748] sm:$0xff]  ;;  %v15760_v42 = vcombine.high %v349_v20, %v353_v58  ;;  %v15759_v29 = vcombine.low %v349_v20, %v353_v58 }
 0x280   : > { %13517 = vmatprep.subr.bf16.mxu1 %v15784_v24  ;;  %v481_v61 = vld [vmem:[%s18128_s25 + $0x768] sm:$0xff] }
 0x281   : > { %13477 = vmatpush1.bf16.msra.mxu0 %v15655_v27  ;;  %v15888_v35 = vcombine.high %v477_v5, %v481_v61  ;;  %v341_v25 = vld [vmem:[%s18128_s25 + $0x308] sm:$0xff]  ;;  %v15887_v14 = vcombine.low %v477_v5, %v481_v61 }
 0x282   : > { %13478 = vmatprep.subr.bf16.mxu0 %v15776_v28  ;;  %v345_v12 = vld [vmem:[%s18128_s25 + $0x328] sm:$0xff] }
 0x283   : > { %13518 = vmatpush1.bf16.msra.mxu1 %v15783_v37  ;;  %v469_v18 = vld [vmem:[%s18128_s25 + $0x708] sm:$0xff]  ;;  %v15752_v16 = vcombine.high %v341_v25, %v345_v12  ;;  %v15751_v31 = vcombine.low %v341_v25, %v345_v12 }
 0x284   : > { %13519 = vmatprep.subr.bf16.mxu1 %v15904_v52  ;;  %v473_v24 = vld [vmem:[%s18128_s25 + $0x728] sm:$0xff] }
 0x285   : > { %13479 = vmatpush2.bf16.msra.mxu0 %v15775_v7  ;;  %v15880_v10 = vcombine.high %v469_v18, %v473_v24  ;;  %v333_v27 = vld [vmem:[%s18128_s25 + $0x2c8] sm:$0xff]  ;;  %v15879_v2 = vcombine.low %v469_v18, %v473_v24 }
 0x286   : > { %13480 = vmatprep.subr.bf16.mxu0 %v15768_v46  ;;  %v337_v37 = vld [vmem:[%s18128_s25 + $0x2e8] sm:$0xff] }
 0x287   : > { %13520 = vmatpush2.bf16.msra.mxu1 %v15903_v45  ;;  %v461_v28 = vld [vmem:[%s18128_s25 + $0x6c8] sm:$0xff]  ;;  %v15744_v40 = vcombine.high %v333_v27, %v337_v37  ;;  %v15743_v20 = vcombine.low %v333_v27, %v337_v37 }
 0x288   : > { %13521 = vmatprep.subr.bf16.mxu1 %v15896_v55  ;;  %v465_v52 = vld [vmem:[%s18128_s25 + $0x6e8] sm:$0xff] }
 0x289   : > { %13481 = vmatpush2.bf16.msra.mxu0 %v15767_v62  ;;  %v15872_v48 = vcombine.high %v461_v28, %v465_v52  ;;  %v325_v7 = vld [vmem:[%s18128_s25 + $0x288] sm:$0xff]  ;;  %v15871_v58 = vcombine.low %v461_v28, %v465_v52 }
 0x28a   : > { %13482 = vmatprep.subr.bf16.mxu0 %v15760_v42  ;;  %v329_v45 = vld [vmem:[%s18128_s25 + $0x2a8] sm:$0xff] }
 0x28b   : > { %13522 = vmatpush2.bf16.msra.mxu1 %v15895_v4  ;;  %v453_v46 = vld [vmem:[%s18128_s25 + $0x688] sm:$0xff]  ;;  %v15736_v5 = vcombine.high %v325_v7, %v329_v45  ;;  %v15735_v25 = vcombine.low %v325_v7, %v329_v45 }
 0x28c   : > { %13523 = vmatprep.subr.bf16.mxu1 %v15888_v35  ;;  %v457_v55 = vld [vmem:[%s18128_s25 + $0x6a8] sm:$0xff] }
 0x28d   : > { %13483 = vmatpush2.bf16.msra.mxu0 %v15759_v29  ;;  %v15864_v61 = vcombine.high %v453_v46, %v457_v55  ;;  %v317_v62 = vld [vmem:[%s18128_s25 + $0x248] sm:$0xff]  ;;  %v15863_v12 = vcombine.low %v453_v46, %v457_v55 }
 0x28e   : > { %13484 = vmatprep.subr.bf16.mxu0 %v15752_v16  ;;  %v321_v4 = vld [vmem:[%s18128_s25 + $0x268] sm:$0xff] }
 0x28f   : > { %13524 = vmatpush2.bf16.msra.mxu1 %v15887_v14  ;;  %v445_v42 = vld [vmem:[%s18128_s25 + $0x648] sm:$0xff]  ;;  %v15728_v18 = vcombine.high %v317_v62, %v321_v4  ;;  %v15727_v27 = vcombine.low %v317_v62, %v321_v4 }
 0x290   : > { %13525 = vmatprep.subr.bf16.mxu1 %v15880_v10  ;;  %v449_v35 = vld [vmem:[%s18128_s25 + $0x668] sm:$0xff] }
 0x291   : > { %13485 = vmatpush2.bf16.msra.mxu0 %v15751_v31  ;;  %v15856_v24 = vcombine.high %v445_v42, %v449_v35  ;;  %v309_v29 = vld [vmem:[%s18128_s25 + $0x208] sm:$0xff]  ;;  %v15855_v37 = vcombine.low %v445_v42, %v449_v35 }
 0x292   : > { %13486 = vmatprep.subr.bf16.mxu0 %v15744_v40  ;;  %v313_v14 = vld [vmem:[%s18128_s25 + $0x228] sm:$0xff] }
 0x293   : > { %13526 = vmatpush2.bf16.msra.mxu1 %v15879_v2  ;;  %v437_v16 = vld [vmem:[%s18128_s25 + $0x608] sm:$0xff]  ;;  %v15720_v28 = vcombine.high %v309_v29, %v313_v14  ;;  %v15719_v7 = vcombine.low %v309_v29, %v313_v14 }
 0x294   : > { %13527 = vmatprep.subr.bf16.mxu1 %v15872_v48  ;;  %v441_v10 = vld [vmem:[%s18128_s25 + $0x628] sm:$0xff] }
 0x295   : > { %13487 = vmatpush2.bf16.msra.mxu0 %v15743_v20  ;;  %v15848_v52 = vcombine.high %v437_v16, %v441_v10  ;;  %v557_v31 = vld [vmem:[%s18128_s25 + $0x9c8] sm:$0xff]  ;;  %v15847_v45 = vcombine.low %v437_v16, %v441_v10 }
 0x296   : > { %13488 = vmatprep.subr.bf16.mxu0 %v15736_v5  ;;  %v561_v2 = vld [vmem:[%s18128_s25 + $0x9e8] sm:$0xff] }
 0x297   : > { %13528 = vmatpush2.bf16.msra.mxu1 %v15871_v58  ;;  %v685_v40 = vld [vmem:[%s18128_s25 + $0xdc8] sm:$0xff]  ;;  %v15968_v46 = vcombine.high %v557_v31, %v561_v2  ;;  %v15967_v62 = vcombine.low %v557_v31, %v561_v2 }
 0x298   : > { %13529 = vmatprep.subr.bf16.mxu1 %v15864_v61  ;;  %v689_v48 = vld [vmem:[%s18128_s25 + $0xde8] sm:$0xff] }
 0x299   : > { %13489 = vmatpush2.bf16.msra.mxu0 %v15735_v25  ;;  %v16096_v55 = vcombine.high %v685_v40, %v689_v48  ;;  %v549_v20 = vld [vmem:[%s18128_s25 + $0x988] sm:$0xff]  ;;  %v16095_v4 = vcombine.low %v685_v40, %v689_v48 }
 0x29a   : > { %13490 = vmatprep.subr.bf16.mxu0 %v15728_v18  ;;  %v553_v58 = vld [vmem:[%s18128_s25 + $0x9a8] sm:$0xff] }
 0x29b   : > { %13530 = vmatpush2.bf16.msra.mxu1 %v15863_v12  ;;  %v677_v5 = vld [vmem:[%s18128_s25 + $0xd88] sm:$0xff]  ;;  %v15960_v42 = vcombine.high %v549_v20, %v553_v58  ;;  %v15959_v10 = vcombine.low %v549_v20, %v553_v58 }
 0x29c   : > { %13531 = vmatprep.subr.bf16.mxu1 %v15856_v24  ;;  %v681_v61 = vld [vmem:[%s18128_s25 + $0xda8] sm:$0xff] }
 0x29d   : > { %13491 = vmatpush2.bf16.msra.mxu0 %v15727_v27  ;;  %v16088_v35 = vcombine.high %v677_v5, %v681_v61  ;;  %v541_v25 = vld [vmem:[%s18128_s25 + $0x948] sm:$0xff] }
 0x29e   : > { %13492 = vmatprep.subr.bf16.mxu0 %v15720_v28  ;;  %v545_v12 = vld [vmem:[%s18128_s25 + $0x968] sm:$0xff] }
 0x29f   : > { %13532 = vmatpush2.bf16.msra.mxu1 %v15855_v37  ;;  %v669_v24 = vld [vmem:[%s18128_s25 + $0xd48] sm:$0xff]  ;;  %v16087_v37 = vcombine.low %v677_v5, %v681_v61  ;;  %v15952_v28 = vcombine.high %v541_v25, %v545_v12 }
 0x2a0   : > { %13533 = vmatprep.subr.bf16.mxu1 %v15848_v52  ;;  %v673_v29 = vld [vmem:[%s18128_s25 + $0xd68] sm:$0xff] }
 0x2a1   : > { %13493 = vmatpush2.bf16.msra.mxu0 %v15719_v7  ;;  %v533_v40 = vld [vmem:[%s18128_s25 + $0x908] sm:$0xff]  ;;  %v16079_v5 = vcombine.low %v669_v24, %v673_v29 }
 0x2a2   : > { %13544 = vmatprep.subr.bf16.mxu0 %v15968_v46  ;;  %v537_v48 = vld [vmem:[%s18128_s25 + $0x928] sm:$0xff] }
 0x2a3   : > { %13534 = vmatpush2.bf16.msra.mxu1 %v15847_v45  ;;  %v661_v45 = vld [vmem:[%s18128_s25 + $0xd08] sm:$0xff]  ;;  %v15944_v61 = vcombine.high %v533_v40, %v537_v48 }
 0x2a4   : > { %13585 = vmatprep.subr.bf16.mxu1 %v16096_v55  ;;  %v13250_v18 = vpop.f32.mrf.mxu0  ;;  %13495 = vmatmul.mubr.bf16.vlgmr.msra.gmra.mxu0 %v18233_v22  ;;  %v665_v46 = vld [vmem:[%s18128_s25 + $0xd28] sm:$0xff] }
 0x2a5   : > { %v13251_v14 = vadd.f32 %v13250_v18, %v18906_v49  ;;  %13545 = vmatpush1.bf16.msra.mxu0 %v15967_v62  ;;  %v16080_v49 = vcombine.high %v669_v24, %v673_v29  ;;  %13576 = vmatprep.mubr.bf16.mxu0 %v18240_v30  ;;  %v653_v18 = vld [vmem:[%s18128_s25 + $0xcc8] sm:$0xff] }
 0x2a6   : > { %v13291_v16 = vpop.f32.mrf.mxu1  ;;  %13536 = vmatmul.mubr.bf16.vlgmr.msra.gmra.mxu1 %v18244_v63  ;;  %v13252_v27 = vpop.f32.mrf.mxu0  ;;  %13546 = vmatprep.subr.bf16.mxu0 %v15960_v42  ;;  %v525_v42 = vld [vmem:[%s18128_s25 + $0x8c8] sm:$0xff] }
 0x2a7   : > { %13586 = vmatpush1.bf16.msra.mxu1 %v16095_v4  ;;  %v18980_v52 = vadd.f32 %v13291_v16, %v13251_v14  ;;  %v13253_v31 = vadd.f32 %v13252_v27, %v18915_v57  ;;  %13617 = vmatprep.mubr.bf16.mxu1 %v18253_v39  ;;  %v15951_v57 = vcombine.low %v541_v25, %v545_v12  ;;  %v657_v14 = vld [vmem:[%s18128_s25 + $0xce8] sm:$0xff] }
 0x2a8   : > { %v13293_v2 = vpop.f32.mrf.mxu1  ;;  %13587 = vmatprep.subr.bf16.mxu1 %v16088_v35  ;;  %v13254_v7 = vpop.f32.mrf.mxu0  ;;  %v16072_v4 = vcombine.high %v661_v45, %v665_v46  ;;  %v529_v35 = vld [vmem:[%s18128_s25 + $0x8e8] sm:$0xff]  ;;  %v15943_v16 = vcombine.low %v533_v40, %v537_v48  ;;  %v16071_v25 = vcombine.low %v661_v45, %v665_v46  ;;  %v16064_v24 = vcombine.high %v653_v18, %v657_v14 }
 0x2a9   : > { %v18989_v55 = vadd.f32 %v13293_v2, %v13253_v31  ;;  %13547 = vmatpush1.bf16.msra.mxu0 %v15959_v10  ;;  %v15936_v12 = vcombine.high %v525_v42, %v529_v35  ;;  %v517_v29 = vld [vmem:[%s18128_s25 + $0x888] sm:$0xff]  ;;  %v16063_v31 = vcombine.low %v653_v18, %v657_v14 }
 0x2aa   : > { %v13295_v20 = vpop.f32.mrf.mxu1  ;;  %v13255_v58 = vpop.f32.mrf.mxu0  ;;  %13548 = vmatprep.subr.bf16.mxu0 %v15952_v28  ;;  %v521_v10 = vld [vmem:[%s18128_s25 + $0x8a8] sm:$0xff]  ;;  %v15935_v28 = vcombine.low %v525_v42, %v529_v35 }
 0x2ab   : > { %13588 = vmatpush1.bf16.msra.mxu1 %v16087_v37  ;;  %v645_v27 = vld [vmem:[%s18128_s25 + $0xc88] sm:$0xff]  ;;  %v15928_v2 = vcombine.high %v517_v29, %v521_v10  ;;  %v15927_v46 = vcombine.low %v517_v29, %v521_v10 }
 0x2ac   : > { %v13296_v62 = vpop.f32.mrf.mxu1  ;;  %13589 = vmatprep.subr.bf16.mxu1 %v16080_v49  ;;  %v649_v37 = vld [vmem:[%s18128_s25 + $0xca8] sm:$0xff] }
 0x2ad   : > { %13549 = vmatpush1.bf16.msra.mxu0 %v15951_v57  ;;  %v16056_v49 = vcombine.high %v645_v27, %v649_v37  ;;  %v509_v40 = vld [vmem:[%s18128_s25 + $0x848] sm:$0xff]  ;;  %v16055_v20 = vcombine.low %v645_v27, %v649_v37 }
 0x2ae   : > { %13550 = vmatprep.subr.bf16.mxu0 %v15944_v61  ;;  %v513_v48 = vld [vmem:[%s18128_s25 + $0x868] sm:$0xff] }
 0x2af   : > { %13590 = vmatpush1.bf16.msra.mxu1 %v16079_v5  ;;  %v637_v7 = vld [vmem:[%s18128_s25 + $0xc48] sm:$0xff]  ;;  %v15920_v57 = vcombine.high %v509_v40, %v513_v48  ;;  %v15919_v42 = vcombine.low %v509_v40, %v513_v48 }
 0x2b0   : > { %13591 = vmatprep.subr.bf16.mxu1 %v16072_v4  ;;  %v641_v45 = vld [vmem:[%s18128_s25 + $0xc68] sm:$0xff] }
 0x2b1   : > { %13551 = vmatpush1.bf16.msra.mxu0 %v15943_v16  ;;  %v16048_v58 = vcombine.high %v637_v7, %v641_v45  ;;  %v501_v5 = vld [vmem:[%s18128_s25 + $0x808] sm:$0xff]  ;;  %v16047_v35 = vcombine.low %v637_v7, %v641_v45 }
 0x2b2   : > { %13552 = vmatprep.subr.bf16.mxu0 %v15936_v12  ;;  %v505_v61 = vld [vmem:[%s18128_s25 + $0x828] sm:$0xff] }
 0x2b3   : > { %13592 = vmatpush1.bf16.msra.mxu1 %v16071_v25  ;;  %v629_v62 = vld [vmem:[%s18128_s25 + $0xc08] sm:$0xff]  ;;  %v15912_v18 = vcombine.high %v501_v5, %v505_v61  ;;  %v15911_v29 = vcombine.low %v501_v5, %v505_v61 }
 0x2b4   : > { %13593 = vmatprep.subr.bf16.mxu1 %v16064_v24  ;;  %v633_v4 = vld [vmem:[%s18128_s25 + $0xc28] sm:$0xff] }
 0x2b5   : > { %13553 = vmatpush1.bf16.msra.mxu0 %v15935_v28  ;;  %v16040_v14 = vcombine.high %v629_v62, %v633_v4  ;;  %v621_v16 = vld [vmem:[%s18128_s25 + $0xbc8] sm:$0xff]  ;;  %v16039_v10 = vcombine.low %v629_v62, %v633_v4 }
 0x2b6   : > { %13554 = vmatprep.subr.bf16.mxu0 %v15928_v2  ;;  %v625_v25 = vld [vmem:[%s18128_s25 + $0xbe8] sm:$0xff] }
 0x2b7   : > { %13594 = vmatpush1.bf16.msra.mxu1 %v16063_v31  ;;  %v749_v12 = vld [vmem:[%s18128_s25 + $0xfc8] sm:$0xff]  ;;  %v16032_v27 = vcombine.high %v621_v16, %v625_v25  ;;  %v16031_v40 = vcombine.low %v621_v16, %v625_v25 }
 0x2b8   : > { %13595 = vmatprep.subr.bf16.mxu1 %v16056_v49  ;;  %v753_v24 = vld [vmem:[%s18128_s25 + $0xfe8] sm:$0xff] }
 0x2b9   : > { %13555 = vmatpush1.bf16.msra.mxu0 %v15927_v46  ;;  %v16160_v37 = vcombine.high %v749_v12, %v753_v24  ;;  %v613_v28 = vld [vmem:[%s18128_s25 + $0xb88] sm:$0xff]  ;;  %v16159_v48 = vcombine.low %v749_v12, %v753_v24 }
 0x2ba   : > { %13556 = vmatprep.subr.bf16.mxu0 %v15920_v57  ;;  %v617_v31 = vld [vmem:[%s18128_s25 + $0xba8] sm:$0xff] }
 0x2bb   : > { %13596 = vmatpush1.bf16.msra.mxu1 %v16055_v20  ;;  %v741_v2 = vld [vmem:[%s18128_s25 + $0xf88] sm:$0xff]  ;;  %v16024_v7 = vcombine.high %v613_v28, %v617_v31  ;;  %v16023_v5 = vcombine.low %v613_v28, %v617_v31 }
 0x2bc   : > { %13597 = vmatprep.subr.bf16.mxu1 %v16048_v58  ;;  %v745_v49 = vld [vmem:[%s18128_s25 + $0xfa8] sm:$0xff] }
 0x2bd   : > { %13557 = vmatpush1.bf16.msra.mxu0 %v15919_v42  ;;  %v16152_v45 = vcombine.high %v741_v2, %v745_v49  ;;  %v605_v46 = vld [vmem:[%s18128_s25 + $0xb48] sm:$0xff]  ;;  %v16151_v61 = vcombine.low %v741_v2, %v745_v49 }
 0x2be   : > { %13558 = vmatprep.subr.bf16.mxu0 %v15912_v18  ;;  %v609_v20 = vld [vmem:[%s18128_s25 + $0xb68] sm:$0xff] }
 0x2bf   : > { %13598 = vmatpush1.bf16.msra.mxu1 %v16047_v35  ;;  %v733_v57 = vld [vmem:[%s18128_s25 + $0xf48] sm:$0xff]  ;;  %v16016_v62 = vcombine.high %v605_v46, %v609_v20  ;;  %v16015_v16 = vcombine.low %v605_v46, %v609_v20 }
 0x2c0   : > { %13599 = vmatprep.subr.bf16.mxu1 %v16040_v14  ;;  %v737_v58 = vld [vmem:[%s18128_s25 + $0xf68] sm:$0xff] }
 0x2c1   : > { %13559 = vmatpush1.bf16.msra.mxu0 %v15911_v29  ;;  %v16144_v4 = vcombine.high %v733_v57, %v737_v58  ;;  %v597_v42 = vld [vmem:[%s18128_s25 + $0xb08] sm:$0xff]  ;;  %v16143_v25 = vcombine.low %v733_v57, %v737_v58 }
 0x2c2   : > { %13560 = vmatprep.subr.bf16.mxu0 %v16032_v27  ;;  %v601_v35 = vld [vmem:[%s18128_s25 + $0xb28] sm:$0xff] }
 0x2c3   : > { %13600 = vmatpush1.bf16.msra.mxu1 %v16039_v10  ;;  %v725_v18 = vld [vmem:[%s18128_s25 + $0xf08] sm:$0xff]  ;;  %v16008_v12 = vcombine.high %v597_v42, %v601_v35  ;;  %v16007_v28 = vcombine.low %v597_v42, %v601_v35 }
 0x2c4   : > { %13601 = vmatprep.subr.bf16.mxu1 %v16160_v37  ;;  %v729_v14 = vld [vmem:[%s18128_s25 + $0xf28] sm:$0xff] }
 0x2c5   : > { %13561 = vmatpush2.bf16.msra.mxu0 %v16031_v40  ;;  %v16136_v24 = vcombine.high %v725_v18, %v729_v14  ;;  %v589_v29 = vld [vmem:[%s18128_s25 + $0xac8] sm:$0xff]  ;;  %v16135_v31 = vcombine.low %v725_v18, %v729_v14 }
 0x2c6   : > { %13562 = vmatprep.subr.bf16.mxu0 %v16024_v7  ;;  %v593_v10 = vld [vmem:[%s18128_s25 + $0xae8] sm:$0xff] }
 0x2c7   : > { %13602 = vmatpush2.bf16.msra.mxu1 %v16159_v48  ;;  %v717_v27 = vld [vmem:[%s18128_s25 + $0xec8] sm:$0xff]  ;;  %v16000_v2 = vcombine.high %v589_v29, %v593_v10  ;;  %v15999_v46 = vcombine.low %v589_v29, %v593_v10 }
 0x2c8   : > { %13603 = vmatprep.subr.bf16.mxu1 %v16152_v45  ;;  %v721_v37 = vld [vmem:[%s18128_s25 + $0xee8] sm:$0xff] }
 0x2c9   : > { %13563 = vmatpush2.bf16.msra.mxu0 %v16023_v5  ;;  %v16128_v49 = vcombine.high %v717_v27, %v721_v37  ;;  %v581_v40 = vld [vmem:[%s18128_s25 + $0xa88] sm:$0xff]  ;;  %v16127_v20 = vcombine.low %v717_v27, %v721_v37 }
 0x2ca   : > { %13564 = vmatprep.subr.bf16.mxu0 %v16016_v62  ;;  %v585_v48 = vld [vmem:[%s18128_s25 + $0xaa8] sm:$0xff] }
 0x2cb   : > { %13604 = vmatpush2.bf16.msra.mxu1 %v16151_v61  ;;  %v709_v7 = vld [vmem:[%s18128_s25 + $0xe88] sm:$0xff]  ;;  %v15992_v57 = vcombine.high %v581_v40, %v585_v48  ;;  %v15991_v42 = vcombine.low %v581_v40, %v585_v48 }
 0x2cc   : > { %13605 = vmatprep.subr.bf16.mxu1 %v16144_v4  ;;  %v713_v45 = vld [vmem:[%s18128_s25 + $0xea8] sm:$0xff] }
 0x2cd   : > { %13565 = vmatpush2.bf16.msra.mxu0 %v16015_v16  ;;  %v16120_v58 = vcombine.high %v709_v7, %v713_v45  ;;  %v573_v5 = vld [vmem:[%s18128_s25 + $0xa48] sm:$0xff]  ;;  %v16119_v35 = vcombine.low %v709_v7, %v713_v45 }
 0x2ce   : > { %13566 = vmatprep.subr.bf16.mxu0 %v16008_v12  ;;  %v577_v61 = vld [vmem:[%s18128_s25 + $0xa68] sm:$0xff] }
 0x2cf   : > { %13606 = vmatpush2.bf16.msra.mxu1 %v16143_v25  ;;  %v701_v62 = vld [vmem:[%s18128_s25 + $0xe48] sm:$0xff]  ;;  %v15984_v18 = vcombine.high %v573_v5, %v577_v61  ;;  %v15983_v29 = vcombine.low %v573_v5, %v577_v61 }
 0x2d0   : > { %13607 = vmatprep.subr.bf16.mxu1 %v16136_v24  ;;  %v705_v4 = vld [vmem:[%s18128_s25 + $0xe68] sm:$0xff] }
 0x2d1   : > { %13567 = vmatpush2.bf16.msra.mxu0 %v16007_v28  ;;  %v16112_v14 = vcombine.high %v701_v62, %v705_v4  ;;  %v565_v16 = vld [vmem:[%s18128_s25 + $0xa08] sm:$0xff]  ;;  %v16111_v10 = vcombine.low %v701_v62, %v705_v4 }
 0x2d2   : > { %13568 = vmatprep.subr.bf16.mxu0 %v16000_v2  ;;  %v569_v25 = vld [vmem:[%s18128_s25 + $0xa28] sm:$0xff] }
 0x2d3   : > { %13608 = vmatpush2.bf16.msra.mxu1 %v16135_v31  ;;  %v693_v12 = vld [vmem:[%s18128_s25 + $0xe08] sm:$0xff]  ;;  %v15976_v27 = vcombine.high %v565_v16, %v569_v25  ;;  %v15975_v40 = vcombine.low %v565_v16, %v569_v25 }
 0x2d4   : > { %13609 = vmatprep.subr.bf16.mxu1 %v16128_v49  ;;  %v697_v24 = vld [vmem:[%s18128_s25 + $0xe28] sm:$0xff] }
 0x2d5   : > { %13569 = vmatpush2.bf16.msra.mxu0 %v15999_v46  ;;  %v16104_v37 = vcombine.high %v693_v12, %v697_v24  ;;  %v813_v28 = vld [vmem:[%s18128_s25 + $0x11c8] sm:$0xff]  ;;  %v16103_v48 = vcombine.low %v693_v12, %v697_v24 }
 0x2d6   : > { %13570 = vmatprep.subr.bf16.mxu0 %v15992_v57  ;;  %v817_v31 = vld [vmem:[%s18128_s25 + $0x11e8] sm:$0xff] }
 0x2d7   : > { %13610 = vmatpush2.bf16.msra.mxu1 %v16127_v20  ;;  %v941_v2 = vld [vmem:[%s18128_s25 + $0x15c8] sm:$0xff]  ;;  %v16224_v7 = vcombine.high %v813_v28, %v817_v31  ;;  %v16223_v5 = vcombine.low %v813_v28, %v817_v31 }
 0x2d8   : > { %13611 = vmatprep.subr.bf16.mxu1 %v16120_v58  ;;  %v945_v49 = vld [vmem:[%s18128_s25 + $0x15e8] sm:$0xff] }
 0x2d9   : > { %13571 = vmatpush2.bf16.msra.mxu0 %v15991_v42  ;;  %v16352_v45 = vcombine.high %v941_v2, %v945_v49  ;;  %v805_v46 = vld [vmem:[%s18128_s25 + $0x1188] sm:$0xff]  ;;  %v16351_v61 = vcombine.low %v941_v2, %v945_v49 }
 0x2da   : > { %13572 = vmatprep.subr.bf16.mxu0 %v15984_v18  ;;  %v809_v20 = vld [vmem:[%s18128_s25 + $0x11a8] sm:$0xff] }
 0x2db   : > { %13612 = vmatpush2.bf16.msra.mxu1 %v16119_v35  ;;  %v933_v57 = vld [vmem:[%s18128_s25 + $0x1588] sm:$0xff]  ;;  %v16216_v62 = vcombine.high %v805_v46, %v809_v20  ;;  %v16215_v24 = vcombine.low %v805_v46, %v809_v20 }
 0x2dc   : > { %13613 = vmatprep.subr.bf16.mxu1 %v16112_v14  ;;  %v937_v58 = vld [vmem:[%s18128_s25 + $0x15a8] sm:$0xff] }
 0x2dd   : > { %13573 = vmatpush2.bf16.msra.mxu0 %v15983_v29  ;;  %v16344_v4 = vcombine.high %v933_v57, %v937_v58  ;;  %v797_v42 = vld [vmem:[%s18128_s25 + $0x1148] sm:$0xff] }
 0x2de   : > { %13574 = vmatprep.subr.bf16.mxu0 %v15976_v27  ;;  %v801_v35 = vld [vmem:[%s18128_s25 + $0x1168] sm:$0xff] }
 0x2df   : > { %13614 = vmatpush2.bf16.msra.mxu1 %v16111_v10  ;;  %v925_v14 = vld [vmem:[%s18128_s25 + $0x1548] sm:$0xff]  ;;  %v16343_v10 = vcombine.low %v933_v57, %v937_v58  ;;  %v16208_v27 = vcombine.high %v797_v42, %v801_v35 }
 0x2e0   : > { %13615 = vmatprep.subr.bf16.mxu1 %v16104_v37  ;;  %v929_v16 = vld [vmem:[%s18128_s25 + $0x1568] sm:$0xff] }
 0x2e1   : > { %13575 = vmatpush2.bf16.msra.mxu0 %v15975_v40  ;;  %v789_v2 = vld [vmem:[%s18128_s25 + $0x1108] sm:$0xff]  ;;  %v16335_v57 = vcombine.low %v925_v14, %v929_v16 }
 0x2e2   : > { %13626 = vmatprep.subr.bf16.mxu0 %v16224_v7  ;;  %v793_v49 = vld [vmem:[%s18128_s25 + $0x1128] sm:$0xff] }
 0x2e3   : > { %13616 = vmatpush2.bf16.msra.mxu1 %v16103_v48  ;;  %v917_v48 = vld [vmem:[%s18128_s25 + $0x1508] sm:$0xff]  ;;  %v16200_v58 = vcombine.high %v789_v2, %v793_v49 }
 0x2e4   : > { %13667 = vmatprep.subr.bf16.mxu1 %v16352_v45  ;;  %v13332_v18 = vpop.f32.mrf.mxu0  ;;  %13577 = vmatmul.mubr.bf16.vlgmr.msra.gmra.mxu0 %v18324_v47  ;;  %v921_v7 = vld [vmem:[%s18128_s25 + $0x1528] sm:$0xff] }
 0x2e5   : > { %v13333_v25 = vadd.f32 %v13332_v18, %v18980_v52  ;;  %13627 = vmatpush1.bf16.msra.mxu0 %v16223_v5  ;;  %v16336_v52 = vcombine.high %v925_v14, %v929_v16  ;;  %13658 = vmatprep.mubr.bf16.mxu0 %v18331_v56  ;;  %v909_v18 = vld [vmem:[%s18128_s25 + $0x14c8] sm:$0xff] }
 0x2e6   : > { %v13373_v12 = vpop.f32.mrf.mxu1  ;;  %13618 = vmatmul.mubr.bf16.vlgmr.msra.gmra.mxu1 %v18335_v11  ;;  %v13334_v29 = vpop.f32.mrf.mxu0  ;;  %13628 = vmatprep.subr.bf16.mxu0 %v16216_v62  ;;  %v781_v62 = vld [vmem:[%s18128_s25 + $0x10c8] sm:$0xff] }
 0x2e7   : > { %13668 = vmatpush1.bf16.msra.mxu1 %v16351_v61  ;;  %v19054_v37 = vadd.f32 %v13373_v12, %v13333_v25  ;;  %v13335_v28 = vadd.f32 %v13334_v29, %v18989_v55  ;;  %13699 = vmatprep.mubr.bf16.mxu1 %v18344_v3  ;;  %v16207_v55 = vcombine.low %v797_v42, %v801_v35  ;;  %v913_v25 = vld [vmem:[%s18128_s25 + $0x14e8] sm:$0xff] }
 0x2e8   : > { %v13375_v31 = vpop.f32.mrf.mxu1  ;;  %13669 = vmatprep.subr.bf16.mxu1 %v16344_v4  ;;  %v13336_v40 = vpop.f32.mrf.mxu0  ;;  %v16328_v61 = vcombine.high %v917_v48, %v921_v7  ;;  %v785_v4 = vld [vmem:[%s18128_s25 + $0x10e8] sm:$0xff]  ;;  %v16199_v12 = vcombine.low %v789_v2, %v793_v49  ;;  %v16327_v42 = vcombine.low %v917_v48, %v921_v7  ;;  %v16320_v14 = vcombine.high %v909_v18, %v913_v25 }
 0x2e9   : > { %v19063_v45 = vadd.f32 %v13375_v31, %v13335_v28  ;;  %13629 = vmatpush1.bf16.msra.mxu0 %v16215_v24  ;;  %v16192_v35 = vcombine.high %v781_v62, %v785_v4  ;;  %v773_v16 = vld [vmem:[%s18128_s25 + $0x1088] sm:$0xff]  ;;  %v16319_v28 = vcombine.low %v909_v18, %v913_v25 }
 0x2ea   : > { %v13377_v46 = vpop.f32.mrf.mxu1  ;;  %v13337_v20 = vpop.f32.mrf.mxu0  ;;  %13630 = vmatprep.subr.bf16.mxu0 %v16208_v27  ;;  %v777_v24 = vld [vmem:[%s18128_s25 + $0x10a8] sm:$0xff]  ;;  %v16191_v27 = vcombine.low %v781_v62, %v785_v4 }
 0x2eb   : > { %13670 = vmatpush1.bf16.msra.mxu1 %v16343_v10  ;;  %v901_v29 = vld [vmem:[%s18128_s25 + $0x1488] sm:$0xff]  ;;  %v16184_v31 = vcombine.high %v773_v16, %v777_v24  ;;  %v16183_v7 = vcombine.low %v773_v16, %v777_v24 }
 0x2ec   : > { %v13378_v5 = vpop.f32.mrf.mxu1  ;;  %13671 = vmatprep.subr.bf16.mxu1 %v16336_v52  ;;  %v905_v10 = vld [vmem:[%s18128_s25 + $0x14a8] sm:$0xff] }
 0x2ed   : > { %13631 = vmatpush1.bf16.msra.mxu0 %v16207_v55  ;;  %v16312_v52 = vcombine.high %v901_v29, %v905_v10  ;;  %v765_v2 = vld [vmem:[%s18128_s25 + $0x1048] sm:$0xff]  ;;  %v16311_v46 = vcombine.low %v901_v29, %v905_v10 }
 0x2ee   : > { %13632 = vmatprep.subr.bf16.mxu0 %v16200_v58  ;;  %v769_v49 = vld [vmem:[%s18128_s25 + $0x1068] sm:$0xff] }
 0x2ef   : > { %13672 = vmatpush1.bf16.msra.mxu1 %v16335_v57  ;;  %v893_v40 = vld [vmem:[%s18128_s25 + $0x1448] sm:$0xff]  ;;  %v16176_v55 = vcombine.high %v765_v2, %v769_v49  ;;  %v16175_v62 = vcombine.low %v765_v2, %v769_v49 }
 0x2f0   : > { %13673 = vmatprep.subr.bf16.mxu1 %v16328_v61  ;;  %v897_v48 = vld [vmem:[%s18128_s25 + $0x1468] sm:$0xff] }
 0x2f1   : > { %13633 = vmatpush1.bf16.msra.mxu0 %v16199_v12  ;;  %v16304_v20 = vcombine.high %v893_v40, %v897_v48  ;;  %v757_v57 = vld [vmem:[%s18128_s25 + $0x1008] sm:$0xff]  ;;  %v16303_v4 = vcombine.low %v893_v40, %v897_v48 }
 0x2f2   : > { %13634 = vmatprep.subr.bf16.mxu0 %v16192_v35  ;;  %v761_v58 = vld [vmem:[%s18128_s25 + $0x1028] sm:$0xff] }
 0x2f3   : > { %13674 = vmatpush1.bf16.msra.mxu1 %v16327_v42  ;;  %v885_v5 = vld [vmem:[%s18128_s25 + $0x1408] sm:$0xff]  ;;  %v16168_v18 = vcombine.high %v757_v57, %v761_v58  ;;  %v16167_v16 = vcombine.low %v757_v57, %v761_v58 }
 0x2f4   : > { %13675 = vmatprep.subr.bf16.mxu1 %v16320_v14  ;;  %v889_v61 = vld [vmem:[%s18128_s25 + $0x1428] sm:$0xff] }
 0x2f5   : > { %13635 = vmatpush1.bf16.msra.mxu0 %v16191_v27  ;;  %v16296_v25 = vcombine.high %v885_v5, %v889_v61  ;;  %v877_v12 = vld [vmem:[%s18128_s25 + $0x13c8] sm:$0xff]  ;;  %v16295_v24 = vcombine.low %v885_v5, %v889_v61 }
 0x2f6   : > { %13636 = vmatprep.subr.bf16.mxu0 %v16184_v31  ;;  %v881_v42 = vld [vmem:[%s18128_s25 + $0x13e8] sm:$0xff] }
 0x2f7   : > { %13676 = vmatpush1.bf16.msra.mxu1 %v16319_v28  ;;  %v1005_v35 = vld [vmem:[%s18128_s25 + $0x17c8] sm:$0xff]  ;;  %v16288_v29 = vcombine.high %v877_v12, %v881_v42  ;;  %v16287_v2 = vcombine.low %v877_v12, %v881_v42 }
 0x2f8   : > { %13677 = vmatprep.subr.bf16.mxu1 %v16312_v52  ;;  %v1009_v14 = vld [vmem:[%s18128_s25 + $0x17e8] sm:$0xff] }
 0x2f9   : > { %13637 = vmatpush1.bf16.msra.mxu0 %v16183_v7  ;;  %v16416_v10 = vcombine.high %v1005_v35, %v1009_v14  ;;  %v869_v27 = vld [vmem:[%s18128_s25 + $0x1388] sm:$0xff]  ;;  %v16415_v49 = vcombine.low %v1005_v35, %v1009_v14 }
 0x2fa   : > { %13638 = vmatprep.subr.bf16.mxu0 %v16176_v55  ;;  %v873_v28 = vld [vmem:[%s18128_s25 + $0x13a8] sm:$0xff] }
 0x2fb   : > { %13678 = vmatpush1.bf16.msra.mxu1 %v16311_v46  ;;  %v997_v31 = vld [vmem:[%s18128_s25 + $0x1788] sm:$0xff]  ;;  %v16280_v40 = vcombine.high %v869_v27, %v873_v28  ;;  %v16279_v57 = vcombine.low %v869_v27, %v873_v28 }
 0x2fc   : > { %13679 = vmatprep.subr.bf16.mxu1 %v16304_v20  ;;  %v1001_v52 = vld [vmem:[%s18128_s25 + $0x17a8] sm:$0xff] }
 0x2fd   : > { %13639 = vmatpush1.bf16.msra.mxu0 %v16175_v62  ;;  %v16408_v48 = vcombine.high %v997_v31, %v1001_v52  ;;  %v861_v7 = vld [vmem:[%s18128_s25 + $0x1348] sm:$0xff]  ;;  %v16407_v58 = vcombine.low %v997_v31, %v1001_v52 }
 0x2fe   : > { %13640 = vmatprep.subr.bf16.mxu0 %v16168_v18  ;;  %v865_v46 = vld [vmem:[%s18128_s25 + $0x1368] sm:$0xff] }
 0x2ff   : > { %13680 = vmatpush1.bf16.msra.mxu1 %v16303_v4  ;;  %v989_v55 = vld [vmem:[%s18128_s25 + $0x1748] sm:$0xff]  ;;  %v16272_v5 = vcombine.high %v861_v7, %v865_v46  ;;  %v16271_v12 = vcombine.low %v861_v7, %v865_v46 }
 0x300   : > { %13681 = vmatprep.subr.bf16.mxu1 %v16296_v25  ;;  %v993_v20 = vld [vmem:[%s18128_s25 + $0x1768] sm:$0xff] }
 0x301   : > { %13641 = vmatpush1.bf16.msra.mxu0 %v16167_v16  ;;  %v16400_v61 = vcombine.high %v989_v55, %v993_v20  ;;  %v853_v62 = vld [vmem:[%s18128_s25 + $0x1308] sm:$0xff]  ;;  %v16399_v42 = vcombine.low %v989_v55, %v993_v20 }
 0x302   : > { %13642 = vmatprep.subr.bf16.mxu0 %v16288_v29  ;;  %v857_v4 = vld [vmem:[%s18128_s25 + $0x1328] sm:$0xff] }
 0x303   : > { %13682 = vmatpush1.bf16.msra.mxu1 %v16295_v24  ;;  %v981_v18 = vld [vmem:[%s18128_s25 + $0x1708] sm:$0xff]  ;;  %v16264_v35 = vcombine.high %v853_v62, %v857_v4  ;;  %v16263_v27 = vcombine.low %v853_v62, %v857_v4 }
 0x304   : > { %13683 = vmatprep.subr.bf16.mxu1 %v16416_v10  ;;  %v985_v25 = vld [vmem:[%s18128_s25 + $0x1728] sm:$0xff] }
 0x305   : > { %13643 = vmatpush2.bf16.msra.mxu0 %v16287_v2  ;;  %v16392_v14 = vcombine.high %v981_v18, %v985_v25  ;;  %v845_v16 = vld [vmem:[%s18128_s25 + $0x12c8] sm:$0xff]  ;;  %v16391_v28 = vcombine.low %v981_v18, %v985_v25 }
 0x306   : > { %13644 = vmatprep.subr.bf16.mxu0 %v16280_v40  ;;  %v849_v24 = vld [vmem:[%s18128_s25 + $0x12e8] sm:$0xff] }
 0x307   : > { %13684 = vmatpush2.bf16.msra.mxu1 %v16415_v49  ;;  %v973_v29 = vld [vmem:[%s18128_s25 + $0x16c8] sm:$0xff]  ;;  %v16256_v31 = vcombine.high %v845_v16, %v849_v24  ;;  %v16255_v7 = vcombine.low %v845_v16, %v849_v24 }
 0x308   : > { %13685 = vmatprep.subr.bf16.mxu1 %v16408_v48  ;;  %v977_v10 = vld [vmem:[%s18128_s25 + $0x16e8] sm:$0xff] }
 0x309   : > { %13645 = vmatpush2.bf16.msra.mxu0 %v16279_v57  ;;  %v16384_v52 = vcombine.high %v973_v29, %v977_v10  ;;  %v837_v2 = vld [vmem:[%s18128_s25 + $0x1288] sm:$0xff]  ;;  %v16383_v46 = vcombine.low %v973_v29, %v977_v10 }
 0x30a   : > { %13646 = vmatprep.subr.bf16.mxu0 %v16272_v5  ;;  %v841_v49 = vld [vmem:[%s18128_s25 + $0x12a8] sm:$0xff] }
 0x30b   : > { %13686 = vmatpush2.bf16.msra.mxu1 %v16407_v58  ;;  %v965_v40 = vld [vmem:[%s18128_s25 + $0x1688] sm:$0xff]  ;;  %v16248_v55 = vcombine.high %v837_v2, %v841_v49  ;;  %v16247_v62 = vcombine.low %v837_v2, %v841_v49 }
 0x30c   : > { %13687 = vmatprep.subr.bf16.mxu1 %v16400_v61  ;;  %v969_v48 = vld [vmem:[%s18128_s25 + $0x16a8] sm:$0xff] }
 0x30d   : > { %13647 = vmatpush2.bf16.msra.mxu0 %v16271_v12  ;;  %v16376_v20 = vcombine.high %v965_v40, %v969_v48  ;;  %v829_v57 = vld [vmem:[%s18128_s25 + $0x1248] sm:$0xff]  ;;  %v16375_v4 = vcombine.low %v965_v40, %v969_v48 }
 0x30e   : > { %13648 = vmatprep.subr.bf16.mxu0 %v16264_v35  ;;  %v833_v58 = vld [vmem:[%s18128_s25 + $0x1268] sm:$0xff] }
 0x30f   : > { %13688 = vmatpush2.bf16.msra.mxu1 %v16399_v42  ;;  %v957_v5 = vld [vmem:[%s18128_s25 + $0x1648] sm:$0xff]  ;;  %v16240_v18 = vcombine.high %v829_v57, %v833_v58  ;;  %v16239_v16 = vcombine.low %v829_v57, %v833_v58 }
 0x310   : > { %13689 = vmatprep.subr.bf16.mxu1 %v16392_v14  ;;  %v961_v61 = vld [vmem:[%s18128_s25 + $0x1668] sm:$0xff] }
 0x311   : > { %13649 = vmatpush2.bf16.msra.mxu0 %v16263_v27  ;;  %v16368_v25 = vcombine.high %v957_v5, %v961_v61  ;;  %v821_v12 = vld [vmem:[%s18128_s25 + $0x1208] sm:$0xff]  ;;  %v16367_v24 = vcombine.low %v957_v5, %v961_v61 }
 0x312   : > { %13650 = vmatprep.subr.bf16.mxu0 %v16256_v31  ;;  %v825_v42 = vld [vmem:[%s18128_s25 + $0x1228] sm:$0xff] }
 0x313   : > { %13690 = vmatpush2.bf16.msra.mxu1 %v16391_v28  ;;  %v949_v35 = vld [vmem:[%s18128_s25 + $0x1608] sm:$0xff]  ;;  %v16232_v29 = vcombine.high %v821_v12, %v825_v42  ;;  %v16231_v2 = vcombine.low %v821_v12, %v825_v42 }
 0x314   : > { %13691 = vmatprep.subr.bf16.mxu1 %v16384_v52  ;;  %v953_v14 = vld [vmem:[%s18128_s25 + $0x1628] sm:$0xff] }
 0x315   : > { %13651 = vmatpush2.bf16.msra.mxu0 %v16255_v7  ;;  %v16360_v10 = vcombine.high %v949_v35, %v953_v14  ;;  %v1069_v27 = vld [vmem:[%s18128_s25 + $0x19c8] sm:$0xff]  ;;  %v16359_v49 = vcombine.low %v949_v35, %v953_v14 }
 0x316   : > { %13652 = vmatprep.subr.bf16.mxu0 %v16248_v55  ;;  %v1073_v28 = vld [vmem:[%s18128_s25 + $0x19e8] sm:$0xff] }
 0x317   : > { %13692 = vmatpush2.bf16.msra.mxu1 %v16383_v46  ;;  %v1197_v31 = vld [vmem:[%s18128_s25 + $0x1dc8] sm:$0xff]  ;;  %v16480_v40 = vcombine.high %v1069_v27, %v1073_v28  ;;  %v16479_v57 = vcombine.low %v1069_v27, %v1073_v28 }
 0x318   : > { %13693 = vmatprep.subr.bf16.mxu1 %v16376_v20  ;;  %v1201_v52 = vld [vmem:[%s18128_s25 + $0x1de8] sm:$0xff] }
 0x319   : > { %13653 = vmatpush2.bf16.msra.mxu0 %v16247_v62  ;;  %v16608_v48 = vcombine.high %v1197_v31, %v1201_v52  ;;  %v1061_v7 = vld [vmem:[%s18128_s25 + $0x1988] sm:$0xff]  ;;  %v16607_v58 = vcombine.low %v1197_v31, %v1201_v52 }
 0x31a   : > { %13654 = vmatprep.subr.bf16.mxu0 %v16240_v18  ;;  %v1065_v46 = vld [vmem:[%s18128_s25 + $0x19a8] sm:$0xff] }
 0x31b   : > { %13694 = vmatpush2.bf16.msra.mxu1 %v16375_v4  ;;  %v1189_v55 = vld [vmem:[%s18128_s25 + $0x1d88] sm:$0xff]  ;;  %v16472_v5 = vcombine.high %v1061_v7, %v1065_v46  ;;  %v16471_v14 = vcombine.low %v1061_v7, %v1065_v46 }
 0x31c   : > { %13695 = vmatprep.subr.bf16.mxu1 %v16368_v25  ;;  %v1193_v20 = vld [vmem:[%s18128_s25 + $0x1da8] sm:$0xff] }
 0x31d   : > { %13655 = vmatpush2.bf16.msra.mxu0 %v16239_v16  ;;  %v16600_v61 = vcombine.high %v1189_v55, %v1193_v20  ;;  %v1053_v62 = vld [vmem:[%s18128_s25 + $0x1948] sm:$0xff] }
 0x31e   : > { %13656 = vmatprep.subr.bf16.mxu0 %v16232_v29  ;;  %v1057_v4 = vld [vmem:[%s18128_s25 + $0x1968] sm:$0xff] }
 0x31f   : > { %13696 = vmatpush2.bf16.msra.mxu1 %v16367_v24  ;;  %v1181_v25 = vld [vmem:[%s18128_s25 + $0x1d48] sm:$0xff]  ;;  %v16599_v24 = vcombine.low %v1189_v55, %v1193_v20  ;;  %v16464_v29 = vcombine.high %v1053_v62, %v1057_v4 }
 0x320   : > { %13697 = vmatprep.subr.bf16.mxu1 %v16360_v10  ;;  %v1185_v12 = vld [vmem:[%s18128_s25 + $0x1d68] sm:$0xff] }
 0x321   : > { %13657 = vmatpush2.bf16.msra.mxu0 %v16231_v2  ;;  %v16592_v31 = vcombine.high %v1181_v25, %v1185_v12  ;;  %v1049_v52 = vld [vmem:[%s18128_s25 + $0x1928] sm:$0xff]  ;;  %v16591_v20 = vcombine.low %v1181_v25, %v1185_v12 }
 0x322   : > { %13708 = vmatprep.subr.bf16.mxu0 %v16480_v40  ;;  %v1177_v40 = vld [vmem:[%s18128_s25 + $0x1d28] sm:$0xff] }
 0x323   : > { %13698 = vmatpush2.bf16.msra.mxu1 %v16359_v49  ;;  %v1173_v49 = vld [vmem:[%s18128_s25 + $0x1d08] sm:$0xff] }
 0x324   : > { %13749 = vmatprep.subr.bf16.mxu1 %v16608_v48  ;;  %v13414_v18 = vpop.f32.mrf.mxu0  ;;  %13659 = vmatmul.mubr.bf16.vlgmr.msra.gmra.mxu0 %v18414_v21 }
 0x325   : > { %v13415_v42 = vadd.f32 %v13414_v18, %v19054_v37  ;;  %13709 = vmatpush1.bf16.msra.mxu0 %v16479_v57  ;;  %v1045_v37 = vld [vmem:[%s18128_s25 + $0x1908] sm:$0xff]  ;;  %13740 = vmatprep.mubr.bf16.mxu0 %v18421_v32 }
 0x326   : > { %v13455_v35 = vpop.f32.mrf.mxu1  ;;  %13700 = vmatmul.mubr.bf16.vlgmr.msra.gmra.mxu1 %v18425_v34  ;;  %v13416_v16 = vpop.f32.mrf.mxu0  ;;  %13710 = vmatprep.subr.bf16.mxu0 %v16472_v5  ;;  %v16456_v57 = vcombine.high %v1045_v37, %v1049_v52  ;;  %v1037_v18 = vld [vmem:[%s18128_s25 + $0x18c8] sm:$0xff]  ;;  %v16455_v25 = vcombine.low %v1045_v37, %v1049_v52 }
 0x327   : > { %13750 = vmatpush1.bf16.msra.mxu1 %v16607_v58  ;;  %v13456_v10 = vadd.f32 %v13455_v35, %v13415_v42  ;;  %v13417_v27 = vadd.f32 %v13416_v16, %v19063_v45  ;;  %13781 = vmatprep.mubr.bf16.mxu1 %v18434_v44  ;;  %v16463_v45 = vcombine.low %v1053_v62, %v1057_v4  ;;  %v1041_v42 = vld [vmem:[%s18128_s25 + $0x18e8] sm:$0xff] }
 0x328   : > { %v13457_v28 = vpop.f32.mrf.mxu1  ;;  %13751 = vmatprep.subr.bf16.mxu1 %v16600_v61  ;;  %v13418_v2 = vpop.f32.mrf.mxu0  ;;  %v16584_v61 = vcombine.high %v1173_v49, %v1177_v40  ;;  %v1165_v35 = vld [vmem:[%s18128_s25 + $0x1cc8] sm:$0xff]  ;;  %v16583_v16 = vcombine.low %v1173_v49, %v1177_v40 }
 0x329   : > { %v15438_v48 = vmul.f32 0.2, %v13456_v10  ;;  %v13458_v7 = vadd.f32 %v13457_v28, %v13417_v27  ;;  %13711 = vmatpush1.bf16.msra.mxu0 %v16471_v14  ;;  %vm15430_vm0 = vcmp.gt.f32.partialorder %v13456_v10, 0.0  ;;  %v1169_v14 = vld [vmem:[%s18128_s25 + $0x1ce8] sm:$0xff]  ;;  %v16447_v2 = vcombine.low %v1037_v18, %v1041_v42 }
 0x32a   : > { %v13459_v46 = vpop.f32.mrf.mxu1  ;;  %v13419_v55 = vpop.f32.mrf.mxu0  ;;  %13712 = vmatprep.subr.bf16.mxu0 %v16464_v29  ;;  %v16576_v29 = vcombine.high %v1165_v35, %v1169_v14  ;;  %v1029_v27 = vld [vmem:[%s18128_s25 + $0x1888] sm:$0xff]  ;;  %v16575_v37 = vcombine.low %v1165_v35, %v1169_v14 }
 0x32b   : > { %13752 = vmatpush1.bf16.msra.mxu1 %v16599_v24  ;;  %vm15431_vm1 = vcmp.gt.f32.partialorder %v13458_v7, 0.0  ;;  %v15439_v58 = vmul.f32 0.2, %v13458_v7  ;;  %v19139_v62 = vsel %vm15430_vm0, %v13456_v10, %v15438_v48  ;;  %v16448_v24 = vcombine.high %v1037_v18, %v1041_v42  ;;  %v1033_v10 = vld [vmem:[%s18128_s25 + $0x18a8] sm:$0xff] }
 0x32c   : > { %v13460_v5 = vpop.f32.mrf.mxu1  ;;  %13753 = vmatprep.subr.bf16.mxu1 %v16592_v31  ;;  %v1157_v28 = vld [vmem:[%s18128_s25 + $0x1c88] sm:$0xff]  ;;  %v16440_v52 = vcombine.high %v1029_v27, %v1033_v10 }
 0x32d   : > { %v19141_v4 = vsel %vm15431_vm1, %v13458_v7, %v15439_v58  ;;  %13713 = vmatpush1.bf16.msra.mxu0 %v16463_v45  ;;  %v1161_v31 = vld [vmem:[%s18128_s25 + $0x1ca8] sm:$0xff]  ;;  %v16439_v45 = vcombine.low %v1029_v27, %v1033_v10 }
 0x32e   : > { %v17701_v12 = vpack.c.bf16 %v19141_v4, %v19139_v62  ;;  %13714 = vmatprep.subr.bf16.mxu0 %v16456_v57  ;;  %v16568_v49 = vcombine.high %v1157_v28, %v1161_v31  ;;  %v1021_v40 = vld [vmem:[%s18128_s25 + $0x1848] sm:$0xff]  ;;  %v16567_v55 = vcombine.low %v1157_v28, %v1161_v31  ;;  %v1022_v4 = vld [vmem:[%s18128_s25 + $0x1850] sm:$0xff] }
 0x32f   : > { %13754 = vmatpush1.bf16.msra.mxu1 %v16591_v20  ;;  %v1025_v48 = vld [vmem:[%s18128_s25 + $0x1868] sm:$0xff] }
 0x330   : > { %13755 = vmatprep.subr.bf16.mxu1 %v16584_v61  ;;  %v1149_v7 = vld [vmem:[%s18128_s25 + $0x1c48] sm:$0xff]  ;;  %v16432_v20 = vcombine.high %v1021_v40, %v1025_v48  ;;  %v16431_v42 = vcombine.low %v1021_v40, %v1025_v48 }
 0x331   : > { %13715 = vmatpush1.bf16.msra.mxu0 %v16455_v25  ;;  %v1153_v46 = vld [vmem:[%s18128_s25 + $0x1c68] sm:$0xff] }
 0x332   : > { %13716 = vmatprep.subr.bf16.mxu0 %v16448_v24  ;;  %v16560_v57 = vcombine.high %v1149_v7, %v1153_v46  ;;  %v1013_v58 = vld [vmem:[%s18128_s25 + $0x1808] sm:$0xff]  ;;  %v16559_v35 = vcombine.low %v1149_v7, %v1153_v46 }
 0x333   : > { %13756 = vmatpush1.bf16.msra.mxu1 %v16583_v16  ;;  %v1017_v5 = vld [vmem:[%s18128_s25 + $0x1828] sm:$0xff] }
 0x334   : > { %13757 = vmatprep.subr.bf16.mxu1 %v16576_v29  ;;  %v1141_v61 = vld [vmem:[%s18128_s25 + $0x1c08] sm:$0xff]  ;;  %v16424_v14 = vcombine.high %v1013_v58, %v1017_v5  ;;  %v16423_v10 = vcombine.low %v1013_v58, %v1017_v5 }
 0x335   : > { %13717 = vmatpush1.bf16.msra.mxu0 %v16447_v2  ;;  %v1145_v18 = vld [vmem:[%s18128_s25 + $0x1c28] sm:$0xff] }
 0x336   : > { %13718 = vmatprep.subr.bf16.mxu0 %v16440_v52  ;;  %v16552_v25 = vcombine.high %v1141_v61, %v1145_v18  ;;  %v1133_v16 = vld [vmem:[%s18128_s25 + $0x1bc8] sm:$0xff]  ;;  %v16551_v28 = vcombine.low %v1141_v61, %v1145_v18 }
 0x337   : > { %13758 = vmatpush1.bf16.msra.mxu1 %v16575_v37  ;;  %v1137_v24 = vld [vmem:[%s18128_s25 + $0x1be8] sm:$0xff] }
 0x338   : > { %13759 = vmatprep.subr.bf16.mxu1 %v16568_v49  ;;  %v1261_v29 = vld [vmem:[%s18128_s25 + $0x1fc8] sm:$0xff]  ;;  %v16544_v31 = vcombine.high %v1133_v16, %v1137_v24  ;;  %v16543_v48 = vcombine.low %v1133_v16, %v1137_v24 }
 0x339   : > { %13719 = vmatpush1.bf16.msra.mxu0 %v16439_v45  ;;  %v1265_v27 = vld [vmem:[%s18128_s25 + $0x1fe8] sm:$0xff] }
 0x33a   : > { %13720 = vmatprep.subr.bf16.mxu0 %v16432_v20  ;;  %v16672_v2 = vcombine.high %v1261_v29, %v1265_v27  ;;  %v1125_v37 = vld [vmem:[%s18128_s25 + $0x1b88] sm:$0xff]  ;;  %v16671_v7 = vcombine.low %v1261_v29, %v1265_v27 }
 0x33b   : > { %13760 = vmatpush1.bf16.msra.mxu1 %v16567_v55  ;;  %v1129_v52 = vld [vmem:[%s18128_s25 + $0x1ba8] sm:$0xff] }
 0x33c   : > { %13761 = vmatprep.subr.bf16.mxu1 %v16560_v57  ;;  %v1253_v49 = vld [vmem:[%s18128_s25 + $0x1f88] sm:$0xff]  ;;  %v16536_v46 = vcombine.high %v1125_v37, %v1129_v52  ;;  %v16535_v5 = vcombine.low %v1125_v37, %v1129_v52 }
 0x33d   : > { %13721 = vmatpush1.bf16.msra.mxu0 %v16431_v42  ;;  %v1257_v40 = vld [vmem:[%s18128_s25 + $0x1fa8] sm:$0xff] }
 0x33e   : > { %13722 = vmatprep.subr.bf16.mxu0 %v16424_v14  ;;  %v16664_v45 = vcombine.high %v1253_v49, %v1257_v40  ;;  %v1117_v55 = vld [vmem:[%s18128_s25 + $0x1b48] sm:$0xff]  ;;  %v16663_v61 = vcombine.low %v1253_v49, %v1257_v40 }
 0x33f   : > { %13762 = vmatpush1.bf16.msra.mxu1 %v16559_v35  ;;  %v1121_v20 = vld [vmem:[%s18128_s25 + $0x1b68] sm:$0xff] }
 0x340   : > { %13763 = vmatprep.subr.bf16.mxu1 %v16552_v25  ;;  %v1245_v57 = vld [vmem:[%s18128_s25 + $0x1f48] sm:$0xff]  ;;  %v16528_v18 = vcombine.high %v1117_v55, %v1121_v20  ;;  %v16527_v24 = vcombine.low %v1117_v55, %v1121_v20 }
 0x341   : > { %13723 = vmatpush1.bf16.msra.mxu0 %v16423_v10  ;;  %v1249_v58 = vld [vmem:[%s18128_s25 + $0x1f68] sm:$0xff] }
 0x342   : > { %13724 = vmatprep.subr.bf16.mxu0 %v16544_v31  ;;  %v16656_v42 = vcombine.high %v1245_v57, %v1249_v58  ;;  %v1109_v35 = vld [vmem:[%s18128_s25 + $0x1b08] sm:$0xff]  ;;  %v16655_v29 = vcombine.low %v1245_v57, %v1249_v58 }
 0x343   : > { %13764 = vmatpush1.bf16.msra.mxu1 %v16551_v28  ;;  %v1113_v14 = vld [vmem:[%s18128_s25 + $0x1b28] sm:$0xff] }
 0x344   : > { %13765 = vmatprep.subr.bf16.mxu1 %v16672_v2  ;;  %v1237_v25 = vld [vmem:[%s18128_s25 + $0x1f08] sm:$0xff]  ;;  %v16520_v27 = vcombine.high %v1109_v35, %v1113_v14  ;;  %v16519_v52 = vcombine.low %v1109_v35, %v1113_v14 }
 0x345   : > { %13725 = vmatpush2.bf16.msra.mxu0 %v16543_v48  ;;  %v1241_v16 = vld [vmem:[%s18128_s25 + $0x1f28] sm:$0xff] }
 0x346   : > { %13726 = vmatprep.subr.bf16.mxu0 %v16536_v46  ;;  %v16648_v10 = vcombine.high %v1237_v25, %v1241_v16  ;;  %v1101_v28 = vld [vmem:[%s18128_s25 + $0x1ac8] sm:$0xff]  ;;  %v16647_v49 = vcombine.low %v1237_v25, %v1241_v16 }
 0x347   : > { %13766 = vmatpush2.bf16.msra.mxu1 %v16671_v7  ;;  %v1105_v31 = vld [vmem:[%s18128_s25 + $0x1ae8] sm:$0xff] }
 0x348   : > { %13767 = vmatprep.subr.bf16.mxu1 %v16664_v45  ;;  %v1229_v2 = vld [vmem:[%s18128_s25 + $0x1ec8] sm:$0xff]  ;;  %v16512_v40 = vcombine.high %v1101_v28, %v1105_v31  ;;  %v16511_v20 = vcombine.low %v1101_v28, %v1105_v31 }
 0x349   : > { %13727 = vmatpush2.bf16.msra.mxu0 %v16535_v5  ;;  %v1233_v37 = vld [vmem:[%s18128_s25 + $0x1ee8] sm:$0xff] }
 0x34a   : > { %13728 = vmatprep.subr.bf16.mxu0 %v16528_v18  ;;  %v16640_v48 = vcombine.high %v1229_v2, %v1233_v37  ;;  %v1093_v7 = vld [vmem:[%s18128_s25 + $0x1a88] sm:$0xff]  ;;  %v16639_v57 = vcombine.low %v1229_v2, %v1233_v37 }
 0x34b   : > { %13768 = vmatpush2.bf16.msra.mxu1 %v16663_v61  ;;  %v1097_v46 = vld [vmem:[%s18128_s25 + $0x1aa8] sm:$0xff] }
 0x34c   : > { %13769 = vmatprep.subr.bf16.mxu1 %v16656_v42  ;;  %v1221_v45 = vld [vmem:[%s18128_s25 + $0x1e88] sm:$0xff]  ;;  %v16504_v58 = vcombine.high %v1093_v7, %v1097_v46  ;;  %v16503_v14 = vcombine.low %v1093_v7, %v1097_v46 }
 0x34d   : > { %13729 = vmatpush2.bf16.msra.mxu0 %v16527_v24  ;;  %v1225_v55 = vld [vmem:[%s18128_s25 + $0x1ea8] sm:$0xff] }
 0x34e   : > { %13730 = vmatprep.subr.bf16.mxu0 %v16520_v27  ;;  %v16632_v5 = vcombine.high %v1221_v45, %v1225_v55  ;;  %v1085_v61 = vld [vmem:[%s18128_s25 + $0x1a48] sm:$0xff]  ;;  %v16631_v25 = vcombine.low %v1221_v45, %v1225_v55  ;;  %v2304_v45 = vsub.s32 2, %v18156_v43 }
 0x34f   : > { %13770 = vmatpush2.bf16.msra.mxu1 %v16655_v29  ;;  %v1089_v18 = vld [vmem:[%s18128_s25 + $0x1a68] sm:$0xff] }
 0x350   : > { %13771 = vmatprep.subr.bf16.mxu1 %v16648_v10  ;;  %v1213_v42 = vld [vmem:[%s18128_s25 + $0x1e48] sm:$0xff]  ;;  %v16496_v16 = vcombine.high %v1085_v61, %v1089_v18  ;;  %v16495_v31 = vcombine.low %v1085_v61, %v1089_v18 }
 0x351   : > { %13731 = vmatpush2.bf16.msra.mxu0 %v16519_v52  ;;  %v1217_v35 = vld [vmem:[%s18128_s25 + $0x1e68] sm:$0xff] }
 0x352   : > { %13732 = vmatprep.subr.bf16.mxu0 %v16512_v40  ;;  %v16624_v24 = vcombine.high %v1213_v42, %v1217_v35  ;;  %v1077_v29 = vld [vmem:[%s18128_s25 + $0x1a08] sm:$0xff]  ;;  %v16623_v2 = vcombine.low %v1213_v42, %v1217_v35 }
 0x353   : > { %13772 = vmatpush2.bf16.msra.mxu1 %v16647_v49  ;;  %v1081_v27 = vld [vmem:[%s18128_s25 + $0x1a28] sm:$0xff] }
 0x354   : > { %13773 = vmatprep.subr.bf16.mxu1 %v16640_v48  ;;  %v1205_v10 = vld [vmem:[%s18128_s25 + $0x1e08] sm:$0xff]  ;;  %v16488_v37 = vcombine.high %v1077_v29, %v1081_v27  ;;  %v16487_v46 = vcombine.low %v1077_v29, %v1081_v27 }
 0x355   : > { %13733 = vmatpush2.bf16.msra.mxu0 %v16511_v20  ;;  %v1209_v28 = vld [vmem:[%s18128_s25 + $0x1e28] sm:$0xff] }
 0x356   : > { %13734 = vmatprep.subr.bf16.mxu0 %v16504_v58  ;;  %v16616_v52 = vcombine.high %v1205_v10, %v1209_v28  ;;  %v1325_v49 = vld [vmem:[%s18128_s25 + $0x21c8] sm:$0xff]  ;;  %v16615_v55 = vcombine.low %v1205_v10, %v1209_v28  ;;  %v2308_v58 = vsub.s32 3, %v18156_v43 }
 0x357   : > { %13774 = vmatpush2.bf16.msra.mxu1 %v16639_v57  ;;  %v1329_v40 = vld [vmem:[%s18128_s25 + $0x21e8] sm:$0xff] }
 0x358   : > { %13775 = vmatprep.subr.bf16.mxu1 %v16632_v5  ;;  %v1453_v48 = vld [vmem:[%s18128_s25 + $0x25c8] sm:$0xff]  ;;  %v16736_v20 = vcombine.high %v1325_v49, %v1329_v40 }
 0x359   : > { %13735 = vmatpush2.bf16.msra.mxu0 %v16503_v14  ;;  %v1457_v7 = vld [vmem:[%s18128_s25 + $0x25e8] sm:$0xff] }
 0x35a   : > { %13736 = vmatprep.subr.bf16.mxu0 %v16496_v16  ;;  %v16864_v57 = vcombine.high %v1453_v48, %v1457_v7  ;;  %v1317_v5 = vld [vmem:[%s18128_s25 + $0x2188] sm:$0xff]  ;;  %v16863_v16 = vcombine.low %v1453_v48, %v1457_v7 }
 0x35b   : > { %13776 = vmatpush2.bf16.msra.mxu1 %v16631_v25  ;;  %v1321_v61 = vld [vmem:[%s18128_s25 + $0x21a8] sm:$0xff]  ;;  %v16735_v25 = vcombine.low %v1325_v49, %v1329_v40 }
 0x35c   : > { %13777 = vmatprep.subr.bf16.mxu1 %v16624_v24  ;;  %v1445_v18 = vld [vmem:[%s18128_s25 + $0x2588] sm:$0xff]  ;;  %v16728_v24 = vcombine.high %v1317_v5, %v1321_v61  ;;  %v16727_v49 = vcombine.low %v1317_v5, %v1321_v61 }
 0x35d   : > { %13737 = vmatpush2.bf16.msra.mxu0 %v16495_v31  ;;  %v1449_v42 = vld [vmem:[%s18128_s25 + $0x25a8] sm:$0xff] }
 0x35e   : > { %13738 = vmatprep.subr.bf16.mxu0 %v16488_v37  ;;  %v17783_v35 = vld [vmem:[%s18511_s27] sm:$0xff]  ;;  %v16856_v27 = vcombine.high %v1445_v18, %v1449_v42  ;;  %v16855_v48 = vcombine.low %v1445_v18, %v1449_v42 }
 0x35f   : > { %13778 = vmatpush2.bf16.msra.mxu1 %v16623_v2  ;;  %v2305_v14 = vrot.slane %v17783_v35, %v2304_v45  ;;  %v2309_v29 = vrot.slane %v17783_v35, %v2308_v58  ;;  %v1309_v10 = vld [vmem:[%s18128_s25 + $0x2148] sm:$0xff] }
 0x360   : > { %13779 = vmatprep.subr.bf16.mxu1 %v16616_v52  ;;  %v1313_v28 = vld [vmem:[%s18128_s25 + $0x2168] sm:$0xff] }
 0x361   : > { %13739 = vmatpush2.bf16.msra.mxu0 %v16487_v46  ;;  %v1437_v2 = vld [vmem:[%s18128_s25 + $0x2548] sm:$0xff]  ;;  %v16720_v7 = vcombine.high %v1309_v10, %v1313_v28  ;;  %v16719_v42 = vcombine.low %v1309_v10, %v1313_v28 }
 0x362   : > { %13790 = vmatprep.subr.bf16.mxu0 %v16736_v20  ;;  %v1441_v37 = vld [vmem:[%s18128_s25 + $0x2568] sm:$0xff] }
 0x363   : > { %13780 = vmatpush2.bf16.msra.mxu1 %v16615_v55  ;;  %v1301_v58 = vld [vmem:[%s18128_s25 + $0x2108] sm:$0xff] }
 0x364   : > { %13831 = vmatprep.subr.bf16.mxu1 %v16864_v57  ;;  %v13496_v31 = vpop.f32.mrf.mxu0  ;;  %13741 = vmatmul.mubr.bf16.vlgmr.msra.gmra.mxu0 %v18507_v59  ;;  %v16848_v57 = vcombine.high %v1437_v2, %v1441_v37  ;;  %v1305_v35 = vld [vmem:[%s18128_s25 + $0x2128] sm:$0xff] }
 0x365   : > { %v13497_v52 = vadd.f32 %v13496_v31, %v2305_v14  ;;  %13791 = vmatpush1.bf16.msra.mxu0 %v16735_v25  ;;  %13822 = vmatprep.mubr.bf16.mxu0 %v18520_v23  ;;  %v1429_v25 = vld [vmem:[%s18128_s25 + $0x2508] sm:$0xff] }
 0x366   : > { %v13537_v46 = vpop.f32.mrf.mxu1  ;;  %13782 = vmatmul.mubr.bf16.vlgmr.msra.gmra.mxu1 %v18524_v26  ;;  %v13498_v40 = vpop.f32.mrf.mxu0  ;;  %13792 = vmatprep.subr.bf16.mxu0 %v16728_v24  ;;  %v1433_v5 = vld [vmem:[%s18128_s25 + $0x2528] sm:$0xff]  ;;  %v16847_v24 = vcombine.low %v1437_v2, %v1441_v37 }
 0x367   : > { %13832 = vmatpush1.bf16.msra.mxu1 %v16863_v16  ;;  %v19206_v45 = vadd.f32 %v13537_v46, %v13497_v52  ;;  %v13499_v55 = vadd.f32 %v13498_v40, %v2309_v29  ;;  %13863 = vmatprep.mubr.bf16.mxu1 %v18533_v41  ;;  %v16712_v29 = vcombine.high %v1301_v58, %v1305_v35  ;;  %v1293_v52 = vld [vmem:[%s18128_s25 + $0x20c8] sm:$0xff] }
 0x368   : > { %v13539_v20 = vpop.f32.mrf.mxu1  ;;  %13833 = vmatprep.subr.bf16.mxu1 %v16856_v27  ;;  %v13500_v14 = vpop.f32.mrf.mxu0  ;;  %v16840_v31 = vcombine.high %v1429_v25, %v1433_v5  ;;  %v1297_v46 = vld [vmem:[%s18128_s25 + $0x20e8] sm:$0xff]  ;;  %v16839_v10 = vcombine.low %v1429_v25, %v1433_v5 }
 0x369   : > { %v19214_v61 = vadd.f32 %v13539_v20, %v13499_v55  ;;  %13793 = vmatpush1.bf16.msra.mxu0 %v16727_v49  ;;  %v1421_v40 = vld [vmem:[%s18128_s25 + $0x24c8] sm:$0xff]  ;;  %v16711_v20 = vcombine.low %v1301_v58, %v1305_v35  ;;  %v16704_v28 = vcombine.high %v1293_v52, %v1297_v46 }
 0x36a   : > { %v13541_v18 = vpop.f32.mrf.mxu1  ;;  %v13501_v16 = vpop.f32.mrf.mxu0  ;;  %13794 = vmatprep.subr.bf16.mxu0 %v16720_v7  ;;  %v1425_v55 = vld [vmem:[%s18128_s25 + $0x24e8] sm:$0xff] }
 0x36b   : > { %13834 = vmatpush1.bf16.msra.mxu1 %v16855_v48  ;;  %v16832_v2 = vcombine.high %v1421_v40, %v1425_v55  ;;  %v1285_v37 = vld [vmem:[%s18128_s25 + $0x2088] sm:$0xff]  ;;  %v16831_v14 = vcombine.low %v1421_v40, %v1425_v55 }
 0x36c   : > { %v13542_v27 = vpop.f32.mrf.mxu1  ;;  %13835 = vmatprep.subr.bf16.mxu1 %v16848_v57  ;;  %v1289_v49 = vld [vmem:[%s18128_s25 + $0x20a8] sm:$0xff]  ;;  %v16703_v57 = vcombine.low %v1293_v52, %v1297_v46 }
 0x36d   : > { %13795 = vmatpush1.bf16.msra.mxu0 %v16719_v42  ;;  %v1413_v48 = vld [vmem:[%s18128_s25 + $0x2488] sm:$0xff]  ;;  %v16696_v58 = vcombine.high %v1285_v37, %v1289_v49  ;;  %v16695_v16 = vcombine.low %v1285_v37, %v1289_v49 }
 0x36e   : > { %13796 = vmatprep.subr.bf16.mxu0 %v16712_v29  ;;  %v1417_v7 = vld [vmem:[%s18128_s25 + $0x24a8] sm:$0xff] }
 0x36f   : > { %13836 = vmatpush1.bf16.msra.mxu1 %v16847_v24  ;;  %v16824_v35 = vcombine.high %v1413_v48, %v1417_v7  ;;  %v1277_v25 = vld [vmem:[%s18128_s25 + $0x2048] sm:$0xff]  ;;  %v16823_v24 = vcombine.low %v1413_v48, %v1417_v7 }
 0x370   : > { %13837 = vmatprep.subr.bf16.mxu1 %v16840_v31  ;;  %v1281_v5 = vld [vmem:[%s18128_s25 + $0x2068] sm:$0xff] }
 0x371   : > { %13797 = vmatpush1.bf16.msra.mxu0 %v16711_v20  ;;  %v1405_v18 = vld [vmem:[%s18128_s25 + $0x2448] sm:$0xff]  ;;  %v16688_v29 = vcombine.high %v1277_v25, %v1281_v5  ;;  %v16687_v55 = vcombine.low %v1277_v25, %v1281_v5 }
 0x372   : > { %13798 = vmatprep.subr.bf16.mxu0 %v16704_v28  ;;  %v1409_v42 = vld [vmem:[%s18128_s25 + $0x2468] sm:$0xff] }
 0x373   : > { %13838 = vmatpush1.bf16.msra.mxu1 %v16839_v10  ;;  %v16816_v27 = vcombine.high %v1405_v18, %v1409_v42  ;;  %v1269_v31 = vld [vmem:[%s18128_s25 + $0x2008] sm:$0xff]  ;;  %v16815_v20 = vcombine.low %v1405_v18, %v1409_v42 }
 0x374   : > { %13839 = vmatprep.subr.bf16.mxu1 %v16832_v2  ;;  %v1273_v52 = vld [vmem:[%s18128_s25 + $0x2028] sm:$0xff] }
 0x375   : > { %13799 = vmatpush1.bf16.msra.mxu0 %v16703_v57  ;;  %v1397_v46 = vld [vmem:[%s18128_s25 + $0x2408] sm:$0xff]  ;;  %v16680_v10 = vcombine.high %v1269_v31, %v1273_v52  ;;  %v16679_v7 = vcombine.low %v1269_v31, %v1273_v52 }
 0x376   : > { %13800 = vmatprep.subr.bf16.mxu0 %v16696_v58  ;;  %v1401_v40 = vld [vmem:[%s18128_s25 + $0x2428] sm:$0xff] }
 0x377   : > { %13840 = vmatpush1.bf16.msra.mxu1 %v16831_v14  ;;  %v16808_v28 = vcombine.high %v1397_v46, %v1401_v40  ;;  %v1389_v2 = vld [vmem:[%s18128_s25 + $0x23c8] sm:$0xff]  ;;  %v16807_v57 = vcombine.low %v1397_v46, %v1401_v40 }
 0x378   : > { %13841 = vmatprep.subr.bf16.mxu1 %v16824_v35  ;;  %v1393_v37 = vld [vmem:[%s18128_s25 + $0x23e8] sm:$0xff] }
 0x379   : > { %13801 = vmatpush1.bf16.msra.mxu0 %v16695_v16  ;;  %v1517_v49 = vld [vmem:[%s18128_s25 + $0x27c8] sm:$0xff]  ;;  %v16800_v14 = vcombine.high %v1389_v2, %v1393_v37  ;;  %v16799_v42 = vcombine.low %v1389_v2, %v1393_v37 }
 0x37a   : > { %13802 = vmatprep.subr.bf16.mxu0 %v16688_v29  ;;  %v1521_v48 = vld [vmem:[%s18128_s25 + $0x27e8] sm:$0xff] }
 0x37b   : > { %13842 = vmatpush1.bf16.msra.mxu1 %v16823_v24  ;;  %v16928_v58 = vcombine.high %v1517_v49, %v1521_v48  ;;  %v1381_v35 = vld [vmem:[%s18128_s25 + $0x2388] sm:$0xff]  ;;  %v16927_v16 = vcombine.low %v1517_v49, %v1521_v48 }
 0x37c   : > { %13843 = vmatprep.subr.bf16.mxu1 %v16816_v27  ;;  %v1385_v25 = vld [vmem:[%s18128_s25 + $0x23a8] sm:$0xff] }
 0x37d   : > { %13803 = vmatpush1.bf16.msra.mxu0 %v16687_v55  ;;  %v1509_v5 = vld [vmem:[%s18128_s25 + $0x2788] sm:$0xff]  ;;  %v16792_v24 = vcombine.high %v1381_v35, %v1385_v25  ;;  %v16791_v40 = vcombine.low %v1381_v35, %v1385_v25 }
 0x37e   : > { %13804 = vmatprep.subr.bf16.mxu0 %v16680_v10  ;;  %v1513_v18 = vld [vmem:[%s18128_s25 + $0x27a8] sm:$0xff] }
 0x37f   : > { %13844 = vmatpush1.bf16.msra.mxu1 %v16815_v20  ;;  %v16920_v29 = vcombine.high %v1509_v5, %v1513_v18  ;;  %v1373_v27 = vld [vmem:[%s18128_s25 + $0x2348] sm:$0xff]  ;;  %v16919_v55 = vcombine.low %v1509_v5, %v1513_v18 }
 0x380   : > { %13845 = vmatprep.subr.bf16.mxu1 %v16808_v28  ;;  %v1377_v31 = vld [vmem:[%s18128_s25 + $0x2368] sm:$0xff] }
 0x381   : > { %13805 = vmatpush1.bf16.msra.mxu0 %v16679_v7  ;;  %v1501_v52 = vld [vmem:[%s18128_s25 + $0x2748] sm:$0xff]  ;;  %v16784_v20 = vcombine.high %v1373_v27, %v1377_v31  ;;  %v16783_v48 = vcombine.low %v1373_v27, %v1377_v31 }
 0x382   : > { %13806 = vmatprep.subr.bf16.mxu0 %v16800_v14  ;;  %v1505_v46 = vld [vmem:[%s18128_s25 + $0x2768] sm:$0xff] }
 0x383   : > { %13846 = vmatpush1.bf16.msra.mxu1 %v16807_v57  ;;  %v16912_v10 = vcombine.high %v1501_v52, %v1505_v46  ;;  %v1365_v28 = vld [vmem:[%s18128_s25 + $0x2308] sm:$0xff]  ;;  %v16911_v7 = vcombine.low %v1501_v52, %v1505_v46 }
 0x384   : > { %13847 = vmatprep.subr.bf16.mxu1 %v16928_v58  ;;  %v1369_v2 = vld [vmem:[%s18128_s25 + $0x2328] sm:$0xff] }
 0x385   : > { %13807 = vmatpush2.bf16.msra.mxu0 %v16799_v42  ;;  %v1493_v37 = vld [vmem:[%s18128_s25 + $0x2708] sm:$0xff]  ;;  %v16776_v57 = vcombine.high %v1365_v28, %v1369_v2  ;;  %v16775_v18 = vcombine.low %v1365_v28, %v1369_v2 }
 0x386   : > { %13808 = vmatprep.subr.bf16.mxu0 %v16792_v24  ;;  %v1497_v49 = vld [vmem:[%s18128_s25 + $0x2728] sm:$0xff] }
 0x387   : > { %13848 = vmatpush2.bf16.msra.mxu1 %v16927_v16  ;;  %v16904_v14 = vcombine.high %v1493_v37, %v1497_v49  ;;  %v1357_v58 = vld [vmem:[%s18128_s25 + $0x22c8] sm:$0xff]  ;;  %v16903_v42 = vcombine.low %v1493_v37, %v1497_v49 }
 0x388   : > { %13849 = vmatprep.subr.bf16.mxu1 %v16920_v29  ;;  %v1361_v35 = vld [vmem:[%s18128_s25 + $0x22e8] sm:$0xff] }
 0x389   : > { %13809 = vmatpush2.bf16.msra.mxu0 %v16791_v40  ;;  %v1485_v25 = vld [vmem:[%s18128_s25 + $0x26c8] sm:$0xff]  ;;  %v16768_v16 = vcombine.high %v1357_v58, %v1361_v35  ;;  %v16767_v46 = vcombine.low %v1357_v58, %v1361_v35 }
 0x38a   : > { %13810 = vmatprep.subr.bf16.mxu0 %v16784_v20  ;;  %v1489_v5 = vld [vmem:[%s18128_s25 + $0x26e8] sm:$0xff] }
 0x38b   : > { %13850 = vmatpush2.bf16.msra.mxu1 %v16919_v55  ;;  %v16896_v24 = vcombine.high %v1485_v25, %v1489_v5  ;;  %v1349_v29 = vld [vmem:[%s18128_s25 + $0x2288] sm:$0xff]  ;;  %v16895_v40 = vcombine.low %v1485_v25, %v1489_v5 }
 0x38c   : > { %13851 = vmatprep.subr.bf16.mxu1 %v16912_v10  ;;  %v1353_v27 = vld [vmem:[%s18128_s25 + $0x22a8] sm:$0xff] }
 0x38d   : > { %13811 = vmatpush2.bf16.msra.mxu0 %v16783_v48  ;;  %v1477_v31 = vld [vmem:[%s18128_s25 + $0x2688] sm:$0xff]  ;;  %v16760_v55 = vcombine.high %v1349_v29, %v1353_v27  ;;  %v16759_v49 = vcombine.low %v1349_v29, %v1353_v27 }
 0x38e   : > { %13812 = vmatprep.subr.bf16.mxu0 %v16776_v57  ;;  %v1481_v52 = vld [vmem:[%s18128_s25 + $0x26a8] sm:$0xff] }
 0x38f   : > { %13852 = vmatpush2.bf16.msra.mxu1 %v16911_v7  ;;  %v16888_v20 = vcombine.high %v1477_v31, %v1481_v52  ;;  %v1341_v10 = vld [vmem:[%s18128_s25 + $0x2248] sm:$0xff]  ;;  %v16887_v48 = vcombine.low %v1477_v31, %v1481_v52 }
 0x390   : > { %13853 = vmatprep.subr.bf16.mxu1 %v16904_v14  ;;  %v1345_v28 = vld [vmem:[%s18128_s25 + $0x2268] sm:$0xff] }
 0x391   : > { %13813 = vmatpush2.bf16.msra.mxu0 %v16775_v18  ;;  %v1469_v2 = vld [vmem:[%s18128_s25 + $0x2648] sm:$0xff]  ;;  %v16752_v7 = vcombine.high %v1341_v10, %v1345_v28  ;;  %v16751_v5 = vcombine.low %v1341_v10, %v1345_v28 }
 0x392   : > { %13814 = vmatprep.subr.bf16.mxu0 %v16768_v16  ;;  %v1473_v37 = vld [vmem:[%s18128_s25 + $0x2668] sm:$0xff] }
 0x393   : > { %13854 = vmatpush2.bf16.msra.mxu1 %v16903_v42  ;;  %v16880_v57 = vcombine.high %v1469_v2, %v1473_v37  ;;  %v1333_v14 = vld [vmem:[%s18128_s25 + $0x2208] sm:$0xff]  ;;  %v16879_v18 = vcombine.low %v1469_v2, %v1473_v37 }
 0x394   : > { %13855 = vmatprep.subr.bf16.mxu1 %v16896_v24  ;;  %v1337_v58 = vld [vmem:[%s18128_s25 + $0x2228] sm:$0xff] }
 0x395   : > { %13815 = vmatpush2.bf16.msra.mxu0 %v16767_v46  ;;  %v1461_v35 = vld [vmem:[%s18128_s25 + $0x2608] sm:$0xff]  ;;  %v16744_v42 = vcombine.high %v1333_v14, %v1337_v58  ;;  %v16743_v52 = vcombine.low %v1333_v14, %v1337_v58 }
 0x396   : > { %13816 = vmatprep.subr.bf16.mxu0 %v16760_v55  ;;  %v1465_v25 = vld [vmem:[%s18128_s25 + $0x2628] sm:$0xff] }
 0x397   : > { %13856 = vmatpush2.bf16.msra.mxu1 %v16895_v40  ;;  %v16872_v16 = vcombine.high %v1461_v35, %v1465_v25  ;;  %v1581_v24 = vld [vmem:[%s18128_s25 + $0x29c8] sm:$0xff]  ;;  %v16871_v46 = vcombine.low %v1461_v35, %v1465_v25 }
 0x398   : > { %13857 = vmatprep.subr.bf16.mxu1 %v16888_v20  ;;  %v1585_v29 = vld [vmem:[%s18128_s25 + $0x29e8] sm:$0xff] }
 0x399   : > { %13817 = vmatpush2.bf16.msra.mxu0 %v16759_v49  ;;  %v1709_v27 = vld [vmem:[%s18128_s25 + $0x2dc8] sm:$0xff]  ;;  %v16992_v40 = vcombine.high %v1581_v24, %v1585_v29  ;;  %v16991_v37 = vcombine.low %v1581_v24, %v1585_v29 }
 0x39a   : > { %13818 = vmatprep.subr.bf16.mxu0 %v16752_v7  ;;  %v1713_v31 = vld [vmem:[%s18128_s25 + $0x2de8] sm:$0xff] }
 0x39b   : > { %13858 = vmatpush2.bf16.msra.mxu1 %v16887_v48  ;;  %v17120_v55 = vcombine.high %v1709_v27, %v1713_v31  ;;  %v1573_v20 = vld [vmem:[%s18128_s25 + $0x2988] sm:$0xff]  ;;  %v17119_v49 = vcombine.low %v1709_v27, %v1713_v31 }
 0x39c   : > { %13859 = vmatprep.subr.bf16.mxu1 %v16880_v57  ;;  %v1577_v10 = vld [vmem:[%s18128_s25 + $0x29a8] sm:$0xff] }
 0x39d   : > { %13819 = vmatpush2.bf16.msra.mxu0 %v16751_v5  ;;  %v1701_v28 = vld [vmem:[%s18128_s25 + $0x2d88] sm:$0xff]  ;;  %v16984_v48 = vcombine.high %v1573_v20, %v1577_v10 }
 0x39e   : > { %13820 = vmatprep.subr.bf16.mxu0 %v16744_v42  ;;  %v1705_v2 = vld [vmem:[%s18128_s25 + $0x2da8] sm:$0xff]  ;;  %v16983_v42 = vcombine.low %v1573_v20, %v1577_v10 }
 0x39f   : > { %13860 = vmatpush2.bf16.msra.mxu1 %v16879_v18  ;;  %v17112_v7 = vcombine.high %v1701_v28, %v1705_v2  ;;  %v1565_v57 = vld [vmem:[%s18128_s25 + $0x2948] sm:$0xff]  ;;  %v17111_v24 = vcombine.low %v1701_v28, %v1705_v2 }
 0x3a0   : > { %13861 = vmatprep.subr.bf16.mxu1 %v16872_v16  ;;  %v1569_v14 = vld [vmem:[%s18128_s25 + $0x2968] sm:$0xff] }
 0x3a1   : > { %13821 = vmatpush2.bf16.msra.mxu0 %v16743_v52  ;;  %v1693_v35 = vld [vmem:[%s18128_s25 + $0x2d48] sm:$0xff]  ;;  %v16976_v29 = vcombine.high %v1565_v57, %v1569_v14 }
 0x3a2   : > { %13872 = vmatprep.subr.bf16.mxu0 %v16992_v40  ;;  %v1697_v25 = vld [vmem:[%s18128_s25 + $0x2d68] sm:$0xff] }
 0x3a3   : > { %13862 = vmatpush2.bf16.msra.mxu1 %v16871_v46  ;;  %v1557_v46 = vld [vmem:[%s18128_s25 + $0x2908] sm:$0xff] }
 0x3a4   : > { %13913 = vmatprep.subr.bf16.mxu1 %v17120_v55  ;;  %v13578_v58 = vpop.f32.mrf.mxu0  ;;  %13823 = vmatmul.mubr.bf16.vlgmr.msra.gmra.mxu0 %v18607_v50  ;;  %v1561_v40 = vld [vmem:[%s18128_s25 + $0x2928] sm:$0xff] }
 0x3a5   : > { %v13579_v5 = vadd.f32 %v13578_v58, %v19206_v45  ;;  %13873 = vmatpush1.bf16.msra.mxu0 %v16991_v37  ;;  %v17104_v45 = vcombine.high %v1693_v35, %v1697_v25  ;;  %13904 = vmatprep.mubr.bf16.mxu0 %v18614_v0  ;;  %v1685_v20 = vld [vmem:[%s18128_s25 + $0x2d08] sm:$0xff] }
 0x3a6   : > { %v13619_v18 = vpop.f32.mrf.mxu1  ;;  %13864 = vmatmul.mubr.bf16.vlgmr.msra.gmra.mxu1 %v18618_v60  ;;  %v13580_v16 = vpop.f32.mrf.mxu0  ;;  %13874 = vmatprep.subr.bf16.mxu0 %v16984_v48  ;;  %v1689_v10 = vld [vmem:[%s18128_s25 + $0x2d28] sm:$0xff]  ;;  %v16968_v48 = vcombine.high %v1557_v46, %v1561_v40 }
 0x3a7   : > { %13914 = vmatpush1.bf16.msra.mxu1 %v17119_v49  ;;  %v19279_v27 = vadd.f32 %v13619_v18, %v13579_v5  ;;  %v13581_v31 = vadd.f32 %v13580_v16, %v19214_v61  ;;  %13945 = vmatprep.mubr.bf16.mxu1 %v18627_v15  ;;  %v16975_v61 = vcombine.low %v1565_v57, %v1569_v14  ;;  %v1549_v5 = vld [vmem:[%s18128_s25 + $0x28c8] sm:$0xff] }
 0x3a8   : > { %v13621_v52 = vpop.f32.mrf.mxu1  ;;  %13915 = vmatprep.subr.bf16.mxu1 %v17112_v7  ;;  %v13582_v55 = vpop.f32.mrf.mxu0  ;;  %v17103_v49 = vcombine.low %v1693_v35, %v1697_v25  ;;  %v17096_v58 = vcombine.high %v1685_v20, %v1689_v10  ;;  %v1553_v18 = vld [vmem:[%s18128_s25 + $0x28e8] sm:$0xff]  ;;  %v17095_v57 = vcombine.low %v1685_v20, %v1689_v10 }
 0x3a9   : > { %v19288_v28 = vadd.f32 %v13621_v52, %v13581_v31  ;;  %13875 = vmatpush1.bf16.msra.mxu0 %v16983_v42  ;;  %v1677_v16 = vld [vmem:[%s18128_s25 + $0x2cc8] sm:$0xff]  ;;  %v16967_v52 = vcombine.low %v1557_v46, %v1561_v40  ;;  %v16960_v14 = vcombine.high %v1549_v5, %v1553_v18 }
 0x3aa   : > { %v13623_v2 = vpop.f32.mrf.mxu1  ;;  %v13583_v37 = vpop.f32.mrf.mxu0  ;;  %13876 = vmatprep.subr.bf16.mxu0 %v16976_v29  ;;  %v1681_v31 = vld [vmem:[%s18128_s25 + $0x2ce8] sm:$0xff] }
 0x3ab   : > { %13916 = vmatpush1.bf16.msra.mxu1 %v17111_v24  ;;  %v17088_v35 = vcombine.high %v1677_v16, %v1681_v31  ;;  %v1541_v25 = vld [vmem:[%s18128_s25 + $0x2888] sm:$0xff]  ;;  %v17087_v55 = vcombine.low %v1677_v16, %v1681_v31 }
 0x3ac   : > { %v13624_v7 = vpop.f32.mrf.mxu1  ;;  %13917 = vmatprep.subr.bf16.mxu1 %v17104_v45  ;;  %v1545_v42 = vld [vmem:[%s18128_s25 + $0x28a8] sm:$0xff]  ;;  %v16959_v45 = vcombine.low %v1549_v5, %v1553_v18 }
 0x3ad   : > { %13877 = vmatpush1.bf16.msra.mxu0 %v16975_v61  ;;  %v1669_v24 = vld [vmem:[%s18128_s25 + $0x2c88] sm:$0xff]  ;;  %v16952_v46 = vcombine.high %v1541_v25, %v1545_v42  ;;  %v16951_v37 = vcombine.low %v1541_v25, %v1545_v42 }
 0x3ae   : > { %13878 = vmatprep.subr.bf16.mxu0 %v16968_v48  ;;  %v1673_v29 = vld [vmem:[%s18128_s25 + $0x2ca8] sm:$0xff] }
 0x3af   : > { %13918 = vmatpush1.bf16.msra.mxu1 %v17103_v49  ;;  %v17080_v40 = vcombine.high %v1669_v24, %v1673_v29  ;;  %v1533_v20 = vld [vmem:[%s18128_s25 + $0x2848] sm:$0xff]  ;;  %v17079_v49 = vcombine.low %v1669_v24, %v1673_v29 }
 0x3b0   : > { %13919 = vmatprep.subr.bf16.mxu1 %v17096_v58  ;;  %v1537_v10 = vld [vmem:[%s18128_s25 + $0x2868] sm:$0xff] }
 0x3b1   : > { %13879 = vmatpush1.bf16.msra.mxu0 %v16967_v52  ;;  %v1661_v2 = vld [vmem:[%s18128_s25 + $0x2c48] sm:$0xff]  ;;  %v16944_v48 = vcombine.high %v1533_v20, %v1537_v10  ;;  %v16943_v31 = vcombine.low %v1533_v20, %v1537_v10 }
 0x3b2   : > { %13880 = vmatprep.subr.bf16.mxu0 %v16960_v14  ;;  %v1665_v61 = vld [vmem:[%s18128_s25 + $0x2c68] sm:$0xff] }
 0x3b3   : > { %13920 = vmatpush1.bf16.msra.mxu1 %v17095_v57  ;;  %v17072_v7 = vcombine.high %v1661_v2, %v1665_v61  ;;  %v1525_v58 = vld [vmem:[%s18128_s25 + $0x2808] sm:$0xff]  ;;  %v17071_v52 = vcombine.low %v1661_v2, %v1665_v61 }
 0x3b4   : > { %13921 = vmatprep.subr.bf16.mxu1 %v17088_v35  ;;  %v1529_v5 = vld [vmem:[%s18128_s25 + $0x2828] sm:$0xff] }
 0x3b5   : > { %13881 = vmatpush1.bf16.msra.mxu0 %v16959_v45  ;;  %v1653_v18 = vld [vmem:[%s18128_s25 + $0x2c08] sm:$0xff]  ;;  %v16936_v57 = vcombine.high %v1525_v58, %v1529_v5  ;;  %v16935_v29 = vcombine.low %v1525_v58, %v1529_v5 }
 0x3b6   : > { %13882 = vmatprep.subr.bf16.mxu0 %v16952_v46  ;;  %v1657_v16 = vld [vmem:[%s18128_s25 + $0x2c28] sm:$0xff] }
 0x3b7   : > { %13922 = vmatpush1.bf16.msra.mxu1 %v17087_v55  ;;  %v17064_v14 = vcombine.high %v1653_v18, %v1657_v16  ;;  %v1645_v35 = vld [vmem:[%s18128_s25 + $0x2bc8] sm:$0xff]  ;;  %v17063_v45 = vcombine.low %v1653_v18, %v1657_v16 }
 0x3b8   : > { %13923 = vmatprep.subr.bf16.mxu1 %v17080_v40  ;;  %v1649_v25 = vld [vmem:[%s18128_s25 + $0x2be8] sm:$0xff] }
 0x3b9   : > { %13883 = vmatpush1.bf16.msra.mxu0 %v16951_v37  ;;  %v1773_v42 = vld [vmem:[%s18128_s25 + $0x2fc8] sm:$0xff]  ;;  %v17056_v55 = vcombine.high %v1645_v35, %v1649_v25  ;;  %v17055_v61 = vcombine.low %v1645_v35, %v1649_v25 }
 0x3ba   : > { %13884 = vmatprep.subr.bf16.mxu0 %v16944_v48  ;;  %v1777_v24 = vld [vmem:[%s18128_s25 + $0x2fe8] sm:$0xff] }
 0x3bb   : > { %13924 = vmatpush1.bf16.msra.mxu1 %v17079_v49  ;;  %v17184_v46 = vcombine.high %v1773_v42, %v1777_v24  ;;  %v1637_v40 = vld [vmem:[%s18128_s25 + $0x2b88] sm:$0xff]  ;;  %v17183_v37 = vcombine.low %v1773_v42, %v1777_v24 }
 0x3bc   : > { %13925 = vmatprep.subr.bf16.mxu1 %v17072_v7  ;;  %v1641_v20 = vld [vmem:[%s18128_s25 + $0x2ba8] sm:$0xff] }
 0x3bd   : > { %13885 = vmatpush1.bf16.msra.mxu0 %v16943_v31  ;;  %v1765_v10 = vld [vmem:[%s18128_s25 + $0x2f88] sm:$0xff]  ;;  %v17048_v49 = vcombine.high %v1637_v40, %v1641_v20  ;;  %v17047_v16 = vcombine.low %v1637_v40, %v1641_v20 }
 0x3be   : > { %13886 = vmatprep.subr.bf16.mxu0 %v16936_v57  ;;  %v1769_v2 = vld [vmem:[%s18128_s25 + $0x2fa8] sm:$0xff] }
 0x3bf   : > { %13926 = vmatpush1.bf16.msra.mxu1 %v17071_v52  ;;  %v17176_v48 = vcombine.high %v1765_v10, %v1769_v2  ;;  %v1629_v7 = vld [vmem:[%s18128_s25 + $0x2b48] sm:$0xff]  ;;  %v17175_v31 = vcombine.low %v1765_v10, %v1769_v2 }
 0x3c0   : > { %13927 = vmatprep.subr.bf16.mxu1 %v17064_v14  ;;  %v1633_v58 = vld [vmem:[%s18128_s25 + $0x2b68] sm:$0xff] }
 0x3c1   : > { %13887 = vmatpush1.bf16.msra.mxu0 %v16935_v29  ;;  %v1757_v5 = vld [vmem:[%s18128_s25 + $0x2f48] sm:$0xff]  ;;  %v17040_v52 = vcombine.high %v1629_v7, %v1633_v58  ;;  %v17039_v24 = vcombine.low %v1629_v7, %v1633_v58 }
 0x3c2   : > { %13888 = vmatprep.subr.bf16.mxu0 %v17056_v55  ;;  %v1761_v18 = vld [vmem:[%s18128_s25 + $0x2f68] sm:$0xff] }
 0x3c3   : > { %13928 = vmatpush1.bf16.msra.mxu1 %v17063_v45  ;;  %v17168_v57 = vcombine.high %v1757_v5, %v1761_v18  ;;  %v1621_v14 = vld [vmem:[%s18128_s25 + $0x2b08] sm:$0xff]  ;;  %v17167_v29 = vcombine.low %v1757_v5, %v1761_v18 }
 0x3c4   : > { %13929 = vmatprep.subr.bf16.mxu1 %v17184_v46  ;;  %v1625_v35 = vld [vmem:[%s18128_s25 + $0x2b28] sm:$0xff] }
 0x3c5   : > { %13889 = vmatpush2.bf16.msra.mxu0 %v17055_v61  ;;  %v1749_v25 = vld [vmem:[%s18128_s25 + $0x2f08] sm:$0xff]  ;;  %v17032_v45 = vcombine.high %v1621_v14, %v1625_v35  ;;  %v17031_v2 = vcombine.low %v1621_v14, %v1625_v35 }
 0x3c6   : > { %13890 = vmatprep.subr.bf16.mxu0 %v17048_v49  ;;  %v1753_v42 = vld [vmem:[%s18128_s25 + $0x2f28] sm:$0xff] }
 0x3c7   : > { %13930 = vmatpush2.bf16.msra.mxu1 %v17183_v37  ;;  %v17160_v55 = vcombine.high %v1749_v25, %v1753_v42  ;;  %v1613_v46 = vld [vmem:[%s18128_s25 + $0x2ac8] sm:$0xff]  ;;  %v17159_v61 = vcombine.low %v1749_v25, %v1753_v42 }
 0x3c8   : > { %13931 = vmatprep.subr.bf16.mxu1 %v17176_v48  ;;  %v1617_v40 = vld [vmem:[%s18128_s25 + $0x2ae8] sm:$0xff] }
 0x3c9   : > { %13891 = vmatpush2.bf16.msra.mxu0 %v17047_v16  ;;  %v1741_v20 = vld [vmem:[%s18128_s25 + $0x2ec8] sm:$0xff]  ;;  %v17024_v37 = vcombine.high %v1613_v46, %v1617_v40  ;;  %v17023_v18 = vcombine.low %v1613_v46, %v1617_v40 }
 0x3ca   : > { %13892 = vmatprep.subr.bf16.mxu0 %v17040_v52  ;;  %v1745_v10 = vld [vmem:[%s18128_s25 + $0x2ee8] sm:$0xff] }
 0x3cb   : > { %13932 = vmatpush2.bf16.msra.mxu1 %v17175_v31  ;;  %v17152_v49 = vcombine.high %v1741_v20, %v1745_v10  ;;  %v1605_v48 = vld [vmem:[%s18128_s25 + $0x2a88] sm:$0xff]  ;;  %v17151_v16 = vcombine.low %v1741_v20, %v1745_v10 }
 0x3cc   : > { %13933 = vmatprep.subr.bf16.mxu1 %v17168_v57  ;;  %v1609_v7 = vld [vmem:[%s18128_s25 + $0x2aa8] sm:$0xff] }
 0x3cd   : > { %13893 = vmatpush2.bf16.msra.mxu0 %v17039_v24  ;;  %v1733_v58 = vld [vmem:[%s18128_s25 + $0x2e88] sm:$0xff]  ;;  %v17016_v31 = vcombine.high %v1605_v48, %v1609_v7  ;;  %v17015_v42 = vcombine.low %v1605_v48, %v1609_v7 }
 0x3ce   : > { %13894 = vmatprep.subr.bf16.mxu0 %v17032_v45  ;;  %v1737_v5 = vld [vmem:[%s18128_s25 + $0x2ea8] sm:$0xff] }
 0x3cf   : > { %13934 = vmatpush2.bf16.msra.mxu1 %v17167_v29  ;;  %v17144_v52 = vcombine.high %v1733_v58, %v1737_v5  ;;  %v1597_v57 = vld [vmem:[%s18128_s25 + $0x2a48] sm:$0xff]  ;;  %v17143_v24 = vcombine.low %v1733_v58, %v1737_v5 }
 0x3d0   : > { %13935 = vmatprep.subr.bf16.mxu1 %v17160_v55  ;;  %v1601_v14 = vld [vmem:[%s18128_s25 + $0x2a68] sm:$0xff] }
 0x3d1   : > { %13895 = vmatpush2.bf16.msra.mxu0 %v17031_v2  ;;  %v1725_v35 = vld [vmem:[%s18128_s25 + $0x2e48] sm:$0xff]  ;;  %v17008_v29 = vcombine.high %v1597_v57, %v1601_v14  ;;  %v17007_v10 = vcombine.low %v1597_v57, %v1601_v14 }
 0x3d2   : > { %13896 = vmatprep.subr.bf16.mxu0 %v17024_v37  ;;  %v1729_v25 = vld [vmem:[%s18128_s25 + $0x2e68] sm:$0xff] }
 0x3d3   : > { %13936 = vmatpush2.bf16.msra.mxu1 %v17159_v61  ;;  %v17136_v45 = vcombine.high %v1725_v35, %v1729_v25  ;;  %v1589_v55 = vld [vmem:[%s18128_s25 + $0x2a08] sm:$0xff]  ;;  %v17135_v2 = vcombine.low %v1725_v35, %v1729_v25 }
 0x3d4   : > { %13937 = vmatprep.subr.bf16.mxu1 %v17152_v49  ;;  %v1593_v46 = vld [vmem:[%s18128_s25 + $0x2a28] sm:$0xff] }
 0x3d5   : > { %13897 = vmatpush2.bf16.msra.mxu0 %v17023_v18  ;;  %v1717_v40 = vld [vmem:[%s18128_s25 + $0x2e08] sm:$0xff]  ;;  %v17000_v61 = vcombine.high %v1589_v55, %v1593_v46  ;;  %v16999_v5 = vcombine.low %v1589_v55, %v1593_v46 }
 0x3d6   : > { %13898 = vmatprep.subr.bf16.mxu0 %v17016_v31  ;;  %v1721_v20 = vld [vmem:[%s18128_s25 + $0x2e28] sm:$0xff] }
 0x3d7   : > { %13938 = vmatpush2.bf16.msra.mxu1 %v17151_v16  ;;  %v17128_v37 = vcombine.high %v1717_v40, %v1721_v20  ;;  %v1837_v49 = vld [vmem:[%s18128_s25 + $0x31c8] sm:$0xff]  ;;  %v17127_v18 = vcombine.low %v1717_v40, %v1721_v20 }
 0x3d8   : > { %13939 = vmatprep.subr.bf16.mxu1 %v17144_v52  ;;  %v1841_v48 = vld [vmem:[%s18128_s25 + $0x31e8] sm:$0xff] }
 0x3d9   : > { %13899 = vmatpush2.bf16.msra.mxu0 %v17015_v42  ;;  %v1965_v7 = vld [vmem:[%s18128_s25 + $0x35c8] sm:$0xff]  ;;  %v17248_v16 = vcombine.high %v1837_v49, %v1841_v48  ;;  %v17247_v25 = vcombine.low %v1837_v49, %v1841_v48 }
 0x3da   : > { %13900 = vmatprep.subr.bf16.mxu0 %v17008_v29  ;;  %v1969_v58 = vld [vmem:[%s18128_s25 + $0x35e8] sm:$0xff] }
 0x3db   : > { %13940 = vmatpush2.bf16.msra.mxu1 %v17143_v24  ;;  %v17376_v31 = vcombine.high %v1965_v7, %v1969_v58  ;;  %v1829_v52 = vld [vmem:[%s18128_s25 + $0x3188] sm:$0xff]  ;;  %v17375_v42 = vcombine.low %v1965_v7, %v1969_v58 }
 0x3dc   : > { %13941 = vmatprep.subr.bf16.mxu1 %v17136_v45  ;;  %v1833_v57 = vld [vmem:[%s18128_s25 + $0x31a8] sm:$0xff] }
 0x3dd   : > { %13901 = vmatpush2.bf16.msra.mxu0 %v17007_v10  ;;  %v1957_v14 = vld [vmem:[%s18128_s25 + $0x3588] sm:$0xff]  ;;  %v17240_v24 = vcombine.high %v1829_v52, %v1833_v57 }
 0x3de   : > { %13902 = vmatprep.subr.bf16.mxu0 %v17000_v61  ;;  %v1961_v35 = vld [vmem:[%s18128_s25 + $0x35a8] sm:$0xff]  ;;  %v17239_v61 = vcombine.low %v1829_v52, %v1833_v57 }
 0x3df   : > { %13942 = vmatpush2.bf16.msra.mxu1 %v17135_v2  ;;  %v17368_v29 = vcombine.high %v1957_v14, %v1961_v35  ;;  %v1821_v45 = vld [vmem:[%s18128_s25 + $0x3148] sm:$0xff]  ;;  %v17367_v49 = vcombine.low %v1957_v14, %v1961_v35 }
 0x3e0   : > { %13943 = vmatprep.subr.bf16.mxu1 %v17128_v37  ;;  %v1825_v55 = vld [vmem:[%s18128_s25 + $0x3168] sm:$0xff] }
 0x3e1   : > { %13903 = vmatpush2.bf16.msra.mxu0 %v16999_v5  ;;  %v1949_v40 = vld [vmem:[%s18128_s25 + $0x3548] sm:$0xff]  ;;  %v17232_v48 = vcombine.high %v1821_v45, %v1825_v55 }
 0x3e2   : > { %13954 = vmatprep.subr.bf16.mxu0 %v17248_v16  ;;  %v1953_v20 = vld [vmem:[%s18128_s25 + $0x3568] sm:$0xff] }
 0x3e3   : > { %13944 = vmatpush2.bf16.msra.mxu1 %v17127_v18  ;;  %v1813_v18 = vld [vmem:[%s18128_s25 + $0x3108] sm:$0xff] }
 0x3e4   : > { %13995 = vmatprep.subr.bf16.mxu1 %v17376_v31  ;;  %v13660_v46 = vpop.f32.mrf.mxu0  ;;  %13905 = vmatmul.mubr.bf16.vlgmr.msra.gmra.mxu0 %v18704_v38  ;;  %v1817_v16 = vld [vmem:[%s18128_s25 + $0x3128] sm:$0xff] }
 0x3e5   : > { %v13661_v10 = vadd.f32 %v13660_v46, %v19279_v27  ;;  %13955 = vmatpush1.bf16.msra.mxu0 %v17247_v25  ;;  %v17360_v27 = vcombine.high %v1949_v40, %v1953_v20  ;;  %13986 = vmatprep.mubr.bf16.mxu0 %v18711_v54  ;;  %v1941_v52 = vld [vmem:[%s18128_s25 + $0x3508] sm:$0xff] }
 0x3e6   : > { %v13701_v2 = vpop.f32.mrf.mxu1  ;;  %13946 = vmatmul.mubr.bf16.vlgmr.msra.gmra.mxu1 %v18715_v33  ;;  %v13662_v37 = vpop.f32.mrf.mxu0  ;;  %13956 = vmatprep.subr.bf16.mxu0 %v17240_v24  ;;  %v1945_v57 = vld [vmem:[%s18128_s25 + $0x3528] sm:$0xff]  ;;  %v17224_v24 = vcombine.high %v1813_v18, %v1817_v16 }
 0x3e7   : > { %13996 = vmatpush1.bf16.msra.mxu1 %v17375_v42  ;;  %v19353_v7 = vadd.f32 %v13701_v2, %v13661_v10  ;;  %v13663_v58 = vadd.f32 %v13662_v37, %v19288_v28  ;;  %14027 = vmatprep.mubr.bf16.mxu1 %v18724_v8  ;;  %v17231_v28 = vcombine.low %v1821_v45, %v1825_v55  ;;  %v1805_v10 = vld [vmem:[%s18128_s25 + $0x30c8] sm:$0xff] }
 0x3e8   : > { %v13703_v5 = vpop.f32.mrf.mxu1  ;;  %13997 = vmatprep.subr.bf16.mxu1 %v17368_v29  ;;  %v13664_v31 = vpop.f32.mrf.mxu0  ;;  %v17359_v42 = vcombine.low %v1949_v40, %v1953_v20  ;;  %v17352_v46 = vcombine.high %v1941_v52, %v1945_v57  ;;  %v1809_v2 = vld [vmem:[%s18128_s25 + $0x30e8] sm:$0xff]  ;;  %v17351_v45 = vcombine.low %v1941_v52, %v1945_v57 }
 0x3e9   : > { %v19362_v14 = vadd.f32 %v13703_v5, %v13663_v58  ;;  %13957 = vmatpush1.bf16.msra.mxu0 %v17239_v61  ;;  %v1933_v37 = vld [vmem:[%s18128_s25 + $0x34c8] sm:$0xff]  ;;  %v17223_v5 = vcombine.low %v1813_v18, %v1817_v16  ;;  %v17216_v55 = vcombine.high %v1805_v10, %v1809_v2 }
 0x3ea   : > { %v13705_v35 = vpop.f32.mrf.mxu1  ;;  %v13665_v25 = vpop.f32.mrf.mxu0  ;;  %13958 = vmatprep.subr.bf16.mxu0 %v17232_v48  ;;  %v1937_v58 = vld [vmem:[%s18128_s25 + $0x34e8] sm:$0xff] }
 0x3eb   : > { %13998 = vmatpush1.bf16.msra.mxu1 %v17367_v49  ;;  %v17344_v40 = vcombine.high %v1933_v37, %v1937_v58  ;;  %v1797_v20 = vld [vmem:[%s18128_s25 + $0x3088] sm:$0xff]  ;;  %v17343_v31 = vcombine.low %v1933_v37, %v1937_v58 }
 0x3ec   : > { %v13706_v29 = vpop.f32.mrf.mxu1  ;;  %13999 = vmatprep.subr.bf16.mxu1 %v17360_v27  ;;  %v1801_v61 = vld [vmem:[%s18128_s25 + $0x30a8] sm:$0xff]  ;;  %v17215_v27 = vcombine.low %v1805_v10, %v1809_v2 }
 0x3ed   : > { %13959 = vmatpush1.bf16.msra.mxu0 %v17231_v28  ;;  %v1925_v49 = vld [vmem:[%s18128_s25 + $0x3488] sm:$0xff]  ;;  %v17208_v18 = vcombine.high %v1797_v20, %v1801_v61  ;;  %v17207_v25 = vcombine.low %v1797_v20, %v1801_v61 }
 0x3ee   : > { %13960 = vmatprep.subr.bf16.mxu0 %v17224_v24  ;;  %v1929_v48 = vld [vmem:[%s18128_s25 + $0x34a8] sm:$0xff] }
 0x3ef   : > { %14000 = vmatpush1.bf16.msra.mxu1 %v17359_v42  ;;  %v17336_v16 = vcombine.high %v1925_v49, %v1929_v48  ;;  %v1789_v52 = vld [vmem:[%s18128_s25 + $0x3048] sm:$0xff]  ;;  %v17335_v42 = vcombine.low %v1925_v49, %v1929_v48 }
 0x3f0   : > { %14001 = vmatprep.subr.bf16.mxu1 %v17352_v46  ;;  %v1793_v57 = vld [vmem:[%s18128_s25 + $0x3068] sm:$0xff] }
 0x3f1   : > { %13961 = vmatpush1.bf16.msra.mxu0 %v17223_v5  ;;  %v1917_v35 = vld [vmem:[%s18128_s25 + $0x3448] sm:$0xff]  ;;  %v17200_v24 = vcombine.high %v1789_v52, %v1793_v57  ;;  %v17199_v58 = vcombine.low %v1789_v52, %v1793_v57 }
 0x3f2   : > { %13962 = vmatprep.subr.bf16.mxu0 %v17216_v55  ;;  %v1921_v28 = vld [vmem:[%s18128_s25 + $0x3468] sm:$0xff] }
 0x3f3   : > { %14002 = vmatpush1.bf16.msra.mxu1 %v17351_v45  ;;  %v17328_v29 = vcombine.high %v1917_v35, %v1921_v28  ;;  %v1781_v46 = vld [vmem:[%s18128_s25 + $0x3008] sm:$0xff]  ;;  %v17327_v5 = vcombine.low %v1917_v35, %v1921_v28 }
 0x3f4   : > { %14003 = vmatprep.subr.bf16.mxu1 %v17344_v40  ;;  %v1785_v10 = vld [vmem:[%s18128_s25 + $0x3028] sm:$0xff] }
 0x3f5   : > { %13963 = vmatpush1.bf16.msra.mxu0 %v17215_v27  ;;  %v1909_v2 = vld [vmem:[%s18128_s25 + $0x3408] sm:$0xff]  ;;  %v17192_v45 = vcombine.high %v1781_v46, %v1785_v10  ;;  %v17191_v48 = vcombine.low %v1781_v46, %v1785_v10 }
 0x3f6   : > { %13964 = vmatprep.subr.bf16.mxu0 %v17208_v18  ;;  %v1913_v37 = vld [vmem:[%s18128_s25 + $0x3428] sm:$0xff] }
 0x3f7   : > { %14004 = vmatpush1.bf16.msra.mxu1 %v17343_v31  ;;  %v17320_v55 = vcombine.high %v1909_v2, %v1913_v37  ;;  %v1901_v40 = vld [vmem:[%s18128_s25 + $0x33c8] sm:$0xff]  ;;  %v17319_v27 = vcombine.low %v1909_v2, %v1913_v37 }
 0x3f8   : > { %14005 = vmatprep.subr.bf16.mxu1 %v17336_v16  ;;  %v1905_v20 = vld [vmem:[%s18128_s25 + $0x33e8] sm:$0xff] }
 0x3f9   : > { %13965 = vmatpush1.bf16.msra.mxu0 %v17207_v25  ;;  %v2029_v61 = vld [vmem:[%s18128_s25 + $0x37c8] sm:$0xff]  ;;  %v17312_v31 = vcombine.high %v1901_v40, %v1905_v20  ;;  %v17311_v28 = vcombine.low %v1901_v40, %v1905_v20 }
 0x3fa   : > { %13966 = vmatprep.subr.bf16.mxu0 %v17200_v24  ;;  %v2033_v49 = vld [vmem:[%s18128_s25 + $0x37e8] sm:$0xff] }
 0x3fb   : > { %14006 = vmatpush1.bf16.msra.mxu1 %v17335_v42  ;;  %v17440_v18 = vcombine.high %v2029_v61, %v2033_v49  ;;  %v1893_v16 = vld [vmem:[%s18128_s25 + $0x3388] sm:$0xff]  ;;  %v17439_v25 = vcombine.low %v2029_v61, %v2033_v49 }
 0x3fc   : > { %14007 = vmatprep.subr.bf16.mxu1 %v17328_v29  ;;  %v1897_v52 = vld [vmem:[%s18128_s25 + $0x33a8] sm:$0xff] }
 0x3fd   : > { %13967 = vmatpush1.bf16.msra.mxu0 %v17199_v58  ;;  %v2021_v57 = vld [vmem:[%s18128_s25 + $0x3788] sm:$0xff]  ;;  %v17304_v42 = vcombine.high %v1893_v16, %v1897_v52  ;;  %v17303_v37 = vcombine.low %v1893_v16, %v1897_v52 }
 0x3fe   : > { %13968 = vmatprep.subr.bf16.mxu0 %v17192_v45  ;;  %v2025_v35 = vld [vmem:[%s18128_s25 + $0x37a8] sm:$0xff] }
 0x3ff   : > { %14008 = vmatpush1.bf16.msra.mxu1 %v17327_v5  ;;  %v17432_v24 = vcombine.high %v2021_v57, %v2025_v35  ;;  %v1885_v29 = vld [vmem:[%s18128_s25 + $0x3348] sm:$0xff]  ;;  %v17431_v58 = vcombine.low %v2021_v57, %v2025_v35 }
 0x400   : > { %14009 = vmatprep.subr.bf16.mxu1 %v17320_v55  ;;  %v1889_v46 = vld [vmem:[%s18128_s25 + $0x3368] sm:$0xff] }
 0x401   : > { %13969 = vmatpush1.bf16.msra.mxu0 %v17191_v48  ;;  %v2013_v10 = vld [vmem:[%s18128_s25 + $0x3748] sm:$0xff]  ;;  %v17296_v5 = vcombine.high %v1885_v29, %v1889_v46  ;;  %v17295_v49 = vcombine.low %v1885_v29, %v1889_v46 }
 0x402   : > { %13970 = vmatprep.subr.bf16.mxu0 %v17312_v31  ;;  %v2017_v2 = vld [vmem:[%s18128_s25 + $0x3768] sm:$0xff] }
 0x403   : > { %14010 = vmatpush1.bf16.msra.mxu1 %v17319_v27  ;;  %v17424_v45 = vcombine.high %v2013_v10, %v2017_v2  ;;  %v1877_v55 = vld [vmem:[%s18128_s25 + $0x3308] sm:$0xff]  ;;  %v17423_v48 = vcombine.low %v2013_v10, %v2017_v2 }
 0x404   : > { %14011 = vmatprep.subr.bf16.mxu1 %v17440_v18  ;;  %v1881_v40 = vld [vmem:[%s18128_s25 + $0x3328] sm:$0xff] }
 0x405   : > { %13971 = vmatpush2.bf16.msra.mxu0 %v17311_v28  ;;  %v2005_v20 = vld [vmem:[%s18128_s25 + $0x3708] sm:$0xff]  ;;  %v17288_v27 = vcombine.high %v1877_v55, %v1881_v40  ;;  %v17287_v35 = vcombine.low %v1877_v55, %v1881_v40 }
 0x406   : > { %13972 = vmatprep.subr.bf16.mxu0 %v17304_v42  ;;  %v2009_v61 = vld [vmem:[%s18128_s25 + $0x3728] sm:$0xff] }
 0x407   : > { %14012 = vmatpush2.bf16.msra.mxu1 %v17439_v25  ;;  %v17416_v31 = vcombine.high %v2005_v20, %v2009_v61  ;;  %v1869_v18 = vld [vmem:[%s18128_s25 + $0x32c8] sm:$0xff]  ;;  %v17415_v28 = vcombine.low %v2005_v20, %v2009_v61 }
 0x408   : > { %14013 = vmatprep.subr.bf16.mxu1 %v17432_v24  ;;  %v1873_v16 = vld [vmem:[%s18128_s25 + $0x32e8] sm:$0xff] }
 0x409   : > { %13973 = vmatpush2.bf16.msra.mxu0 %v17303_v37  ;;  %v1997_v52 = vld [vmem:[%s18128_s25 + $0x36c8] sm:$0xff]  ;;  %v17280_v25 = vcombine.high %v1869_v18, %v1873_v16  ;;  %v17279_v2 = vcombine.low %v1869_v18, %v1873_v16 }
 0x40a   : > { %13974 = vmatprep.subr.bf16.mxu0 %v17296_v5  ;;  %v2001_v57 = vld [vmem:[%s18128_s25 + $0x36e8] sm:$0xff] }
 0x40b   : > { %14014 = vmatpush2.bf16.msra.mxu1 %v17431_v58  ;;  %v17408_v42 = vcombine.high %v1997_v52, %v2001_v57  ;;  %v1861_v24 = vld [vmem:[%s18128_s25 + $0x3288] sm:$0xff]  ;;  %v17407_v37 = vcombine.low %v1997_v52, %v2001_v57 }
 0x40c   : > { %14015 = vmatprep.subr.bf16.mxu1 %v17424_v45  ;;  %v1865_v29 = vld [vmem:[%s18128_s25 + $0x32a8] sm:$0xff] }
 0x40d   : > { %13975 = vmatpush2.bf16.msra.mxu0 %v17295_v49  ;;  %v1989_v46 = vld [vmem:[%s18128_s25 + $0x3688] sm:$0xff]  ;;  %v17272_v58 = vcombine.high %v1861_v24, %v1865_v29  ;;  %v17271_v61 = vcombine.low %v1861_v24, %v1865_v29 }
 0x40e   : > { %13976 = vmatprep.subr.bf16.mxu0 %v17288_v27  ;;  %v1993_v10 = vld [vmem:[%s18128_s25 + $0x36a8] sm:$0xff] }
 0x40f   : > { %14016 = vmatpush2.bf16.msra.mxu1 %v17423_v48  ;;  %v17400_v5 = vcombine.high %v1989_v46, %v1993_v10  ;;  %v1853_v45 = vld [vmem:[%s18128_s25 + $0x3248] sm:$0xff]  ;;  %v17399_v49 = vcombine.low %v1989_v46, %v1993_v10 }
 0x410   : > { %14017 = vmatprep.subr.bf16.mxu1 %v17416_v31  ;;  %v1857_v55 = vld [vmem:[%s18128_s25 + $0x3268] sm:$0xff] }
 0x411   : > { %13977 = vmatpush2.bf16.msra.mxu0 %v17287_v35  ;;  %v1981_v40 = vld [vmem:[%s18128_s25 + $0x3648] sm:$0xff]  ;;  %v17264_v48 = vcombine.high %v1853_v45, %v1857_v55  ;;  %v17263_v57 = vcombine.low %v1853_v45, %v1857_v55 }
 0x412   : > { %13978 = vmatprep.subr.bf16.mxu0 %v17280_v25  ;;  %v1985_v20 = vld [vmem:[%s18128_s25 + $0x3668] sm:$0xff] }
 0x413   : > { %14018 = vmatpush2.bf16.msra.mxu1 %v17415_v28  ;;  %v17392_v27 = vcombine.high %v1981_v40, %v1985_v20  ;;  %v1845_v31 = vld [vmem:[%s18128_s25 + $0x3208] sm:$0xff]  ;;  %v17391_v35 = vcombine.low %v1981_v40, %v1985_v20 }
 0x414   : > { %14019 = vmatprep.subr.bf16.mxu1 %v17408_v42  ;;  %v1849_v18 = vld [vmem:[%s18128_s25 + $0x3228] sm:$0xff] }
 0x415   : > { %13979 = vmatpush2.bf16.msra.mxu0 %v17279_v2  ;;  %v1973_v16 = vld [vmem:[%s18128_s25 + $0x3608] sm:$0xff]  ;;  %v17256_v28 = vcombine.high %v1845_v31, %v1849_v18  ;;  %v17255_v10 = vcombine.low %v1845_v31, %v1849_v18 }
 0x416   : > { %13980 = vmatprep.subr.bf16.mxu0 %v17272_v58  ;;  %v1977_v52 = vld [vmem:[%s18128_s25 + $0x3628] sm:$0xff] }
 0x417   : > { %14020 = vmatpush2.bf16.msra.mxu1 %v17407_v37  ;;  %v17384_v25 = vcombine.high %v1973_v16, %v1977_v52  ;;  %v2093_v42 = vld [vmem:[%s18128_s25 + $0x39c8] sm:$0xff]  ;;  %v17383_v2 = vcombine.low %v1973_v16, %v1977_v52 }
 0x418   : > { %14021 = vmatprep.subr.bf16.mxu1 %v17400_v5  ;;  %v2097_v24 = vld [vmem:[%s18128_s25 + $0x39e8] sm:$0xff] }
 0x419   : > { %13981 = vmatpush2.bf16.msra.mxu0 %v17271_v61  ;;  %v2221_v29 = vld [vmem:[%s18128_s25 + $0x3dc8] sm:$0xff]  ;;  %v17504_v37 = vcombine.high %v2093_v42, %v2097_v24  ;;  %v17503_v20 = vcombine.low %v2093_v42, %v2097_v24 }
 0x41a   : > { %13982 = vmatprep.subr.bf16.mxu0 %v17264_v48  ;;  %v2225_v46 = vld [vmem:[%s18128_s25 + $0x3de8] sm:$0xff] }
 0x41b   : > { %14022 = vmatpush2.bf16.msra.mxu1 %v17399_v49  ;;  %v17632_v58 = vcombine.high %v2221_v29, %v2225_v46  ;;  %v2085_v5 = vld [vmem:[%s18128_s25 + $0x3988] sm:$0xff]  ;;  %v17631_v61 = vcombine.low %v2221_v29, %v2225_v46 }
 0x41c   : > { %14023 = vmatprep.subr.bf16.mxu1 %v17392_v27  ;;  %v2089_v45 = vld [vmem:[%s18128_s25 + $0x39a8] sm:$0xff] }
 0x41d   : > { %13983 = vmatpush2.bf16.msra.mxu0 %v17263_v57  ;;  %v2213_v55 = vld [vmem:[%s18128_s25 + $0x3d88] sm:$0xff]  ;;  %v17496_v49 = vcombine.high %v2085_v5, %v2089_v45 }
 0x41e   : > { %13984 = vmatprep.subr.bf16.mxu0 %v17256_v28  ;;  %v2217_v40 = vld [vmem:[%s18128_s25 + $0x3da8] sm:$0xff]  ;;  %v17495_v28 = vcombine.low %v2085_v5, %v2089_v45 }
 0x41f   : > { %14024 = vmatpush2.bf16.msra.mxu1 %v17391_v35  ;;  %v17624_v48 = vcombine.high %v2213_v55, %v2217_v40  ;;  %v2077_v27 = vld [vmem:[%s18128_s25 + $0x3948] sm:$0xff]  ;;  %v17623_v42 = vcombine.low %v2213_v55, %v2217_v40 }
 0x420   : > { %14025 = vmatprep.subr.bf16.mxu1 %v17384_v25  ;;  %v2081_v31 = vld [vmem:[%s18128_s25 + $0x3968] sm:$0xff] }
 0x421   : > { %13985 = vmatpush2.bf16.msra.mxu0 %v17255_v10  ;;  %v2205_v16 = vld [vmem:[%s18128_s25 + $0x3d48] sm:$0xff]  ;;  %v17488_v24 = vcombine.high %v2077_v27, %v2081_v31 }
 0x422   : > { %14036 = vmatprep.subr.bf16.mxu0 %v17504_v37  ;;  %v2209_v52 = vld [vmem:[%s18128_s25 + $0x3d68] sm:$0xff] }
 0x423   : > { %14026 = vmatpush2.bf16.msra.mxu1 %v17383_v2  ;;  %v2069_v2 = vld [vmem:[%s18128_s25 + $0x3908] sm:$0xff] }
 0x424   : > { %14077 = vmatprep.subr.bf16.mxu1 %v17632_v58  ;;  %v13742_v18 = vpop.f32.mrf.mxu0  ;;  %13987 = vmatmul.mubr.bf16.vlgmr.msra.gmra.mxu0 %v18800_v1  ;;  %v2073_v37 = vld [vmem:[%s18128_s25 + $0x3928] sm:$0xff] }
 0x425   : > { %v13743_v57 = vadd.f32 %v13742_v18, %v19353_v7  ;;  %14037 = vmatpush1.bf16.msra.mxu0 %v17503_v20  ;;  %v17616_v7 = vcombine.high %v2205_v16, %v2209_v52  ;;  %14068 = vmatprep.mubr.bf16.mxu0 %v18807_v17  ;;  %v2197_v5 = vld [vmem:[%s18128_s25 + $0x3d08] sm:$0xff] }
 0x426   : > { %v13783_v35 = vpop.f32.mrf.mxu1  ;;  %14028 = vmatmul.mubr.bf16.vlgmr.msra.gmra.mxu1 %v18811_v19  ;;  %v13744_v25 = vpop.f32.mrf.mxu0  ;;  %14038 = vmatprep.subr.bf16.mxu0 %v17496_v49  ;;  %v2201_v45 = vld [vmem:[%s18128_s25 + $0x3d28] sm:$0xff]  ;;  %v17480_v49 = vcombine.high %v2069_v2, %v2073_v37 }
 0x427   : > { %14078 = vmatpush1.bf16.msra.mxu1 %v17631_v61  ;;  %v19427_v29 = vadd.f32 %v13783_v35, %v13743_v57  ;;  %v13745_v46 = vadd.f32 %v13744_v25, %v19362_v14  ;;  %14109 = vmatprep.mubr.bf16.mxu1 %v18820_v36  ;;  %v17487_v14 = vcombine.low %v2077_v27, %v2081_v31  ;;  %v2061_v57 = vld [vmem:[%s18128_s25 + $0x38c8] sm:$0xff] }
 0x428   : > { %v13785_v10 = vpop.f32.mrf.mxu1  ;;  %14079 = vmatprep.subr.bf16.mxu1 %v17624_v48  ;;  %v13746_v58 = vpop.f32.mrf.mxu0  ;;  %v17615_v61 = vcombine.low %v2205_v16, %v2209_v52  ;;  %v17608_v18 = vcombine.high %v2197_v5, %v2201_v45  ;;  %v2065_v35 = vld [vmem:[%s18128_s25 + $0x38e8] sm:$0xff]  ;;  %v17607_v27 = vcombine.low %v2197_v5, %v2201_v45 }
 0x429   : > { %v19436_v55 = vadd.f32 %v13785_v10, %v13745_v46  ;;  %14039 = vmatpush1.bf16.msra.mxu0 %v17495_v28  ;;  %v2189_v25 = vld [vmem:[%s18128_s25 + $0x3cc8] sm:$0xff]  ;;  %v17479_v10 = vcombine.low %v2069_v2, %v2073_v37  ;;  %v17472_v31 = vcombine.high %v2061_v57, %v2065_v35 }
 0x42a   : > { %v13787_v40 = vpop.f32.mrf.mxu1  ;;  %v13747_v20 = vpop.f32.mrf.mxu0  ;;  %14040 = vmatprep.subr.bf16.mxu0 %v17488_v24  ;;  %v2193_v46 = vld [vmem:[%s18128_s25 + $0x3ce8] sm:$0xff] }
 0x42b   : > { %14080 = vmatpush1.bf16.msra.mxu1 %v17623_v42  ;;  %v17600_v16 = vcombine.high %v2189_v25, %v2193_v46  ;;  %v2053_v52 = vld [vmem:[%s18128_s25 + $0x3888] sm:$0xff]  ;;  %v17599_v58 = vcombine.low %v2189_v25, %v2193_v46 }
 0x42c   : > { %v13788_v48 = vpop.f32.mrf.mxu1  ;;  %14081 = vmatprep.subr.bf16.mxu1 %v17616_v7  ;;  %v2057_v28 = vld [vmem:[%s18128_s25 + $0x38a8] sm:$0xff]  ;;  %v17471_v7 = vcombine.low %v2061_v57, %v2065_v35 }
 0x42d   : > { %14041 = vmatpush1.bf16.msra.mxu0 %v17487_v14  ;;  %v2181_v42 = vld [vmem:[%s18128_s25 + $0x3c88] sm:$0xff]  ;;  %v17464_v2 = vcombine.high %v2053_v52, %v2057_v28  ;;  %v17463_v20 = vcombine.low %v2053_v52, %v2057_v28 }
 0x42e   : > { %14042 = vmatprep.subr.bf16.mxu0 %v17480_v49  ;;  %v2185_v24 = vld [vmem:[%s18128_s25 + $0x3ca8] sm:$0xff] }
 0x42f   : > { %14082 = vmatpush1.bf16.msra.mxu1 %v17615_v61  ;;  %v17592_v37 = vcombine.high %v2181_v42, %v2185_v24  ;;  %v2045_v5 = vld [vmem:[%s18128_s25 + $0x3848] sm:$0xff]  ;;  %v17591_v61 = vcombine.low %v2181_v42, %v2185_v24 }
 0x430   : > { %14083 = vmatprep.subr.bf16.mxu1 %v17608_v18  ;;  %v2049_v45 = vld [vmem:[%s18128_s25 + $0x3868] sm:$0xff] }
 0x431   : > { %14043 = vmatpush1.bf16.msra.mxu0 %v17479_v10  ;;  %v2173_v40 = vld [vmem:[%s18128_s25 + $0x3c48] sm:$0xff]  ;;  %v17456_v49 = vcombine.high %v2045_v5, %v2049_v45  ;;  %v17455_v46 = vcombine.low %v2045_v5, %v2049_v45 }
 0x432   : > { %14044 = vmatprep.subr.bf16.mxu0 %v17472_v31  ;;  %v2177_v14 = vld [vmem:[%s18128_s25 + $0x3c68] sm:$0xff] }
 0x433   : > { %14084 = vmatpush1.bf16.msra.mxu1 %v17607_v27  ;;  %v17584_v48 = vcombine.high %v2173_v40, %v2177_v14  ;;  %v2037_v18 = vld [vmem:[%s18128_s25 + $0x3808] sm:$0xff]  ;;  %v17583_v10 = vcombine.low %v2173_v40, %v2177_v14 }
 0x434   : > { %14085 = vmatprep.subr.bf16.mxu1 %v17600_v16  ;;  %v2041_v57 = vld [vmem:[%s18128_s25 + $0x3828] sm:$0xff] }
 0x435   : > { %14045 = vmatpush1.bf16.msra.mxu0 %v17471_v7  ;;  %v2165_v35 = vld [vmem:[%s18128_s25 + $0x3c08] sm:$0xff]  ;;  %v17448_v27 = vcombine.high %v2037_v18, %v2041_v57  ;;  %v17447_v24 = vcombine.low %v2037_v18, %v2041_v57 }
 0x436   : > { %14046 = vmatprep.subr.bf16.mxu0 %v17464_v2  ;;  %v2169_v25 = vld [vmem:[%s18128_s25 + $0x3c28] sm:$0xff] }
 0x437   : > { %14086 = vmatpush1.bf16.msra.mxu1 %v17599_v58  ;;  %v17576_v31 = vcombine.high %v2165_v35, %v2169_v25  ;;  %v2157_v16 = vld [vmem:[%s18128_s25 + $0x3bc8] sm:$0xff]  ;;  %v17575_v7 = vcombine.low %v2165_v35, %v2169_v25 }
 0x438   : > { %14087 = vmatprep.subr.bf16.mxu1 %v17592_v37  ;;  %v2161_v52 = vld [vmem:[%s18128_s25 + $0x3be8] sm:$0xff] }
 0x439   : > { %14047 = vmatpush1.bf16.msra.mxu0 %v17463_v20  ;;  %v2285_v28 = vld [vmem:[%s18128_s25 + $0x3fc8] sm:$0xff]  ;;  %v17568_v58 = vcombine.high %v2157_v16, %v2161_v52  ;;  %v17567_v14 = vcombine.low %v2157_v16, %v2161_v52 }
 0x43a   : > { %14048 = vmatprep.subr.bf16.mxu0 %v17456_v49  ;;  %v2289_v42 = vld [vmem:[%s18128_s25 + $0x3fe8] sm:$0xff] }
 0x43b   : > { %14088 = vmatpush1.bf16.msra.mxu1 %v17591_v61  ;;  %v17696_v2 = vcombine.high %v2285_v28, %v2289_v42  ;;  %v2149_v37 = vld [vmem:[%s18128_s25 + $0x3b88] sm:$0xff]  ;;  %v17695_v20 = vcombine.low %v2285_v28, %v2289_v42 }
 0x43c   : > { %14089 = vmatprep.subr.bf16.mxu1 %v17584_v48  ;;  %v2153_v5 = vld [vmem:[%s18128_s25 + $0x3ba8] sm:$0xff] }
 0x43d   : > { %14049 = vmatpush1.bf16.msra.mxu0 %v17455_v46  ;;  %v2277_v45 = vld [vmem:[%s18128_s25 + $0x3f88] sm:$0xff]  ;;  %v17560_v61 = vcombine.high %v2149_v37, %v2153_v5  ;;  %v17559_v25 = vcombine.low %v2149_v37, %v2153_v5 }
 0x43e   : > { %14050 = vmatprep.subr.bf16.mxu0 %v17448_v27  ;;  %v2281_v40 = vld [vmem:[%s18128_s25 + $0x3fa8] sm:$0xff] }
 0x43f   : > { %14090 = vmatpush1.bf16.msra.mxu1 %v17583_v10  ;;  %v17688_v49 = vcombine.high %v2277_v45, %v2281_v40  ;;  %v2141_v48 = vld [vmem:[%s18128_s25 + $0x3b48] sm:$0xff]  ;;  %v17687_v46 = vcombine.low %v2277_v45, %v2281_v40 }
 0x440   : > { %14091 = vmatprep.subr.bf16.mxu1 %v17576_v31  ;;  %v2145_v18 = vld [vmem:[%s18128_s25 + $0x3b68] sm:$0xff] }
 0x441   : > { %14051 = vmatpush1.bf16.msra.mxu0 %v17447_v24  ;;  %v2269_v57 = vld [vmem:[%s18128_s25 + $0x3f48] sm:$0xff]  ;;  %v17552_v10 = vcombine.high %v2141_v48, %v2145_v18  ;;  %v17551_v42 = vcombine.low %v2141_v48, %v2145_v18 }
 0x442   : > { %14052 = vmatprep.subr.bf16.mxu0 %v17568_v58  ;;  %v2273_v35 = vld [vmem:[%s18128_s25 + $0x3f68] sm:$0xff] }
 0x443   : > { %14092 = vmatpush1.bf16.msra.mxu1 %v17575_v7  ;;  %v17680_v27 = vcombine.high %v2269_v57, %v2273_v35  ;;  %v2133_v31 = vld [vmem:[%s18128_s25 + $0x3b08] sm:$0xff]  ;;  %v17679_v24 = vcombine.low %v2269_v57, %v2273_v35 }
 0x444   : > { %14093 = vmatprep.subr.bf16.mxu1 %v17696_v2  ;;  %v2137_v16 = vld [vmem:[%s18128_s25 + $0x3b28] sm:$0xff] }
 0x445   : > { %14053 = vmatpush2.bf16.msra.mxu0 %v17567_v14  ;;  %v2261_v52 = vld [vmem:[%s18128_s25 + $0x3f08] sm:$0xff]  ;;  %v17544_v7 = vcombine.high %v2133_v31, %v2137_v16  ;;  %v17543_v40 = vcombine.low %v2133_v31, %v2137_v16 }
 0x446   : > { %14054 = vmatprep.subr.bf16.mxu0 %v17560_v61  ;;  %v2265_v28 = vld [vmem:[%s18128_s25 + $0x3f28] sm:$0xff] }
 0x447   : > { %14094 = vmatpush2.bf16.msra.mxu1 %v17695_v20  ;;  %v17672_v58 = vcombine.high %v2261_v52, %v2265_v28  ;;  %v2125_v2 = vld [vmem:[%s18128_s25 + $0x3ac8] sm:$0xff]  ;;  %v17671_v14 = vcombine.low %v2261_v52, %v2265_v28 }
 0x448   : > { %14095 = vmatprep.subr.bf16.mxu1 %v17688_v49  ;;  %v2129_v37 = vld [vmem:[%s18128_s25 + $0x3ae8] sm:$0xff] }
 0x449   : > { %14055 = vmatpush2.bf16.msra.mxu0 %v17559_v25  ;;  %v2253_v5 = vld [vmem:[%s18128_s25 + $0x3ec8] sm:$0xff]  ;;  %v17536_v20 = vcombine.high %v2125_v2, %v2129_v37  ;;  %v17535_v35 = vcombine.low %v2125_v2, %v2129_v37 }
 0x44a   : > { %14056 = vmatprep.subr.bf16.mxu0 %v17552_v10  ;;  %v2257_v45 = vld [vmem:[%s18128_s25 + $0x3ee8] sm:$0xff] }
 0x44b   : > { %14096 = vmatpush2.bf16.msra.mxu1 %v17687_v46  ;;  %v17664_v61 = vcombine.high %v2253_v5, %v2257_v45  ;;  %v2117_v49 = vld [vmem:[%s18128_s25 + $0x3a88] sm:$0xff]  ;;  %v17663_v25 = vcombine.low %v2253_v5, %v2257_v45 }
 0x44c   : > { %14097 = vmatprep.subr.bf16.mxu1 %v17680_v27  ;;  %v2121_v48 = vld [vmem:[%s18128_s25 + $0x3aa8] sm:$0xff] }
 0x44d   : > { %14057 = vmatpush2.bf16.msra.mxu0 %v17551_v42  ;;  %v2245_v18 = vld [vmem:[%s18128_s25 + $0x3e88] sm:$0xff]  ;;  %v17528_v46 = vcombine.high %v2117_v49, %v2121_v48  ;;  %v17527_v28 = vcombine.low %v2117_v49, %v2121_v48  ;;  %v306_v49 = vld [vmem:[%s18128_s25 + $0x1f0] sm:$0xff] }
 0x44e   : > { %14058 = vmatprep.subr.bf16.mxu0 %v17544_v7  ;;  %v2249_v57 = vld [vmem:[%s18128_s25 + $0x3ea8] sm:$0xff]  ;;  %v430_v48 = vld [vmem:[%s18128_s25 + $0x5d0] sm:$0xff] }
 0x44f   : > { %14098 = vmatpush2.bf16.msra.mxu1 %v17679_v24  ;;  %v17656_v10 = vcombine.high %v2245_v18, %v2249_v57  ;;  %v2109_v27 = vld [vmem:[%s18128_s25 + $0x3a48] sm:$0xff]  ;;  %v17655_v42 = vcombine.low %v2245_v18, %v2249_v57  ;;  %v434_v18 = vld [vmem:[%s18128_s25 + $0x5f0] sm:$0xff] }
 0x450   : > { %14099 = vmatprep.subr.bf16.mxu1 %v17672_v58  ;;  %v2113_v31 = vld [vmem:[%s18128_s25 + $0x3a68] sm:$0xff] }
 0x451   : > { %14059 = vmatpush2.bf16.msra.mxu0 %v17543_v40  ;;  %v2237_v16 = vld [vmem:[%s18128_s25 + $0x3e48] sm:$0xff]  ;;  %v17520_v24 = vcombine.high %v2109_v27, %v2113_v31  ;;  %v17519_v45 = vcombine.low %v2109_v27, %v2113_v31  ;;  %v298_v27 = vld [vmem:[%s18128_s25 + $0x1b0] sm:$0xff] }
 0x452   : > { %14060 = vmatprep.subr.bf16.mxu0 %v17536_v20  ;;  %v2241_v52 = vld [vmem:[%s18128_s25 + $0x3e68] sm:$0xff]  ;;  %v422_v31 = vld [vmem:[%s18128_s25 + $0x590] sm:$0xff] }
 0x453   : > { %14100 = vmatpush2.bf16.msra.mxu1 %v17671_v14  ;;  %v17648_v7 = vcombine.high %v2237_v16, %v2241_v52  ;;  %v2101_v58 = vld [vmem:[%s18128_s25 + $0x3a08] sm:$0xff]  ;;  %v17647_v40 = vcombine.low %v2237_v16, %v2241_v52  ;;  %v426_v16 = vld [vmem:[%s18128_s25 + $0x5b0] sm:$0xff] }
 0x454   : > { %14101 = vmatprep.subr.bf16.mxu1 %v17664_v61  ;;  %v2105_v2 = vld [vmem:[%s18128_s25 + $0x3a28] sm:$0xff]  ;;  %v302_v61 = vld [vmem:[%s18128_s25 + $0x1d0] sm:$0xff] }
 0x455   : > { %14061 = vmatpush2.bf16.msra.mxu0 %v17535_v35  ;;  %v2229_v37 = vld [vmem:[%s18128_s25 + $0x3e08] sm:$0xff]  ;;  %v17512_v14 = vcombine.high %v2101_v58, %v2105_v2  ;;  %v17511_v57 = vcombine.low %v2101_v58, %v2105_v2  ;;  %v15713_v52 = vcombine.low %v302_v61, %v306_v49  ;;  %v290_v58 = vld [vmem:[%s18128_s25 + $0x170] sm:$0xff] }
 0x456   : > { %14062 = vmatprep.subr.bf16.mxu0 %v17528_v46  ;;  %v2233_v5 = vld [vmem:[%s18128_s25 + $0x3e28] sm:$0xff]  ;;  %v15842_v46 = vcombine.high %v430_v48, %v434_v18 }
 0x457   : > { %14102 = vmatpush2.bf16.msra.mxu1 %v17663_v25  ;;  %v17640_v20 = vcombine.high %v2229_v37, %v2233_v5  ;;  %v17639_v35 = vcombine.low %v2229_v37, %v2233_v5  ;;  %v15714_v25 = vcombine.high %v302_v61, %v306_v49  ;;  %v414_v37 = vld [vmem:[%s18128_s25 + $0x550] sm:$0xff]  ;;  %v15833_v61 = vcombine.low %v422_v31, %v426_v16 }
 0x458   : > { %14103 = vmatprep.subr.bf16.mxu1 %v17656_v10  ;;  %v294_v10 = vld [vmem:[%s18128_s25 + $0x190] sm:$0xff] }
 0x459   : > { %14063 = vmatpush2.bf16.msra.mxu0 %v17527_v28  ;;  %v15841_v28 = vcombine.low %v430_v48, %v434_v18  ;;  %v418_v5 = vld [vmem:[%s18128_s25 + $0x570] sm:$0xff] }
 0x45a   : > { %14064 = vmatprep.subr.bf16.mxu0 %v17520_v24  ;;  %v15834_v24 = vcombine.high %v422_v31, %v426_v16 }
 0x45b   : > { %14104 = vmatpush2.bf16.msra.mxu1 %v17655_v42  ;;  %v15706_v42 = vcombine.high %v294_v10, %v298_v27 }
 0x45c   : > { %14105 = vmatprep.subr.bf16.mxu1 %v17648_v7  ;;  %v286_v7 = vld [vmem:[%s18128_s25 + $0x150] sm:$0xff] }
 0x45d   : > { %14065 = vmatpush2.bf16.msra.mxu0 %v17519_v45  ;;  %v15698_v49 = vcombine.high %v286_v7, %v290_v58 }
 0x45e   : > { %14066 = vmatprep.subr.bf16.mxu0 %v17512_v14  ;;  %v15705_v14 = vcombine.low %v294_v10, %v298_v27  ;;  %v406_v10 = vld [vmem:[%s18128_s25 + $0x510] sm:$0xff] }
 0x45f   : > { %14106 = vmatpush2.bf16.msra.mxu1 %v17647_v40  ;;  %v410_v27 = vld [vmem:[%s18128_s25 + $0x530] sm:$0xff] }
 0x460   : > { %14107 = vmatprep.subr.bf16.mxu1 %v17640_v20 }
 0x461   : > { %14067 = vmatpush2.bf16.msra.mxu0 %v17511_v57 }
 0x462   : > { %14118 = vmatprep.subr.bf16.mxu0 %v15714_v25  ;;  %v282_v25 = vld [vmem:[%s18128_s25 + $0x130] sm:$0xff] }
 0x463   : > { %14108 = vmatpush2.bf16.msra.mxu1 %v17639_v35  ;;  %v278_v35 = vld [vmem:[%s18128_s25 + $0x110] sm:$0xff] }
 0x464   : > { %14159 = vmatprep.subr.bf16.mxu1 %v15842_v46  ;;  %v13824_v2 = vpop.f32.mrf.mxu0  ;;  %14069 = vmatmul.mubr.bf16.vlgmr.msra.gmra.mxu0 %v18889_v51 }
 0x465   : > { %v13825_v45 = vadd.f32 %v13824_v2, %v19427_v29  ;;  %14119 = vmatpush1.bf16.msra.mxu0 %v15713_v52  ;;  %v15826_v29 = vcombine.high %v414_v37, %v418_v5  ;;  %14150 = vmatprep.mubr.bf16.mxu0 %v18182_v9  ;;  %v15818_v2 = vcombine.high %v406_v10, %v410_v27 }
 0x466   : > { %v13865_v40 = vpop.f32.mrf.mxu1  ;;  %14110 = vmatmul.mubr.bf16.vlgmr.msra.gmra.mxu1 %v18897_v6  ;;  %v13826_v20 = vpop.f32.mrf.mxu0  ;;  %14120 = vmatprep.subr.bf16.mxu0 %v15706_v42  ;;  %v15690_v42 = vcombine.high %v278_v35, %v282_v25 }
 0x467   : > { %14160 = vmatpush1.bf16.msra.mxu1 %v15841_v28  ;;  %v19501_v48 = vadd.f32 %v13865_v40, %v13825_v45  ;;  %v13827_v18 = vadd.f32 %v13826_v20, %v19436_v55  ;;  %14191 = vmatprep.mubr.bf16.mxu1 %v18189_v13  ;;  %v15697_v55 = vcombine.low %v286_v7, %v290_v58  ;;  %v270_v45 = vld [vmem:[%s18128_s25 + $0xd0] sm:$0xff] }
 0x468   : > { %v13867_v57 = vpop.f32.mrf.mxu1  ;;  %14161 = vmatprep.subr.bf16.mxu1 %v15834_v24  ;;  %v13828_v46 = vpop.f32.mrf.mxu0  ;;  %v15825_v28 = vcombine.low %v414_v37, %v418_v5  ;;  %v274_v40 = vld [vmem:[%s18128_s25 + $0xf0] sm:$0xff]  ;;  %v15817_v7 = vcombine.low %v406_v10, %v410_v27 }
 0x469   : > { %v19510_v31 = vadd.f32 %v13867_v57, %v13827_v18  ;;  %14121 = vmatpush1.bf16.msra.mxu0 %v15705_v14  ;;  %v398_v20 = vld [vmem:[%s18128_s25 + $0x4d0] sm:$0xff]  ;;  %v15689_v57 = vcombine.low %v278_v35, %v282_v25  ;;  %v15682_v58 = vcombine.high %v270_v45, %v274_v40 }
 0x46a   : > { %v13869_v16 = vpop.f32.mrf.mxu1  ;;  %v13829_v52 = vpop.f32.mrf.mxu0  ;;  %14122 = vmatprep.subr.bf16.mxu0 %v15698_v49  ;;  %v402_v18 = vld [vmem:[%s18128_s25 + $0x4f0] sm:$0xff] }
 0x46b   : > { %14162 = vmatpush1.bf16.msra.mxu1 %v15833_v61  ;;  %v15810_v37 = vcombine.high %v398_v20, %v402_v18  ;;  %v262_v5 = vld [vmem:[%s18128_s25 + $0x90] sm:$0xff]  ;;  %v15809_v46 = vcombine.low %v398_v20, %v402_v18 }
 0x46c   : > { %v13870_v24 = vpop.f32.mrf.mxu1  ;;  %14163 = vmatprep.subr.bf16.mxu1 %v15826_v29  ;;  %v266_v14 = vld [vmem:[%s18128_s25 + $0xb0] sm:$0xff]  ;;  %v15681_v29 = vcombine.low %v270_v45, %v274_v40 }
 0x46d   : > { %14123 = vmatpush1.bf16.msra.mxu0 %v15697_v55  ;;  %v390_v61 = vld [vmem:[%s18128_s25 + $0x490] sm:$0xff]  ;;  %v15674_v35 = vcombine.high %v262_v5, %v266_v14  ;;  %v15673_v52 = vcombine.low %v262_v5, %v266_v14 }
 0x46e   : > { %14124 = vmatprep.subr.bf16.mxu0 %v15690_v42  ;;  %v394_v49 = vld [vmem:[%s18128_s25 + $0x4b0] sm:$0xff] }
 0x46f   : > { %14164 = vmatpush1.bf16.msra.mxu1 %v15825_v28  ;;  %v15802_v25 = vcombine.high %v390_v61, %v394_v49  ;;  %v254_v10 = vld [vmem:[%s18128_s25 + $0x50] sm:$0xff]  ;;  %v15801_v28 = vcombine.low %v390_v61, %v394_v49 }
 0x470   : > { %14165 = vmatprep.subr.bf16.mxu1 %v15818_v2  ;;  %v258_v27 = vld [vmem:[%s18128_s25 + $0x70] sm:$0xff] }
 0x471   : > { %14125 = vmatpush1.bf16.msra.mxu0 %v15689_v57  ;;  %v382_v16 = vld [vmem:[%s18128_s25 + $0x450] sm:$0xff]  ;;  %v15666_v42 = vcombine.high %v254_v10, %v258_v27  ;;  %v15665_v18 = vcombine.low %v254_v10, %v258_v27 }
 0x472   : > { %14126 = vmatprep.subr.bf16.mxu0 %v15682_v58  ;;  %v386_v55 = vld [vmem:[%s18128_s25 + $0x470] sm:$0xff] }
 0x473   : > { %14166 = vmatpush1.bf16.msra.mxu1 %v15817_v7  ;;  %v15794_v24 = vcombine.high %v382_v16, %v386_v55  ;;  %v246_v2 = vld [vmem:[%s18128_s25 + $0x10] sm:$0xff]  ;;  %v15793_v57 = vcombine.low %v382_v16, %v386_v55 }
 0x474   : > { %14167 = vmatprep.subr.bf16.mxu1 %v15810_v37  ;;  %v250_v45 = vld [vmem:[%s18128_s25 + $0x30] sm:$0xff] }
 0x475   : > { %14127 = vmatpush1.bf16.msra.mxu0 %v15681_v29  ;;  %v374_v40 = vld [vmem:[%s18128_s25 + $0x410] sm:$0xff]  ;;  %v15658_v7 = vcombine.high %v246_v2, %v250_v45  ;;  %v15657_v49 = vcombine.low %v246_v2, %v250_v45 }
 0x476   : > { %14128 = vmatprep.subr.bf16.mxu0 %v15674_v35  ;;  %v378_v20 = vld [vmem:[%s18128_s25 + $0x430] sm:$0xff] }
 0x477   : > { %14168 = vmatpush1.bf16.msra.mxu1 %v15809_v46  ;;  %v15786_v58 = vcombine.high %v374_v40, %v378_v20  ;;  %v366_v37 = vld [vmem:[%s18128_s25 + $0x3d0] sm:$0xff]  ;;  %v15785_v29 = vcombine.low %v374_v40, %v378_v20 }
 0x478   : > { %14169 = vmatprep.subr.bf16.mxu1 %v15802_v25  ;;  %v370_v5 = vld [vmem:[%s18128_s25 + $0x3f0] sm:$0xff] }
 0x479   : > { %14129 = vmatpush1.bf16.msra.mxu0 %v15673_v52  ;;  %v494_v14 = vld [vmem:[%s18128_s25 + $0x7d0] sm:$0xff]  ;;  %v15778_v46 = vcombine.high %v366_v37, %v370_v5  ;;  %v15777_v55 = vcombine.low %v366_v37, %v370_v5 }
 0x47a   : > { %14130 = vmatprep.subr.bf16.mxu0 %v15666_v42  ;;  %v498_v61 = vld [vmem:[%s18128_s25 + $0x7f0] sm:$0xff] }
 0x47b   : > { %14170 = vmatpush1.bf16.msra.mxu1 %v15801_v28  ;;  %v15906_v35 = vcombine.high %v494_v14, %v498_v61  ;;  %v358_v25 = vld [vmem:[%s18128_s25 + $0x390] sm:$0xff]  ;;  %v15905_v52 = vcombine.low %v494_v14, %v498_v61 }
 0x47c   : > { %14171 = vmatprep.subr.bf16.mxu1 %v15794_v24  ;;  %v362_v10 = vld [vmem:[%s18128_s25 + $0x3b0] sm:$0xff] }
 0x47d   : > { %14131 = vmatpush1.bf16.msra.mxu0 %v15665_v18  ;;  %v486_v27 = vld [vmem:[%s18128_s25 + $0x790] sm:$0xff]  ;;  %v15770_v28 = vcombine.high %v358_v25, %v362_v10  ;;  %v15769_v20 = vcombine.low %v358_v25, %v362_v10 }
 0x47e   : > { %14132 = vmatprep.subr.bf16.mxu0 %v15658_v7  ;;  %v490_v16 = vld [vmem:[%s18128_s25 + $0x7b0] sm:$0xff] }
 0x47f   : > { %14172 = vmatpush1.bf16.msra.mxu1 %v15793_v57  ;;  %v15898_v42 = vcombine.high %v486_v27, %v490_v16  ;;  %v350_v24 = vld [vmem:[%s18128_s25 + $0x350] sm:$0xff]  ;;  %v15897_v18 = vcombine.low %v486_v27, %v490_v16 }
 0x480   : > { %14173 = vmatprep.subr.bf16.mxu1 %v15786_v58  ;;  %v354_v2 = vld [vmem:[%s18128_s25 + $0x370] sm:$0xff] }
 0x481   : > { %14133 = vmatpush1.bf16.msra.mxu0 %v15657_v49  ;;  %v478_v45 = vld [vmem:[%s18128_s25 + $0x750] sm:$0xff]  ;;  %v15762_v57 = vcombine.high %v350_v24, %v354_v2  ;;  %v15761_v61 = vcombine.low %v350_v24, %v354_v2 }
 0x482   : > { %14134 = vmatprep.subr.bf16.mxu0 %v15778_v46  ;;  %v482_v40 = vld [vmem:[%s18128_s25 + $0x770] sm:$0xff] }
 0x483   : > { %14174 = vmatpush1.bf16.msra.mxu1 %v15785_v29  ;;  %v15890_v7 = vcombine.high %v478_v45, %v482_v40  ;;  %v342_v58 = vld [vmem:[%s18128_s25 + $0x310] sm:$0xff]  ;;  %v15889_v49 = vcombine.low %v478_v45, %v482_v40 }
 0x484   : > { %14175 = vmatprep.subr.bf16.mxu1 %v15906_v35  ;;  %v346_v37 = vld [vmem:[%s18128_s25 + $0x330] sm:$0xff] }
 0x485   : > { %14135 = vmatpush2.bf16.msra.mxu0 %v15777_v55  ;;  %v470_v5 = vld [vmem:[%s18128_s25 + $0x710] sm:$0xff]  ;;  %v15754_v29 = vcombine.high %v342_v58, %v346_v37  ;;  %v15753_v16 = vcombine.low %v342_v58, %v346_v37 }
 0x486   : > { %14136 = vmatprep.subr.bf16.mxu0 %v15770_v28  ;;  %v474_v14 = vld [vmem:[%s18128_s25 + $0x730] sm:$0xff] }
 0x487   : > { %14176 = vmatpush2.bf16.msra.mxu1 %v15905_v52  ;;  %v15882_v46 = vcombine.high %v470_v5, %v474_v14  ;;  %v334_v35 = vld [vmem:[%s18128_s25 + $0x2d0] sm:$0xff]  ;;  %v15881_v55 = vcombine.low %v470_v5, %v474_v14 }
 0x488   : > { %14177 = vmatprep.subr.bf16.mxu1 %v15898_v42  ;;  %v338_v25 = vld [vmem:[%s18128_s25 + $0x2f0] sm:$0xff] }
 0x489   : > { %14137 = vmatpush2.bf16.msra.mxu0 %v15769_v20  ;;  %v462_v10 = vld [vmem:[%s18128_s25 + $0x6d0] sm:$0xff]  ;;  %v15746_v52 = vcombine.high %v334_v35, %v338_v25  ;;  %v15745_v40 = vcombine.low %v334_v35, %v338_v25 }
 0x48a   : > { %14138 = vmatprep.subr.bf16.mxu0 %v15762_v57  ;;  %v466_v27 = vld [vmem:[%s18128_s25 + $0x6f0] sm:$0xff] }
 0x48b   : > { %14178 = vmatpush2.bf16.msra.mxu1 %v15897_v18  ;;  %v15874_v28 = vcombine.high %v462_v10, %v466_v27  ;;  %v326_v42 = vld [vmem:[%s18128_s25 + $0x290] sm:$0xff]  ;;  %v15873_v20 = vcombine.low %v462_v10, %v466_v27 }
 0x48c   : > { %14179 = vmatprep.subr.bf16.mxu1 %v15890_v7  ;;  %v330_v24 = vld [vmem:[%s18128_s25 + $0x2b0] sm:$0xff] }
 0x48d   : > { %14139 = vmatpush2.bf16.msra.mxu0 %v15761_v61  ;;  %v454_v2 = vld [vmem:[%s18128_s25 + $0x690] sm:$0xff]  ;;  %v15738_v18 = vcombine.high %v326_v42, %v330_v24  ;;  %v15737_v14 = vcombine.low %v326_v42, %v330_v24 }
 0x48e   : > { %14140 = vmatprep.subr.bf16.mxu0 %v15754_v29  ;;  %v458_v45 = vld [vmem:[%s18128_s25 + $0x6b0] sm:$0xff] }
 0x48f   : > { %14180 = vmatpush2.bf16.msra.mxu1 %v15889_v49  ;;  %v15866_v57 = vcombine.high %v454_v2, %v458_v45  ;;  %v318_v7 = vld [vmem:[%s18128_s25 + $0x250] sm:$0xff]  ;;  %v15865_v61 = vcombine.low %v454_v2, %v458_v45 }
 0x490   : > { %14181 = vmatprep.subr.bf16.mxu1 %v15882_v46  ;;  %v322_v58 = vld [vmem:[%s18128_s25 + $0x270] sm:$0xff] }
 0x491   : > { %14141 = vmatpush2.bf16.msra.mxu0 %v15753_v16  ;;  %v446_v37 = vld [vmem:[%s18128_s25 + $0x650] sm:$0xff]  ;;  %v15730_v49 = vcombine.high %v318_v7, %v322_v58  ;;  %v15729_v27 = vcombine.low %v318_v7, %v322_v58 }
 0x492   : > { %14142 = vmatprep.subr.bf16.mxu0 %v15746_v52  ;;  %v450_v5 = vld [vmem:[%s18128_s25 + $0x670] sm:$0xff] }
 0x493   : > { %14182 = vmatpush2.bf16.msra.mxu1 %v15881_v55  ;;  %v15858_v29 = vcombine.high %v446_v37, %v450_v5  ;;  %v310_v46 = vld [vmem:[%s18128_s25 + $0x210] sm:$0xff]  ;;  %v15857_v16 = vcombine.low %v446_v37, %v450_v5 }
 0x494   : > { %14183 = vmatprep.subr.bf16.mxu1 %v15874_v28  ;;  %v314_v35 = vld [vmem:[%s18128_s25 + $0x230] sm:$0xff] }
 0x495   : > { %14143 = vmatpush2.bf16.msra.mxu0 %v15745_v40  ;;  %v438_v25 = vld [vmem:[%s18128_s25 + $0x610] sm:$0xff]  ;;  %v15722_v55 = vcombine.high %v310_v46, %v314_v35  ;;  %v15721_v45 = vcombine.low %v310_v46, %v314_v35 }
 0x496   : > { %14144 = vmatprep.subr.bf16.mxu0 %v15738_v18  ;;  %v442_v10 = vld [vmem:[%s18128_s25 + $0x630] sm:$0xff] }
 0x497   : > { %14184 = vmatpush2.bf16.msra.mxu1 %v15873_v20  ;;  %v15850_v52 = vcombine.high %v438_v25, %v442_v10  ;;  %v558_v28 = vld [vmem:[%s18128_s25 + $0x9d0] sm:$0xff]  ;;  %v15849_v40 = vcombine.low %v438_v25, %v442_v10 }
 0x498   : > { %14185 = vmatprep.subr.bf16.mxu1 %v15866_v57  ;;  %v562_v42 = vld [vmem:[%s18128_s25 + $0x9f0] sm:$0xff] }
 0x499   : > { %14145 = vmatpush2.bf16.msra.mxu0 %v15737_v14  ;;  %v686_v24 = vld [vmem:[%s18128_s25 + $0xdd0] sm:$0xff]  ;;  %v15970_v20 = vcombine.high %v558_v28, %v562_v42  ;;  %v15969_v5 = vcombine.low %v558_v28, %v562_v42 }
 0x49a   : > { %14146 = vmatprep.subr.bf16.mxu0 %v15730_v49  ;;  %v690_v2 = vld [vmem:[%s18128_s25 + $0xdf0] sm:$0xff] }
 0x49b   : > { %14186 = vmatpush2.bf16.msra.mxu1 %v15865_v61  ;;  %v16098_v18 = vcombine.high %v686_v24, %v690_v2  ;;  %v550_v57 = vld [vmem:[%s18128_s25 + $0x990] sm:$0xff]  ;;  %v16097_v14 = vcombine.low %v686_v24, %v690_v2 }
 0x49c   : > { %14187 = vmatprep.subr.bf16.mxu1 %v15858_v29  ;;  %v554_v7 = vld [vmem:[%s18128_s25 + $0x9b0] sm:$0xff] }
 0x49d   : > { %14147 = vmatpush2.bf16.msra.mxu0 %v15729_v27  ;;  %v678_v58 = vld [vmem:[%s18128_s25 + $0xd90] sm:$0xff]  ;;  %v15962_v61 = vcombine.high %v550_v57, %v554_v7 }
 0x49e   : > { %14148 = vmatprep.subr.bf16.mxu0 %v15722_v55  ;;  %v682_v37 = vld [vmem:[%s18128_s25 + $0xdb0] sm:$0xff]  ;;  %v15961_v55 = vcombine.low %v550_v57, %v554_v7 }
 0x49f   : > { %14188 = vmatpush2.bf16.msra.mxu1 %v15857_v16  ;;  %v16090_v49 = vcombine.high %v678_v58, %v682_v37  ;;  %v542_v29 = vld [vmem:[%s18128_s25 + $0x950] sm:$0xff]  ;;  %v16089_v28 = vcombine.low %v678_v58, %v682_v37 }
 0x4a0   : > { %14189 = vmatprep.subr.bf16.mxu1 %v15850_v52  ;;  %v546_v46 = vld [vmem:[%s18128_s25 + $0x970] sm:$0xff] }
 0x4a1   : > { %14149 = vmatpush2.bf16.msra.mxu0 %v15721_v45  ;;  %v670_v25 = vld [vmem:[%s18128_s25 + $0xd50] sm:$0xff]  ;;  %v15954_v42 = vcombine.high %v542_v29, %v546_v46 }
 0x4a2   : > { %14200 = vmatprep.subr.bf16.mxu0 %v15970_v20  ;;  %v674_v10 = vld [vmem:[%s18128_s25 + $0xd70] sm:$0xff] }
 0x4a3   : > { %14190 = vmatpush2.bf16.msra.mxu1 %v15849_v40  ;;  %v534_v40 = vld [vmem:[%s18128_s25 + $0x910] sm:$0xff] }
 0x4a4   : > { %14241 = vmatprep.subr.bf16.mxu1 %v16098_v18  ;;  %v13906_v35 = vpop.f32.mrf.mxu0  ;;  %14151 = vmatmul.mubr.bf16.vlgmr.msra.gmra.mxu0 %v18233_v22  ;;  %v538_v20 = vld [vmem:[%s18128_s25 + $0x930] sm:$0xff] }
 0x4a5   : > { %v13907_v27 = vadd.f32 %v13906_v35, %v19501_v48  ;;  %14201 = vmatpush1.bf16.msra.mxu0 %v15969_v5  ;;  %v16082_v48 = vcombine.high %v670_v25, %v674_v10  ;;  %14232 = vmatprep.mubr.bf16.mxu0 %v18240_v30  ;;  %v662_v57 = vld [vmem:[%s18128_s25 + $0xd10] sm:$0xff] }
 0x4a6   : > { %v13947_v16 = vpop.f32.mrf.mxu1  ;;  %14192 = vmatmul.mubr.bf16.vlgmr.msra.gmra.mxu1 %v18244_v63  ;;  %v13908_v52 = vpop.f32.mrf.mxu0  ;;  %14202 = vmatprep.subr.bf16.mxu0 %v15962_v61  ;;  %v666_v7 = vld [vmem:[%s18128_s25 + $0xd30] sm:$0xff]  ;;  %v15946_v61 = vcombine.high %v534_v40, %v538_v20 }
 0x4a7   : > { %14242 = vmatpush1.bf16.msra.mxu1 %v16097_v14  ;;  %v19575_v24 = vadd.f32 %v13947_v16, %v13907_v27  ;;  %v13909_v2 = vadd.f32 %v13908_v52, %v19510_v31  ;;  %14273 = vmatprep.mubr.bf16.mxu1 %v18253_v39  ;;  %v15953_v31 = vcombine.low %v542_v29, %v546_v46  ;;  %v526_v27 = vld [vmem:[%s18128_s25 + $0x8d0] sm:$0xff] }
 0x4a8   : > { %v13949_v45 = vpop.f32.mrf.mxu1  ;;  %14243 = vmatprep.subr.bf16.mxu1 %v16090_v49  ;;  %v13910_v18 = vpop.f32.mrf.mxu0  ;;  %v16081_v14 = vcombine.low %v670_v25, %v674_v10  ;;  %v16074_v35 = vcombine.high %v662_v57, %v666_v7  ;;  %v530_v16 = vld [vmem:[%s18128_s25 + $0x8f0] sm:$0xff]  ;;  %v16073_v29 = vcombine.low %v662_v57, %v666_v7 }
 0x4a9   : > { %v19584_v58 = vadd.f32 %v13949_v45, %v13909_v2  ;;  %14203 = vmatpush1.bf16.msra.mxu0 %v15961_v55  ;;  %v654_v52 = vld [vmem:[%s18128_s25 + $0xcd0] sm:$0xff]  ;;  %v15945_v45 = vcombine.low %v534_v40, %v538_v20  ;;  %v15938_v46 = vcombine.high %v526_v27, %v530_v16 }
 0x4aa   : > { %v13951_v37 = vpop.f32.mrf.mxu1  ;;  %v13911_v5 = vpop.f32.mrf.mxu0  ;;  %14204 = vmatprep.subr.bf16.mxu0 %v15954_v42  ;;  %v658_v2 = vld [vmem:[%s18128_s25 + $0xcf0] sm:$0xff] }
 0x4ab   : > { %14244 = vmatpush1.bf16.msra.mxu1 %v16089_v28  ;;  %v16066_v25 = vcombine.high %v654_v52, %v658_v2  ;;  %v518_v10 = vld [vmem:[%s18128_s25 + $0x890] sm:$0xff]  ;;  %v16065_v18 = vcombine.low %v654_v52, %v658_v2 }
 0x4ac   : > { %v13952_v49 = vpop.f32.mrf.mxu1  ;;  %14245 = vmatprep.subr.bf16.mxu1 %v16082_v48  ;;  %v522_v55 = vld [vmem:[%s18128_s25 + $0x8b0] sm:$0xff]  ;;  %v15937_v48 = vcombine.low %v526_v27, %v530_v16 }
 0x4ad   : > { %14205 = vmatpush1.bf16.msra.mxu0 %v15953_v31  ;;  %v646_v28 = vld [vmem:[%s18128_s25 + $0xc90] sm:$0xff]  ;;  %v15930_v40 = vcombine.high %v518_v10, %v522_v55  ;;  %v15929_v5 = vcombine.low %v518_v10, %v522_v55 }
 0x4ae   : > { %14206 = vmatprep.subr.bf16.mxu0 %v15946_v61  ;;  %v650_v42 = vld [vmem:[%s18128_s25 + $0xcb0] sm:$0xff] }
 0x4af   : > { %14246 = vmatpush1.bf16.msra.mxu1 %v16081_v14  ;;  %v16058_v20 = vcombine.high %v646_v28, %v650_v42  ;;  %v510_v57 = vld [vmem:[%s18128_s25 + $0x850] sm:$0xff]  ;;  %v16057_v14 = vcombine.low %v646_v28, %v650_v42 }
 0x4b0   : > { %14247 = vmatprep.subr.bf16.mxu1 %v16074_v35  ;;  %v514_v7 = vld [vmem:[%s18128_s25 + $0x870] sm:$0xff] }
 0x4b1   : > { %14207 = vmatpush1.bf16.msra.mxu0 %v15945_v45  ;;  %v638_v37 = vld [vmem:[%s18128_s25 + $0xc50] sm:$0xff]  ;;  %v15922_v61 = vcombine.high %v510_v57, %v514_v7  ;;  %v15921_v2 = vcombine.low %v510_v57, %v514_v7 }
 0x4b2   : > { %14208 = vmatprep.subr.bf16.mxu0 %v15938_v46  ;;  %v642_v31 = vld [vmem:[%s18128_s25 + $0xc70] sm:$0xff] }
 0x4b3   : > { %14248 = vmatpush1.bf16.msra.mxu1 %v16073_v29  ;;  %v16050_v49 = vcombine.high %v638_v37, %v642_v31  ;;  %v502_v35 = vld [vmem:[%s18128_s25 + $0x810] sm:$0xff]  ;;  %v16049_v45 = vcombine.low %v638_v37, %v642_v31 }
 0x4b4   : > { %14249 = vmatprep.subr.bf16.mxu1 %v16066_v25  ;;  %v506_v27 = vld [vmem:[%s18128_s25 + $0x830] sm:$0xff] }
 0x4b5   : > { %14209 = vmatpush1.bf16.msra.mxu0 %v15937_v48  ;;  %v630_v16 = vld [vmem:[%s18128_s25 + $0xc10] sm:$0xff]  ;;  %v15914_v29 = vcombine.high %v502_v35, %v506_v27  ;;  %v15913_v42 = vcombine.low %v502_v35, %v506_v27 }
 0x4b6   : > { %14210 = vmatprep.subr.bf16.mxu0 %v15930_v40  ;;  %v634_v52 = vld [vmem:[%s18128_s25 + $0xc30] sm:$0xff] }
 0x4b7   : > { %14250 = vmatpush1.bf16.msra.mxu1 %v16065_v18  ;;  %v16042_v46 = vcombine.high %v630_v16, %v634_v52  ;;  %v622_v25 = vld [vmem:[%s18128_s25 + $0xbd0] sm:$0xff]  ;;  %v16041_v48 = vcombine.low %v630_v16, %v634_v52 }
 0x4b8   : > { %14251 = vmatprep.subr.bf16.mxu1 %v16058_v20  ;;  %v626_v10 = vld [vmem:[%s18128_s25 + $0xbf0] sm:$0xff] }
 0x4b9   : > { %14211 = vmatpush1.bf16.msra.mxu0 %v15929_v5  ;;  %v750_v55 = vld [vmem:[%s18128_s25 + $0xfd0] sm:$0xff]  ;;  %v16034_v18 = vcombine.high %v622_v25, %v626_v10  ;;  %v16033_v31 = vcombine.low %v622_v25, %v626_v10 }
 0x4ba   : > { %14212 = vmatprep.subr.bf16.mxu0 %v15922_v61  ;;  %v754_v28 = vld [vmem:[%s18128_s25 + $0xff0] sm:$0xff] }
 0x4bb   : > { %14252 = vmatpush1.bf16.msra.mxu1 %v16057_v14  ;;  %v16162_v40 = vcombine.high %v750_v55, %v754_v28  ;;  %v614_v20 = vld [vmem:[%s18128_s25 + $0xb90] sm:$0xff]  ;;  %v16161_v5 = vcombine.low %v750_v55, %v754_v28 }
 0x4bc   : > { %14253 = vmatprep.subr.bf16.mxu1 %v16050_v49  ;;  %v618_v57 = vld [vmem:[%s18128_s25 + $0xbb0] sm:$0xff] }
 0x4bd   : > { %14213 = vmatpush1.bf16.msra.mxu0 %v15921_v2  ;;  %v742_v7 = vld [vmem:[%s18128_s25 + $0xf90] sm:$0xff]  ;;  %v16026_v14 = vcombine.high %v614_v20, %v618_v57  ;;  %v16025_v52 = vcombine.low %v614_v20, %v618_v57 }
 0x4be   : > { %14214 = vmatprep.subr.bf16.mxu0 %v15914_v29  ;;  %v746_v37 = vld [vmem:[%s18128_s25 + $0xfb0] sm:$0xff] }
 0x4bf   : > { %14254 = vmatpush1.bf16.msra.mxu1 %v16049_v45  ;;  %v16154_v61 = vcombine.high %v742_v7, %v746_v37  ;;  %v606_v49 = vld [vmem:[%s18128_s25 + $0xb50] sm:$0xff]  ;;  %v16153_v2 = vcombine.low %v742_v7, %v746_v37 }
 0x4c0   : > { %14255 = vmatprep.subr.bf16.mxu1 %v16042_v46  ;;  %v610_v35 = vld [vmem:[%s18128_s25 + $0xb70] sm:$0xff] }
 0x4c1   : > { %14215 = vmatpush1.bf16.msra.mxu0 %v15913_v42  ;;  %v734_v27 = vld [vmem:[%s18128_s25 + $0xf50] sm:$0xff]  ;;  %v16018_v45 = vcombine.high %v606_v49, %v610_v35  ;;  %v16017_v28 = vcombine.low %v606_v49, %v610_v35 }
 0x4c2   : > { %14216 = vmatprep.subr.bf16.mxu0 %v16034_v18  ;;  %v738_v16 = vld [vmem:[%s18128_s25 + $0xf70] sm:$0xff] }
 0x4c3   : > { %14256 = vmatpush1.bf16.msra.mxu1 %v16041_v48  ;;  %v16146_v29 = vcombine.high %v734_v27, %v738_v16  ;;  %v598_v46 = vld [vmem:[%s18128_s25 + $0xb10] sm:$0xff]  ;;  %v16145_v42 = vcombine.low %v734_v27, %v738_v16 }
 0x4c4   : > { %14257 = vmatprep.subr.bf16.mxu1 %v16162_v40  ;;  %v602_v25 = vld [vmem:[%s18128_s25 + $0xb30] sm:$0xff] }
 0x4c5   : > { %14217 = vmatpush2.bf16.msra.mxu0 %v16033_v31  ;;  %v726_v10 = vld [vmem:[%s18128_s25 + $0xf10] sm:$0xff]  ;;  %v16010_v48 = vcombine.high %v598_v46, %v602_v25  ;;  %v16009_v37 = vcombine.low %v598_v46, %v602_v25 }
 0x4c6   : > { %14218 = vmatprep.subr.bf16.mxu0 %v16026_v14  ;;  %v730_v55 = vld [vmem:[%s18128_s25 + $0xf30] sm:$0xff] }
 0x4c7   : > { %14258 = vmatpush2.bf16.msra.mxu1 %v16161_v5  ;;  %v16138_v18 = vcombine.high %v726_v10, %v730_v55  ;;  %v590_v40 = vld [vmem:[%s18128_s25 + $0xad0] sm:$0xff]  ;;  %v16137_v31 = vcombine.low %v726_v10, %v730_v55 }
 0x4c8   : > { %14259 = vmatprep.subr.bf16.mxu1 %v16154_v61  ;;  %v594_v20 = vld [vmem:[%s18128_s25 + $0xaf0] sm:$0xff] }
 0x4c9   : > { %14219 = vmatpush2.bf16.msra.mxu0 %v16025_v52  ;;  %v718_v57 = vld [vmem:[%s18128_s25 + $0xed0] sm:$0xff]  ;;  %v16002_v5 = vcombine.high %v590_v40, %v594_v20  ;;  %v16001_v16 = vcombine.low %v590_v40, %v594_v20 }
 0x4ca   : > { %14220 = vmatprep.subr.bf16.mxu0 %v16018_v45  ;;  %v722_v7 = vld [vmem:[%s18128_s25 + $0xef0] sm:$0xff] }
 0x4cb   : > { %14260 = vmatpush2.bf16.msra.mxu1 %v16153_v2  ;;  %v16130_v14 = vcombine.high %v718_v57, %v722_v7  ;;  %v582_v61 = vld [vmem:[%s18128_s25 + $0xa90] sm:$0xff]  ;;  %v16129_v52 = vcombine.low %v718_v57, %v722_v7 }
 0x4cc   : > { %14261 = vmatprep.subr.bf16.mxu1 %v16146_v29  ;;  %v586_v49 = vld [vmem:[%s18128_s25 + $0xab0] sm:$0xff] }
 0x4cd   : > { %14221 = vmatpush2.bf16.msra.mxu0 %v16017_v28  ;;  %v710_v35 = vld [vmem:[%s18128_s25 + $0xe90] sm:$0xff]  ;;  %v15994_v2 = vcombine.high %v582_v61, %v586_v49  ;;  %v15993_v55 = vcombine.low %v582_v61, %v586_v49 }
 0x4ce   : > { %14222 = vmatprep.subr.bf16.mxu0 %v16010_v48  ;;  %v714_v27 = vld [vmem:[%s18128_s25 + $0xeb0] sm:$0xff] }
 0x4cf   : > { %14262 = vmatpush2.bf16.msra.mxu1 %v16145_v42  ;;  %v16122_v45 = vcombine.high %v710_v35, %v714_v27  ;;  %v574_v29 = vld [vmem:[%s18128_s25 + $0xa50] sm:$0xff]  ;;  %v16121_v28 = vcombine.low %v710_v35, %v714_v27 }
 0x4d0   : > { %14263 = vmatprep.subr.bf16.mxu1 %v16138_v18  ;;  %v578_v46 = vld [vmem:[%s18128_s25 + $0xa70] sm:$0xff] }
 0x4d1   : > { %14223 = vmatpush2.bf16.msra.mxu0 %v16009_v37  ;;  %v702_v25 = vld [vmem:[%s18128_s25 + $0xe50] sm:$0xff]  ;;  %v15986_v42 = vcombine.high %v574_v29, %v578_v46  ;;  %v15985_v7 = vcombine.low %v574_v29, %v578_v46 }
 0x4d2   : > { %14224 = vmatprep.subr.bf16.mxu0 %v16002_v5  ;;  %v706_v10 = vld [vmem:[%s18128_s25 + $0xe70] sm:$0xff] }
 0x4d3   : > { %14264 = vmatpush2.bf16.msra.mxu1 %v16137_v31  ;;  %v16114_v48 = vcombine.high %v702_v25, %v706_v10  ;;  %v566_v18 = vld [vmem:[%s18128_s25 + $0xa10] sm:$0xff]  ;;  %v16113_v37 = vcombine.low %v702_v25, %v706_v10 }
 0x4d4   : > { %14265 = vmatprep.subr.bf16.mxu1 %v16130_v14  ;;  %v570_v40 = vld [vmem:[%s18128_s25 + $0xa30] sm:$0xff] }
 0x4d5   : > { %14225 = vmatpush2.bf16.msra.mxu0 %v16001_v16  ;;  %v694_v20 = vld [vmem:[%s18128_s25 + $0xe10] sm:$0xff]  ;;  %v15978_v31 = vcombine.high %v566_v18, %v570_v40  ;;  %v15977_v27 = vcombine.low %v566_v18, %v570_v40 }
 0x4d6   : > { %14226 = vmatprep.subr.bf16.mxu0 %v15994_v2  ;;  %v698_v57 = vld [vmem:[%s18128_s25 + $0xe30] sm:$0xff] }
 0x4d7   : > { %14266 = vmatpush2.bf16.msra.mxu1 %v16129_v52  ;;  %v16106_v5 = vcombine.high %v694_v20, %v698_v57  ;;  %v814_v14 = vld [vmem:[%s18128_s25 + $0x11d0] sm:$0xff]  ;;  %v16105_v16 = vcombine.low %v694_v20, %v698_v57 }
 0x4d8   : > { %14267 = vmatprep.subr.bf16.mxu1 %v16122_v45  ;;  %v818_v61 = vld [vmem:[%s18128_s25 + $0x11f0] sm:$0xff] }
 0x4d9   : > { %14227 = vmatpush2.bf16.msra.mxu0 %v15993_v55  ;;  %v942_v49 = vld [vmem:[%s18128_s25 + $0x15d0] sm:$0xff]  ;;  %v16226_v52 = vcombine.high %v814_v14, %v818_v61  ;;  %v16225_v10 = vcombine.low %v814_v14, %v818_v61 }
 0x4da   : > { %14228 = vmatprep.subr.bf16.mxu0 %v15986_v42  ;;  %v946_v35 = vld [vmem:[%s18128_s25 + $0x15f0] sm:$0xff] }
 0x4db   : > { %14268 = vmatpush2.bf16.msra.mxu1 %v16121_v28  ;;  %v16354_v2 = vcombine.high %v942_v49, %v946_v35  ;;  %v806_v45 = vld [vmem:[%s18128_s25 + $0x1190] sm:$0xff]  ;;  %v16353_v55 = vcombine.low %v942_v49, %v946_v35 }
 0x4dc   : > { %14269 = vmatprep.subr.bf16.mxu1 %v16114_v48  ;;  %v810_v29 = vld [vmem:[%s18128_s25 + $0x11b0] sm:$0xff] }
 0x4dd   : > { %14229 = vmatpush2.bf16.msra.mxu0 %v15985_v7  ;;  %v934_v46 = vld [vmem:[%s18128_s25 + $0x1590] sm:$0xff]  ;;  %v16218_v28 = vcombine.high %v806_v45, %v810_v29 }
 0x4de   : > { %14230 = vmatprep.subr.bf16.mxu0 %v15978_v31  ;;  %v938_v25 = vld [vmem:[%s18128_s25 + $0x15b0] sm:$0xff]  ;;  %v16217_v31 = vcombine.low %v806_v45, %v810_v29 }
 0x4df   : > { %14270 = vmatpush2.bf16.msra.mxu1 %v16113_v37  ;;  %v16346_v42 = vcombine.high %v934_v46, %v938_v25  ;;  %v798_v48 = vld [vmem:[%s18128_s25 + $0x1150] sm:$0xff]  ;;  %v16345_v14 = vcombine.low %v934_v46, %v938_v25 }
 0x4e0   : > { %14271 = vmatprep.subr.bf16.mxu1 %v16106_v5  ;;  %v802_v18 = vld [vmem:[%s18128_s25 + $0x1170] sm:$0xff] }
 0x4e1   : > { %14231 = vmatpush2.bf16.msra.mxu0 %v15977_v27  ;;  %v926_v20 = vld [vmem:[%s18128_s25 + $0x1550] sm:$0xff]  ;;  %v16210_v61 = vcombine.high %v798_v48, %v802_v18 }
 0x4e2   : > { %14282 = vmatprep.subr.bf16.mxu0 %v16226_v52  ;;  %v930_v57 = vld [vmem:[%s18128_s25 + $0x1570] sm:$0xff] }
 0x4e3   : > { %14272 = vmatpush2.bf16.msra.mxu1 %v16105_v16  ;;  %v790_v16 = vld [vmem:[%s18128_s25 + $0x1110] sm:$0xff] }
 0x4e4   : > { %14323 = vmatprep.subr.bf16.mxu1 %v16354_v2  ;;  %v13988_v40 = vpop.f32.mrf.mxu0  ;;  %14233 = vmatmul.mubr.bf16.vlgmr.msra.gmra.mxu0 %v18324_v47  ;;  %v794_v52 = vld [vmem:[%s18128_s25 + $0x1130] sm:$0xff] }
 0x4e5   : > { %v13989_v7 = vadd.f32 %v13988_v40, %v19575_v24  ;;  %14283 = vmatpush1.bf16.msra.mxu0 %v16225_v10  ;;  %v16338_v24 = vcombine.high %v926_v20, %v930_v57  ;;  %14314 = vmatprep.mubr.bf16.mxu0 %v18331_v56  ;;  %v918_v45 = vld [vmem:[%s18128_s25 + $0x1510] sm:$0xff] }
 0x4e6   : > { %v14029_v37 = vpop.f32.mrf.mxu1  ;;  %14274 = vmatmul.mubr.bf16.vlgmr.msra.gmra.mxu1 %v18335_v11  ;;  %v13990_v5 = vpop.f32.mrf.mxu0  ;;  %14284 = vmatprep.subr.bf16.mxu0 %v16218_v28  ;;  %v922_v29 = vld [vmem:[%s18128_s25 + $0x1530] sm:$0xff]  ;;  %v16202_v28 = vcombine.high %v790_v16, %v794_v52 }
 0x4e7   : > { %14324 = vmatpush1.bf16.msra.mxu1 %v16353_v55  ;;  %v19649_v49 = vadd.f32 %v14029_v37, %v13989_v7  ;;  %v13991_v35 = vadd.f32 %v13990_v5, %v19584_v58  ;;  %14355 = vmatprep.mubr.bf16.mxu1 %v18344_v3  ;;  %v16209_v58 = vcombine.low %v798_v48, %v802_v18  ;;  %v782_v7 = vld [vmem:[%s18128_s25 + $0x10d0] sm:$0xff] }
 0x4e8   : > { %v14031_v27 = vpop.f32.mrf.mxu1  ;;  %14325 = vmatprep.subr.bf16.mxu1 %v16346_v42  ;;  %v13992_v2 = vpop.f32.mrf.mxu0  ;;  %v16337_v55 = vcombine.low %v926_v20, %v930_v57  ;;  %v16330_v40 = vcombine.high %v918_v45, %v922_v29  ;;  %v786_v37 = vld [vmem:[%s18128_s25 + $0x10f0] sm:$0xff]  ;;  %v16329_v48 = vcombine.low %v918_v45, %v922_v29 }
 0x4e9   : > { %v19658_v46 = vadd.f32 %v14031_v27, %v13991_v35  ;;  %14285 = vmatpush1.bf16.msra.mxu0 %v16217_v31  ;;  %v910_v5 = vld [vmem:[%s18128_s25 + $0x14d0] sm:$0xff]  ;;  %v16201_v27 = vcombine.low %v790_v16, %v794_v52  ;;  %v16194_v18 = vcombine.high %v782_v7, %v786_v37 }
 0x4ea   : > { %v14033_v25 = vpop.f32.mrf.mxu1  ;;  %v13993_v10 = vpop.f32.mrf.mxu0  ;;  %14286 = vmatprep.subr.bf16.mxu0 %v16210_v61  ;;  %v914_v35 = vld [vmem:[%s18128_s25 + $0x14f0] sm:$0xff] }
 0x4eb   : > { %14326 = vmatpush1.bf16.msra.mxu1 %v16345_v14  ;;  %v16322_v20 = vcombine.high %v910_v5, %v914_v35  ;;  %v774_v57 = vld [vmem:[%s18128_s25 + $0x1090] sm:$0xff]  ;;  %v16321_v2 = vcombine.low %v910_v5, %v914_v35 }
 0x4ec   : > { %v14034_v42 = vpop.f32.mrf.mxu1  ;;  %14327 = vmatprep.subr.bf16.mxu1 %v16338_v24  ;;  %v778_v31 = vld [vmem:[%s18128_s25 + $0x10b0] sm:$0xff]  ;;  %v16193_v24 = vcombine.low %v782_v7, %v786_v37 }
 0x4ed   : > { %14287 = vmatpush1.bf16.msra.mxu0 %v16209_v58  ;;  %v902_v14 = vld [vmem:[%s18128_s25 + $0x1490] sm:$0xff]  ;;  %v16186_v16 = vcombine.high %v774_v57, %v778_v31  ;;  %v16185_v10 = vcombine.low %v774_v57, %v778_v31 }
 0x4ee   : > { %14288 = vmatprep.subr.bf16.mxu0 %v16202_v28  ;;  %v906_v61 = vld [vmem:[%s18128_s25 + $0x14b0] sm:$0xff] }
 0x4ef   : > { %14328 = vmatpush1.bf16.msra.mxu1 %v16337_v55  ;;  %v16314_v52 = vcombine.high %v902_v14, %v906_v61  ;;  %v766_v45 = vld [vmem:[%s18128_s25 + $0x1050] sm:$0xff]  ;;  %v16313_v55 = vcombine.low %v902_v14, %v906_v61 }
 0x4f0   : > { %14329 = vmatprep.subr.bf16.mxu1 %v16330_v40  ;;  %v770_v29 = vld [vmem:[%s18128_s25 + $0x1070] sm:$0xff] }
 0x4f1   : > { %14289 = vmatpush1.bf16.msra.mxu0 %v16201_v27  ;;  %v894_v25 = vld [vmem:[%s18128_s25 + $0x1450] sm:$0xff]  ;;  %v16178_v28 = vcombine.high %v766_v45, %v770_v29  ;;  %v16177_v35 = vcombine.low %v766_v45, %v770_v29 }
 0x4f2   : > { %14290 = vmatprep.subr.bf16.mxu0 %v16194_v18  ;;  %v898_v58 = vld [vmem:[%s18128_s25 + $0x1470] sm:$0xff] }
 0x4f3   : > { %14330 = vmatpush1.bf16.msra.mxu1 %v16329_v48  ;;  %v16306_v42 = vcombine.high %v894_v25, %v898_v58  ;;  %v758_v40 = vld [vmem:[%s18128_s25 + $0x1010] sm:$0xff]  ;;  %v16305_v27 = vcombine.low %v894_v25, %v898_v58 }
 0x4f4   : > { %14331 = vmatprep.subr.bf16.mxu1 %v16322_v20  ;;  %v762_v7 = vld [vmem:[%s18128_s25 + $0x1030] sm:$0xff] }
 0x4f5   : > { %14291 = vmatpush1.bf16.msra.mxu0 %v16193_v24  ;;  %v886_v37 = vld [vmem:[%s18128_s25 + $0x1410] sm:$0xff]  ;;  %v16170_v48 = vcombine.high %v758_v40, %v762_v7  ;;  %v16169_v61 = vcombine.low %v758_v40, %v762_v7 }
 0x4f6   : > { %14292 = vmatprep.subr.bf16.mxu0 %v16186_v16  ;;  %v890_v5 = vld [vmem:[%s18128_s25 + $0x1430] sm:$0xff] }
 0x4f7   : > { %14332 = vmatpush1.bf16.msra.mxu1 %v16321_v2  ;;  %v16298_v18 = vcombine.high %v886_v37, %v890_v5  ;;  %v878_v20 = vld [vmem:[%s18128_s25 + $0x13d0] sm:$0xff]  ;;  %v16297_v24 = vcombine.low %v886_v37, %v890_v5 }
 0x4f8   : > { %14333 = vmatprep.subr.bf16.mxu1 %v16314_v52  ;;  %v882_v57 = vld [vmem:[%s18128_s25 + $0x13f0] sm:$0xff] }
 0x4f9   : > { %14293 = vmatpush1.bf16.msra.mxu0 %v16185_v10  ;;  %v1006_v31 = vld [vmem:[%s18128_s25 + $0x17d0] sm:$0xff]  ;;  %v16290_v2 = vcombine.high %v878_v20, %v882_v57  ;;  %v16289_v58 = vcombine.low %v878_v20, %v882_v57 }
 0x4fa   : > { %14294 = vmatprep.subr.bf16.mxu0 %v16178_v28  ;;  %v1010_v14 = vld [vmem:[%s18128_s25 + $0x17f0] sm:$0xff] }
 0x4fb   : > { %14334 = vmatpush1.bf16.msra.mxu1 %v16313_v55  ;;  %v16418_v16 = vcombine.high %v1006_v31, %v1010_v14  ;;  %v870_v52 = vld [vmem:[%s18128_s25 + $0x1390] sm:$0xff]  ;;  %v16417_v10 = vcombine.low %v1006_v31, %v1010_v14 }
 0x4fc   : > { %14335 = vmatprep.subr.bf16.mxu1 %v16306_v42  ;;  %v874_v45 = vld [vmem:[%s18128_s25 + $0x13b0] sm:$0xff] }
 0x4fd   : > { %14295 = vmatpush1.bf16.msra.mxu0 %v16177_v35  ;;  %v998_v29 = vld [vmem:[%s18128_s25 + $0x1790] sm:$0xff]  ;;  %v16282_v55 = vcombine.high %v870_v52, %v874_v45  ;;  %v16281_v5 = vcombine.low %v870_v52, %v874_v45 }
 0x4fe   : > { %14296 = vmatprep.subr.bf16.mxu0 %v16170_v48  ;;  %v1002_v25 = vld [vmem:[%s18128_s25 + $0x17b0] sm:$0xff] }
 0x4ff   : > { %14336 = vmatpush1.bf16.msra.mxu1 %v16305_v27  ;;  %v16410_v28 = vcombine.high %v998_v29, %v1002_v25  ;;  %v862_v42 = vld [vmem:[%s18128_s25 + $0x1350] sm:$0xff]  ;;  %v16409_v35 = vcombine.low %v998_v29, %v1002_v25 }
 0x500   : > { %14337 = vmatprep.subr.bf16.mxu1 %v16298_v18  ;;  %v866_v40 = vld [vmem:[%s18128_s25 + $0x1370] sm:$0xff] }
 0x501   : > { %14297 = vmatpush1.bf16.msra.mxu0 %v16169_v61  ;;  %v990_v7 = vld [vmem:[%s18128_s25 + $0x1750] sm:$0xff]  ;;  %v16274_v27 = vcombine.high %v862_v42, %v866_v40  ;;  %v16273_v14 = vcombine.low %v862_v42, %v866_v40 }
 0x502   : > { %14298 = vmatprep.subr.bf16.mxu0 %v16290_v2  ;;  %v994_v37 = vld [vmem:[%s18128_s25 + $0x1770] sm:$0xff] }
 0x503   : > { %14338 = vmatpush1.bf16.msra.mxu1 %v16297_v24  ;;  %v16402_v48 = vcombine.high %v990_v7, %v994_v37  ;;  %v854_v18 = vld [vmem:[%s18128_s25 + $0x1310] sm:$0xff]  ;;  %v16401_v61 = vcombine.low %v990_v7, %v994_v37 }
 0x504   : > { %14339 = vmatprep.subr.bf16.mxu1 %v16418_v16  ;;  %v858_v20 = vld [vmem:[%s18128_s25 + $0x1330] sm:$0xff] }
 0x505   : > { %14299 = vmatpush2.bf16.msra.mxu0 %v16289_v58  ;;  %v982_v57 = vld [vmem:[%s18128_s25 + $0x1710] sm:$0xff]  ;;  %v16266_v24 = vcombine.high %v854_v18, %v858_v20  ;;  %v16265_v25 = vcombine.low %v854_v18, %v858_v20 }
 0x506   : > { %14300 = vmatprep.subr.bf16.mxu0 %v16282_v55  ;;  %v986_v31 = vld [vmem:[%s18128_s25 + $0x1730] sm:$0xff] }
 0x507   : > { %14340 = vmatpush2.bf16.msra.mxu1 %v16417_v10  ;;  %v16394_v2 = vcombine.high %v982_v57, %v986_v31  ;;  %v846_v16 = vld [vmem:[%s18128_s25 + $0x12d0] sm:$0xff]  ;;  %v16393_v58 = vcombine.low %v982_v57, %v986_v31 }
 0x508   : > { %14341 = vmatprep.subr.bf16.mxu1 %v16410_v28  ;;  %v850_v52 = vld [vmem:[%s18128_s25 + $0x12f0] sm:$0xff] }
 0x509   : > { %14301 = vmatpush2.bf16.msra.mxu0 %v16281_v5  ;;  %v974_v45 = vld [vmem:[%s18128_s25 + $0x16d0] sm:$0xff]  ;;  %v16258_v10 = vcombine.high %v846_v16, %v850_v52  ;;  %v16257_v37 = vcombine.low %v846_v16, %v850_v52 }
 0x50a   : > { %14302 = vmatprep.subr.bf16.mxu0 %v16274_v27  ;;  %v978_v29 = vld [vmem:[%s18128_s25 + $0x16f0] sm:$0xff] }
 0x50b   : > { %14342 = vmatpush2.bf16.msra.mxu1 %v16409_v35  ;;  %v16386_v55 = vcombine.high %v974_v45, %v978_v29  ;;  %v838_v28 = vld [vmem:[%s18128_s25 + $0x1290] sm:$0xff]  ;;  %v16385_v5 = vcombine.low %v974_v45, %v978_v29 }
 0x50c   : > { %14343 = vmatprep.subr.bf16.mxu1 %v16402_v48  ;;  %v842_v42 = vld [vmem:[%s18128_s25 + $0x12b0] sm:$0xff] }
 0x50d   : > { %14303 = vmatpush2.bf16.msra.mxu0 %v16273_v14  ;;  %v966_v40 = vld [vmem:[%s18128_s25 + $0x1690] sm:$0xff]  ;;  %v16250_v35 = vcombine.high %v838_v28, %v842_v42  ;;  %v16249_v31 = vcombine.low %v838_v28, %v842_v42 }
 0x50e   : > { %14304 = vmatprep.subr.bf16.mxu0 %v16266_v24  ;;  %v970_v7 = vld [vmem:[%s18128_s25 + $0x16b0] sm:$0xff] }
 0x50f   : > { %14344 = vmatpush2.bf16.msra.mxu1 %v16401_v61  ;;  %v16378_v27 = vcombine.high %v966_v40, %v970_v7  ;;  %v830_v48 = vld [vmem:[%s18128_s25 + $0x1250] sm:$0xff]  ;;  %v16377_v14 = vcombine.low %v966_v40, %v970_v7 }
 0x510   : > { %14345 = vmatprep.subr.bf16.mxu1 %v16394_v2  ;;  %v834_v18 = vld [vmem:[%s18128_s25 + $0x1270] sm:$0xff] }
 0x511   : > { %14305 = vmatpush2.bf16.msra.mxu0 %v16265_v25  ;;  %v958_v20 = vld [vmem:[%s18128_s25 + $0x1650] sm:$0xff]  ;;  %v16242_v61 = vcombine.high %v830_v48, %v834_v18  ;;  %v16241_v29 = vcombine.low %v830_v48, %v834_v18 }
 0x512   : > { %14306 = vmatprep.subr.bf16.mxu0 %v16258_v10  ;;  %v962_v57 = vld [vmem:[%s18128_s25 + $0x1670] sm:$0xff] }
 0x513   : > { %14346 = vmatpush2.bf16.msra.mxu1 %v16393_v58  ;;  %v16370_v24 = vcombine.high %v958_v20, %v962_v57  ;;  %v822_v2 = vld [vmem:[%s18128_s25 + $0x1210] sm:$0xff]  ;;  %v16369_v25 = vcombine.low %v958_v20, %v962_v57 }
 0x514   : > { %14347 = vmatprep.subr.bf16.mxu1 %v16386_v55  ;;  %v826_v16 = vld [vmem:[%s18128_s25 + $0x1230] sm:$0xff] }
 0x515   : > { %14307 = vmatpush2.bf16.msra.mxu0 %v16257_v37  ;;  %v950_v52 = vld [vmem:[%s18128_s25 + $0x1610] sm:$0xff]  ;;  %v16234_v58 = vcombine.high %v822_v2, %v826_v16  ;;  %v16233_v7 = vcombine.low %v822_v2, %v826_v16 }
 0x516   : > { %14308 = vmatprep.subr.bf16.mxu0 %v16250_v35  ;;  %v954_v45 = vld [vmem:[%s18128_s25 + $0x1630] sm:$0xff] }
 0x517   : > { %14348 = vmatpush2.bf16.msra.mxu1 %v16385_v5  ;;  %v16362_v10 = vcombine.high %v950_v52, %v954_v45  ;;  %v1070_v55 = vld [vmem:[%s18128_s25 + $0x19d0] sm:$0xff]  ;;  %v16361_v37 = vcombine.low %v950_v52, %v954_v45 }
 0x518   : > { %14349 = vmatprep.subr.bf16.mxu1 %v16378_v27  ;;  %v1074_v28 = vld [vmem:[%s18128_s25 + $0x19f0] sm:$0xff] }
 0x519   : > { %14309 = vmatpush2.bf16.msra.mxu0 %v16249_v31  ;;  %v1198_v42 = vld [vmem:[%s18128_s25 + $0x1dd0] sm:$0xff]  ;;  %v16482_v5 = vcombine.high %v1070_v55, %v1074_v28  ;;  %v16481_v57 = vcombine.low %v1070_v55, %v1074_v28 }
 0x51a   : > { %14310 = vmatprep.subr.bf16.mxu0 %v16242_v61  ;;  %v1202_v40 = vld [vmem:[%s18128_s25 + $0x1df0] sm:$0xff] }
 0x51b   : > { %14350 = vmatpush2.bf16.msra.mxu1 %v16377_v14  ;;  %v16610_v35 = vcombine.high %v1198_v42, %v1202_v40  ;;  %v1062_v27 = vld [vmem:[%s18128_s25 + $0x1990] sm:$0xff]  ;;  %v16609_v31 = vcombine.low %v1198_v42, %v1202_v40 }
 0x51c   : > { %14351 = vmatprep.subr.bf16.mxu1 %v16370_v24  ;;  %v1066_v48 = vld [vmem:[%s18128_s25 + $0x19b0] sm:$0xff] }
 0x51d   : > { %14311 = vmatpush2.bf16.msra.mxu0 %v16241_v29  ;;  %v1190_v18 = vld [vmem:[%s18128_s25 + $0x1d90] sm:$0xff]  ;;  %v16474_v14 = vcombine.high %v1062_v27, %v1066_v48 }
 0x51e   : > { %14312 = vmatprep.subr.bf16.mxu0 %v16234_v58  ;;  %v1194_v20 = vld [vmem:[%s18128_s25 + $0x1db0] sm:$0xff]  ;;  %v16473_v58 = vcombine.low %v1062_v27, %v1066_v48 }
 0x51f   : > { %14352 = vmatpush2.bf16.msra.mxu1 %v16369_v25  ;;  %v16602_v61 = vcombine.high %v1190_v18, %v1194_v20  ;;  %v1054_v24 = vld [vmem:[%s18128_s25 + $0x1950] sm:$0xff]  ;;  %v16601_v55 = vcombine.low %v1190_v18, %v1194_v20 }
 0x520   : > { %14353 = vmatprep.subr.bf16.mxu1 %v16362_v10  ;;  %v1058_v2 = vld [vmem:[%s18128_s25 + $0x1970] sm:$0xff] }
 0x521   : > { %14313 = vmatpush2.bf16.msra.mxu0 %v16233_v7  ;;  %v1182_v52 = vld [vmem:[%s18128_s25 + $0x1d50] sm:$0xff]  ;;  %v16466_v28 = vcombine.high %v1054_v24, %v1058_v2 }
 0x522   : > { %14364 = vmatprep.subr.bf16.mxu0 %v16482_v5  ;;  %v1186_v45 = vld [vmem:[%s18128_s25 + $0x1d70] sm:$0xff] }
 0x523   : > { %14354 = vmatpush2.bf16.msra.mxu1 %v16361_v37  ;;  %v16594_v37 = vcombine.high %v1182_v52, %v1186_v45  ;;  %v1050_v5 = vld [vmem:[%s18128_s25 + $0x1930] sm:$0xff] }
 0x524   : > { %14405 = vmatprep.subr.bf16.mxu1 %v16610_v35  ;;  %v14070_v16 = vpop.f32.mrf.mxu0  ;;  %14315 = vmatmul.mubr.bf16.vlgmr.msra.gmra.mxu0 %v18414_v21 }
 0x525   : > { %v14071_v29 = vadd.f32 %v14070_v16, %v19649_v49  ;;  %14365 = vmatpush1.bf16.msra.mxu0 %v16481_v57  ;;  %v1046_v49 = vld [vmem:[%s18128_s25 + $0x1910] sm:$0xff]  ;;  %14396 = vmatprep.mubr.bf16.mxu0 %v18421_v32 }
 0x526   : > { %v14111_v25 = vpop.f32.mrf.mxu1  ;;  %14356 = vmatmul.mubr.bf16.vlgmr.msra.gmra.mxu1 %v18425_v34  ;;  %v14072_v10 = vpop.f32.mrf.mxu0  ;;  %14366 = vmatprep.subr.bf16.mxu0 %v16474_v14  ;;  %v1174_v57 = vld [vmem:[%s18128_s25 + $0x1d10] sm:$0xff]  ;;  %v16458_v14 = vcombine.high %v1046_v49, %v1050_v5 }
 0x527   : > { %14406 = vmatpush1.bf16.msra.mxu1 %v16609_v31  ;;  %v14112_v42 = vadd.f32 %v14111_v25, %v14071_v29  ;;  %v14073_v40 = vadd.f32 %v14072_v10, %v19658_v46  ;;  %v1178_v16 = vld [vmem:[%s18128_s25 + $0x1d30] sm:$0xff]  ;;  %14437 = vmatprep.mubr.bf16.mxu1 %v18434_v44  ;;  %v16465_v46 = vcombine.low %v1054_v24, %v1058_v2 }
 0x528   : > { %v14113_v7 = vpop.f32.mrf.mxu1  ;;  %14407 = vmatprep.subr.bf16.mxu1 %v16602_v61  ;;  %v14074_v35 = vpop.f32.mrf.mxu0  ;;  %v16593_v31 = vcombine.low %v1182_v52, %v1186_v45  ;;  %v16586_v25 = vcombine.high %v1174_v57, %v1178_v16  ;;  %v1038_v10 = vld [vmem:[%s18128_s25 + $0x18d0] sm:$0xff]  ;;  %v16457_v2 = vcombine.low %v1046_v49, %v1050_v5  ;;  %v16585_v52 = vcombine.low %v1174_v57, %v1178_v16 }
 0x529   : > { %v15440_v27 = vmul.f32 0.2, %v14112_v42  ;;  %v14114_v48 = vadd.f32 %v14113_v7, %v14073_v40  ;;  %14367 = vmatpush1.bf16.msra.mxu0 %v16473_v58  ;;  %vm15432_vm2 = vcmp.gt.f32.partialorder %v14112_v42, 0.0  ;;  %v1042_v40 = vld [vmem:[%s18128_s25 + $0x18f0] sm:$0xff] }
 0x52a   : > { %v14115_v18 = vpop.f32.mrf.mxu1  ;;  %v14075_v20 = vpop.f32.mrf.mxu0  ;;  %14368 = vmatprep.subr.bf16.mxu0 %v16466_v28  ;;  %v1166_v7 = vld [vmem:[%s18128_s25 + $0x1cd0] sm:$0xff]  ;;  %v16450_v45 = vcombine.high %v1038_v10, %v1042_v40  ;;  %v16449_v16 = vcombine.low %v1038_v10, %v1042_v40 }
 0x52b   : > { %14408 = vmatpush1.bf16.msra.mxu1 %v16601_v55  ;;  %vm15433_vm3 = vcmp.gt.f32.partialorder %v14114_v48, 0.0  ;;  %v15441_v61 = vmul.f32 0.2, %v14114_v48  ;;  %v1170_v35 = vld [vmem:[%s18128_s25 + $0x1cf0] sm:$0xff]  ;;  %v15448_v58 = vsel %vm15432_vm2, %v14112_v42, %v15440_v27  ;;  %v19740_v42 = vrot.slane %v17701_v12, %v18163_v53 }
 0x52c   : > { %v14116_v29 = vpop.f32.mrf.mxu1  ;;  %14409 = vmatprep.subr.bf16.mxu1 %v16594_v37  ;;  %v16578_v28 = vcombine.high %v1166_v7, %v1170_v35  ;;  %v1030_v37 = vld [vmem:[%s18128_s25 + $0x1890] sm:$0xff] }
 0x52d   : > { %v15449_v24 = vsel %vm15433_vm3, %v14114_v48, %v15441_v61  ;;  %14369 = vmatpush1.bf16.msra.mxu0 %v16465_v46  ;;  %v1034_v18 = vld [vmem:[%s18128_s25 + $0x18b0] sm:$0xff]  ;;  %v16577_v48 = vcombine.low %v1166_v7, %v1170_v35 }
 0x52e   : > { %v17702_v55 = vpack.c.bf16 %v15449_v24, %v15448_v58  ;;  %14370 = vmatprep.subr.bf16.mxu0 %v16458_v14  ;;  %v1158_v5 = vld [vmem:[%s18128_s25 + $0x1c90] sm:$0xff]  ;;  %v16442_v46 = vcombine.high %v1030_v37, %v1034_v18  ;;  %v16441_v14 = vcombine.low %v1030_v37, %v1034_v18 }
 0x52f   : > { %14410 = vmatpush1.bf16.msra.mxu1 %v16593_v31  ;;  %v1162_v57 = vld [vmem:[%s18128_s25 + $0x1cb0] sm:$0xff] }
 0x530   : > { %14411 = vmatprep.subr.bf16.mxu1 %v16586_v25  ;;  %v19743_v49 = vrot.slane %v17702_v55, %v18163_v53  ;;  %v16570_v62 = vcombine.high %v1158_v5, %v1162_v57  ;;  %v1026_v12 = vld [vmem:[%s18128_s25 + $0x1870] sm:$0xff]  ;;  %v16569_v61 = vcombine.low %v1158_v5, %v1162_v57 }
 0x531   : > { %14371 = vmatpush1.bf16.msra.mxu0 %v16457_v2  ;;  %v1150_v20 = vld [vmem:[%s18128_s25 + $0x1c50] sm:$0xff]  ;;  %v16434_v29 = vcombine.high %v1022_v4, %v1026_v12  ;;  %v16433_v58 = vcombine.low %v1022_v4, %v1026_v12 }
 0x532   : > { %v15502_v27 = vcombine.low %v19740_v42, %v19743_v49  ;;  %14372 = vmatprep.subr.bf16.mxu0 %v16450_v45  ;;  %v1154_v31 = vld [vmem:[%s18128_s25 + $0x1c70] sm:$0xff] }
 0x533   : > { %14412 = vmatpush1.bf16.msra.mxu1 %v16585_v52  ;;  %v16562_v25 = vcombine.high %v1150_v20, %v1154_v31  ;;  %v1014_v10 = vld [vmem:[%s18128_s25 + $0x1810] sm:$0xff]  ;;  %v16561_v24 = vcombine.low %v1150_v20, %v1154_v31 }
 0x534   : > { %14413 = vmatprep.subr.bf16.mxu1 %v16578_v28  ;;  %v1018_v40 = vld [vmem:[%s18128_s25 + $0x1830] sm:$0xff] }
 0x535   : > { %14373 = vmatpush1.bf16.msra.mxu0 %v16449_v16  ;;  %v1142_v7 = vld [vmem:[%s18128_s25 + $0x1c10] sm:$0xff]  ;;  %v16426_v2 = vcombine.high %v1014_v10, %v1018_v40  ;;  %v16425_v18 = vcombine.low %v1014_v10, %v1018_v40 }
 0x536   : > { %14374 = vmatprep.subr.bf16.mxu0 %v16442_v46  ;;  %v1146_v35 = vld [vmem:[%s18128_s25 + $0x1c30] sm:$0xff] }
 0x537   : > { %14414 = vmatpush1.bf16.msra.mxu1 %v16577_v48  ;;  %v16554_v55 = vcombine.high %v1142_v7, %v1146_v35  ;;  %v1134_v52 = vld [vmem:[%s18128_s25 + $0x1bd0] sm:$0xff]  ;;  %v16553_v5 = vcombine.low %v1142_v7, %v1146_v35 }
 0x538   : > { %14415 = vmatprep.subr.bf16.mxu1 %v16570_v62  ;;  %v1138_v45 = vld [vmem:[%s18128_s25 + $0x1bf0] sm:$0xff] }
 0x539   : > { %14375 = vmatpush1.bf16.msra.mxu0 %v16441_v14  ;;  %v1262_v28 = vld [vmem:[%s18128_s25 + $0x1fd0] sm:$0xff]  ;;  %v16546_v57 = vcombine.high %v1134_v52, %v1138_v45  ;;  %v16545_v12 = vcombine.low %v1134_v52, %v1138_v45 }
 0x53a   : > { %14376 = vmatprep.subr.bf16.mxu0 %v16434_v29  ;;  %v1266_v37 = vld [vmem:[%s18128_s25 + $0x1ff0] sm:$0xff] }
 0x53b   : > { %14416 = vmatpush1.bf16.msra.mxu1 %v16569_v61  ;;  %v16674_v16 = vcombine.high %v1262_v28, %v1266_v37  ;;  %v1126_v48 = vld [vmem:[%s18128_s25 + $0x1b90] sm:$0xff]  ;;  %v16673_v20 = vcombine.low %v1262_v28, %v1266_v37 }
 0x53c   : > { %14417 = vmatprep.subr.bf16.mxu1 %v16562_v25  ;;  %v1130_v46 = vld [vmem:[%s18128_s25 + $0x1bb0] sm:$0xff] }
 0x53d   : > { %14377 = vmatpush1.bf16.msra.mxu0 %v16433_v58  ;;  %v1254_v62 = vld [vmem:[%s18128_s25 + $0x1f90] sm:$0xff]  ;;  %v16538_v31 = vcombine.high %v1126_v48, %v1130_v46  ;;  %v16537_v40 = vcombine.low %v1126_v48, %v1130_v46 }
 0x53e   : > { %14378 = vmatprep.subr.bf16.mxu0 %v16426_v2  ;;  %v1258_v4 = vld [vmem:[%s18128_s25 + $0x1fb0] sm:$0xff] }
 0x53f   : > { %14418 = vmatpush1.bf16.msra.mxu1 %v16561_v24  ;;  %v16666_v14 = vcombine.high %v1254_v62, %v1258_v4  ;;  %v1118_v61 = vld [vmem:[%s18128_s25 + $0x1b50] sm:$0xff]  ;;  %v16665_v7 = vcombine.low %v1254_v62, %v1258_v4 }
 0x540   : > { %14419 = vmatprep.subr.bf16.mxu1 %v16554_v55  ;;  %v1122_v29 = vld [vmem:[%s18128_s25 + $0x1b70] sm:$0xff] }
 0x541   : > { %14379 = vmatpush1.bf16.msra.mxu0 %v16425_v18  ;;  %v1246_v25 = vld [vmem:[%s18128_s25 + $0x1f50] sm:$0xff]  ;;  %v16530_v35 = vcombine.high %v1118_v61, %v1122_v29  ;;  %v16529_v45 = vcombine.low %v1118_v61, %v1122_v29 }
 0x542   : > { %14380 = vmatprep.subr.bf16.mxu0 %v16546_v57  ;;  %v1250_v10 = vld [vmem:[%s18128_s25 + $0x1f70] sm:$0xff] }
 0x543   : > { %14420 = vmatpush1.bf16.msra.mxu1 %v16553_v5  ;;  %v16658_v58 = vcombine.high %v1246_v25, %v1250_v10  ;;  %v1110_v24 = vld [vmem:[%s18128_s25 + $0x1b10] sm:$0xff]  ;;  %v16657_v28 = vcombine.low %v1246_v25, %v1250_v10 }
 0x544   : > { %14421 = vmatprep.subr.bf16.mxu1 %v16674_v16  ;;  %v1114_v2 = vld [vmem:[%s18128_s25 + $0x1b30] sm:$0xff] }
 0x545   : > { %14381 = vmatpush2.bf16.msra.mxu0 %v16545_v12  ;;  %v1238_v55 = vld [vmem:[%s18128_s25 + $0x1f10] sm:$0xff]  ;;  %v16522_v37 = vcombine.high %v1110_v24, %v1114_v2  ;;  %v16521_v46 = vcombine.low %v1110_v24, %v1114_v2 }
 0x546   : > { %14382 = vmatprep.subr.bf16.mxu0 %v16538_v31  ;;  %v1242_v52 = vld [vmem:[%s18128_s25 + $0x1f30] sm:$0xff] }
 0x547   : > { %14422 = vmatpush2.bf16.msra.mxu1 %v16673_v20  ;;  %v16650_v18 = vcombine.high %v1238_v55, %v1242_v52  ;;  %v1102_v5 = vld [vmem:[%s18128_s25 + $0x1ad0] sm:$0xff]  ;;  %v16649_v62 = vcombine.low %v1238_v55, %v1242_v52 }
 0x548   : > { %14423 = vmatprep.subr.bf16.mxu1 %v16666_v14  ;;  %v1106_v57 = vld [vmem:[%s18128_s25 + $0x1af0] sm:$0xff] }
 0x549   : > { %14383 = vmatpush2.bf16.msra.mxu0 %v16537_v40  ;;  %v1230_v16 = vld [vmem:[%s18128_s25 + $0x1ed0] sm:$0xff]  ;;  %v16514_v4 = vcombine.high %v1102_v5, %v1106_v57  ;;  %v16513_v29 = vcombine.low %v1102_v5, %v1106_v57 }
 0x54a   : > { %14384 = vmatprep.subr.bf16.mxu0 %v16530_v35  ;;  %v1234_v48 = vld [vmem:[%s18128_s25 + $0x1ef0] sm:$0xff] }
 0x54b   : > { %14424 = vmatpush2.bf16.msra.mxu1 %v16665_v7  ;;  %v16642_v12 = vcombine.high %v1230_v16, %v1234_v48  ;;  %v1094_v20 = vld [vmem:[%s18128_s25 + $0x1a90] sm:$0xff]  ;;  %v16641_v25 = vcombine.low %v1230_v16, %v1234_v48 }
 0x54c   : > { %14425 = vmatprep.subr.bf16.mxu1 %v16658_v58  ;;  %v1098_v31 = vld [vmem:[%s18128_s25 + $0x1ab0] sm:$0xff] }
 0x54d   : > { %14385 = vmatpush2.bf16.msra.mxu0 %v16529_v45  ;;  %v1222_v14 = vld [vmem:[%s18128_s25 + $0x1e90] sm:$0xff]  ;;  %v16506_v10 = vcombine.high %v1094_v20, %v1098_v31  ;;  %v16505_v2 = vcombine.low %v1094_v20, %v1098_v31 }
 0x54e   : > { %14386 = vmatprep.subr.bf16.mxu0 %v16522_v37  ;;  %v1226_v61 = vld [vmem:[%s18128_s25 + $0x1eb0] sm:$0xff] }
 0x54f   : > { %14426 = vmatpush2.bf16.msra.mxu1 %v16657_v28  ;;  %v16634_v40 = vcombine.high %v1222_v14, %v1226_v61  ;;  %v1086_v7 = vld [vmem:[%s18128_s25 + $0x1a50] sm:$0xff]  ;;  %v16633_v55 = vcombine.low %v1222_v14, %v1226_v61  ;;  %v2312_v14 = vsub.s32 4, %v18156_v43 }
 0x550   : > { %14427 = vmatprep.subr.bf16.mxu1 %v16650_v18  ;;  %v1090_v35 = vld [vmem:[%s18128_s25 + $0x1a70] sm:$0xff] }
 0x551   : > { %14387 = vmatpush2.bf16.msra.mxu0 %v16521_v46  ;;  %v1214_v58 = vld [vmem:[%s18128_s25 + $0x1e50] sm:$0xff]  ;;  %v16498_v52 = vcombine.high %v1086_v7, %v1090_v35  ;;  %v16497_v57 = vcombine.low %v1086_v7, %v1090_v35 }
 0x552   : > { %14388 = vmatprep.subr.bf16.mxu0 %v16514_v4  ;;  %v1218_v24 = vld [vmem:[%s18128_s25 + $0x1e70] sm:$0xff] }
 0x553   : > { %14428 = vmatpush2.bf16.msra.mxu1 %v16649_v62  ;;  %v16626_v45 = vcombine.high %v1214_v58, %v1218_v24  ;;  %v1078_v28 = vld [vmem:[%s18128_s25 + $0x1a10] sm:$0xff]  ;;  %v16625_v16 = vcombine.low %v1214_v58, %v1218_v24  ;;  %v17784_v24 = vld [vmem:[%s18511_s27] sm:$0xff] }
 0x554   : > { %14429 = vmatprep.subr.bf16.mxu1 %v16642_v12  ;;  %v1082_v37 = vld [vmem:[%s18128_s25 + $0x1a30] sm:$0xff] }
 0x555   : > { %14389 = vmatpush2.bf16.msra.mxu0 %v16513_v29  ;;  %v1206_v18 = vld [vmem:[%s18128_s25 + $0x1e10] sm:$0xff]  ;;  %v16490_v48 = vcombine.high %v1078_v28, %v1082_v37  ;;  %v16489_v31 = vcombine.low %v1078_v28, %v1082_v37 }
 0x556   : > { %14390 = vmatprep.subr.bf16.mxu0 %v16506_v10  ;;  %v1210_v5 = vld [vmem:[%s18128_s25 + $0x1e30] sm:$0xff]  ;;  %v2316_v10 = vsub.s32 5, %v18156_v43 }
 0x557   : > { %14430 = vmatpush2.bf16.msra.mxu1 %v16641_v25  ;;  %v16618_v46 = vcombine.high %v1206_v18, %v1210_v5  ;;  %v1326_v62 = vld [vmem:[%s18128_s25 + $0x21d0] sm:$0xff]  ;;  %v16617_v61 = vcombine.low %v1206_v18, %v1210_v5 }
 0x558   : > { %14431 = vmatprep.subr.bf16.mxu1 %v16634_v40  ;;  %v1330_v4 = vld [vmem:[%s18128_s25 + $0x21f0] sm:$0xff]  ;;  %v2317_v28 = vrot.slane %v17784_v24, %v2316_v10 }
 0x559   : > { %14391 = vmatpush2.bf16.msra.mxu0 %v16505_v2  ;;  %v1454_v12 = vld [vmem:[%s18128_s25 + $0x25d0] sm:$0xff]  ;;  %v16738_v29 = vcombine.high %v1326_v62, %v1330_v4  ;;  %v2313_v2 = vrot.slane %v17784_v24, %v2312_v14 }
 0x55a   : > { %14392 = vmatprep.subr.bf16.mxu0 %v16498_v52  ;;  %v1458_v20 = vld [vmem:[%s18128_s25 + $0x25f0] sm:$0xff] }
 0x55b   : > { %14432 = vmatpush2.bf16.msra.mxu1 %v16633_v55  ;;  %v16866_v25 = vcombine.high %v1454_v12, %v1458_v20  ;;  %v1318_v40 = vld [vmem:[%s18128_s25 + $0x2190] sm:$0xff]  ;;  %v16737_v55 = vcombine.low %v1326_v62, %v1330_v4  ;;  %v16865_v52 = vcombine.low %v1454_v12, %v1458_v20 }
 0x55c   : > { %14433 = vmatprep.subr.bf16.mxu1 %v16626_v45  ;;  %v1322_v7 = vld [vmem:[%s18128_s25 + $0x21b0] sm:$0xff] }
 0x55d   : > { %14393 = vmatpush2.bf16.msra.mxu0 %v16497_v57  ;;  %v1446_v35 = vld [vmem:[%s18128_s25 + $0x2590] sm:$0xff]  ;;  %v16730_v45 = vcombine.high %v1318_v40, %v1322_v7  ;;  %v16729_v62 = vcombine.low %v1318_v40, %v1322_v7 }
 0x55e   : > { %14394 = vmatprep.subr.bf16.mxu0 %v16490_v48  ;;  %v1450_v58 = vld [vmem:[%s18128_s25 + $0x25b0] sm:$0xff] }
 0x55f   : > { %14434 = vmatpush2.bf16.msra.mxu1 %v16625_v16  ;;  %v16858_v37 = vcombine.high %v1446_v35, %v1450_v58  ;;  %v1310_v18 = vld [vmem:[%s18128_s25 + $0x2150] sm:$0xff]  ;;  %v16857_v12 = vcombine.low %v1446_v35, %v1450_v58 }
 0x560   : > { %14435 = vmatprep.subr.bf16.mxu1 %v16618_v46  ;;  %v1314_v5 = vld [vmem:[%s18128_s25 + $0x2170] sm:$0xff] }
 0x561   : > { %14395 = vmatpush2.bf16.msra.mxu0 %v16489_v31  ;;  %v1438_v16 = vld [vmem:[%s18128_s25 + $0x2550] sm:$0xff]  ;;  %v16722_v20 = vcombine.high %v1310_v18, %v1314_v5  ;;  %v16721_v58 = vcombine.low %v1310_v18, %v1314_v5 }
 0x562   : > { %14446 = vmatprep.subr.bf16.mxu0 %v16738_v29  ;;  %v1442_v48 = vld [vmem:[%s18128_s25 + $0x2570] sm:$0xff] }
 0x563   : > { %14436 = vmatpush2.bf16.msra.mxu1 %v16617_v61  ;;  %v1302_v10 = vld [vmem:[%s18128_s25 + $0x2110] sm:$0xff] }
 0x564   : > { %14487 = vmatprep.subr.bf16.mxu1 %v16866_v25  ;;  %v14152_v57 = vpop.f32.mrf.mxu0  ;;  %14397 = vmatmul.mubr.bf16.vlgmr.msra.gmra.mxu0 %v18507_v59  ;;  %v16850_v25 = vcombine.high %v1438_v16, %v1442_v48  ;;  %v1306_v24 = vld [vmem:[%s18128_s25 + $0x2130] sm:$0xff] }
 0x565   : > { %v14153_v46 = vadd.f32 %v14152_v57, %v2313_v2  ;;  %14447 = vmatpush1.bf16.msra.mxu0 %v16737_v55  ;;  %14478 = vmatprep.mubr.bf16.mxu0 %v18520_v23  ;;  %v1430_v55 = vld [vmem:[%s18128_s25 + $0x2510] sm:$0xff] }
 0x566   : > { %v14193_v31 = vpop.f32.mrf.mxu1  ;;  %14438 = vmatmul.mubr.bf16.vlgmr.msra.gmra.mxu1 %v18524_v26  ;;  %v14154_v4 = vpop.f32.mrf.mxu0  ;;  %14448 = vmatprep.subr.bf16.mxu0 %v16730_v45  ;;  %v1434_v40 = vld [vmem:[%s18128_s25 + $0x2530] sm:$0xff]  ;;  %v16849_v45 = vcombine.low %v1438_v16, %v1442_v48 }
 0x567   : > { %14488 = vmatpush1.bf16.msra.mxu1 %v16865_v52  ;;  %v19806_v14 = vadd.f32 %v14193_v31, %v14153_v46  ;;  %v14155_v61 = vadd.f32 %v14154_v4, %v2317_v28  ;;  %14519 = vmatprep.mubr.bf16.mxu1 %v18533_v41  ;;  %v16714_v28 = vcombine.high %v1302_v10, %v1306_v24  ;;  %v1294_v46 = vld [vmem:[%s18128_s25 + $0x20d0] sm:$0xff] }
 0x568   : > { %v14195_v29 = vpop.f32.mrf.mxu1  ;;  %14489 = vmatprep.subr.bf16.mxu1 %v16858_v37  ;;  %v14156_v2 = vpop.f32.mrf.mxu0  ;;  %v16842_v57 = vcombine.high %v1430_v55, %v1434_v40  ;;  %v1298_v31 = vld [vmem:[%s18128_s25 + $0x20f0] sm:$0xff]  ;;  %v16841_v18 = vcombine.low %v1430_v55, %v1434_v40 }
 0x569   : > { %v19814_v7 = vadd.f32 %v14195_v29, %v14155_v61  ;;  %14449 = vmatpush1.bf16.msra.mxu0 %v16729_v62  ;;  %v1422_v4 = vld [vmem:[%s18128_s25 + $0x24d0] sm:$0xff]  ;;  %v16713_v29 = vcombine.low %v1302_v10, %v1306_v24  ;;  %v16706_v5 = vcombine.high %v1294_v46, %v1298_v31 }
 0x56a   : > { %v14197_v35 = vpop.f32.mrf.mxu1  ;;  %v14157_v52 = vpop.f32.mrf.mxu0  ;;  %14450 = vmatprep.subr.bf16.mxu0 %v16722_v20  ;;  %v1426_v61 = vld [vmem:[%s18128_s25 + $0x24f0] sm:$0xff] }
 0x56b   : > { %14490 = vmatpush1.bf16.msra.mxu1 %v16857_v12  ;;  %v16834_v16 = vcombine.high %v1422_v4, %v1426_v61  ;;  %v1286_v48 = vld [vmem:[%s18128_s25 + $0x2090] sm:$0xff]  ;;  %v16833_v2 = vcombine.low %v1422_v4, %v1426_v61 }
 0x56c   : > { %v14198_v37 = vpop.f32.mrf.mxu1  ;;  %14491 = vmatprep.subr.bf16.mxu1 %v16850_v25  ;;  %v1290_v62 = vld [vmem:[%s18128_s25 + $0x20b0] sm:$0xff]  ;;  %v16705_v25 = vcombine.low %v1294_v46, %v1298_v31 }
 0x56d   : > { %14451 = vmatpush1.bf16.msra.mxu0 %v16721_v58  ;;  %v1414_v12 = vld [vmem:[%s18128_s25 + $0x2490] sm:$0xff]  ;;  %v16698_v10 = vcombine.high %v1286_v48, %v1290_v62  ;;  %v16697_v52 = vcombine.low %v1286_v48, %v1290_v62 }
 0x56e   : > { %14452 = vmatprep.subr.bf16.mxu0 %v16714_v28  ;;  %v1418_v20 = vld [vmem:[%s18128_s25 + $0x24b0] sm:$0xff] }
 0x56f   : > { %14492 = vmatpush1.bf16.msra.mxu1 %v16849_v45  ;;  %v16826_v24 = vcombine.high %v1414_v12, %v1418_v20  ;;  %v1278_v55 = vld [vmem:[%s18128_s25 + $0x2050] sm:$0xff]  ;;  %v16825_v45 = vcombine.low %v1414_v12, %v1418_v20 }
 0x570   : > { %14493 = vmatprep.subr.bf16.mxu1 %v16842_v57  ;;  %v1282_v40 = vld [vmem:[%s18128_s25 + $0x2070] sm:$0xff] }
 0x571   : > { %14453 = vmatpush1.bf16.msra.mxu0 %v16713_v29  ;;  %v1406_v35 = vld [vmem:[%s18128_s25 + $0x2450] sm:$0xff]  ;;  %v16690_v28 = vcombine.high %v1278_v55, %v1282_v40  ;;  %v16689_v61 = vcombine.low %v1278_v55, %v1282_v40 }
 0x572   : > { %14454 = vmatprep.subr.bf16.mxu0 %v16706_v5  ;;  %v1410_v58 = vld [vmem:[%s18128_s25 + $0x2470] sm:$0xff] }
 0x573   : > { %14494 = vmatpush1.bf16.msra.mxu1 %v16841_v18  ;;  %v16818_v37 = vcombine.high %v1406_v35, %v1410_v58  ;;  %v1270_v57 = vld [vmem:[%s18128_s25 + $0x2010] sm:$0xff]  ;;  %v16817_v29 = vcombine.low %v1406_v35, %v1410_v58 }
 0x574   : > { %14495 = vmatprep.subr.bf16.mxu1 %v16834_v16  ;;  %v1274_v46 = vld [vmem:[%s18128_s25 + $0x2030] sm:$0xff] }
 0x575   : > { %14455 = vmatpush1.bf16.msra.mxu0 %v16705_v25  ;;  %v1398_v31 = vld [vmem:[%s18128_s25 + $0x2410] sm:$0xff]  ;;  %v16682_v18 = vcombine.high %v1270_v57, %v1274_v46  ;;  %v16681_v20 = vcombine.low %v1270_v57, %v1274_v46 }
 0x576   : > { %14456 = vmatprep.subr.bf16.mxu0 %v16698_v10  ;;  %v1402_v4 = vld [vmem:[%s18128_s25 + $0x2430] sm:$0xff] }
 0x577   : > { %14496 = vmatpush1.bf16.msra.mxu1 %v16833_v2  ;;  %v16810_v5 = vcombine.high %v1398_v31, %v1402_v4  ;;  %v1390_v16 = vld [vmem:[%s18128_s25 + $0x23d0] sm:$0xff]  ;;  %v16809_v25 = vcombine.low %v1398_v31, %v1402_v4 }
 0x578   : > { %14497 = vmatprep.subr.bf16.mxu1 %v16826_v24  ;;  %v1394_v48 = vld [vmem:[%s18128_s25 + $0x23f0] sm:$0xff] }
 0x579   : > { %14457 = vmatpush1.bf16.msra.mxu0 %v16697_v52  ;;  %v1518_v62 = vld [vmem:[%s18128_s25 + $0x27d0] sm:$0xff]  ;;  %v16802_v2 = vcombine.high %v1390_v16, %v1394_v48  ;;  %v16801_v58 = vcombine.low %v1390_v16, %v1394_v48 }
 0x57a   : > { %14458 = vmatprep.subr.bf16.mxu0 %v16690_v28  ;;  %v1522_v12 = vld [vmem:[%s18128_s25 + $0x27f0] sm:$0xff] }
 0x57b   : > { %14498 = vmatpush1.bf16.msra.mxu1 %v16825_v45  ;;  %v16930_v10 = vcombine.high %v1518_v62, %v1522_v12  ;;  %v1382_v24 = vld [vmem:[%s18128_s25 + $0x2390] sm:$0xff]  ;;  %v16929_v52 = vcombine.low %v1518_v62, %v1522_v12 }
 0x57c   : > { %14499 = vmatprep.subr.bf16.mxu1 %v16818_v37  ;;  %v1386_v55 = vld [vmem:[%s18128_s25 + $0x23b0] sm:$0xff] }
 0x57d   : > { %14459 = vmatpush1.bf16.msra.mxu0 %v16689_v61  ;;  %v1510_v40 = vld [vmem:[%s18128_s25 + $0x2790] sm:$0xff]  ;;  %v16794_v45 = vcombine.high %v1382_v24, %v1386_v55  ;;  %v16793_v4 = vcombine.low %v1382_v24, %v1386_v55 }
 0x57e   : > { %14460 = vmatprep.subr.bf16.mxu0 %v16682_v18  ;;  %v1514_v35 = vld [vmem:[%s18128_s25 + $0x27b0] sm:$0xff] }
 0x57f   : > { %14500 = vmatpush1.bf16.msra.mxu1 %v16817_v29  ;;  %v16922_v28 = vcombine.high %v1510_v40, %v1514_v35  ;;  %v1374_v37 = vld [vmem:[%s18128_s25 + $0x2350] sm:$0xff]  ;;  %v16921_v61 = vcombine.low %v1510_v40, %v1514_v35 }
 0x580   : > { %14501 = vmatprep.subr.bf16.mxu1 %v16810_v5  ;;  %v1378_v57 = vld [vmem:[%s18128_s25 + $0x2370] sm:$0xff] }
 0x581   : > { %14461 = vmatpush1.bf16.msra.mxu0 %v16681_v20  ;;  %v1502_v46 = vld [vmem:[%s18128_s25 + $0x2750] sm:$0xff]  ;;  %v16786_v29 = vcombine.high %v1374_v37, %v1378_v57  ;;  %v16785_v12 = vcombine.low %v1374_v37, %v1378_v57 }
 0x582   : > { %14462 = vmatprep.subr.bf16.mxu0 %v16802_v2  ;;  %v1506_v31 = vld [vmem:[%s18128_s25 + $0x2770] sm:$0xff] }
 0x583   : > { %14502 = vmatpush1.bf16.msra.mxu1 %v16809_v25  ;;  %v16914_v18 = vcombine.high %v1502_v46, %v1506_v31  ;;  %v1366_v5 = vld [vmem:[%s18128_s25 + $0x2310] sm:$0xff]  ;;  %v16913_v20 = vcombine.low %v1502_v46, %v1506_v31 }
 0x584   : > { %14503 = vmatprep.subr.bf16.mxu1 %v16930_v10  ;;  %v1370_v16 = vld [vmem:[%s18128_s25 + $0x2330] sm:$0xff] }
 0x585   : > { %14463 = vmatpush2.bf16.msra.mxu0 %v16801_v58  ;;  %v1494_v48 = vld [vmem:[%s18128_s25 + $0x2710] sm:$0xff]  ;;  %v16778_v25 = vcombine.high %v1366_v5, %v1370_v16  ;;  %v16777_v35 = vcombine.low %v1366_v5, %v1370_v16 }
 0x586   : > { %14464 = vmatprep.subr.bf16.mxu0 %v16794_v45  ;;  %v1498_v62 = vld [vmem:[%s18128_s25 + $0x2730] sm:$0xff] }
 0x587   : > { %14504 = vmatpush2.bf16.msra.mxu1 %v16929_v52  ;;  %v16906_v2 = vcombine.high %v1494_v48, %v1498_v62  ;;  %v1358_v10 = vld [vmem:[%s18128_s25 + $0x22d0] sm:$0xff]  ;;  %v16905_v58 = vcombine.low %v1494_v48, %v1498_v62 }
 0x588   : > { %14505 = vmatprep.subr.bf16.mxu1 %v16922_v28  ;;  %v1362_v24 = vld [vmem:[%s18128_s25 + $0x22f0] sm:$0xff] }
 0x589   : > { %14465 = vmatpush2.bf16.msra.mxu0 %v16793_v4  ;;  %v1486_v55 = vld [vmem:[%s18128_s25 + $0x26d0] sm:$0xff]  ;;  %v16770_v52 = vcombine.high %v1358_v10, %v1362_v24  ;;  %v16769_v31 = vcombine.low %v1358_v10, %v1362_v24 }
 0x58a   : > { %14466 = vmatprep.subr.bf16.mxu0 %v16786_v29  ;;  %v1490_v40 = vld [vmem:[%s18128_s25 + $0x26f0] sm:$0xff] }
 0x58b   : > { %14506 = vmatpush2.bf16.msra.mxu1 %v16921_v61  ;;  %v16898_v45 = vcombine.high %v1486_v55, %v1490_v40  ;;  %v1350_v28 = vld [vmem:[%s18128_s25 + $0x2290] sm:$0xff]  ;;  %v16897_v4 = vcombine.low %v1486_v55, %v1490_v40 }
 0x58c   : > { %14507 = vmatprep.subr.bf16.mxu1 %v16914_v18  ;;  %v1354_v37 = vld [vmem:[%s18128_s25 + $0x22b0] sm:$0xff] }
 0x58d   : > { %14467 = vmatpush2.bf16.msra.mxu0 %v16785_v12  ;;  %v1478_v57 = vld [vmem:[%s18128_s25 + $0x2690] sm:$0xff]  ;;  %v16762_v61 = vcombine.high %v1350_v28, %v1354_v37  ;;  %v16761_v62 = vcombine.low %v1350_v28, %v1354_v37 }
 0x58e   : > { %14468 = vmatprep.subr.bf16.mxu0 %v16778_v25  ;;  %v1482_v46 = vld [vmem:[%s18128_s25 + $0x26b0] sm:$0xff] }
 0x58f   : > { %14508 = vmatpush2.bf16.msra.mxu1 %v16913_v20  ;;  %v16890_v29 = vcombine.high %v1478_v57, %v1482_v46  ;;  %v1342_v18 = vld [vmem:[%s18128_s25 + $0x2250] sm:$0xff]  ;;  %v16889_v12 = vcombine.low %v1478_v57, %v1482_v46 }
 0x590   : > { %14509 = vmatprep.subr.bf16.mxu1 %v16906_v2  ;;  %v1346_v5 = vld [vmem:[%s18128_s25 + $0x2270] sm:$0xff] }
 0x591   : > { %14469 = vmatpush2.bf16.msra.mxu0 %v16777_v35  ;;  %v1470_v16 = vld [vmem:[%s18128_s25 + $0x2650] sm:$0xff]  ;;  %v16754_v20 = vcombine.high %v1342_v18, %v1346_v5  ;;  %v16753_v40 = vcombine.low %v1342_v18, %v1346_v5 }
 0x592   : > { %14470 = vmatprep.subr.bf16.mxu0 %v16770_v52  ;;  %v1474_v48 = vld [vmem:[%s18128_s25 + $0x2670] sm:$0xff] }
 0x593   : > { %14510 = vmatpush2.bf16.msra.mxu1 %v16905_v58  ;;  %v16882_v25 = vcombine.high %v1470_v16, %v1474_v48  ;;  %v1334_v2 = vld [vmem:[%s18128_s25 + $0x2210] sm:$0xff]  ;;  %v16881_v35 = vcombine.low %v1470_v16, %v1474_v48 }
 0x594   : > { %14511 = vmatprep.subr.bf16.mxu1 %v16898_v45  ;;  %v1338_v10 = vld [vmem:[%s18128_s25 + $0x2230] sm:$0xff] }
 0x595   : > { %14471 = vmatpush2.bf16.msra.mxu0 %v16769_v31  ;;  %v1462_v24 = vld [vmem:[%s18128_s25 + $0x2610] sm:$0xff]  ;;  %v16746_v58 = vcombine.high %v1334_v2, %v1338_v10  ;;  %v16745_v46 = vcombine.low %v1334_v2, %v1338_v10 }
 0x596   : > { %14472 = vmatprep.subr.bf16.mxu0 %v16762_v61  ;;  %v1466_v55 = vld [vmem:[%s18128_s25 + $0x2630] sm:$0xff] }
 0x597   : > { %14512 = vmatpush2.bf16.msra.mxu1 %v16897_v4  ;;  %v16874_v52 = vcombine.high %v1462_v24, %v1466_v55  ;;  %v1582_v45 = vld [vmem:[%s18128_s25 + $0x29d0] sm:$0xff]  ;;  %v16873_v31 = vcombine.low %v1462_v24, %v1466_v55 }
 0x598   : > { %14513 = vmatprep.subr.bf16.mxu1 %v16890_v29  ;;  %v1586_v28 = vld [vmem:[%s18128_s25 + $0x29f0] sm:$0xff] }
 0x599   : > { %14473 = vmatpush2.bf16.msra.mxu0 %v16761_v62  ;;  %v1710_v37 = vld [vmem:[%s18128_s25 + $0x2dd0] sm:$0xff]  ;;  %v16994_v4 = vcombine.high %v1582_v45, %v1586_v28  ;;  %v16993_v48 = vcombine.low %v1582_v45, %v1586_v28 }
 0x59a   : > { %14474 = vmatprep.subr.bf16.mxu0 %v16754_v20  ;;  %v1714_v57 = vld [vmem:[%s18128_s25 + $0x2df0] sm:$0xff] }
 0x59b   : > { %14514 = vmatpush2.bf16.msra.mxu1 %v16889_v12  ;;  %v17122_v61 = vcombine.high %v1710_v37, %v1714_v57  ;;  %v1574_v29 = vld [vmem:[%s18128_s25 + $0x2990] sm:$0xff]  ;;  %v17121_v62 = vcombine.low %v1710_v37, %v1714_v57 }
 0x59c   : > { %14515 = vmatprep.subr.bf16.mxu1 %v16882_v25  ;;  %v1578_v18 = vld [vmem:[%s18128_s25 + $0x29b0] sm:$0xff] }
 0x59d   : > { %14475 = vmatpush2.bf16.msra.mxu0 %v16753_v40  ;;  %v1702_v5 = vld [vmem:[%s18128_s25 + $0x2d90] sm:$0xff]  ;;  %v16986_v12 = vcombine.high %v1574_v29, %v1578_v18 }
 0x59e   : > { %14476 = vmatprep.subr.bf16.mxu0 %v16746_v58  ;;  %v1706_v16 = vld [vmem:[%s18128_s25 + $0x2db0] sm:$0xff]  ;;  %v16985_v58 = vcombine.low %v1574_v29, %v1578_v18 }
 0x59f   : > { %14516 = vmatpush2.bf16.msra.mxu1 %v16881_v35  ;;  %v17114_v20 = vcombine.high %v1702_v5, %v1706_v16  ;;  %v1566_v25 = vld [vmem:[%s18128_s25 + $0x2950] sm:$0xff]  ;;  %v17113_v45 = vcombine.low %v1702_v5, %v1706_v16 }
 0x5a0   : > { %14517 = vmatprep.subr.bf16.mxu1 %v16874_v52  ;;  %v1570_v2 = vld [vmem:[%s18128_s25 + $0x2970] sm:$0xff] }
 0x5a1   : > { %14477 = vmatpush2.bf16.msra.mxu0 %v16745_v46  ;;  %v1694_v24 = vld [vmem:[%s18128_s25 + $0x2d50] sm:$0xff]  ;;  %v16978_v28 = vcombine.high %v1566_v25, %v1570_v2 }
 0x5a2   : > { %14528 = vmatprep.subr.bf16.mxu0 %v16994_v4  ;;  %v1698_v55 = vld [vmem:[%s18128_s25 + $0x2d70] sm:$0xff] }
 0x5a3   : > { %14518 = vmatpush2.bf16.msra.mxu1 %v16873_v31  ;;  %v1558_v31 = vld [vmem:[%s18128_s25 + $0x2910] sm:$0xff] }
 0x5a4   : > { %14569 = vmatprep.subr.bf16.mxu1 %v17122_v61  ;;  %v14234_v10 = vpop.f32.mrf.mxu0  ;;  %14479 = vmatmul.mubr.bf16.vlgmr.msra.gmra.mxu0 %v18607_v50  ;;  %v1562_v4 = vld [vmem:[%s18128_s25 + $0x2930] sm:$0xff] }
 0x5a5   : > { %v14235_v40 = vadd.f32 %v14234_v10, %v19806_v14  ;;  %14529 = vmatpush1.bf16.msra.mxu0 %v16993_v48  ;;  %v17106_v14 = vcombine.high %v1694_v24, %v1698_v55  ;;  %14560 = vmatprep.mubr.bf16.mxu0 %v18614_v0  ;;  %v1686_v29 = vld [vmem:[%s18128_s25 + $0x2d10] sm:$0xff] }
 0x5a6   : > { %v14275_v35 = vpop.f32.mrf.mxu1  ;;  %14520 = vmatmul.mubr.bf16.vlgmr.msra.gmra.mxu1 %v18618_v60  ;;  %v14236_v52 = vpop.f32.mrf.mxu0  ;;  %14530 = vmatprep.subr.bf16.mxu0 %v16986_v12  ;;  %v1690_v18 = vld [vmem:[%s18128_s25 + $0x2d30] sm:$0xff]  ;;  %v16970_v12 = vcombine.high %v1558_v31, %v1562_v4 }
 0x5a7   : > { %14570 = vmatpush1.bf16.msra.mxu1 %v17121_v62  ;;  %v19879_v37 = vadd.f32 %v14275_v35, %v14235_v40  ;;  %v14237_v57 = vadd.f32 %v14236_v52, %v19814_v7  ;;  %14601 = vmatprep.mubr.bf16.mxu1 %v18627_v15  ;;  %v16977_v7 = vcombine.low %v1566_v25, %v1570_v2  ;;  %v1550_v40 = vld [vmem:[%s18128_s25 + $0x28d0] sm:$0xff] }
 0x5a8   : > { %v14277_v46 = vpop.f32.mrf.mxu1  ;;  %14571 = vmatprep.subr.bf16.mxu1 %v17114_v20  ;;  %v14238_v61 = vpop.f32.mrf.mxu0  ;;  %v17105_v62 = vcombine.low %v1694_v24, %v1698_v55  ;;  %v17098_v10 = vcombine.high %v1686_v29, %v1690_v18  ;;  %v1554_v35 = vld [vmem:[%s18128_s25 + $0x28f0] sm:$0xff]  ;;  %v17097_v25 = vcombine.low %v1686_v29, %v1690_v18 }
 0x5a9   : > { %v19888_v5 = vadd.f32 %v14277_v46, %v14237_v57  ;;  %14531 = vmatpush1.bf16.msra.mxu0 %v16985_v58  ;;  %v1678_v52 = vld [vmem:[%s18128_s25 + $0x2cd0] sm:$0xff]  ;;  %v16969_v46 = vcombine.low %v1558_v31, %v1562_v4  ;;  %v16962_v2 = vcombine.high %v1550_v40, %v1554_v35 }
 0x5aa   : > { %v14279_v16 = vpop.f32.mrf.mxu1  ;;  %v14239_v48 = vpop.f32.mrf.mxu0  ;;  %14532 = vmatprep.subr.bf16.mxu0 %v16978_v28  ;;  %v1682_v57 = vld [vmem:[%s18128_s25 + $0x2cf0] sm:$0xff] }
 0x5ab   : > { %14572 = vmatpush1.bf16.msra.mxu1 %v17113_v45  ;;  %v17090_v24 = vcombine.high %v1678_v52, %v1682_v57  ;;  %v1542_v55 = vld [vmem:[%s18128_s25 + $0x2890] sm:$0xff]  ;;  %v17089_v61 = vcombine.low %v1678_v52, %v1682_v57 }
 0x5ac   : > { %v14280_v20 = vpop.f32.mrf.mxu1  ;;  %14573 = vmatprep.subr.bf16.mxu1 %v17106_v14  ;;  %v1546_v58 = vld [vmem:[%s18128_s25 + $0x28b0] sm:$0xff]  ;;  %v16961_v14 = vcombine.low %v1550_v40, %v1554_v35 }
 0x5ad   : > { %14533 = vmatpush1.bf16.msra.mxu0 %v16977_v7  ;;  %v1670_v45 = vld [vmem:[%s18128_s25 + $0x2c90] sm:$0xff]  ;;  %v16954_v31 = vcombine.high %v1542_v55, %v1546_v58  ;;  %v16953_v48 = vcombine.low %v1542_v55, %v1546_v58 }
 0x5ae   : > { %14534 = vmatprep.subr.bf16.mxu0 %v16970_v12  ;;  %v1674_v28 = vld [vmem:[%s18128_s25 + $0x2cb0] sm:$0xff] }
 0x5af   : > { %14574 = vmatpush1.bf16.msra.mxu1 %v17105_v62  ;;  %v17082_v4 = vcombine.high %v1670_v45, %v1674_v28  ;;  %v1534_v29 = vld [vmem:[%s18128_s25 + $0x2850] sm:$0xff]  ;;  %v17081_v62 = vcombine.low %v1670_v45, %v1674_v28 }
 0x5b0   : > { %14575 = vmatprep.subr.bf16.mxu1 %v17098_v10  ;;  %v1538_v18 = vld [vmem:[%s18128_s25 + $0x2870] sm:$0xff] }
 0x5b1   : > { %14535 = vmatpush1.bf16.msra.mxu0 %v16969_v46  ;;  %v1662_v16 = vld [vmem:[%s18128_s25 + $0x2c50] sm:$0xff]  ;;  %v16946_v12 = vcombine.high %v1534_v29, %v1538_v18  ;;  %v16945_v57 = vcombine.low %v1534_v29, %v1538_v18 }
 0x5b2   : > { %14536 = vmatprep.subr.bf16.mxu0 %v16962_v2  ;;  %v1666_v7 = vld [vmem:[%s18128_s25 + $0x2c70] sm:$0xff] }
 0x5b3   : > { %14576 = vmatpush1.bf16.msra.mxu1 %v17097_v25  ;;  %v17074_v20 = vcombine.high %v1662_v16, %v1666_v7  ;;  %v1526_v10 = vld [vmem:[%s18128_s25 + $0x2810] sm:$0xff]  ;;  %v17073_v46 = vcombine.low %v1662_v16, %v1666_v7 }
 0x5b4   : > { %14577 = vmatprep.subr.bf16.mxu1 %v17090_v24  ;;  %v1530_v40 = vld [vmem:[%s18128_s25 + $0x2830] sm:$0xff] }
 0x5b5   : > { %14537 = vmatpush1.bf16.msra.mxu0 %v16961_v14  ;;  %v1654_v35 = vld [vmem:[%s18128_s25 + $0x2c10] sm:$0xff]  ;;  %v16938_v25 = vcombine.high %v1526_v10, %v1530_v40  ;;  %v16937_v28 = vcombine.low %v1526_v10, %v1530_v40 }
 0x5b6   : > { %14538 = vmatprep.subr.bf16.mxu0 %v16954_v31  ;;  %v1658_v52 = vld [vmem:[%s18128_s25 + $0x2c30] sm:$0xff] }
 0x5b7   : > { %14578 = vmatpush1.bf16.msra.mxu1 %v17089_v61  ;;  %v17066_v2 = vcombine.high %v1654_v35, %v1658_v52  ;;  %v1646_v24 = vld [vmem:[%s18128_s25 + $0x2bd0] sm:$0xff]  ;;  %v17065_v14 = vcombine.low %v1654_v35, %v1658_v52 }
 0x5b8   : > { %14579 = vmatprep.subr.bf16.mxu1 %v17082_v4  ;;  %v1650_v55 = vld [vmem:[%s18128_s25 + $0x2bf0] sm:$0xff] }
 0x5b9   : > { %14539 = vmatpush1.bf16.msra.mxu0 %v16953_v48  ;;  %v1774_v58 = vld [vmem:[%s18128_s25 + $0x2fd0] sm:$0xff]  ;;  %v17058_v61 = vcombine.high %v1646_v24, %v1650_v55  ;;  %v17057_v7 = vcombine.low %v1646_v24, %v1650_v55 }
 0x5ba   : > { %14540 = vmatprep.subr.bf16.mxu0 %v16946_v12  ;;  %v1778_v45 = vld [vmem:[%s18128_s25 + $0x2ff0] sm:$0xff] }
 0x5bb   : > { %14580 = vmatpush1.bf16.msra.mxu1 %v17081_v62  ;;  %v17186_v31 = vcombine.high %v1774_v58, %v1778_v45  ;;  %v1638_v4 = vld [vmem:[%s18128_s25 + $0x2b90] sm:$0xff]  ;;  %v17185_v48 = vcombine.low %v1774_v58, %v1778_v45 }
 0x5bc   : > { %14581 = vmatprep.subr.bf16.mxu1 %v17074_v20  ;;  %v1642_v29 = vld [vmem:[%s18128_s25 + $0x2bb0] sm:$0xff] }
 0x5bd   : > { %14541 = vmatpush1.bf16.msra.mxu0 %v16945_v57  ;;  %v1766_v18 = vld [vmem:[%s18128_s25 + $0x2f90] sm:$0xff]  ;;  %v17050_v62 = vcombine.high %v1638_v4, %v1642_v29  ;;  %v17049_v52 = vcombine.low %v1638_v4, %v1642_v29 }
 0x5be   : > { %14542 = vmatprep.subr.bf16.mxu0 %v16938_v25  ;;  %v1770_v16 = vld [vmem:[%s18128_s25 + $0x2fb0] sm:$0xff] }
 0x5bf   : > { %14582 = vmatpush1.bf16.msra.mxu1 %v17073_v46  ;;  %v17178_v12 = vcombine.high %v1766_v18, %v1770_v16  ;;  %v1630_v20 = vld [vmem:[%s18128_s25 + $0x2b50] sm:$0xff]  ;;  %v17177_v57 = vcombine.low %v1766_v18, %v1770_v16 }
 0x5c0   : > { %14583 = vmatprep.subr.bf16.mxu1 %v17066_v2  ;;  %v1634_v10 = vld [vmem:[%s18128_s25 + $0x2b70] sm:$0xff] }
 0x5c1   : > { %14543 = vmatpush1.bf16.msra.mxu0 %v16937_v28  ;;  %v1758_v40 = vld [vmem:[%s18128_s25 + $0x2f50] sm:$0xff]  ;;  %v17042_v46 = vcombine.high %v1630_v20, %v1634_v10  ;;  %v17041_v45 = vcombine.low %v1630_v20, %v1634_v10 }
 0x5c2   : > { %14544 = vmatprep.subr.bf16.mxu0 %v17058_v61  ;;  %v1762_v35 = vld [vmem:[%s18128_s25 + $0x2f70] sm:$0xff] }
 0x5c3   : > { %14584 = vmatpush1.bf16.msra.mxu1 %v17065_v14  ;;  %v17170_v25 = vcombine.high %v1758_v40, %v1762_v35  ;;  %v1622_v2 = vld [vmem:[%s18128_s25 + $0x2b10] sm:$0xff]  ;;  %v17169_v28 = vcombine.low %v1758_v40, %v1762_v35 }
 0x5c4   : > { %14585 = vmatprep.subr.bf16.mxu1 %v17186_v31  ;;  %v1626_v24 = vld [vmem:[%s18128_s25 + $0x2b30] sm:$0xff] }
 0x5c5   : > { %14545 = vmatpush2.bf16.msra.mxu0 %v17057_v7  ;;  %v1750_v55 = vld [vmem:[%s18128_s25 + $0x2f10] sm:$0xff]  ;;  %v17034_v14 = vcombine.high %v1622_v2, %v1626_v24  ;;  %v17033_v16 = vcombine.low %v1622_v2, %v1626_v24 }
 0x5c6   : > { %14546 = vmatprep.subr.bf16.mxu0 %v17050_v62  ;;  %v1754_v58 = vld [vmem:[%s18128_s25 + $0x2f30] sm:$0xff] }
 0x5c7   : > { %14586 = vmatpush2.bf16.msra.mxu1 %v17185_v48  ;;  %v17162_v61 = vcombine.high %v1750_v55, %v1754_v58  ;;  %v1614_v31 = vld [vmem:[%s18128_s25 + $0x2ad0] sm:$0xff]  ;;  %v17161_v7 = vcombine.low %v1750_v55, %v1754_v58 }
 0x5c8   : > { %14587 = vmatprep.subr.bf16.mxu1 %v17178_v12  ;;  %v1618_v4 = vld [vmem:[%s18128_s25 + $0x2af0] sm:$0xff] }
 0x5c9   : > { %14547 = vmatpush2.bf16.msra.mxu0 %v17049_v52  ;;  %v1742_v29 = vld [vmem:[%s18128_s25 + $0x2ed0] sm:$0xff]  ;;  %v17026_v48 = vcombine.high %v1614_v31, %v1618_v4  ;;  %v17025_v35 = vcombine.low %v1614_v31, %v1618_v4 }
 0x5ca   : > { %14548 = vmatprep.subr.bf16.mxu0 %v17042_v46  ;;  %v1746_v18 = vld [vmem:[%s18128_s25 + $0x2ef0] sm:$0xff] }
 0x5cb   : > { %14588 = vmatpush2.bf16.msra.mxu1 %v17177_v57  ;;  %v17154_v62 = vcombine.high %v1742_v29, %v1746_v18  ;;  %v1606_v12 = vld [vmem:[%s18128_s25 + $0x2a90] sm:$0xff]  ;;  %v17153_v52 = vcombine.low %v1742_v29, %v1746_v18 }
 0x5cc   : > { %14589 = vmatprep.subr.bf16.mxu1 %v17170_v25  ;;  %v1610_v20 = vld [vmem:[%s18128_s25 + $0x2ab0] sm:$0xff] }
 0x5cd   : > { %14549 = vmatpush2.bf16.msra.mxu0 %v17041_v45  ;;  %v1734_v10 = vld [vmem:[%s18128_s25 + $0x2e90] sm:$0xff]  ;;  %v17018_v57 = vcombine.high %v1606_v12, %v1610_v20  ;;  %v17017_v58 = vcombine.low %v1606_v12, %v1610_v20 }
 0x5ce   : > { %14550 = vmatprep.subr.bf16.mxu0 %v17034_v14  ;;  %v1738_v40 = vld [vmem:[%s18128_s25 + $0x2eb0] sm:$0xff] }
 0x5cf   : > { %14590 = vmatpush2.bf16.msra.mxu1 %v17169_v28  ;;  %v17146_v46 = vcombine.high %v1734_v10, %v1738_v40  ;;  %v1598_v25 = vld [vmem:[%s18128_s25 + $0x2a50] sm:$0xff]  ;;  %v17145_v45 = vcombine.low %v1734_v10, %v1738_v40 }
 0x5d0   : > { %14591 = vmatprep.subr.bf16.mxu1 %v17162_v61  ;;  %v1602_v2 = vld [vmem:[%s18128_s25 + $0x2a70] sm:$0xff] }
 0x5d1   : > { %14551 = vmatpush2.bf16.msra.mxu0 %v17033_v16  ;;  %v1726_v24 = vld [vmem:[%s18128_s25 + $0x2e50] sm:$0xff]  ;;  %v17010_v28 = vcombine.high %v1598_v25, %v1602_v2  ;;  %v17009_v18 = vcombine.low %v1598_v25, %v1602_v2 }
 0x5d2   : > { %14552 = vmatprep.subr.bf16.mxu0 %v17026_v48  ;;  %v1730_v55 = vld [vmem:[%s18128_s25 + $0x2e70] sm:$0xff] }
 0x5d3   : > { %14592 = vmatpush2.bf16.msra.mxu1 %v17161_v7  ;;  %v17138_v14 = vcombine.high %v1726_v24, %v1730_v55  ;;  %v1590_v61 = vld [vmem:[%s18128_s25 + $0x2a10] sm:$0xff]  ;;  %v17137_v16 = vcombine.low %v1726_v24, %v1730_v55 }
 0x5d4   : > { %14593 = vmatprep.subr.bf16.mxu1 %v17154_v62  ;;  %v1594_v31 = vld [vmem:[%s18128_s25 + $0x2a30] sm:$0xff] }
 0x5d5   : > { %14553 = vmatpush2.bf16.msra.mxu0 %v17025_v35  ;;  %v1718_v4 = vld [vmem:[%s18128_s25 + $0x2e10] sm:$0xff]  ;;  %v17002_v7 = vcombine.high %v1590_v61, %v1594_v31  ;;  %v17001_v40 = vcombine.low %v1590_v61, %v1594_v31 }
 0x5d6   : > { %14554 = vmatprep.subr.bf16.mxu0 %v17018_v57  ;;  %v1722_v29 = vld [vmem:[%s18128_s25 + $0x2e30] sm:$0xff] }
 0x5d7   : > { %14594 = vmatpush2.bf16.msra.mxu1 %v17153_v52  ;;  %v17130_v48 = vcombine.high %v1718_v4, %v1722_v29  ;;  %v1838_v62 = vld [vmem:[%s18128_s25 + $0x31d0] sm:$0xff]  ;;  %v17129_v35 = vcombine.low %v1718_v4, %v1722_v29 }
 0x5d8   : > { %14595 = vmatprep.subr.bf16.mxu1 %v17146_v46  ;;  %v1842_v12 = vld [vmem:[%s18128_s25 + $0x31f0] sm:$0xff] }
 0x5d9   : > { %14555 = vmatpush2.bf16.msra.mxu0 %v17017_v58  ;;  %v1966_v20 = vld [vmem:[%s18128_s25 + $0x35d0] sm:$0xff]  ;;  %v17250_v52 = vcombine.high %v1838_v62, %v1842_v12  ;;  %v17249_v55 = vcombine.low %v1838_v62, %v1842_v12 }
 0x5da   : > { %14556 = vmatprep.subr.bf16.mxu0 %v17010_v28  ;;  %v1970_v10 = vld [vmem:[%s18128_s25 + $0x35f0] sm:$0xff] }
 0x5db   : > { %14596 = vmatpush2.bf16.msra.mxu1 %v17145_v45  ;;  %v17378_v57 = vcombine.high %v1966_v20, %v1970_v10  ;;  %v1830_v46 = vld [vmem:[%s18128_s25 + $0x3190] sm:$0xff]  ;;  %v17377_v58 = vcombine.low %v1966_v20, %v1970_v10 }
 0x5dc   : > { %14597 = vmatprep.subr.bf16.mxu1 %v17138_v14  ;;  %v1834_v25 = vld [vmem:[%s18128_s25 + $0x31b0] sm:$0xff] }
 0x5dd   : > { %14557 = vmatpush2.bf16.msra.mxu0 %v17009_v18  ;;  %v1958_v2 = vld [vmem:[%s18128_s25 + $0x3590] sm:$0xff]  ;;  %v17242_v45 = vcombine.high %v1830_v46, %v1834_v25 }
 0x5de   : > { %14558 = vmatprep.subr.bf16.mxu0 %v17002_v7  ;;  %v1962_v24 = vld [vmem:[%s18128_s25 + $0x35b0] sm:$0xff]  ;;  %v17241_v7 = vcombine.low %v1830_v46, %v1834_v25 }
 0x5df   : > { %14598 = vmatpush2.bf16.msra.mxu1 %v17137_v16  ;;  %v17370_v28 = vcombine.high %v1958_v2, %v1962_v24  ;;  %v1822_v14 = vld [vmem:[%s18128_s25 + $0x3150] sm:$0xff]  ;;  %v17369_v62 = vcombine.low %v1958_v2, %v1962_v24 }
 0x5e0   : > { %14599 = vmatprep.subr.bf16.mxu1 %v17130_v48  ;;  %v1826_v61 = vld [vmem:[%s18128_s25 + $0x3170] sm:$0xff] }
 0x5e1   : > { %14559 = vmatpush2.bf16.msra.mxu0 %v17001_v40  ;;  %v1950_v4 = vld [vmem:[%s18128_s25 + $0x3550] sm:$0xff]  ;;  %v17234_v12 = vcombine.high %v1822_v14, %v1826_v61 }
 0x5e2   : > { %14610 = vmatprep.subr.bf16.mxu0 %v17250_v52  ;;  %v1954_v29 = vld [vmem:[%s18128_s25 + $0x3570] sm:$0xff] }
 0x5e3   : > { %14600 = vmatpush2.bf16.msra.mxu1 %v17129_v35  ;;  %v1814_v35 = vld [vmem:[%s18128_s25 + $0x3110] sm:$0xff] }
 0x5e4   : > { %14651 = vmatprep.subr.bf16.mxu1 %v17378_v57  ;;  %v14316_v31 = vpop.f32.mrf.mxu0  ;;  %14561 = vmatmul.mubr.bf16.vlgmr.msra.gmra.mxu0 %v18704_v38  ;;  %v1818_v52 = vld [vmem:[%s18128_s25 + $0x3130] sm:$0xff] }
 0x5e5   : > { %v14317_v18 = vadd.f32 %v14316_v31, %v19879_v37  ;;  %14611 = vmatpush1.bf16.msra.mxu0 %v17249_v55  ;;  %v17362_v37 = vcombine.high %v1950_v4, %v1954_v29  ;;  %14642 = vmatprep.mubr.bf16.mxu0 %v18711_v54  ;;  %v1942_v46 = vld [vmem:[%s18128_s25 + $0x3510] sm:$0xff] }
 0x5e6   : > { %v14357_v16 = vpop.f32.mrf.mxu1  ;;  %14602 = vmatmul.mubr.bf16.vlgmr.msra.gmra.mxu1 %v18715_v33  ;;  %v14318_v48 = vpop.f32.mrf.mxu0  ;;  %14612 = vmatprep.subr.bf16.mxu0 %v17242_v45  ;;  %v1946_v25 = vld [vmem:[%s18128_s25 + $0x3530] sm:$0xff]  ;;  %v17226_v45 = vcombine.high %v1814_v35, %v1818_v52 }
 0x5e7   : > { %14652 = vmatpush1.bf16.msra.mxu1 %v17377_v58  ;;  %v19953_v20 = vadd.f32 %v14357_v16, %v14317_v18  ;;  %v14319_v10 = vadd.f32 %v14318_v48, %v19888_v5  ;;  %14683 = vmatprep.mubr.bf16.mxu1 %v18724_v8  ;;  %v17233_v5 = vcombine.low %v1822_v14, %v1826_v61  ;;  %v1806_v18 = vld [vmem:[%s18128_s25 + $0x30d0] sm:$0xff] }
 0x5e8   : > { %v14359_v40 = vpop.f32.mrf.mxu1  ;;  %14653 = vmatprep.subr.bf16.mxu1 %v17370_v28  ;;  %v14320_v57 = vpop.f32.mrf.mxu0  ;;  %v17361_v58 = vcombine.low %v1950_v4, %v1954_v29  ;;  %v17354_v31 = vcombine.high %v1942_v46, %v1946_v25  ;;  %v1810_v16 = vld [vmem:[%s18128_s25 + $0x30f0] sm:$0xff]  ;;  %v17353_v14 = vcombine.low %v1942_v46, %v1946_v25 }
 0x5e9   : > { %v19962_v2 = vadd.f32 %v14359_v40, %v14319_v10  ;;  %14613 = vmatpush1.bf16.msra.mxu0 %v17241_v7  ;;  %v1934_v48 = vld [vmem:[%s18128_s25 + $0x34d0] sm:$0xff]  ;;  %v17225_v40 = vcombine.low %v1814_v35, %v1818_v52  ;;  %v17218_v61 = vcombine.high %v1806_v18, %v1810_v16 }
 0x5ea   : > { %v14361_v24 = vpop.f32.mrf.mxu1  ;;  %v14321_v55 = vpop.f32.mrf.mxu0  ;;  %14614 = vmatprep.subr.bf16.mxu0 %v17234_v12  ;;  %v1938_v10 = vld [vmem:[%s18128_s25 + $0x34f0] sm:$0xff] }
 0x5eb   : > { %14654 = vmatpush1.bf16.msra.mxu1 %v17369_v62  ;;  %v17346_v4 = vcombine.high %v1934_v48, %v1938_v10  ;;  %v1798_v29 = vld [vmem:[%s18128_s25 + $0x3090] sm:$0xff]  ;;  %v17345_v57 = vcombine.low %v1934_v48, %v1938_v10 }
 0x5ec   : > { %v14362_v28 = vpop.f32.mrf.mxu1  ;;  %14655 = vmatprep.subr.bf16.mxu1 %v17362_v37  ;;  %v1802_v7 = vld [vmem:[%s18128_s25 + $0x30b0] sm:$0xff]  ;;  %v17217_v37 = vcombine.low %v1806_v18, %v1810_v16 }
 0x5ed   : > { %14615 = vmatpush1.bf16.msra.mxu0 %v17233_v5  ;;  %v1926_v62 = vld [vmem:[%s18128_s25 + $0x3490] sm:$0xff]  ;;  %v17210_v35 = vcombine.high %v1798_v29, %v1802_v7  ;;  %v17209_v55 = vcombine.low %v1798_v29, %v1802_v7 }
 0x5ee   : > { %14616 = vmatprep.subr.bf16.mxu0 %v17226_v45  ;;  %v1930_v12 = vld [vmem:[%s18128_s25 + $0x34b0] sm:$0xff] }
 0x5ef   : > { %14656 = vmatpush1.bf16.msra.mxu1 %v17361_v58  ;;  %v17338_v52 = vcombine.high %v1926_v62, %v1930_v12  ;;  %v1790_v46 = vld [vmem:[%s18128_s25 + $0x3050] sm:$0xff]  ;;  %v17337_v58 = vcombine.low %v1926_v62, %v1930_v12 }
 0x5f0   : > { %14657 = vmatprep.subr.bf16.mxu1 %v17354_v31  ;;  %v1794_v25 = vld [vmem:[%s18128_s25 + $0x3070] sm:$0xff] }
 0x5f1   : > { %14617 = vmatpush1.bf16.msra.mxu0 %v17225_v40  ;;  %v1918_v24 = vld [vmem:[%s18128_s25 + $0x3450] sm:$0xff]  ;;  %v17202_v45 = vcombine.high %v1790_v46, %v1794_v25  ;;  %v17201_v10 = vcombine.low %v1790_v46, %v1794_v25 }
 0x5f2   : > { %14618 = vmatprep.subr.bf16.mxu0 %v17218_v61  ;;  %v1922_v5 = vld [vmem:[%s18128_s25 + $0x3470] sm:$0xff] }
 0x5f3   : > { %14658 = vmatpush1.bf16.msra.mxu1 %v17353_v14  ;;  %v17330_v28 = vcombine.high %v1918_v24, %v1922_v5  ;;  %v1782_v31 = vld [vmem:[%s18128_s25 + $0x3010] sm:$0xff]  ;;  %v17329_v40 = vcombine.low %v1918_v24, %v1922_v5 }
 0x5f4   : > { %14659 = vmatprep.subr.bf16.mxu1 %v17346_v4  ;;  %v1786_v18 = vld [vmem:[%s18128_s25 + $0x3030] sm:$0xff] }
 0x5f5   : > { %14619 = vmatpush1.bf16.msra.mxu0 %v17217_v37  ;;  %v1910_v16 = vld [vmem:[%s18128_s25 + $0x3410] sm:$0xff]  ;;  %v17194_v14 = vcombine.high %v1782_v31, %v1786_v18  ;;  %v17193_v12 = vcombine.low %v1782_v31, %v1786_v18 }
 0x5f6   : > { %14620 = vmatprep.subr.bf16.mxu0 %v17210_v35  ;;  %v1914_v48 = vld [vmem:[%s18128_s25 + $0x3430] sm:$0xff] }
 0x5f7   : > { %14660 = vmatpush1.bf16.msra.mxu1 %v17345_v57  ;;  %v17322_v61 = vcombine.high %v1910_v16, %v1914_v48  ;;  %v1902_v4 = vld [vmem:[%s18128_s25 + $0x33d0] sm:$0xff]  ;;  %v17321_v37 = vcombine.low %v1910_v16, %v1914_v48 }
 0x5f8   : > { %14661 = vmatprep.subr.bf16.mxu1 %v17338_v52  ;;  %v1906_v29 = vld [vmem:[%s18128_s25 + $0x33f0] sm:$0xff] }
 0x5f9   : > { %14621 = vmatpush1.bf16.msra.mxu0 %v17209_v55  ;;  %v2030_v7 = vld [vmem:[%s18128_s25 + $0x37d0] sm:$0xff]  ;;  %v17314_v57 = vcombine.high %v1902_v4, %v1906_v29  ;;  %v17313_v5 = vcombine.low %v1902_v4, %v1906_v29 }
 0x5fa   : > { %14622 = vmatprep.subr.bf16.mxu0 %v17202_v45  ;;  %v2034_v62 = vld [vmem:[%s18128_s25 + $0x37f0] sm:$0xff] }
 0x5fb   : > { %14662 = vmatpush1.bf16.msra.mxu1 %v17337_v58  ;;  %v17442_v35 = vcombine.high %v2030_v7, %v2034_v62  ;;  %v1894_v52 = vld [vmem:[%s18128_s25 + $0x3390] sm:$0xff]  ;;  %v17441_v55 = vcombine.low %v2030_v7, %v2034_v62 }
 0x5fc   : > { %14663 = vmatprep.subr.bf16.mxu1 %v17330_v28  ;;  %v1898_v46 = vld [vmem:[%s18128_s25 + $0x33b0] sm:$0xff] }
 0x5fd   : > { %14623 = vmatpush1.bf16.msra.mxu0 %v17201_v10  ;;  %v2022_v25 = vld [vmem:[%s18128_s25 + $0x3790] sm:$0xff]  ;;  %v17306_v58 = vcombine.high %v1894_v52, %v1898_v46  ;;  %v17305_v48 = vcombine.low %v1894_v52, %v1898_v46 }
 0x5fe   : > { %14624 = vmatprep.subr.bf16.mxu0 %v17194_v14  ;;  %v2026_v24 = vld [vmem:[%s18128_s25 + $0x37b0] sm:$0xff] }
 0x5ff   : > { %14664 = vmatpush1.bf16.msra.mxu1 %v17329_v40  ;;  %v17434_v45 = vcombine.high %v2022_v25, %v2026_v24  ;;  %v1886_v28 = vld [vmem:[%s18128_s25 + $0x3350] sm:$0xff]  ;;  %v17433_v10 = vcombine.low %v2022_v25, %v2026_v24 }
 0x600   : > { %14665 = vmatprep.subr.bf16.mxu1 %v17322_v61  ;;  %v1890_v31 = vld [vmem:[%s18128_s25 + $0x3370] sm:$0xff] }
 0x601   : > { %14625 = vmatpush1.bf16.msra.mxu0 %v17193_v12  ;;  %v2014_v18 = vld [vmem:[%s18128_s25 + $0x3750] sm:$0xff]  ;;  %v17298_v40 = vcombine.high %v1886_v28, %v1890_v31  ;;  %v17297_v62 = vcombine.low %v1886_v28, %v1890_v31 }
 0x602   : > { %14626 = vmatprep.subr.bf16.mxu0 %v17314_v57  ;;  %v2018_v16 = vld [vmem:[%s18128_s25 + $0x3770] sm:$0xff] }
 0x603   : > { %14666 = vmatpush1.bf16.msra.mxu1 %v17321_v37  ;;  %v17426_v14 = vcombine.high %v2014_v18, %v2018_v16  ;;  %v1878_v61 = vld [vmem:[%s18128_s25 + $0x3310] sm:$0xff]  ;;  %v17425_v12 = vcombine.low %v2014_v18, %v2018_v16 }
 0x604   : > { %14667 = vmatprep.subr.bf16.mxu1 %v17442_v35  ;;  %v1882_v4 = vld [vmem:[%s18128_s25 + $0x3330] sm:$0xff] }
 0x605   : > { %14627 = vmatpush2.bf16.msra.mxu0 %v17313_v5  ;;  %v2006_v29 = vld [vmem:[%s18128_s25 + $0x3710] sm:$0xff]  ;;  %v17290_v37 = vcombine.high %v1878_v61, %v1882_v4  ;;  %v17289_v24 = vcombine.low %v1878_v61, %v1882_v4 }
 0x606   : > { %14628 = vmatprep.subr.bf16.mxu0 %v17306_v58  ;;  %v2010_v7 = vld [vmem:[%s18128_s25 + $0x3730] sm:$0xff] }
 0x607   : > { %14668 = vmatpush2.bf16.msra.mxu1 %v17441_v55  ;;  %v17418_v57 = vcombine.high %v2006_v29, %v2010_v7  ;;  %v1870_v35 = vld [vmem:[%s18128_s25 + $0x32d0] sm:$0xff]  ;;  %v17417_v5 = vcombine.low %v2006_v29, %v2010_v7 }
 0x608   : > { %14669 = vmatprep.subr.bf16.mxu1 %v17434_v45  ;;  %v1874_v52 = vld [vmem:[%s18128_s25 + $0x32f0] sm:$0xff] }
 0x609   : > { %14629 = vmatpush2.bf16.msra.mxu0 %v17305_v48  ;;  %v1998_v46 = vld [vmem:[%s18128_s25 + $0x36d0] sm:$0xff]  ;;  %v17282_v55 = vcombine.high %v1870_v35, %v1874_v52  ;;  %v17281_v16 = vcombine.low %v1870_v35, %v1874_v52 }
 0x60a   : > { %14630 = vmatprep.subr.bf16.mxu0 %v17298_v40  ;;  %v2002_v25 = vld [vmem:[%s18128_s25 + $0x36f0] sm:$0xff] }
 0x60b   : > { %14670 = vmatpush2.bf16.msra.mxu1 %v17433_v10  ;;  %v17410_v58 = vcombine.high %v1998_v46, %v2002_v25  ;;  %v1862_v45 = vld [vmem:[%s18128_s25 + $0x3290] sm:$0xff]  ;;  %v17409_v48 = vcombine.low %v1998_v46, %v2002_v25 }
 0x60c   : > { %14671 = vmatprep.subr.bf16.mxu1 %v17426_v14  ;;  %v1866_v28 = vld [vmem:[%s18128_s25 + $0x32b0] sm:$0xff] }
 0x60d   : > { %14631 = vmatpush2.bf16.msra.mxu0 %v17297_v62  ;;  %v1990_v31 = vld [vmem:[%s18128_s25 + $0x3690] sm:$0xff]  ;;  %v17274_v10 = vcombine.high %v1862_v45, %v1866_v28  ;;  %v17273_v7 = vcombine.low %v1862_v45, %v1866_v28 }
 0x60e   : > { %14632 = vmatprep.subr.bf16.mxu0 %v17290_v37  ;;  %v1994_v18 = vld [vmem:[%s18128_s25 + $0x36b0] sm:$0xff] }
 0x60f   : > { %14672 = vmatpush2.bf16.msra.mxu1 %v17425_v12  ;;  %v17402_v40 = vcombine.high %v1990_v31, %v1994_v18  ;;  %v1854_v14 = vld [vmem:[%s18128_s25 + $0x3250] sm:$0xff]  ;;  %v17401_v62 = vcombine.low %v1990_v31, %v1994_v18 }
 0x610   : > { %14673 = vmatprep.subr.bf16.mxu1 %v17418_v57  ;;  %v1858_v61 = vld [vmem:[%s18128_s25 + $0x3270] sm:$0xff] }
 0x611   : > { %14633 = vmatpush2.bf16.msra.mxu0 %v17289_v24  ;;  %v1982_v4 = vld [vmem:[%s18128_s25 + $0x3650] sm:$0xff]  ;;  %v17266_v12 = vcombine.high %v1854_v14, %v1858_v61  ;;  %v17265_v25 = vcombine.low %v1854_v14, %v1858_v61 }
 0x612   : > { %14634 = vmatprep.subr.bf16.mxu0 %v17282_v55  ;;  %v1986_v29 = vld [vmem:[%s18128_s25 + $0x3670] sm:$0xff] }
 0x613   : > { %14674 = vmatpush2.bf16.msra.mxu1 %v17417_v5  ;;  %v17394_v37 = vcombine.high %v1982_v4, %v1986_v29  ;;  %v1846_v57 = vld [vmem:[%s18128_s25 + $0x3210] sm:$0xff]  ;;  %v17393_v24 = vcombine.low %v1982_v4, %v1986_v29 }
 0x614   : > { %14675 = vmatprep.subr.bf16.mxu1 %v17410_v58  ;;  %v1850_v35 = vld [vmem:[%s18128_s25 + $0x3230] sm:$0xff] }
 0x615   : > { %14635 = vmatpush2.bf16.msra.mxu0 %v17281_v16  ;;  %v1974_v52 = vld [vmem:[%s18128_s25 + $0x3610] sm:$0xff]  ;;  %v17258_v5 = vcombine.high %v1846_v57, %v1850_v35  ;;  %v17257_v18 = vcombine.low %v1846_v57, %v1850_v35 }
 0x616   : > { %14636 = vmatprep.subr.bf16.mxu0 %v17274_v10  ;;  %v1978_v46 = vld [vmem:[%s18128_s25 + $0x3630] sm:$0xff] }
 0x617   : > { %14676 = vmatpush2.bf16.msra.mxu1 %v17409_v48  ;;  %v17386_v55 = vcombine.high %v1974_v52, %v1978_v46  ;;  %v2094_v58 = vld [vmem:[%s18128_s25 + $0x39d0] sm:$0xff]  ;;  %v17385_v16 = vcombine.low %v1974_v52, %v1978_v46 }
 0x618   : > { %14677 = vmatprep.subr.bf16.mxu1 %v17402_v40  ;;  %v2098_v45 = vld [vmem:[%s18128_s25 + $0x39f0] sm:$0xff] }
 0x619   : > { %14637 = vmatpush2.bf16.msra.mxu0 %v17273_v7  ;;  %v2222_v28 = vld [vmem:[%s18128_s25 + $0x3dd0] sm:$0xff]  ;;  %v17506_v48 = vcombine.high %v2094_v58, %v2098_v45  ;;  %v17505_v29 = vcombine.low %v2094_v58, %v2098_v45 }
 0x61a   : > { %14638 = vmatprep.subr.bf16.mxu0 %v17266_v12  ;;  %v2226_v31 = vld [vmem:[%s18128_s25 + $0x3df0] sm:$0xff] }
 0x61b   : > { %14678 = vmatpush2.bf16.msra.mxu1 %v17401_v62  ;;  %v17634_v10 = vcombine.high %v2222_v28, %v2226_v31  ;;  %v2086_v40 = vld [vmem:[%s18128_s25 + $0x3990] sm:$0xff]  ;;  %v17633_v7 = vcombine.low %v2222_v28, %v2226_v31 }
 0x61c   : > { %14679 = vmatprep.subr.bf16.mxu1 %v17394_v37  ;;  %v2090_v14 = vld [vmem:[%s18128_s25 + $0x39b0] sm:$0xff] }
 0x61d   : > { %14639 = vmatpush2.bf16.msra.mxu0 %v17265_v25  ;;  %v2214_v61 = vld [vmem:[%s18128_s25 + $0x3d90] sm:$0xff]  ;;  %v17498_v62 = vcombine.high %v2086_v40, %v2090_v14 }
 0x61e   : > { %14640 = vmatprep.subr.bf16.mxu0 %v17258_v5  ;;  %v2218_v4 = vld [vmem:[%s18128_s25 + $0x3db0] sm:$0xff]  ;;  %v17497_v5 = vcombine.low %v2086_v40, %v2090_v14 }
 0x61f   : > { %14680 = vmatpush2.bf16.msra.mxu1 %v17393_v24  ;;  %v17626_v12 = vcombine.high %v2214_v61, %v2218_v4  ;;  %v2078_v37 = vld [vmem:[%s18128_s25 + $0x3950] sm:$0xff]  ;;  %v17625_v58 = vcombine.low %v2214_v61, %v2218_v4 }
 0x620   : > { %14681 = vmatprep.subr.bf16.mxu1 %v17386_v55  ;;  %v2082_v57 = vld [vmem:[%s18128_s25 + $0x3970] sm:$0xff] }
 0x621   : > { %14641 = vmatpush2.bf16.msra.mxu0 %v17257_v18  ;;  %v2206_v52 = vld [vmem:[%s18128_s25 + $0x3d50] sm:$0xff]  ;;  %v17490_v45 = vcombine.high %v2078_v37, %v2082_v57 }
 0x622   : > { %14692 = vmatprep.subr.bf16.mxu0 %v17506_v48  ;;  %v2210_v46 = vld [vmem:[%s18128_s25 + $0x3d70] sm:$0xff] }
 0x623   : > { %14682 = vmatpush2.bf16.msra.mxu1 %v17385_v16  ;;  %v2070_v16 = vld [vmem:[%s18128_s25 + $0x3910] sm:$0xff] }
 0x624   : > { %14733 = vmatprep.subr.bf16.mxu1 %v17634_v10  ;;  %v14398_v35 = vpop.f32.mrf.mxu0  ;;  %14643 = vmatmul.mubr.bf16.vlgmr.msra.gmra.mxu0 %v18800_v1  ;;  %v2074_v48 = vld [vmem:[%s18128_s25 + $0x3930] sm:$0xff] }
 0x625   : > { %v14399_v25 = vadd.f32 %v14398_v35, %v19953_v20  ;;  %14693 = vmatpush1.bf16.msra.mxu0 %v17505_v29  ;;  %v17618_v20 = vcombine.high %v2206_v52, %v2210_v46  ;;  %14724 = vmatprep.mubr.bf16.mxu0 %v18807_v17  ;;  %v2198_v40 = vld [vmem:[%s18128_s25 + $0x3d10] sm:$0xff] }
 0x626   : > { %v14439_v24 = vpop.f32.mrf.mxu1  ;;  %14684 = vmatmul.mubr.bf16.vlgmr.msra.gmra.mxu1 %v18811_v19  ;;  %v14400_v55 = vpop.f32.mrf.mxu0  ;;  %14694 = vmatprep.subr.bf16.mxu0 %v17498_v62  ;;  %v2202_v14 = vld [vmem:[%s18128_s25 + $0x3d30] sm:$0xff]  ;;  %v17482_v62 = vcombine.high %v2070_v16, %v2074_v48 }
 0x627   : > { %14734 = vmatpush1.bf16.msra.mxu1 %v17633_v7  ;;  %v20027_v28 = vadd.f32 %v14439_v24, %v14399_v25  ;;  %v14401_v31 = vadd.f32 %v14400_v55, %v19962_v2  ;;  %14765 = vmatprep.mubr.bf16.mxu1 %v18820_v36  ;;  %v17489_v2 = vcombine.low %v2078_v37, %v2082_v57  ;;  %v2062_v25 = vld [vmem:[%s18128_s25 + $0x38d0] sm:$0xff] }
 0x628   : > { %v14441_v18 = vpop.f32.mrf.mxu1  ;;  %14735 = vmatprep.subr.bf16.mxu1 %v17626_v12  ;;  %v14402_v10 = vpop.f32.mrf.mxu0  ;;  %v17617_v7 = vcombine.low %v2206_v52, %v2210_v46  ;;  %v17610_v35 = vcombine.high %v2198_v40, %v2202_v14  ;;  %v2066_v24 = vld [vmem:[%s18128_s25 + $0x38f0] sm:$0xff]  ;;  %v17609_v37 = vcombine.low %v2198_v40, %v2202_v14 }
 0x629   : > { %v20036_v61 = vadd.f32 %v14441_v18, %v14401_v31  ;;  %14695 = vmatpush1.bf16.msra.mxu0 %v17497_v5  ;;  %v2190_v55 = vld [vmem:[%s18128_s25 + $0x3cd0] sm:$0xff]  ;;  %v17481_v18 = vcombine.low %v2070_v16, %v2074_v48  ;;  %v17474_v57 = vcombine.high %v2062_v25, %v2066_v24 }
 0x62a   : > { %v14443_v4 = vpop.f32.mrf.mxu1  ;;  %v14403_v29 = vpop.f32.mrf.mxu0  ;;  %14696 = vmatprep.subr.bf16.mxu0 %v17490_v45  ;;  %v2194_v31 = vld [vmem:[%s18128_s25 + $0x3cf0] sm:$0xff] }
 0x62b   : > { %14736 = vmatpush1.bf16.msra.mxu1 %v17625_v58  ;;  %v17602_v52 = vcombine.high %v2190_v55, %v2194_v31  ;;  %v2054_v46 = vld [vmem:[%s18128_s25 + $0x3890] sm:$0xff]  ;;  %v17601_v10 = vcombine.low %v2190_v55, %v2194_v31 }
 0x62c   : > { %v14444_v12 = vpop.f32.mrf.mxu1  ;;  %14737 = vmatprep.subr.bf16.mxu1 %v17618_v20  ;;  %v2058_v5 = vld [vmem:[%s18128_s25 + $0x38b0] sm:$0xff]  ;;  %v17473_v20 = vcombine.low %v2062_v25, %v2066_v24 }
 0x62d   : > { %14697 = vmatpush1.bf16.msra.mxu0 %v17489_v2  ;;  %v2182_v58 = vld [vmem:[%s18128_s25 + $0x3c90] sm:$0xff]  ;;  %v17466_v16 = vcombine.high %v2054_v46, %v2058_v5  ;;  %v17465_v29 = vcombine.low %v2054_v46, %v2058_v5 }
 0x62e   : > { %14698 = vmatprep.subr.bf16.mxu0 %v17482_v62  ;;  %v2186_v45 = vld [vmem:[%s18128_s25 + $0x3cb0] sm:$0xff] }
 0x62f   : > { %14738 = vmatpush1.bf16.msra.mxu1 %v17617_v7  ;;  %v17594_v48 = vcombine.high %v2182_v58, %v2186_v45  ;;  %v2046_v40 = vld [vmem:[%s18128_s25 + $0x3850] sm:$0xff]  ;;  %v17593_v7 = vcombine.low %v2182_v58, %v2186_v45 }
 0x630   : > { %14739 = vmatprep.subr.bf16.mxu1 %v17610_v35  ;;  %v2050_v14 = vld [vmem:[%s18128_s25 + $0x3870] sm:$0xff] }
 0x631   : > { %14699 = vmatpush1.bf16.msra.mxu0 %v17481_v18  ;;  %v2174_v4 = vld [vmem:[%s18128_s25 + $0x3c50] sm:$0xff]  ;;  %v17458_v62 = vcombine.high %v2046_v40, %v2050_v14  ;;  %v17457_v31 = vcombine.low %v2046_v40, %v2050_v14 }
 0x632   : > { %14700 = vmatprep.subr.bf16.mxu0 %v17474_v57  ;;  %v2178_v2 = vld [vmem:[%s18128_s25 + $0x3c70] sm:$0xff] }
 0x633   : > { %14740 = vmatpush1.bf16.msra.mxu1 %v17609_v37  ;;  %v17586_v12 = vcombine.high %v2174_v4, %v2178_v2  ;;  %v2038_v35 = vld [vmem:[%s18128_s25 + $0x3810] sm:$0xff]  ;;  %v17585_v18 = vcombine.low %v2174_v4, %v2178_v2 }
 0x634   : > { %14741 = vmatprep.subr.bf16.mxu1 %v17602_v52  ;;  %v2042_v25 = vld [vmem:[%s18128_s25 + $0x3830] sm:$0xff] }
 0x635   : > { %14701 = vmatpush1.bf16.msra.mxu0 %v17473_v20  ;;  %v2166_v24 = vld [vmem:[%s18128_s25 + $0x3c10] sm:$0xff]  ;;  %v17450_v37 = vcombine.high %v2038_v35, %v2042_v25  ;;  %v17449_v45 = vcombine.low %v2038_v35, %v2042_v25 }
 0x636   : > { %14702 = vmatprep.subr.bf16.mxu0 %v17466_v16  ;;  %v2170_v55 = vld [vmem:[%s18128_s25 + $0x3c30] sm:$0xff] }
 0x637   : > { %14742 = vmatpush1.bf16.msra.mxu1 %v17601_v10  ;;  %v17578_v57 = vcombine.high %v2166_v24, %v2170_v55  ;;  %v2158_v52 = vld [vmem:[%s18128_s25 + $0x3bd0] sm:$0xff]  ;;  %v17577_v20 = vcombine.low %v2166_v24, %v2170_v55 }
 0x638   : > { %14743 = vmatprep.subr.bf16.mxu1 %v17594_v48  ;;  %v2162_v46 = vld [vmem:[%s18128_s25 + $0x3bf0] sm:$0xff] }
 0x639   : > { %14703 = vmatpush1.bf16.msra.mxu0 %v17465_v29  ;;  %v2286_v5 = vld [vmem:[%s18128_s25 + $0x3fd0] sm:$0xff]  ;;  %v17570_v10 = vcombine.high %v2158_v52, %v2162_v46  ;;  %v17569_v2 = vcombine.low %v2158_v52, %v2162_v46 }
 0x63a   : > { %14704 = vmatprep.subr.bf16.mxu0 %v17458_v62  ;;  %v2290_v58 = vld [vmem:[%s18128_s25 + $0x3ff0] sm:$0xff] }
 0x63b   : > { %14744 = vmatpush1.bf16.msra.mxu1 %v17593_v7  ;;  %v17698_v16 = vcombine.high %v2286_v5, %v2290_v58  ;;  %v2150_v48 = vld [vmem:[%s18128_s25 + $0x3b90] sm:$0xff]  ;;  %v17697_v29 = vcombine.low %v2286_v5, %v2290_v58 }
 0x63c   : > { %14745 = vmatprep.subr.bf16.mxu1 %v17586_v12  ;;  %v2154_v40 = vld [vmem:[%s18128_s25 + $0x3bb0] sm:$0xff] }
 0x63d   : > { %14705 = vmatpush1.bf16.msra.mxu0 %v17457_v31  ;;  %v2278_v14 = vld [vmem:[%s18128_s25 + $0x3f90] sm:$0xff]  ;;  %v17562_v7 = vcombine.high %v2150_v48, %v2154_v40  ;;  %v17561_v55 = vcombine.low %v2150_v48, %v2154_v40 }
 0x63e   : > { %14706 = vmatprep.subr.bf16.mxu0 %v17450_v37  ;;  %v2282_v4 = vld [vmem:[%s18128_s25 + $0x3fb0] sm:$0xff] }
 0x63f   : > { %14746 = vmatpush1.bf16.msra.mxu1 %v17585_v18  ;;  %v17690_v62 = vcombine.high %v2278_v14, %v2282_v4  ;;  %v2142_v12 = vld [vmem:[%s18128_s25 + $0x3b50] sm:$0xff]  ;;  %v17689_v31 = vcombine.low %v2278_v14, %v2282_v4 }
 0x640   : > { %14747 = vmatprep.subr.bf16.mxu1 %v17578_v57  ;;  %v2146_v35 = vld [vmem:[%s18128_s25 + $0x3b70] sm:$0xff] }
 0x641   : > { %14707 = vmatpush1.bf16.msra.mxu0 %v17449_v45  ;;  %v2270_v25 = vld [vmem:[%s18128_s25 + $0x3f50] sm:$0xff]  ;;  %v17554_v18 = vcombine.high %v2142_v12, %v2146_v35  ;;  %v17553_v58 = vcombine.low %v2142_v12, %v2146_v35 }
 0x642   : > { %14708 = vmatprep.subr.bf16.mxu0 %v17570_v10  ;;  %v2274_v24 = vld [vmem:[%s18128_s25 + $0x3f70] sm:$0xff] }
 0x643   : > { %14748 = vmatpush1.bf16.msra.mxu1 %v17577_v20  ;;  %v17682_v37 = vcombine.high %v2270_v25, %v2274_v24  ;;  %v2134_v57 = vld [vmem:[%s18128_s25 + $0x3b10] sm:$0xff]  ;;  %v17681_v45 = vcombine.low %v2270_v25, %v2274_v24 }
 0x644   : > { %14749 = vmatprep.subr.bf16.mxu1 %v17698_v16  ;;  %v2138_v52 = vld [vmem:[%s18128_s25 + $0x3b30] sm:$0xff] }
 0x645   : > { %14709 = vmatpush2.bf16.msra.mxu0 %v17569_v2  ;;  %v2262_v46 = vld [vmem:[%s18128_s25 + $0x3f10] sm:$0xff]  ;;  %v17546_v20 = vcombine.high %v2134_v57, %v2138_v52  ;;  %v17545_v4 = vcombine.low %v2134_v57, %v2138_v52 }
 0x646   : > { %14710 = vmatprep.subr.bf16.mxu0 %v17562_v7  ;;  %v2266_v5 = vld [vmem:[%s18128_s25 + $0x3f30] sm:$0xff] }
 0x647   : > { %14750 = vmatpush2.bf16.msra.mxu1 %v17697_v29  ;;  %v17674_v10 = vcombine.high %v2262_v46, %v2266_v5  ;;  %v2126_v16 = vld [vmem:[%s18128_s25 + $0x3ad0] sm:$0xff]  ;;  %v17673_v2 = vcombine.low %v2262_v46, %v2266_v5 }
 0x648   : > { %14751 = vmatprep.subr.bf16.mxu1 %v17690_v62  ;;  %v2130_v48 = vld [vmem:[%s18128_s25 + $0x3af0] sm:$0xff] }
 0x649   : > { %14711 = vmatpush2.bf16.msra.mxu0 %v17561_v55  ;;  %v2254_v40 = vld [vmem:[%s18128_s25 + $0x3ed0] sm:$0xff]  ;;  %v17538_v29 = vcombine.high %v2126_v16, %v2130_v48  ;;  %v17537_v24 = vcombine.low %v2126_v16, %v2130_v48 }
 0x64a   : > { %14712 = vmatprep.subr.bf16.mxu0 %v17554_v18  ;;  %v2258_v14 = vld [vmem:[%s18128_s25 + $0x3ef0] sm:$0xff] }
 0x64b   : > { %14752 = vmatpush2.bf16.msra.mxu1 %v17689_v31  ;;  %v17666_v7 = vcombine.high %v2254_v40, %v2258_v14  ;;  %v2118_v62 = vld [vmem:[%s18128_s25 + $0x3a90] sm:$0xff]  ;;  %v17665_v55 = vcombine.low %v2254_v40, %v2258_v14 }
 0x64c   : > { %14753 = vmatprep.subr.bf16.mxu1 %v17682_v37  ;;  %v2122_v12 = vld [vmem:[%s18128_s25 + $0x3ab0] sm:$0xff] }
 0x64d   : > { %14713 = vmatpush2.bf16.msra.mxu0 %v17553_v58  ;;  %v2246_v35 = vld [vmem:[%s18128_s25 + $0x3e90] sm:$0xff]  ;;  %v17530_v31 = vcombine.high %v2118_v62, %v2122_v12  ;;  %v17529_v5 = vcombine.low %v2118_v62, %v2122_v12  ;;  %v307_v62 = vld [vmem:[%s18128_s25 + $0x1f8] sm:$0xff] }
 0x64e   : > { %14714 = vmatprep.subr.bf16.mxu0 %v17546_v20  ;;  %v2250_v25 = vld [vmem:[%s18128_s25 + $0x3eb0] sm:$0xff]  ;;  %v431_v12 = vld [vmem:[%s18128_s25 + $0x5d8] sm:$0xff] }
 0x64f   : > { %14754 = vmatpush2.bf16.msra.mxu1 %v17681_v45  ;;  %v17658_v18 = vcombine.high %v2246_v35, %v2250_v25  ;;  %v2110_v37 = vld [vmem:[%s18128_s25 + $0x3a50] sm:$0xff]  ;;  %v17657_v58 = vcombine.low %v2246_v35, %v2250_v25  ;;  %v435_v35 = vld [vmem:[%s18128_s25 + $0x5f8] sm:$0xff] }
 0x650   : > { %14755 = vmatprep.subr.bf16.mxu1 %v17674_v10  ;;  %v2114_v57 = vld [vmem:[%s18128_s25 + $0x3a70] sm:$0xff] }
 0x651   : > { %14715 = vmatpush2.bf16.msra.mxu0 %v17545_v4  ;;  %v2238_v52 = vld [vmem:[%s18128_s25 + $0x3e50] sm:$0xff]  ;;  %v17522_v45 = vcombine.high %v2110_v37, %v2114_v57  ;;  %v17521_v14 = vcombine.low %v2110_v37, %v2114_v57  ;;  %v299_v37 = vld [vmem:[%s18128_s25 + $0x1b8] sm:$0xff] }
 0x652   : > { %14716 = vmatprep.subr.bf16.mxu0 %v17538_v29  ;;  %v2242_v46 = vld [vmem:[%s18128_s25 + $0x3e70] sm:$0xff]  ;;  %v423_v57 = vld [vmem:[%s18128_s25 + $0x598] sm:$0xff] }
 0x653   : > { %14756 = vmatpush2.bf16.msra.mxu1 %v17673_v2  ;;  %v17650_v20 = vcombine.high %v2238_v52, %v2242_v46  ;;  %v2102_v10 = vld [vmem:[%s18128_s25 + $0x3a10] sm:$0xff]  ;;  %v17649_v4 = vcombine.low %v2238_v52, %v2242_v46  ;;  %v427_v52 = vld [vmem:[%s18128_s25 + $0x5b8] sm:$0xff] }
 0x654   : > { %14757 = vmatprep.subr.bf16.mxu1 %v17666_v7  ;;  %v2106_v16 = vld [vmem:[%s18128_s25 + $0x3a30] sm:$0xff]  ;;  %v303_v7 = vld [vmem:[%s18128_s25 + $0x1d8] sm:$0xff] }
 0x655   : > { %14717 = vmatpush2.bf16.msra.mxu0 %v17537_v24  ;;  %v2230_v48 = vld [vmem:[%s18128_s25 + $0x3e10] sm:$0xff]  ;;  %v17514_v2 = vcombine.high %v2102_v10, %v2106_v16  ;;  %v17513_v25 = vcombine.low %v2102_v10, %v2106_v16  ;;  %v15715_v46 = vcombine.low %v303_v7, %v307_v62  ;;  %v291_v10 = vld [vmem:[%s18128_s25 + $0x178] sm:$0xff] }
 0x656   : > { %14718 = vmatprep.subr.bf16.mxu0 %v17530_v31  ;;  %v2234_v40 = vld [vmem:[%s18128_s25 + $0x3e30] sm:$0xff]  ;;  %v15844_v31 = vcombine.high %v431_v12, %v435_v35 }
 0x657   : > { %14758 = vmatpush2.bf16.msra.mxu1 %v17665_v55  ;;  %v17642_v29 = vcombine.high %v2230_v48, %v2234_v40  ;;  %v17641_v24 = vcombine.low %v2230_v48, %v2234_v40  ;;  %v15716_v55 = vcombine.high %v303_v7, %v307_v62  ;;  %v415_v48 = vld [vmem:[%s18128_s25 + $0x558] sm:$0xff]  ;;  %v15835_v7 = vcombine.low %v423_v57, %v427_v52 }
 0x658   : > { %14759 = vmatprep.subr.bf16.mxu1 %v17658_v18  ;;  %v295_v18 = vld [vmem:[%s18128_s25 + $0x198] sm:$0xff] }
 0x659   : > { %14719 = vmatpush2.bf16.msra.mxu0 %v17529_v5  ;;  %v15843_v5 = vcombine.low %v431_v12, %v435_v35  ;;  %v419_v40 = vld [vmem:[%s18128_s25 + $0x578] sm:$0xff] }
 0x65a   : > { %14720 = vmatprep.subr.bf16.mxu0 %v17522_v45  ;;  %v15836_v45 = vcombine.high %v423_v57, %v427_v52 }
 0x65b   : > { %14760 = vmatpush2.bf16.msra.mxu1 %v17657_v58  ;;  %v15708_v58 = vcombine.high %v295_v18, %v299_v37 }
 0x65c   : > { %14761 = vmatprep.subr.bf16.mxu1 %v17650_v20  ;;  %v287_v20 = vld [vmem:[%s18128_s25 + $0x158] sm:$0xff] }
 0x65d   : > { %14721 = vmatpush2.bf16.msra.mxu0 %v17521_v14  ;;  %v15700_v62 = vcombine.high %v287_v20, %v291_v10 }
 0x65e   : > { %14722 = vmatprep.subr.bf16.mxu0 %v17514_v2  ;;  %v15707_v2 = vcombine.low %v295_v18, %v299_v37  ;;  %v407_v18 = vld [vmem:[%s18128_s25 + $0x518] sm:$0xff] }
 0x65f   : > { %14762 = vmatpush2.bf16.msra.mxu1 %v17649_v4  ;;  %v411_v37 = vld [vmem:[%s18128_s25 + $0x538] sm:$0xff] }
 0x660   : > { %14763 = vmatprep.subr.bf16.mxu1 %v17642_v29 }
 0x661   : > { %14723 = vmatpush2.bf16.msra.mxu0 %v17513_v25 }
 0x662   : > { %14774 = vmatprep.subr.bf16.mxu0 %v15716_v55  ;;  %v283_v55 = vld [vmem:[%s18128_s25 + $0x138] sm:$0xff] }
 0x663   : > { %14764 = vmatpush2.bf16.msra.mxu1 %v17641_v24  ;;  %v279_v24 = vld [vmem:[%s18128_s25 + $0x118] sm:$0xff] }
 0x664   : > { %14815 = vmatprep.subr.bf16.mxu1 %v15844_v31  ;;  %v14480_v16 = vpop.f32.mrf.mxu0  ;;  %14725 = vmatmul.mubr.bf16.vlgmr.msra.gmra.mxu0 %v18889_v51 }
 0x665   : > { %v14481_v14 = vadd.f32 %v14480_v16, %v20027_v28  ;;  %14775 = vmatpush1.bf16.msra.mxu0 %v15715_v46  ;;  %v15828_v28 = vcombine.high %v415_v48, %v419_v40  ;;  %14806 = vmatprep.mubr.bf16.mxu0 %v18182_v9  ;;  %v271_v16 = vld [vmem:[%s18128_s25 + $0xd8] sm:$0xff] }
 0x666   : > { %v14521_v4 = vpop.f32.mrf.mxu1  ;;  %14766 = vmatmul.mubr.bf16.vlgmr.msra.gmra.mxu1 %v18897_v6  ;;  %v14482_v29 = vpop.f32.mrf.mxu0  ;;  %14776 = vmatprep.subr.bf16.mxu0 %v15708_v58  ;;  %v15692_v58 = vcombine.high %v279_v24, %v283_v55 }
 0x667   : > { %14816 = vmatpush1.bf16.msra.mxu1 %v15843_v5  ;;  %v20101_v12 = vadd.f32 %v14521_v4, %v14481_v14  ;;  %v14483_v35 = vadd.f32 %v14482_v29, %v20036_v61  ;;  %14847 = vmatprep.mubr.bf16.mxu1 %v18189_v13  ;;  %v15699_v61 = vcombine.low %v287_v20, %v291_v10  ;;  %v275_v13 = vld [vmem:[%s18128_s25 + $0xf8] sm:$0xff] }
 0x668   : > { %v14523_v25 = vpop.f32.mrf.mxu1  ;;  %14817 = vmatprep.subr.bf16.mxu1 %v15836_v45  ;;  %v14484_v31 = vpop.f32.mrf.mxu0  ;;  %v15827_v5 = vcombine.low %v415_v48, %v419_v40  ;;  %v15820_v45 = vcombine.high %v407_v18, %v411_v37  ;;  %v399_v14 = vld [vmem:[%s18128_s25 + $0x4d8] sm:$0xff]  ;;  %v15691_v29 = vcombine.low %v279_v24, %v283_v55  ;;  %v15819_v20 = vcombine.low %v407_v18, %v411_v37 }
 0x669   : > { %v20110_v57 = vadd.f32 %v14523_v25, %v14483_v35  ;;  %14777 = vmatpush1.bf16.msra.mxu0 %v15707_v2  ;;  %v403_v4 = vld [vmem:[%s18128_s25 + $0x4f8] sm:$0xff]  ;;  %v15684_v10 = vcombine.high %v271_v16, %v275_v13  ;;  %v15683_v35 = vcombine.low %v271_v16, %v275_v13 }
 0x66a   : > { %v14525_v52 = vpop.f32.mrf.mxu1  ;;  %v14485_v46 = vpop.f32.mrf.mxu0  ;;  %14778 = vmatprep.subr.bf16.mxu0 %v15700_v62  ;;  %v15812_v48 = vcombine.high %v399_v14, %v403_v4  ;;  %v263_v40 = vld [vmem:[%s18128_s25 + $0x98] sm:$0xff]  ;;  %v15811_v25 = vcombine.low %v399_v14, %v403_v4 }
 0x66b   : > { %14818 = vmatpush1.bf16.msra.mxu1 %v15835_v7  ;;  %v267_v2 = vld [vmem:[%s18128_s25 + $0xb8] sm:$0xff] }
 0x66c   : > { %v14526_v9 = vpop.f32.mrf.mxu1  ;;  %14819 = vmatprep.subr.bf16.mxu1 %v15828_v28  ;;  %v391_v7 = vld [vmem:[%s18128_s25 + $0x498] sm:$0xff]  ;;  %v15676_v28 = vcombine.high %v263_v40, %v267_v2  ;;  %v15675_v52 = vcombine.low %v263_v40, %v267_v2 }
 0x66d   : > { %14779 = vmatpush1.bf16.msra.mxu0 %v15699_v61  ;;  %v395_v62 = vld [vmem:[%s18128_s25 + $0x4b8] sm:$0xff] }
 0x66e   : > { %14780 = vmatprep.subr.bf16.mxu0 %v15692_v58  ;;  %v15804_v24 = vcombine.high %v391_v7, %v395_v62  ;;  %v255_v55 = vld [vmem:[%s18128_s25 + $0x58] sm:$0xff]  ;;  %v15803_v61 = vcombine.low %v391_v7, %v395_v62 }
 0x66f   : > { %14820 = vmatpush1.bf16.msra.mxu1 %v15827_v5  ;;  %v259_v31 = vld [vmem:[%s18128_s25 + $0x78] sm:$0xff] }
 0x670   : > { %14821 = vmatprep.subr.bf16.mxu1 %v15820_v45  ;;  %v383_v18 = vld [vmem:[%s18128_s25 + $0x458] sm:$0xff]  ;;  %v15668_v46 = vcombine.high %v255_v55, %v259_v31  ;;  %v15667_v13 = vcombine.low %v255_v55, %v259_v31 }
 0x671   : > { %14781 = vmatpush1.bf16.msra.mxu0 %v15691_v29  ;;  %v387_v37 = vld [vmem:[%s18128_s25 + $0x478] sm:$0xff] }
 0x672   : > { %14782 = vmatprep.subr.bf16.mxu0 %v15684_v10  ;;  %v15796_v5 = vcombine.high %v383_v18, %v387_v37  ;;  %v247_v58 = vld [vmem:[%s18128_s25 + $0x18] sm:$0xff]  ;;  %v15795_v14 = vcombine.low %v383_v18, %v387_v37 }
 0x673   : > { %14822 = vmatpush1.bf16.msra.mxu1 %v15819_v20  ;;  %v251_v9 = vld [vmem:[%s18128_s25 + $0x38] sm:$0xff] }
 0x674   : > { %14823 = vmatprep.subr.bf16.mxu1 %v15812_v48  ;;  %v375_v45 = vld [vmem:[%s18128_s25 + $0x418] sm:$0xff]  ;;  %v15660_v4 = vcombine.high %v247_v58, %v251_v9  ;;  %v15659_v2 = vcombine.low %v247_v58, %v251_v9 }
 0x675   : > { %14783 = vmatpush1.bf16.msra.mxu0 %v15683_v35  ;;  %v379_v16 = vld [vmem:[%s18128_s25 + $0x438] sm:$0xff] }
 0x676   : > { %14784 = vmatprep.subr.bf16.mxu0 %v15676_v28  ;;  %v15788_v29 = vcombine.high %v375_v45, %v379_v16  ;;  %v367_v20 = vld [vmem:[%s18128_s25 + $0x3d8] sm:$0xff]  ;;  %v15787_v7 = vcombine.low %v375_v45, %v379_v16 }
 0x677   : > { %14824 = vmatpush1.bf16.msra.mxu1 %v15811_v25  ;;  %v371_v10 = vld [vmem:[%s18128_s25 + $0x3f8] sm:$0xff] }
 0x678   : > { %14825 = vmatprep.subr.bf16.mxu1 %v15804_v24  ;;  %v495_v48 = vld [vmem:[%s18128_s25 + $0x7d8] sm:$0xff]  ;;  %v15780_v62 = vcombine.high %v367_v20, %v371_v10  ;;  %v15779_v31 = vcombine.low %v367_v20, %v371_v10 }
 0x679   : > { %14785 = vmatpush1.bf16.msra.mxu0 %v15675_v52  ;;  %v499_v40 = vld [vmem:[%s18128_s25 + $0x7f8] sm:$0xff] }
 0x67a   : > { %14786 = vmatprep.subr.bf16.mxu0 %v15668_v46  ;;  %v15908_v35 = vcombine.high %v495_v48, %v499_v40  ;;  %v359_v25 = vld [vmem:[%s18128_s25 + $0x398] sm:$0xff]  ;;  %v15907_v18 = vcombine.low %v495_v48, %v499_v40 }
 0x67b   : > { %14826 = vmatpush1.bf16.msra.mxu1 %v15803_v61  ;;  %v363_v28 = vld [vmem:[%s18128_s25 + $0x3b8] sm:$0xff] }
 0x67c   : > { %14827 = vmatprep.subr.bf16.mxu1 %v15796_v5  ;;  %v487_v24 = vld [vmem:[%s18128_s25 + $0x798] sm:$0xff]  ;;  %v15772_v37 = vcombine.high %v359_v25, %v363_v28  ;;  %v15771_v9 = vcombine.low %v359_v25, %v363_v28 }
 0x67d   : > { %14787 = vmatpush1.bf16.msra.mxu0 %v15667_v13  ;;  %v491_v55 = vld [vmem:[%s18128_s25 + $0x7b8] sm:$0xff] }
 0x67e   : > { %14788 = vmatprep.subr.bf16.mxu0 %v15660_v4  ;;  %v15900_v52 = vcombine.high %v487_v24, %v491_v55  ;;  %v351_v61 = vld [vmem:[%s18128_s25 + $0x358] sm:$0xff]  ;;  %v15899_v45 = vcombine.low %v487_v24, %v491_v55 }
 0x67f   : > { %14828 = vmatpush1.bf16.msra.mxu1 %v15795_v14  ;;  %v355_v46 = vld [vmem:[%s18128_s25 + $0x378] sm:$0xff] }
 0x680   : > { %14829 = vmatprep.subr.bf16.mxu1 %v15788_v29  ;;  %v479_v5 = vld [vmem:[%s18128_s25 + $0x758] sm:$0xff]  ;;  %v15764_v16 = vcombine.high %v351_v61, %v355_v46  ;;  %v15763_v10 = vcombine.low %v351_v61, %v355_v46 }
 0x681   : > { %14789 = vmatpush1.bf16.msra.mxu0 %v15659_v2  ;;  %v483_v58 = vld [vmem:[%s18128_s25 + $0x778] sm:$0xff] }
 0x682   : > { %14790 = vmatprep.subr.bf16.mxu0 %v15780_v62  ;;  %v15892_v13 = vcombine.high %v479_v5, %v483_v58  ;;  %v343_v14 = vld [vmem:[%s18128_s25 + $0x318] sm:$0xff]  ;;  %v15891_v48 = vcombine.low %v479_v5, %v483_v58 }
 0x683   : > { %14830 = vmatpush1.bf16.msra.mxu1 %v15787_v7  ;;  %v347_v4 = vld [vmem:[%s18128_s25 + $0x338] sm:$0xff] }
 0x684   : > { %14831 = vmatprep.subr.bf16.mxu1 %v15908_v35  ;;  %v471_v29 = vld [vmem:[%s18128_s25 + $0x718] sm:$0xff]  ;;  %v15756_v40 = vcombine.high %v343_v14, %v347_v4  ;;  %v15755_v28 = vcombine.low %v343_v14, %v347_v4 }
 0x685   : > { %14791 = vmatpush2.bf16.msra.mxu0 %v15779_v31  ;;  %v475_v20 = vld [vmem:[%s18128_s25 + $0x738] sm:$0xff] }
 0x686   : > { %14792 = vmatprep.subr.bf16.mxu0 %v15772_v37  ;;  %v15884_v2 = vcombine.high %v471_v29, %v475_v20  ;;  %v335_v7 = vld [vmem:[%s18128_s25 + $0x2d8] sm:$0xff]  ;;  %v15883_v24 = vcombine.low %v471_v29, %v475_v20 }
 0x687   : > { %14832 = vmatpush2.bf16.msra.mxu1 %v15907_v18  ;;  %v339_v62 = vld [vmem:[%s18128_s25 + $0x2f8] sm:$0xff] }
 0x688   : > { %14833 = vmatprep.subr.bf16.mxu1 %v15900_v52  ;;  %v463_v35 = vld [vmem:[%s18128_s25 + $0x6d8] sm:$0xff]  ;;  %v15748_v55 = vcombine.high %v335_v7, %v339_v62  ;;  %v15747_v46 = vcombine.low %v335_v7, %v339_v62 }
 0x689   : > { %14793 = vmatpush2.bf16.msra.mxu0 %v15771_v9  ;;  %v467_v25 = vld [vmem:[%s18128_s25 + $0x6f8] sm:$0xff] }
 0x68a   : > { %14794 = vmatprep.subr.bf16.mxu0 %v15764_v16  ;;  %v15876_v31 = vcombine.high %v463_v35, %v467_v25  ;;  %v327_v18 = vld [vmem:[%s18128_s25 + $0x298] sm:$0xff]  ;;  %v15875_v5 = vcombine.low %v463_v35, %v467_v25 }
 0x68b   : > { %14834 = vmatpush2.bf16.msra.mxu1 %v15899_v45  ;;  %v331_v37 = vld [vmem:[%s18128_s25 + $0x2b8] sm:$0xff] }
 0x68c   : > { %14835 = vmatprep.subr.bf16.mxu1 %v15892_v13  ;;  %v455_v52 = vld [vmem:[%s18128_s25 + $0x698] sm:$0xff]  ;;  %v15740_v58 = vcombine.high %v327_v18, %v331_v37  ;;  %v15739_v4 = vcombine.low %v327_v18, %v331_v37 }
 0x68d   : > { %14795 = vmatpush2.bf16.msra.mxu0 %v15763_v10  ;;  %v459_v61 = vld [vmem:[%s18128_s25 + $0x6b8] sm:$0xff] }
 0x68e   : > { %14796 = vmatprep.subr.bf16.mxu0 %v15756_v40  ;;  %v15868_v9 = vcombine.high %v455_v52, %v459_v61  ;;  %v319_v45 = vld [vmem:[%s18128_s25 + $0x258] sm:$0xff]  ;;  %v15867_v29 = vcombine.low %v455_v52, %v459_v61 }
 0x68f   : > { %14836 = vmatpush2.bf16.msra.mxu1 %v15891_v48  ;;  %v323_v16 = vld [vmem:[%s18128_s25 + $0x278] sm:$0xff] }
 0x690   : > { %14837 = vmatprep.subr.bf16.mxu1 %v15884_v2  ;;  %v447_v13 = vld [vmem:[%s18128_s25 + $0x658] sm:$0xff]  ;;  %v15732_v20 = vcombine.high %v319_v45, %v323_v16  ;;  %v15731_v62 = vcombine.low %v319_v45, %v323_v16 }
 0x691   : > { %14797 = vmatpush2.bf16.msra.mxu0 %v15755_v28  ;;  %v451_v14 = vld [vmem:[%s18128_s25 + $0x678] sm:$0xff] }
 0x692   : > { %14798 = vmatprep.subr.bf16.mxu0 %v15748_v55  ;;  %v15860_v10 = vcombine.high %v447_v13, %v451_v14  ;;  %v311_v48 = vld [vmem:[%s18128_s25 + $0x218] sm:$0xff]  ;;  %v15859_v35 = vcombine.low %v447_v13, %v451_v14 }
 0x693   : > { %14838 = vmatpush2.bf16.msra.mxu1 %v15883_v24  ;;  %v315_v40 = vld [vmem:[%s18128_s25 + $0x238] sm:$0xff] }
 0x694   : > { %14839 = vmatprep.subr.bf16.mxu1 %v15876_v31  ;;  %v439_v2 = vld [vmem:[%s18128_s25 + $0x618] sm:$0xff]  ;;  %v15724_v25 = vcombine.high %v311_v48, %v315_v40  ;;  %v15723_v37 = vcombine.low %v311_v48, %v315_v40 }
 0x695   : > { %14799 = vmatpush2.bf16.msra.mxu0 %v15747_v46  ;;  %v443_v7 = vld [vmem:[%s18128_s25 + $0x638] sm:$0xff] }
 0x696   : > { %14800 = vmatprep.subr.bf16.mxu0 %v15740_v58  ;;  %v15852_v28 = vcombine.high %v439_v2, %v443_v7  ;;  %v559_v24 = vld [vmem:[%s18128_s25 + $0x9d8] sm:$0xff]  ;;  %v15851_v52 = vcombine.low %v439_v2, %v443_v7 }
 0x697   : > { %14840 = vmatpush2.bf16.msra.mxu1 %v15875_v5  ;;  %v563_v55 = vld [vmem:[%s18128_s25 + $0x9f8] sm:$0xff] }
 0x698   : > { %14841 = vmatprep.subr.bf16.mxu1 %v15868_v9  ;;  %v687_v31 = vld [vmem:[%s18128_s25 + $0xdd8] sm:$0xff]  ;;  %v15972_v61 = vcombine.high %v559_v24, %v563_v55  ;;  %v15971_v16 = vcombine.low %v559_v24, %v563_v55 }
 0x699   : > { %14801 = vmatpush2.bf16.msra.mxu0 %v15739_v4  ;;  %v691_v18 = vld [vmem:[%s18128_s25 + $0xdf8] sm:$0xff] }
 0x69a   : > { %14802 = vmatprep.subr.bf16.mxu0 %v15732_v20  ;;  %v16100_v46 = vcombine.high %v687_v31, %v691_v18  ;;  %v551_v5 = vld [vmem:[%s18128_s25 + $0x998] sm:$0xff]  ;;  %v16099_v13 = vcombine.low %v687_v31, %v691_v18 }
 0x69b   : > { %14842 = vmatpush2.bf16.msra.mxu1 %v15867_v29  ;;  %v555_v58 = vld [vmem:[%s18128_s25 + $0x9b8] sm:$0xff] }
 0x69c   : > { %14843 = vmatprep.subr.bf16.mxu1 %v15860_v10  ;;  %v679_v9 = vld [vmem:[%s18128_s25 + $0xd98] sm:$0xff]  ;;  %v15964_v14 = vcombine.high %v551_v5, %v555_v58 }
 0x69d   : > { %14803 = vmatpush2.bf16.msra.mxu0 %v15731_v62  ;;  %v683_v45 = vld [vmem:[%s18128_s25 + $0xdb8] sm:$0xff]  ;;  %v15963_v62 = vcombine.low %v551_v5, %v555_v58 }
 0x69e   : > { %14804 = vmatprep.subr.bf16.mxu0 %v15724_v25  ;;  %v16092_v4 = vcombine.high %v679_v9, %v683_v45  ;;  %v543_v29 = vld [vmem:[%s18128_s25 + $0x958] sm:$0xff]  ;;  %v16091_v25 = vcombine.low %v679_v9, %v683_v45 }
 0x69f   : > { %14844 = vmatpush2.bf16.msra.mxu1 %v15859_v35  ;;  %v547_v20 = vld [vmem:[%s18128_s25 + $0x978] sm:$0xff] }
 0x6a0   : > { %14845 = vmatprep.subr.bf16.mxu1 %v15852_v28  ;;  %v671_v48 = vld [vmem:[%s18128_s25 + $0xd58] sm:$0xff]  ;;  %v15956_v28 = vcombine.high %v543_v29, %v547_v20 }
 0x6a1   : > { %14805 = vmatpush2.bf16.msra.mxu0 %v15723_v37  ;;  %v675_v40 = vld [vmem:[%s18128_s25 + $0xd78] sm:$0xff] }
 0x6a2   : > { %14856 = vmatprep.subr.bf16.mxu0 %v15972_v61  ;;  %v535_v31 = vld [vmem:[%s18128_s25 + $0x918] sm:$0xff]  ;;  %v16083_v58 = vcombine.low %v671_v48, %v675_v40 }
 0x6a3   : > { %14846 = vmatpush2.bf16.msra.mxu1 %v15851_v52  ;;  %v539_v18 = vld [vmem:[%s18128_s25 + $0x938] sm:$0xff] }
 0x6a4   : > { %14897 = vmatprep.subr.bf16.mxu1 %v16100_v46  ;;  %v14562_v10 = vpop.f32.mrf.mxu0  ;;  %14807 = vmatmul.mubr.bf16.vlgmr.msra.gmra.mxu0 %v18233_v22  ;;  %v663_v37 = vld [vmem:[%s18128_s25 + $0xd18] sm:$0xff]  ;;  %v15948_v9 = vcombine.high %v535_v31, %v539_v18 }
 0x6a5   : > { %v14563_v2 = vadd.f32 %v14562_v10, %v20101_v12  ;;  %14857 = vmatpush1.bf16.msra.mxu0 %v15971_v16  ;;  %v16084_v12 = vcombine.high %v671_v48, %v675_v40  ;;  %14888 = vmatprep.mubr.bf16.mxu0 %v18240_v30  ;;  %v667_v52 = vld [vmem:[%s18128_s25 + $0xd38] sm:$0xff] }
 0x6a6   : > { %v14603_v7 = vpop.f32.mrf.mxu1  ;;  %14848 = vmatmul.mubr.bf16.vlgmr.msra.gmra.mxu1 %v18244_v63  ;;  %v14564_v35 = vpop.f32.mrf.mxu0  ;;  %14858 = vmatprep.subr.bf16.mxu0 %v15964_v14  ;;  %v16076_v45 = vcombine.high %v663_v37, %v667_v52  ;;  %v527_v16 = vld [vmem:[%s18128_s25 + $0x8d8] sm:$0xff] }
 0x6a7   : > { %14898 = vmatpush1.bf16.msra.mxu1 %v16099_v13  ;;  %v20175_v24 = vadd.f32 %v14603_v7, %v14563_v2  ;;  %v14565_v22 = vadd.f32 %v14564_v35, %v20110_v57  ;;  %14929 = vmatprep.mubr.bf16.mxu1 %v18253_v39  ;;  %v15955_v57 = vcombine.low %v543_v29, %v547_v20  ;;  %v531_v39 = vld [vmem:[%s18128_s25 + $0x8f8] sm:$0xff] }
 0x6a8   : > { %v14605_v55 = vpop.f32.mrf.mxu1  ;;  %14899 = vmatprep.subr.bf16.mxu1 %v16092_v4  ;;  %v14566_v63 = vpop.f32.mrf.mxu0  ;;  %v655_v13 = vld [vmem:[%s18128_s25 + $0xcd8] sm:$0xff]  ;;  %v15947_v4 = vcombine.low %v535_v31, %v539_v18  ;;  %v16075_v29 = vcombine.low %v663_v37, %v667_v52  ;;  %v15940_v20 = vcombine.high %v527_v16, %v531_v39 }
 0x6a9   : > { %v20184_v61 = vadd.f32 %v14605_v55, %v14565_v22  ;;  %14859 = vmatpush1.bf16.msra.mxu0 %v15963_v62  ;;  %v659_v14 = vld [vmem:[%s18128_s25 + $0xcf8] sm:$0xff]  ;;  %v15939_v62 = vcombine.low %v527_v16, %v531_v39 }
 0x6aa   : > { %v14607_v46 = vpop.f32.mrf.mxu1  ;;  %v14567_v5 = vpop.f32.mrf.mxu0  ;;  %14860 = vmatprep.subr.bf16.mxu0 %v15956_v28  ;;  %v16068_v10 = vcombine.high %v655_v13, %v659_v14  ;;  %v519_v48 = vld [vmem:[%s18128_s25 + $0x898] sm:$0xff]  ;;  %v16067_v35 = vcombine.low %v655_v13, %v659_v14 }
 0x6ab   : > { %14900 = vmatpush1.bf16.msra.mxu1 %v16091_v25  ;;  %v523_v40 = vld [vmem:[%s18128_s25 + $0x8b8] sm:$0xff] }
 0x6ac   : > { %v14608_v30 = vpop.f32.mrf.mxu1  ;;  %14901 = vmatprep.subr.bf16.mxu1 %v16084_v12  ;;  %v647_v2 = vld [vmem:[%s18128_s25 + $0xc98] sm:$0xff]  ;;  %v15932_v25 = vcombine.high %v519_v48, %v523_v40  ;;  %v15931_v18 = vcombine.low %v519_v48, %v523_v40 }
 0x6ad   : > { %14861 = vmatpush1.bf16.msra.mxu0 %v15955_v57  ;;  %v651_v7 = vld [vmem:[%s18128_s25 + $0xcb8] sm:$0xff] }
 0x6ae   : > { %14862 = vmatprep.subr.bf16.mxu0 %v15948_v9  ;;  %v16060_v28 = vcombine.high %v647_v2, %v651_v7  ;;  %v511_v22 = vld [vmem:[%s18128_s25 + $0x858] sm:$0xff]  ;;  %v16059_v63 = vcombine.low %v647_v2, %v651_v7 }
 0x6af   : > { %14902 = vmatpush1.bf16.msra.mxu1 %v16083_v58  ;;  %v515_v55 = vld [vmem:[%s18128_s25 + $0x878] sm:$0xff] }
 0x6b0   : > { %14903 = vmatprep.subr.bf16.mxu1 %v16076_v45  ;;  %v639_v12 = vld [vmem:[%s18128_s25 + $0xc58] sm:$0xff]  ;;  %v15924_v37 = vcombine.high %v511_v22, %v515_v55  ;;  %v15923_v9 = vcombine.low %v511_v22, %v515_v55 }
 0x6b1   : > { %14863 = vmatpush1.bf16.msra.mxu0 %v15947_v4  ;;  %v643_v31 = vld [vmem:[%s18128_s25 + $0xc78] sm:$0xff] }
 0x6b2   : > { %14864 = vmatprep.subr.bf16.mxu0 %v15940_v20  ;;  %v16052_v52 = vcombine.high %v639_v12, %v643_v31  ;;  %v503_v46 = vld [vmem:[%s18128_s25 + $0x818] sm:$0xff]  ;;  %v16051_v30 = vcombine.low %v639_v12, %v643_v31 }
 0x6b3   : > { %14904 = vmatpush1.bf16.msra.mxu1 %v16075_v29  ;;  %v507_v57 = vld [vmem:[%s18128_s25 + $0x838] sm:$0xff] }
 0x6b4   : > { %14905 = vmatprep.subr.bf16.mxu1 %v16068_v10  ;;  %v631_v5 = vld [vmem:[%s18128_s25 + $0xc18] sm:$0xff]  ;;  %v15916_v45 = vcombine.high %v503_v46, %v507_v57  ;;  %v15915_v29 = vcombine.low %v503_v46, %v507_v57 }
 0x6b5   : > { %14865 = vmatpush1.bf16.msra.mxu0 %v15939_v62  ;;  %v635_v58 = vld [vmem:[%s18128_s25 + $0xc38] sm:$0xff] }
 0x6b6   : > { %14866 = vmatprep.subr.bf16.mxu0 %v15932_v25  ;;  %v16044_v16 = vcombine.high %v631_v5, %v635_v58  ;;  %v623_v39 = vld [vmem:[%s18128_s25 + $0xbd8] sm:$0xff]  ;;  %v16043_v20 = vcombine.low %v631_v5, %v635_v58 }
 0x6b7   : > { %14906 = vmatpush1.bf16.msra.mxu1 %v16067_v35  ;;  %v627_v13 = vld [vmem:[%s18128_s25 + $0xbf8] sm:$0xff] }
 0x6b8   : > { %14907 = vmatprep.subr.bf16.mxu1 %v16060_v28  ;;  %v751_v14 = vld [vmem:[%s18128_s25 + $0xfd8] sm:$0xff]  ;;  %v16036_v10 = vcombine.high %v623_v39, %v627_v13  ;;  %v16035_v35 = vcombine.low %v623_v39, %v627_v13 }
 0x6b9   : > { %14867 = vmatpush1.bf16.msra.mxu0 %v15931_v18  ;;  %v755_v4 = vld [vmem:[%s18128_s25 + $0xff8] sm:$0xff] }
 0x6ba   : > { %14868 = vmatprep.subr.bf16.mxu0 %v15924_v37  ;;  %v16164_v48 = vcombine.high %v751_v14, %v755_v4  ;;  %v615_v40 = vld [vmem:[%s18128_s25 + $0xb98] sm:$0xff]  ;;  %v16163_v25 = vcombine.low %v751_v14, %v755_v4 }
 0x6bb   : > { %14908 = vmatpush1.bf16.msra.mxu1 %v16059_v63  ;;  %v619_v2 = vld [vmem:[%s18128_s25 + $0xbb8] sm:$0xff] }
 0x6bc   : > { %14909 = vmatprep.subr.bf16.mxu1 %v16052_v52  ;;  %v743_v7 = vld [vmem:[%s18128_s25 + $0xf98] sm:$0xff]  ;;  %v16028_v28 = vcombine.high %v615_v40, %v619_v2  ;;  %v16027_v63 = vcombine.low %v615_v40, %v619_v2 }
 0x6bd   : > { %14869 = vmatpush1.bf16.msra.mxu0 %v15923_v9  ;;  %v747_v62 = vld [vmem:[%s18128_s25 + $0xfb8] sm:$0xff] }
 0x6be   : > { %14870 = vmatprep.subr.bf16.mxu0 %v15916_v45  ;;  %v16156_v22 = vcombine.high %v743_v7, %v747_v62  ;;  %v607_v55 = vld [vmem:[%s18128_s25 + $0xb58] sm:$0xff]  ;;  %v16155_v37 = vcombine.low %v743_v7, %v747_v62 }
 0x6bf   : > { %14910 = vmatpush1.bf16.msra.mxu1 %v16051_v30  ;;  %v611_v12 = vld [vmem:[%s18128_s25 + $0xb78] sm:$0xff] }
 0x6c0   : > { %14911 = vmatprep.subr.bf16.mxu1 %v16044_v16  ;;  %v735_v31 = vld [vmem:[%s18128_s25 + $0xf58] sm:$0xff]  ;;  %v16020_v52 = vcombine.high %v607_v55, %v611_v12  ;;  %v16019_v30 = vcombine.low %v607_v55, %v611_v12 }
 0x6c1   : > { %14871 = vmatpush1.bf16.msra.mxu0 %v15915_v29  ;;  %v739_v18 = vld [vmem:[%s18128_s25 + $0xf78] sm:$0xff] }
 0x6c2   : > { %14872 = vmatprep.subr.bf16.mxu0 %v16036_v10  ;;  %v16148_v46 = vcombine.high %v735_v31, %v739_v18  ;;  %v599_v57 = vld [vmem:[%s18128_s25 + $0xb18] sm:$0xff]  ;;  %v16147_v45 = vcombine.low %v735_v31, %v739_v18 }
 0x6c3   : > { %14912 = vmatpush1.bf16.msra.mxu1 %v16043_v20  ;;  %v603_v5 = vld [vmem:[%s18128_s25 + $0xb38] sm:$0xff] }
 0x6c4   : > { %14913 = vmatprep.subr.bf16.mxu1 %v16164_v48  ;;  %v727_v58 = vld [vmem:[%s18128_s25 + $0xf18] sm:$0xff]  ;;  %v16012_v16 = vcombine.high %v599_v57, %v603_v5  ;;  %v16011_v20 = vcombine.low %v599_v57, %v603_v5 }
 0x6c5   : > { %14873 = vmatpush2.bf16.msra.mxu0 %v16035_v35  ;;  %v731_v9 = vld [vmem:[%s18128_s25 + $0xf38] sm:$0xff] }
 0x6c6   : > { %14874 = vmatprep.subr.bf16.mxu0 %v16028_v28  ;;  %v16140_v39 = vcombine.high %v727_v58, %v731_v9  ;;  %v591_v13 = vld [vmem:[%s18128_s25 + $0xad8] sm:$0xff]  ;;  %v16139_v10 = vcombine.low %v727_v58, %v731_v9 }
 0x6c7   : > { %14914 = vmatpush2.bf16.msra.mxu1 %v16163_v25  ;;  %v595_v14 = vld [vmem:[%s18128_s25 + $0xaf8] sm:$0xff] }
 0x6c8   : > { %14915 = vmatprep.subr.bf16.mxu1 %v16156_v22  ;;  %v719_v4 = vld [vmem:[%s18128_s25 + $0xed8] sm:$0xff]  ;;  %v16004_v48 = vcombine.high %v591_v13, %v595_v14  ;;  %v16003_v25 = vcombine.low %v591_v13, %v595_v14 }
 0x6c9   : > { %14875 = vmatpush2.bf16.msra.mxu0 %v16027_v63  ;;  %v723_v29 = vld [vmem:[%s18128_s25 + $0xef8] sm:$0xff] }
 0x6ca   : > { %14876 = vmatprep.subr.bf16.mxu0 %v16020_v52  ;;  %v16132_v40 = vcombine.high %v719_v4, %v723_v29  ;;  %v583_v2 = vld [vmem:[%s18128_s25 + $0xa98] sm:$0xff]  ;;  %v16131_v28 = vcombine.low %v719_v4, %v723_v29 }
 0x6cb   : > { %14916 = vmatpush2.bf16.msra.mxu1 %v16155_v37  ;;  %v587_v7 = vld [vmem:[%s18128_s25 + $0xab8] sm:$0xff] }
 0x6cc   : > { %14917 = vmatprep.subr.bf16.mxu1 %v16148_v46  ;;  %v711_v62 = vld [vmem:[%s18128_s25 + $0xe98] sm:$0xff]  ;;  %v15996_v22 = vcombine.high %v583_v2, %v587_v7  ;;  %v15995_v37 = vcombine.low %v583_v2, %v587_v7 }
 0x6cd   : > { %14877 = vmatpush2.bf16.msra.mxu0 %v16019_v30  ;;  %v715_v35 = vld [vmem:[%s18128_s25 + $0xeb8] sm:$0xff] }
 0x6ce   : > { %14878 = vmatprep.subr.bf16.mxu0 %v16012_v16  ;;  %v16124_v55 = vcombine.high %v711_v62, %v715_v35  ;;  %v575_v12 = vld [vmem:[%s18128_s25 + $0xa58] sm:$0xff]  ;;  %v16123_v52 = vcombine.low %v711_v62, %v715_v35 }
 0x6cf   : > { %14918 = vmatpush2.bf16.msra.mxu1 %v16147_v45  ;;  %v579_v31 = vld [vmem:[%s18128_s25 + $0xa78] sm:$0xff] }
 0x6d0   : > { %14919 = vmatprep.subr.bf16.mxu1 %v16140_v39  ;;  %v703_v18 = vld [vmem:[%s18128_s25 + $0xe58] sm:$0xff]  ;;  %v15988_v46 = vcombine.high %v575_v12, %v579_v31  ;;  %v15987_v45 = vcombine.low %v575_v12, %v579_v31 }
 0x6d1   : > { %14879 = vmatpush2.bf16.msra.mxu0 %v16011_v20  ;;  %v707_v63 = vld [vmem:[%s18128_s25 + $0xe78] sm:$0xff] }
 0x6d2   : > { %14880 = vmatprep.subr.bf16.mxu0 %v16004_v48  ;;  %v16116_v57 = vcombine.high %v703_v18, %v707_v63  ;;  %v567_v5 = vld [vmem:[%s18128_s25 + $0xa18] sm:$0xff]  ;;  %v16115_v16 = vcombine.low %v703_v18, %v707_v63 }
 0x6d3   : > { %14920 = vmatpush2.bf16.msra.mxu1 %v16139_v10  ;;  %v571_v58 = vld [vmem:[%s18128_s25 + $0xa38] sm:$0xff] }
 0x6d4   : > { %14921 = vmatprep.subr.bf16.mxu1 %v16132_v40  ;;  %v695_v9 = vld [vmem:[%s18128_s25 + $0xe18] sm:$0xff]  ;;  %v15980_v39 = vcombine.high %v567_v5, %v571_v58  ;;  %v15979_v10 = vcombine.low %v567_v5, %v571_v58 }
 0x6d5   : > { %14881 = vmatpush2.bf16.msra.mxu0 %v16003_v25  ;;  %v699_v30 = vld [vmem:[%s18128_s25 + $0xe38] sm:$0xff] }
 0x6d6   : > { %14882 = vmatprep.subr.bf16.mxu0 %v15996_v22  ;;  %v16108_v13 = vcombine.high %v695_v9, %v699_v30  ;;  %v815_v14 = vld [vmem:[%s18128_s25 + $0x11d8] sm:$0xff]  ;;  %v16107_v48 = vcombine.low %v695_v9, %v699_v30 }
 0x6d7   : > { %14922 = vmatpush2.bf16.msra.mxu1 %v16131_v28  ;;  %v819_v4 = vld [vmem:[%s18128_s25 + $0x11f8] sm:$0xff] }
 0x6d8   : > { %14923 = vmatprep.subr.bf16.mxu1 %v16124_v55  ;;  %v943_v29 = vld [vmem:[%s18128_s25 + $0x15d8] sm:$0xff]  ;;  %v16228_v40 = vcombine.high %v815_v14, %v819_v4  ;;  %v16227_v28 = vcombine.low %v815_v14, %v819_v4 }
 0x6d9   : > { %14883 = vmatpush2.bf16.msra.mxu0 %v15995_v37  ;;  %v947_v20 = vld [vmem:[%s18128_s25 + $0x15f8] sm:$0xff] }
 0x6da   : > { %14884 = vmatprep.subr.bf16.mxu0 %v15988_v46  ;;  %v16356_v2 = vcombine.high %v943_v29, %v947_v20  ;;  %v807_v7 = vld [vmem:[%s18128_s25 + $0x1198] sm:$0xff]  ;;  %v16355_v22 = vcombine.low %v943_v29, %v947_v20 }
 0x6db   : > { %14924 = vmatpush2.bf16.msra.mxu1 %v16123_v52  ;;  %v811_v62 = vld [vmem:[%s18128_s25 + $0x11b8] sm:$0xff] }
 0x6dc   : > { %14925 = vmatprep.subr.bf16.mxu1 %v16116_v57  ;;  %v935_v35 = vld [vmem:[%s18128_s25 + $0x1598] sm:$0xff]  ;;  %v16220_v55 = vcombine.high %v807_v7, %v811_v62  ;;  %v16219_v5 = vcombine.low %v807_v7, %v811_v62 }
 0x6dd   : > { %14885 = vmatpush2.bf16.msra.mxu0 %v15987_v45  ;;  %v939_v25 = vld [vmem:[%s18128_s25 + $0x15b8] sm:$0xff] }
 0x6de   : > { %14886 = vmatprep.subr.bf16.mxu0 %v15980_v39  ;;  %v16348_v12 = vcombine.high %v935_v35, %v939_v25  ;;  %v799_v31 = vld [vmem:[%s18128_s25 + $0x1158] sm:$0xff]  ;;  %v16347_v9 = vcombine.low %v935_v35, %v939_v25 }
 0x6df   : > { %14926 = vmatpush2.bf16.msra.mxu1 %v16115_v16  ;;  %v803_v18 = vld [vmem:[%s18128_s25 + $0x1178] sm:$0xff] }
 0x6e0   : > { %14927 = vmatprep.subr.bf16.mxu1 %v16108_v13  ;;  %v927_v37 = vld [vmem:[%s18128_s25 + $0x1558] sm:$0xff]  ;;  %v16212_v30 = vcombine.high %v799_v31, %v803_v18 }
 0x6e1   : > { %14887 = vmatpush2.bf16.msra.mxu0 %v15979_v10  ;;  %v931_v52 = vld [vmem:[%s18128_s25 + $0x1578] sm:$0xff] }
 0x6e2   : > { %14938 = vmatprep.subr.bf16.mxu0 %v16228_v40  ;;  %v791_v39 = vld [vmem:[%s18128_s25 + $0x1118] sm:$0xff] }
 0x6e3   : > { %14928 = vmatpush2.bf16.msra.mxu1 %v16107_v48  ;;  %v795_v13 = vld [vmem:[%s18128_s25 + $0x1138] sm:$0xff]  ;;  %v16339_v48 = vcombine.low %v927_v37, %v931_v52 }
 0x6e4   : > { %14979 = vmatprep.subr.bf16.mxu1 %v16356_v2  ;;  %v14644_v63 = vpop.f32.mrf.mxu0  ;;  %14889 = vmatmul.mubr.bf16.vlgmr.msra.gmra.mxu0 %v18324_v47  ;;  %v919_v14 = vld [vmem:[%s18128_s25 + $0x1518] sm:$0xff]  ;;  %v16204_v40 = vcombine.high %v791_v39, %v795_v13  ;;  %v16203_v25 = vcombine.low %v791_v39, %v795_v13 }
 0x6e5   : > { %v14645_v46 = vadd.f32 %v14644_v63, %v20175_v24  ;;  %14939 = vmatpush1.bf16.msra.mxu0 %v16227_v28  ;;  %v16340_v24 = vcombine.high %v927_v37, %v931_v52  ;;  %14970 = vmatprep.mubr.bf16.mxu0 %v18331_v56  ;;  %v923_v4 = vld [vmem:[%s18128_s25 + $0x1538] sm:$0xff] }
 0x6e6   : > { %v14685_v57 = vpop.f32.mrf.mxu1  ;;  %14930 = vmatmul.mubr.bf16.vlgmr.msra.gmra.mxu1 %v18335_v11  ;;  %v14646_v58 = vpop.f32.mrf.mxu0  ;;  %14940 = vmatprep.subr.bf16.mxu0 %v16220_v55  ;;  %v16332_v2 = vcombine.high %v919_v14, %v923_v4  ;;  %v783_v7 = vld [vmem:[%s18128_s25 + $0x10d8] sm:$0xff]  ;;  %v16331_v28 = vcombine.low %v919_v14, %v923_v4 }
 0x6e7   : > { %14980 = vmatpush1.bf16.msra.mxu1 %v16355_v22  ;;  %v20249_v45 = vadd.f32 %v14685_v57, %v14645_v46  ;;  %v14647_v47 = vadd.f32 %v14646_v58, %v20184_v61  ;;  %15011 = vmatprep.mubr.bf16.mxu1 %v18344_v3  ;;  %v16211_v61 = vcombine.low %v799_v31, %v803_v18  ;;  %v787_v3 = vld [vmem:[%s18128_s25 + $0x10f8] sm:$0xff] }
 0x6e8   : > { %v14687_v16 = vpop.f32.mrf.mxu1  ;;  %14981 = vmatprep.subr.bf16.mxu1 %v16348_v12  ;;  %v14648_v11 = vpop.f32.mrf.mxu0  ;;  %v911_v62 = vld [vmem:[%s18128_s25 + $0x14d8] sm:$0xff]  ;;  %v16196_v22 = vcombine.high %v783_v7, %v787_v3  ;;  %v16195_v37 = vcombine.low %v783_v7, %v787_v3 }
 0x6e9   : > { %v20258_v29 = vadd.f32 %v14687_v16, %v14647_v47  ;;  %14941 = vmatpush1.bf16.msra.mxu0 %v16219_v5  ;;  %v915_v35 = vld [vmem:[%s18128_s25 + $0x14f8] sm:$0xff] }
 0x6ea   : > { %v14689_v20 = vpop.f32.mrf.mxu1  ;;  %v14649_v10 = vpop.f32.mrf.mxu0  ;;  %14942 = vmatprep.subr.bf16.mxu0 %v16212_v30  ;;  %v16324_v55 = vcombine.high %v911_v62, %v915_v35  ;;  %v775_v12 = vld [vmem:[%s18128_s25 + $0x1098] sm:$0xff]  ;;  %v16323_v52 = vcombine.low %v911_v62, %v915_v35 }
 0x6eb   : > { %14982 = vmatpush1.bf16.msra.mxu1 %v16347_v9  ;;  %v779_v31 = vld [vmem:[%s18128_s25 + $0x10b8] sm:$0xff] }
 0x6ec   : > { %v14690_v56 = vpop.f32.mrf.mxu1  ;;  %14983 = vmatprep.subr.bf16.mxu1 %v16340_v24  ;;  %v903_v18 = vld [vmem:[%s18128_s25 + $0x1498] sm:$0xff]  ;;  %v16188_v46 = vcombine.high %v775_v12, %v779_v31  ;;  %v16187_v47 = vcombine.low %v775_v12, %v779_v31 }
 0x6ed   : > { %14943 = vmatpush1.bf16.msra.mxu0 %v16211_v61  ;;  %v907_v63 = vld [vmem:[%s18128_s25 + $0x14b8] sm:$0xff] }
 0x6ee   : > { %14944 = vmatprep.subr.bf16.mxu0 %v16204_v40  ;;  %v16316_v57 = vcombine.high %v903_v18, %v907_v63  ;;  %v767_v5 = vld [vmem:[%s18128_s25 + $0x1058] sm:$0xff]  ;;  %v16315_v16 = vcombine.low %v903_v18, %v907_v63 }
 0x6ef   : > { %14984 = vmatpush1.bf16.msra.mxu1 %v16339_v48  ;;  %v771_v58 = vld [vmem:[%s18128_s25 + $0x1078] sm:$0xff] }
 0x6f0   : > { %14985 = vmatprep.subr.bf16.mxu1 %v16332_v2  ;;  %v895_v9 = vld [vmem:[%s18128_s25 + $0x1458] sm:$0xff]  ;;  %v16180_v24 = vcombine.high %v767_v5, %v771_v58  ;;  %v16179_v20 = vcombine.low %v767_v5, %v771_v58 }
 0x6f1   : > { %14945 = vmatpush1.bf16.msra.mxu0 %v16203_v25  ;;  %v899_v30 = vld [vmem:[%s18128_s25 + $0x1478] sm:$0xff] }
 0x6f2   : > { %14946 = vmatprep.subr.bf16.mxu0 %v16196_v22  ;;  %v16308_v39 = vcombine.high %v895_v9, %v899_v30  ;;  %v759_v13 = vld [vmem:[%s18128_s25 + $0x1018] sm:$0xff]  ;;  %v16307_v61 = vcombine.low %v895_v9, %v899_v30 }
 0x6f3   : > { %14986 = vmatpush1.bf16.msra.mxu1 %v16331_v28  ;;  %v763_v11 = vld [vmem:[%s18128_s25 + $0x1038] sm:$0xff] }
 0x6f4   : > { %14987 = vmatprep.subr.bf16.mxu1 %v16324_v55  ;;  %v887_v14 = vld [vmem:[%s18128_s25 + $0x1418] sm:$0xff]  ;;  %v16172_v10 = vcombine.high %v759_v13, %v763_v11  ;;  %v16171_v3 = vcombine.low %v759_v13, %v763_v11 }
 0x6f5   : > { %14947 = vmatpush1.bf16.msra.mxu0 %v16195_v37  ;;  %v891_v4 = vld [vmem:[%s18128_s25 + $0x1438] sm:$0xff] }
 0x6f6   : > { %14948 = vmatprep.subr.bf16.mxu0 %v16188_v46  ;;  %v16300_v48 = vcombine.high %v887_v14, %v891_v4  ;;  %v879_v40 = vld [vmem:[%s18128_s25 + $0x13d8] sm:$0xff]  ;;  %v16299_v62 = vcombine.low %v887_v14, %v891_v4 }
 0x6f7   : > { %14988 = vmatpush1.bf16.msra.mxu1 %v16323_v52  ;;  %v883_v56 = vld [vmem:[%s18128_s25 + $0x13f8] sm:$0xff] }
 0x6f8   : > { %14989 = vmatprep.subr.bf16.mxu1 %v16316_v57  ;;  %v1007_v2 = vld [vmem:[%s18128_s25 + $0x17d8] sm:$0xff]  ;;  %v16292_v35 = vcombine.high %v879_v40, %v883_v56  ;;  %v16291_v31 = vcombine.low %v879_v40, %v883_v56 }
 0x6f9   : > { %14949 = vmatpush1.bf16.msra.mxu0 %v16187_v47  ;;  %v1011_v7 = vld [vmem:[%s18128_s25 + $0x17f8] sm:$0xff] }
 0x6fa   : > { %14950 = vmatprep.subr.bf16.mxu0 %v16180_v24  ;;  %v16420_v25 = vcombine.high %v1007_v2, %v1011_v7  ;;  %v871_v28 = vld [vmem:[%s18128_s25 + $0x1398] sm:$0xff]  ;;  %v16419_v18 = vcombine.low %v1007_v2, %v1011_v7 }
 0x6fb   : > { %14990 = vmatpush1.bf16.msra.mxu1 %v16315_v16  ;;  %v875_v22 = vld [vmem:[%s18128_s25 + $0x13b8] sm:$0xff] }
 0x6fc   : > { %14991 = vmatprep.subr.bf16.mxu1 %v16308_v39  ;;  %v999_v55 = vld [vmem:[%s18128_s25 + $0x1798] sm:$0xff]  ;;  %v16284_v63 = vcombine.high %v871_v28, %v875_v22  ;;  %v16283_v58 = vcombine.low %v871_v28, %v875_v22 }
 0x6fd   : > { %14951 = vmatpush1.bf16.msra.mxu0 %v16179_v20  ;;  %v1003_v12 = vld [vmem:[%s18128_s25 + $0x17b8] sm:$0xff] }
 0x6fe   : > { %14952 = vmatprep.subr.bf16.mxu0 %v16172_v10  ;;  %v16412_v37 = vcombine.high %v999_v55, %v1003_v12  ;;  %v863_v52 = vld [vmem:[%s18128_s25 + $0x1358] sm:$0xff]  ;;  %v16411_v9 = vcombine.low %v999_v55, %v1003_v12 }
 0x6ff   : > { %14992 = vmatpush1.bf16.msra.mxu1 %v16307_v61  ;;  %v867_v46 = vld [vmem:[%s18128_s25 + $0x1378] sm:$0xff] }
 0x700   : > { %14993 = vmatprep.subr.bf16.mxu1 %v16300_v48  ;;  %v991_v57 = vld [vmem:[%s18128_s25 + $0x1758] sm:$0xff]  ;;  %v16276_v30 = vcombine.high %v863_v52, %v867_v46  ;;  %v16275_v11 = vcombine.low %v863_v52, %v867_v46 }
 0x701   : > { %14953 = vmatpush1.bf16.msra.mxu0 %v16171_v3  ;;  %v995_v5 = vld [vmem:[%s18128_s25 + $0x1778] sm:$0xff] }
 0x702   : > { %14954 = vmatprep.subr.bf16.mxu0 %v16292_v35  ;;  %v16404_v47 = vcombine.high %v991_v57, %v995_v5  ;;  %v855_v16 = vld [vmem:[%s18128_s25 + $0x1318] sm:$0xff]  ;;  %v16403_v14 = vcombine.low %v991_v57, %v995_v5 }
 0x703   : > { %14994 = vmatpush1.bf16.msra.mxu1 %v16299_v62  ;;  %v859_v24 = vld [vmem:[%s18128_s25 + $0x1338] sm:$0xff] }
 0x704   : > { %14995 = vmatprep.subr.bf16.mxu1 %v16420_v25  ;;  %v983_v39 = vld [vmem:[%s18128_s25 + $0x1718] sm:$0xff]  ;;  %v16268_v4 = vcombine.high %v855_v16, %v859_v24  ;;  %v16267_v56 = vcombine.low %v855_v16, %v859_v24 }
 0x705   : > { %14955 = vmatpush2.bf16.msra.mxu0 %v16291_v31  ;;  %v987_v13 = vld [vmem:[%s18128_s25 + $0x1738] sm:$0xff] }
 0x706   : > { %14956 = vmatprep.subr.bf16.mxu0 %v16284_v63  ;;  %v16396_v20 = vcombine.high %v983_v39, %v987_v13  ;;  %v847_v61 = vld [vmem:[%s18128_s25 + $0x12d8] sm:$0xff]  ;;  %v16395_v2 = vcombine.low %v983_v39, %v987_v13 }
 0x707   : > { %14996 = vmatpush2.bf16.msra.mxu1 %v16419_v18  ;;  %v851_v10 = vld [vmem:[%s18128_s25 + $0x12f8] sm:$0xff] }
 0x708   : > { %14997 = vmatprep.subr.bf16.mxu1 %v16412_v37  ;;  %v975_v48 = vld [vmem:[%s18128_s25 + $0x16d8] sm:$0xff]  ;;  %v16260_v7 = vcombine.high %v847_v61, %v851_v10  ;;  %v16259_v22 = vcombine.low %v847_v61, %v851_v10 }
 0x709   : > { %14957 = vmatpush2.bf16.msra.mxu0 %v16283_v58  ;;  %v979_v40 = vld [vmem:[%s18128_s25 + $0x16f8] sm:$0xff] }
 0x70a   : > { %14958 = vmatprep.subr.bf16.mxu0 %v16276_v30  ;;  %v16388_v3 = vcombine.high %v975_v48, %v979_v40  ;;  %v839_v62 = vld [vmem:[%s18128_s25 + $0x1298] sm:$0xff]  ;;  %v16387_v55 = vcombine.low %v975_v48, %v979_v40 }
 0x70b   : > { %14998 = vmatpush2.bf16.msra.mxu1 %v16411_v9  ;;  %v843_v35 = vld [vmem:[%s18128_s25 + $0x12b8] sm:$0xff] }
 0x70c   : > { %14999 = vmatprep.subr.bf16.mxu1 %v16404_v47  ;;  %v967_v25 = vld [vmem:[%s18128_s25 + $0x1698] sm:$0xff]  ;;  %v16252_v12 = vcombine.high %v839_v62, %v843_v35  ;;  %v16251_v46 = vcombine.low %v839_v62, %v843_v35 }
 0x70d   : > { %14959 = vmatpush2.bf16.msra.mxu0 %v16275_v11  ;;  %v971_v28 = vld [vmem:[%s18128_s25 + $0x16b8] sm:$0xff] }
 0x70e   : > { %14960 = vmatprep.subr.bf16.mxu0 %v16268_v4  ;;  %v16380_v31 = vcombine.high %v967_v25, %v971_v28  ;;  %v831_v18 = vld [vmem:[%s18128_s25 + $0x1258] sm:$0xff]  ;;  %v16379_v57 = vcombine.low %v967_v25, %v971_v28 }
 0x70f   : > { %15000 = vmatpush2.bf16.msra.mxu1 %v16403_v14  ;;  %v835_v63 = vld [vmem:[%s18128_s25 + $0x1278] sm:$0xff] }
 0x710   : > { %15001 = vmatprep.subr.bf16.mxu1 %v16396_v20  ;;  %v959_v37 = vld [vmem:[%s18128_s25 + $0x1658] sm:$0xff]  ;;  %v16244_v5 = vcombine.high %v831_v18, %v835_v63  ;;  %v16243_v24 = vcombine.low %v831_v18, %v835_v63 }
 0x711   : > { %14961 = vmatpush2.bf16.msra.mxu0 %v16267_v56  ;;  %v963_v52 = vld [vmem:[%s18128_s25 + $0x1678] sm:$0xff] }
 0x712   : > { %14962 = vmatprep.subr.bf16.mxu0 %v16260_v7  ;;  %v16372_v58 = vcombine.high %v959_v37, %v963_v52  ;;  %v823_v9 = vld [vmem:[%s18128_s25 + $0x1218] sm:$0xff]  ;;  %v16371_v39 = vcombine.low %v959_v37, %v963_v52 }
 0x713   : > { %15002 = vmatpush2.bf16.msra.mxu1 %v16395_v2  ;;  %v827_v30 = vld [vmem:[%s18128_s25 + $0x1238] sm:$0xff] }
 0x714   : > { %15003 = vmatprep.subr.bf16.mxu1 %v16388_v3  ;;  %v951_v47 = vld [vmem:[%s18128_s25 + $0x1618] sm:$0xff]  ;;  %v16236_v13 = vcombine.high %v823_v9, %v827_v30  ;;  %v16235_v10 = vcombine.low %v823_v9, %v827_v30 }
 0x715   : > { %14963 = vmatpush2.bf16.msra.mxu0 %v16259_v22  ;;  %v955_v16 = vld [vmem:[%s18128_s25 + $0x1638] sm:$0xff] }
 0x716   : > { %14964 = vmatprep.subr.bf16.mxu0 %v16252_v12  ;;  %v16364_v11 = vcombine.high %v951_v47, %v955_v16  ;;  %v1071_v14 = vld [vmem:[%s18128_s25 + $0x19d8] sm:$0xff]  ;;  %v16363_v48 = vcombine.low %v951_v47, %v955_v16 }
 0x717   : > { %15004 = vmatpush2.bf16.msra.mxu1 %v16387_v55  ;;  %v1075_v4 = vld [vmem:[%s18128_s25 + $0x19f8] sm:$0xff] }
 0x718   : > { %15005 = vmatprep.subr.bf16.mxu1 %v16380_v31  ;;  %v1199_v20 = vld [vmem:[%s18128_s25 + $0x1dd8] sm:$0xff]  ;;  %v16484_v40 = vcombine.high %v1071_v14, %v1075_v4  ;;  %v16483_v35 = vcombine.low %v1071_v14, %v1075_v4 }
 0x719   : > { %14965 = vmatpush2.bf16.msra.mxu0 %v16251_v46  ;;  %v1203_v61 = vld [vmem:[%s18128_s25 + $0x1df8] sm:$0xff] }
 0x71a   : > { %14966 = vmatprep.subr.bf16.mxu0 %v16244_v5  ;;  %v16612_v56 = vcombine.high %v1199_v20, %v1203_v61  ;;  %v1063_v2 = vld [vmem:[%s18128_s25 + $0x1998] sm:$0xff]  ;;  %v16611_v25 = vcombine.low %v1199_v20, %v1203_v61 }
 0x71b   : > { %15006 = vmatpush2.bf16.msra.mxu1 %v16379_v57  ;;  %v1067_v7 = vld [vmem:[%s18128_s25 + $0x19b8] sm:$0xff] }
 0x71c   : > { %15007 = vmatprep.subr.bf16.mxu1 %v16372_v58  ;;  %v1191_v3 = vld [vmem:[%s18128_s25 + $0x1d98] sm:$0xff]  ;;  %v16476_v28 = vcombine.high %v1063_v2, %v1067_v7  ;;  %v16475_v46 = vcombine.low %v1063_v2, %v1067_v7 }
 0x71d   : > { %14967 = vmatpush2.bf16.msra.mxu0 %v16243_v24  ;;  %v1195_v62 = vld [vmem:[%s18128_s25 + $0x1db8] sm:$0xff] }
 0x71e   : > { %14968 = vmatprep.subr.bf16.mxu0 %v16236_v13  ;;  %v16604_v22 = vcombine.high %v1191_v3, %v1195_v62  ;;  %v1055_v55 = vld [vmem:[%s18128_s25 + $0x1958] sm:$0xff]  ;;  %v16603_v5 = vcombine.low %v1191_v3, %v1195_v62 }
 0x71f   : > { %15008 = vmatpush2.bf16.msra.mxu1 %v16371_v39  ;;  %v1059_v12 = vld [vmem:[%s18128_s25 + $0x1978] sm:$0xff] }
 0x720   : > { %15009 = vmatprep.subr.bf16.mxu1 %v16364_v11  ;;  %v1183_v18 = vld [vmem:[%s18128_s25 + $0x1d58] sm:$0xff]  ;;  %v16468_v58 = vcombine.high %v1055_v55, %v1059_v12 }
 0x721   : > { %14969 = vmatpush2.bf16.msra.mxu0 %v16235_v10  ;;  %v1187_v63 = vld [vmem:[%s18128_s25 + $0x1d78] sm:$0xff] }
 0x722   : > { %15020 = vmatprep.subr.bf16.mxu0 %v16484_v40  ;;  %v16596_v47 = vcombine.high %v1183_v18, %v1187_v63  ;;  %v1051_v16 = vld [vmem:[%s18128_s25 + $0x1938] sm:$0xff]  ;;  %v16595_v20 = vcombine.low %v1183_v18, %v1187_v63 }
 0x723   : > { %15010 = vmatpush2.bf16.msra.mxu1 %v16363_v48  ;;  %v1175_v24 = vld [vmem:[%s18128_s25 + $0x1d18] sm:$0xff] }
 0x724   : > { %15061 = vmatprep.subr.bf16.mxu1 %v16612_v56  ;;  %v14726_v31 = vpop.f32.mrf.mxu0  ;;  %14971 = vmatmul.mubr.bf16.vlgmr.msra.gmra.mxu0 %v18414_v21  ;;  %v1179_v39 = vld [vmem:[%s18128_s25 + $0x1d38] sm:$0xff] }
 0x725   : > { %v14727_v37 = vadd.f32 %v14726_v31, %v20249_v45  ;;  %15021 = vmatpush1.bf16.msra.mxu0 %v16483_v35  ;;  %v1047_v45 = vld [vmem:[%s18128_s25 + $0x1918] sm:$0xff]  ;;  %15052 = vmatprep.mubr.bf16.mxu0 %v18421_v32 }
 0x726   : > { %v14767_v52 = vpop.f32.mrf.mxu1  ;;  %15012 = vmatmul.mubr.bf16.vlgmr.msra.gmra.mxu1 %v18425_v34  ;;  %v14728_v57 = vpop.f32.mrf.mxu0  ;;  %15022 = vmatprep.subr.bf16.mxu0 %v16476_v28  ;;  %v16460_v32 = vcombine.high %v1047_v45, %v1051_v16  ;;  %v1039_v48 = vld [vmem:[%s18128_s25 + $0x18d8] sm:$0xff]  ;;  %v16459_v62 = vcombine.low %v1047_v45, %v1051_v16 }
 0x727   : > { %15062 = vmatpush1.bf16.msra.mxu1 %v16611_v25  ;;  %v14768_v9 = vadd.f32 %v14767_v52, %v14727_v37  ;;  %v14729_v21 = vadd.f32 %v14728_v57, %v20258_v29  ;;  %15093 = vmatprep.mubr.bf16.mxu1 %v18434_v44  ;;  %v16467_v29 = vcombine.low %v1055_v55, %v1059_v12  ;;  %v1043_v40 = vld [vmem:[%s18128_s25 + $0x18f8] sm:$0xff] }
 0x728   : > { %v14769_v30 = vpop.f32.mrf.mxu1  ;;  %15063 = vmatprep.subr.bf16.mxu1 %v16604_v22  ;;  %v14730_v34 = vpop.f32.mrf.mxu0  ;;  %v16588_v44 = vcombine.high %v1175_v24, %v1179_v39  ;;  %v1167_v56 = vld [vmem:[%s18128_s25 + $0x1cd8] sm:$0xff]  ;;  %v16587_v25 = vcombine.low %v1175_v24, %v1179_v39  ;;  %v16452_v28 = vcombine.high %v1039_v48, %v1043_v40  ;;  %v16451_v63 = vcombine.low %v1039_v48, %v1043_v40 }
 0x729   : > { %v15442_v13 = vmul.f32 0.2, %v14768_v9  ;;  %v14770_v11 = vadd.f32 %v14769_v30, %v14729_v21  ;;  %15023 = vmatpush1.bf16.msra.mxu0 %v16475_v46  ;;  %vm15434_vm4 = vcmp.gt.f32.partialorder %v14768_v9, 0.0  ;;  %v1171_v2 = vld [vmem:[%s18128_s25 + $0x1cf8] sm:$0xff] }
 0x72a   : > { %v14771_v14 = vpop.f32.mrf.mxu1  ;;  %v14731_v4 = vpop.f32.mrf.mxu0  ;;  %15024 = vmatprep.subr.bf16.mxu0 %v16468_v58  ;;  %v16580_v22 = vcombine.high %v1167_v56, %v1171_v2  ;;  %v1031_v55 = vld [vmem:[%s18128_s25 + $0x1898] sm:$0xff]  ;;  %v16579_v37 = vcombine.low %v1167_v56, %v1171_v2 }
 0x72b   : > { %15064 = vmatpush1.bf16.msra.mxu1 %v16603_v5  ;;  %vm15435_vm5 = vcmp.gt.f32.partialorder %v14770_v11, 0.0  ;;  %v15443_v61 = vmul.f32 0.2, %v14770_v11  ;;  %v20334_v7 = vsel %vm15434_vm4, %v14768_v9, %v15442_v13  ;;  %v1035_v12 = vld [vmem:[%s18128_s25 + $0x18b8] sm:$0xff] }
 0x72c   : > { %v14772_v10 = vpop.f32.mrf.mxu1  ;;  %15065 = vmatprep.subr.bf16.mxu1 %v16596_v47  ;;  %v1159_v31 = vld [vmem:[%s18128_s25 + $0x1c98] sm:$0xff]  ;;  %v16444_v52 = vcombine.high %v1031_v55, %v1035_v12  ;;  %v16443_v21 = vcombine.low %v1031_v55, %v1035_v12 }
 0x72d   : > { %v20336_v3 = vsel %vm15435_vm5, %v14770_v11, %v15443_v61  ;;  %15025 = vmatpush1.bf16.msra.mxu0 %v16467_v29  ;;  %v1163_v18 = vld [vmem:[%s18128_s25 + $0x1cb8] sm:$0xff] }
 0x72e   : > { %v17703_v35 = vpack.c.bf16 %v20336_v3, %v20334_v7  ;;  %15026 = vmatprep.subr.bf16.mxu0 %v16460_v32  ;;  %v16572_v46 = vcombine.high %v1159_v31, %v1163_v18  ;;  %v1023_v57 = vld [vmem:[%s18128_s25 + $0x1858] sm:$0xff]  ;;  %v16571_v30 = vcombine.low %v1159_v31, %v1163_v18 }
 0x72f   : > { %15066 = vmatpush1.bf16.msra.mxu1 %v16595_v20  ;;  %v1027_v5 = vld [vmem:[%s18128_s25 + $0x1878] sm:$0xff] }
 0x730   : > { %15067 = vmatprep.subr.bf16.mxu1 %v16588_v44  ;;  %v1151_v58 = vld [vmem:[%s18128_s25 + $0x1c58] sm:$0xff]  ;;  %v16436_v47 = vcombine.high %v1023_v57, %v1027_v5  ;;  %v16435_v13 = vcombine.low %v1023_v57, %v1027_v5 }
 0x731   : > { %15027 = vmatpush1.bf16.msra.mxu0 %v16459_v62  ;;  %v1155_v9 = vld [vmem:[%s18128_s25 + $0x1c78] sm:$0xff] }
 0x732   : > { %15028 = vmatprep.subr.bf16.mxu0 %v16452_v28  ;;  %v16564_v45 = vcombine.high %v1151_v58, %v1155_v9  ;;  %v1015_v16 = vld [vmem:[%s18128_s25 + $0x1818] sm:$0xff]  ;;  %v16563_v11 = vcombine.low %v1151_v58, %v1155_v9 }
 0x733   : > { %15068 = vmatpush1.bf16.msra.mxu1 %v16587_v25  ;;  %v1019_v34 = vld [vmem:[%s18128_s25 + $0x1838] sm:$0xff] }
 0x734   : > { %15069 = vmatprep.subr.bf16.mxu1 %v16580_v22  ;;  %v1143_v24 = vld [vmem:[%s18128_s25 + $0x1c18] sm:$0xff]  ;;  %v16428_v14 = vcombine.high %v1015_v16, %v1019_v34  ;;  %v16427_v10 = vcombine.low %v1015_v16, %v1019_v34 }
 0x735   : > { %15029 = vmatpush1.bf16.msra.mxu0 %v16451_v63  ;;  %v1147_v39 = vld [vmem:[%s18128_s25 + $0x1c38] sm:$0xff] }
 0x736   : > { %15030 = vmatprep.subr.bf16.mxu0 %v16444_v52  ;;  %v16556_v29 = vcombine.high %v1143_v24, %v1147_v39  ;;  %v1135_v4 = vld [vmem:[%s18128_s25 + $0x1bd8] sm:$0xff]  ;;  %v16555_v44 = vcombine.low %v1143_v24, %v1147_v39 }
 0x737   : > { %15070 = vmatpush1.bf16.msra.mxu1 %v16579_v37  ;;  %v1139_v20 = vld [vmem:[%s18128_s25 + $0x1bf8] sm:$0xff] }
 0x738   : > { %15071 = vmatprep.subr.bf16.mxu1 %v16572_v46  ;;  %v1263_v32 = vld [vmem:[%s18128_s25 + $0x1fd8] sm:$0xff]  ;;  %v16548_v48 = vcombine.high %v1135_v4, %v1139_v20  ;;  %v16547_v28 = vcombine.low %v1135_v4, %v1139_v20 }
 0x739   : > { %15031 = vmatpush1.bf16.msra.mxu0 %v16443_v21  ;;  %v1267_v61 = vld [vmem:[%s18128_s25 + $0x1ff8] sm:$0xff] }
 0x73a   : > { %15032 = vmatprep.subr.bf16.mxu0 %v16436_v47  ;;  %v16676_v40 = vcombine.high %v1263_v32, %v1267_v61  ;;  %v1127_v56 = vld [vmem:[%s18128_s25 + $0x1b98] sm:$0xff]  ;;  %v16675_v22 = vcombine.low %v1263_v32, %v1267_v61 }
 0x73b   : > { %15072 = vmatpush1.bf16.msra.mxu1 %v16571_v30  ;;  %v1131_v2 = vld [vmem:[%s18128_s25 + $0x1bb8] sm:$0xff] }
 0x73c   : > { %15073 = vmatprep.subr.bf16.mxu1 %v16564_v45  ;;  %v1255_v62 = vld [vmem:[%s18128_s25 + $0x1f98] sm:$0xff]  ;;  %v16540_v55 = vcombine.high %v1127_v56, %v1131_v2  ;;  %v16539_v52 = vcombine.low %v1127_v56, %v1131_v2 }
 0x73d   : > { %15033 = vmatpush1.bf16.msra.mxu0 %v16435_v13  ;;  %v1259_v25 = vld [vmem:[%s18128_s25 + $0x1fb8] sm:$0xff] }
 0x73e   : > { %15034 = vmatprep.subr.bf16.mxu0 %v16428_v14  ;;  %v16668_v12 = vcombine.high %v1255_v62, %v1259_v25  ;;  %v1119_v31 = vld [vmem:[%s18128_s25 + $0x1b58] sm:$0xff]  ;;  %v16667_v46 = vcombine.low %v1255_v62, %v1259_v25 }
 0x73f   : > { %15074 = vmatpush1.bf16.msra.mxu1 %v16563_v11  ;;  %v1123_v18 = vld [vmem:[%s18128_s25 + $0x1b78] sm:$0xff] }
 0x740   : > { %15075 = vmatprep.subr.bf16.mxu1 %v16556_v29  ;;  %v1247_v63 = vld [vmem:[%s18128_s25 + $0x1f58] sm:$0xff]  ;;  %v16532_v57 = vcombine.high %v1119_v31, %v1123_v18  ;;  %v16531_v47 = vcombine.low %v1119_v31, %v1123_v18 }
 0x741   : > { %15035 = vmatpush1.bf16.msra.mxu0 %v16427_v10  ;;  %v1251_v37 = vld [vmem:[%s18128_s25 + $0x1f78] sm:$0xff] }
 0x742   : > { %15036 = vmatprep.subr.bf16.mxu0 %v16548_v48  ;;  %v16660_v5 = vcombine.high %v1247_v63, %v1251_v37  ;;  %v1111_v58 = vld [vmem:[%s18128_s25 + $0x1b18] sm:$0xff]  ;;  %v16659_v45 = vcombine.low %v1247_v63, %v1251_v37 }
 0x743   : > { %15076 = vmatpush1.bf16.msra.mxu1 %v16555_v44  ;;  %v1115_v9 = vld [vmem:[%s18128_s25 + $0x1b38] sm:$0xff] }
 0x744   : > { %15077 = vmatprep.subr.bf16.mxu1 %v16676_v40  ;;  %v1239_v21 = vld [vmem:[%s18128_s25 + $0x1f18] sm:$0xff]  ;;  %v16524_v16 = vcombine.high %v1111_v58, %v1115_v9  ;;  %v16523_v14 = vcombine.low %v1111_v58, %v1115_v9 }
 0x745   : > { %15037 = vmatpush2.bf16.msra.mxu0 %v16547_v28  ;;  %v1243_v30 = vld [vmem:[%s18128_s25 + $0x1f38] sm:$0xff] }
 0x746   : > { %15038 = vmatprep.subr.bf16.mxu0 %v16540_v55  ;;  %v16652_v34 = vcombine.high %v1239_v21, %v1243_v30  ;;  %v1103_v24 = vld [vmem:[%s18128_s25 + $0x1ad8] sm:$0xff]  ;;  %v16651_v29 = vcombine.low %v1239_v21, %v1243_v30 }
 0x747   : > { %15078 = vmatpush2.bf16.msra.mxu1 %v16675_v22  ;;  %v1107_v39 = vld [vmem:[%s18128_s25 + $0x1af8] sm:$0xff] }
 0x748   : > { %15079 = vmatprep.subr.bf16.mxu1 %v16668_v12  ;;  %v1231_v13 = vld [vmem:[%s18128_s25 + $0x1ed8] sm:$0xff]  ;;  %v16516_v4 = vcombine.high %v1103_v24, %v1107_v39  ;;  %v16515_v48 = vcombine.low %v1103_v24, %v1107_v39 }
 0x749   : > { %15039 = vmatpush2.bf16.msra.mxu0 %v16539_v52  ;;  %v1235_v11 = vld [vmem:[%s18128_s25 + $0x1ef8] sm:$0xff] }
 0x74a   : > { %15040 = vmatprep.subr.bf16.mxu0 %v16532_v57  ;;  %v16644_v20 = vcombine.high %v1231_v13, %v1235_v11  ;;  %v1095_v32 = vld [vmem:[%s18128_s25 + $0x1a98] sm:$0xff]  ;;  %v16643_v40 = vcombine.low %v1231_v13, %v1235_v11  ;;  %v2324_v11 = vsub.s32 7, %v18156_v43 }
 0x74b   : > { %15080 = vmatpush2.bf16.msra.mxu1 %v16667_v46  ;;  %v1099_v61 = vld [vmem:[%s18128_s25 + $0x1ab8] sm:$0xff] }
 0x74c   : > { %15081 = vmatprep.subr.bf16.mxu1 %v16660_v5  ;;  %v1223_v10 = vld [vmem:[%s18128_s25 + $0x1e98] sm:$0xff]  ;;  %v16508_v56 = vcombine.high %v1095_v32, %v1099_v61  ;;  %v16507_v55 = vcombine.low %v1095_v32, %v1099_v61  ;;  %v17785_v32 = vld [vmem:[%s18511_s27] sm:$0xff] }
 0x74d   : > { %15041 = vmatpush2.bf16.msra.mxu0 %v16531_v47  ;;  %v1227_v44 = vld [vmem:[%s18128_s25 + $0x1eb8] sm:$0xff] }
 0x74e   : > { %15042 = vmatprep.subr.bf16.mxu0 %v16524_v16  ;;  %v16636_v2 = vcombine.high %v1223_v10, %v1227_v44  ;;  %v1087_v62 = vld [vmem:[%s18128_s25 + $0x1a58] sm:$0xff]  ;;  %v16635_v12 = vcombine.low %v1223_v10, %v1227_v44 }
 0x74f   : > { %15082 = vmatpush2.bf16.msra.mxu1 %v16659_v45  ;;  %v1091_v25 = vld [vmem:[%s18128_s25 + $0x1a78] sm:$0xff] }
 0x750   : > { %15083 = vmatprep.subr.bf16.mxu1 %v16652_v34  ;;  %v1215_v28 = vld [vmem:[%s18128_s25 + $0x1e58] sm:$0xff]  ;;  %v16500_v31 = vcombine.high %v1087_v62, %v1091_v25  ;;  %v16499_v57 = vcombine.low %v1087_v62, %v1091_v25  ;;  %v2320_v34 = vsub.s32 6, %v18156_v43 }
 0x751   : > { %15043 = vmatpush2.bf16.msra.mxu0 %v16523_v14  ;;  %v1219_v22 = vld [vmem:[%s18128_s25 + $0x1e78] sm:$0xff] }
 0x752   : > { %15044 = vmatprep.subr.bf16.mxu0 %v16516_v4  ;;  %v16628_v18 = vcombine.high %v1215_v28, %v1219_v22  ;;  %v1079_v63 = vld [vmem:[%s18128_s25 + $0x1a18] sm:$0xff]  ;;  %v16627_v5 = vcombine.low %v1215_v28, %v1219_v22  ;;  %v2321_v61 = vrot.slane %v17785_v32, %v2320_v34 }
 0x753   : > { %15084 = vmatpush2.bf16.msra.mxu1 %v16651_v29  ;;  %v1083_v37 = vld [vmem:[%s18128_s25 + $0x1a38] sm:$0xff] }
 0x754   : > { %15085 = vmatprep.subr.bf16.mxu1 %v16644_v20  ;;  %v1207_v52 = vld [vmem:[%s18128_s25 + $0x1e18] sm:$0xff]  ;;  %v16492_v58 = vcombine.high %v1079_v63, %v1083_v37  ;;  %v16491_v16 = vcombine.low %v1079_v63, %v1083_v37 }
 0x755   : > { %15045 = vmatpush2.bf16.msra.mxu0 %v16515_v48  ;;  %v1211_v46 = vld [vmem:[%s18128_s25 + $0x1e38] sm:$0xff] }
 0x756   : > { %15046 = vmatprep.subr.bf16.mxu0 %v16508_v56  ;;  %v16620_v9 = vcombine.high %v1207_v52, %v1211_v46  ;;  %v1327_v21 = vld [vmem:[%s18128_s25 + $0x21d8] sm:$0xff]  ;;  %v16619_v24 = vcombine.low %v1207_v52, %v1211_v46 }
 0x757   : > { %15086 = vmatpush2.bf16.msra.mxu1 %v16643_v40  ;;  %v1331_v30 = vld [vmem:[%s18128_s25 + $0x21f8] sm:$0xff]  ;;  %v2325_v40 = vrot.slane %v17785_v32, %v2324_v11 }
 0x758   : > { %15087 = vmatprep.subr.bf16.mxu1 %v16636_v2  ;;  %v1455_v47 = vld [vmem:[%s18128_s25 + $0x25d8] sm:$0xff]  ;;  %v16740_v39 = vcombine.high %v1327_v21, %v1331_v30  ;;  %v16739_v10 = vcombine.low %v1327_v21, %v1331_v30 }
 0x759   : > { %15047 = vmatpush2.bf16.msra.mxu0 %v16507_v55  ;;  %v1459_v45 = vld [vmem:[%s18128_s25 + $0x25f8] sm:$0xff] }
 0x75a   : > { %15048 = vmatprep.subr.bf16.mxu0 %v16500_v31  ;;  %v16868_v13 = vcombine.high %v1455_v47, %v1459_v45  ;;  %v1319_v14 = vld [vmem:[%s18128_s25 + $0x2198] sm:$0xff]  ;;  %v16867_v44 = vcombine.low %v1455_v47, %v1459_v45 }
 0x75b   : > { %15088 = vmatpush2.bf16.msra.mxu1 %v16635_v12  ;;  %v1323_v29 = vld [vmem:[%s18128_s25 + $0x21b8] sm:$0xff] }
 0x75c   : > { %15089 = vmatprep.subr.bf16.mxu1 %v16628_v18  ;;  %v1447_v4 = vld [vmem:[%s18128_s25 + $0x2598] sm:$0xff]  ;;  %v16732_v48 = vcombine.high %v1319_v14, %v1323_v29  ;;  %v16731_v12 = vcombine.low %v1319_v14, %v1323_v29 }
 0x75d   : > { %15049 = vmatpush2.bf16.msra.mxu0 %v16499_v57  ;;  %v1451_v20 = vld [vmem:[%s18128_s25 + $0x25b8] sm:$0xff] }
 0x75e   : > { %15050 = vmatprep.subr.bf16.mxu0 %v16492_v58  ;;  %v16860_v56 = vcombine.high %v1447_v4, %v1451_v20  ;;  %v1311_v43 = vld [vmem:[%s18128_s25 + $0x2158] sm:$0xff]  ;;  %v16859_v18 = vcombine.low %v1447_v4, %v1451_v20 }
 0x75f   : > { %15090 = vmatpush2.bf16.msra.mxu1 %v16627_v5  ;;  %v1315_v2 = vld [vmem:[%s18128_s25 + $0x2178] sm:$0xff] }
 0x760   : > { %15091 = vmatprep.subr.bf16.mxu1 %v16620_v9  ;;  %v1439_v25 = vld [vmem:[%s18128_s25 + $0x2558] sm:$0xff]  ;;  %v16724_v63 = vcombine.high %v1311_v43, %v1315_v2  ;;  %v16723_v47 = vcombine.low %v1311_v43, %v1315_v2 }
 0x761   : > { %15051 = vmatpush2.bf16.msra.mxu0 %v16491_v16  ;;  %v1443_v28 = vld [vmem:[%s18128_s25 + $0x2578] sm:$0xff] }
 0x762   : > { %15102 = vmatprep.subr.bf16.mxu0 %v16740_v39  ;;  %v16852_v46 = vcombine.high %v1439_v25, %v1443_v28  ;;  %v1303_v57 = vld [vmem:[%s18128_s25 + $0x2118] sm:$0xff]  ;;  %v16851_v16 = vcombine.low %v1439_v25, %v1443_v28 }
 0x763   : > { %15092 = vmatpush2.bf16.msra.mxu1 %v16619_v24  ;;  %v1307_v5 = vld [vmem:[%s18128_s25 + $0x2138] sm:$0xff] }
 0x764   : > { %15143 = vmatprep.subr.bf16.mxu1 %v16868_v13  ;;  %v14808_v62 = vpop.f32.mrf.mxu0  ;;  %15053 = vmatmul.mubr.bf16.vlgmr.msra.gmra.mxu0 %v18507_v59  ;;  %v1431_v58 = vld [vmem:[%s18128_s25 + $0x2518] sm:$0xff]  ;;  %v16716_v34 = vcombine.high %v1303_v57, %v1307_v5  ;;  %v16715_v14 = vcombine.low %v1303_v57, %v1307_v5 }
 0x765   : > { %v14809_v22 = vadd.f32 %v14808_v62, %v2321_v61  ;;  %15103 = vmatpush1.bf16.msra.mxu0 %v16739_v10  ;;  %15134 = vmatprep.mubr.bf16.mxu0 %v18520_v23  ;;  %v1435_v9 = vld [vmem:[%s18128_s25 + $0x2538] sm:$0xff] }
 0x766   : > { %v14849_v55 = vpop.f32.mrf.mxu1  ;;  %15094 = vmatmul.mubr.bf16.vlgmr.msra.gmra.mxu1 %v18524_v26  ;;  %v14810_v31 = vpop.f32.mrf.mxu0  ;;  %15104 = vmatprep.subr.bf16.mxu0 %v16732_v48  ;;  %v16844_v24 = vcombine.high %v1431_v58, %v1435_v9  ;;  %v1295_v39 = vld [vmem:[%s18128_s25 + $0x20d8] sm:$0xff]  ;;  %v16843_v29 = vcombine.low %v1431_v58, %v1435_v9 }
 0x767   : > { %15144 = vmatpush1.bf16.msra.mxu1 %v16867_v44  ;;  %v20401_v37 = vadd.f32 %v14849_v55, %v14809_v22  ;;  %v14811_v59 = vadd.f32 %v14810_v31, %v2325_v40  ;;  %15175 = vmatprep.mubr.bf16.mxu1 %v18533_v41  ;;  %v1299_v41 = vld [vmem:[%s18128_s25 + $0x20f8] sm:$0xff] }
 0x768   : > { %v14851_v52 = vpop.f32.mrf.mxu1  ;;  %15145 = vmatprep.subr.bf16.mxu1 %v16860_v56  ;;  %v14812_v26 = vpop.f32.mrf.mxu0  ;;  %v1423_v13 = vld [vmem:[%s18128_s25 + $0x24d8] sm:$0xff]  ;;  %v16708_v4 = vcombine.high %v1295_v39, %v1299_v41  ;;  %v16707_v48 = vcombine.low %v1295_v39, %v1299_v41 }
 0x769   : > { %v20409_v21 = vadd.f32 %v14851_v52, %v14811_v59  ;;  %15105 = vmatpush1.bf16.msra.mxu0 %v16731_v12  ;;  %v1427_v11 = vld [vmem:[%s18128_s25 + $0x24f8] sm:$0xff] }
 0x76a   : > { %v14853_v30 = vpop.f32.mrf.mxu1  ;;  %v14813_v45 = vpop.f32.mrf.mxu0  ;;  %15106 = vmatprep.subr.bf16.mxu0 %v16724_v63  ;;  %v16836_v20 = vcombine.high %v1423_v13, %v1427_v11  ;;  %v1287_v32 = vld [vmem:[%s18128_s25 + $0x2098] sm:$0xff]  ;;  %v16835_v40 = vcombine.low %v1423_v13, %v1427_v11 }
 0x76b   : > { %15146 = vmatpush1.bf16.msra.mxu1 %v16859_v18  ;;  %v1291_v61 = vld [vmem:[%s18128_s25 + $0x20b8] sm:$0xff] }
 0x76c   : > { %v14854_v23 = vpop.f32.mrf.mxu1  ;;  %15147 = vmatprep.subr.bf16.mxu1 %v16852_v46  ;;  %v1415_v10 = vld [vmem:[%s18128_s25 + $0x2498] sm:$0xff]  ;;  %v16700_v56 = vcombine.high %v1287_v32, %v1291_v61  ;;  %v16699_v22 = vcombine.low %v1287_v32, %v1291_v61 }
 0x76d   : > { %15107 = vmatpush1.bf16.msra.mxu0 %v16723_v47  ;;  %v1419_v44 = vld [vmem:[%s18128_s25 + $0x24b8] sm:$0xff] }
 0x76e   : > { %15108 = vmatprep.subr.bf16.mxu0 %v16716_v34  ;;  %v16828_v43 = vcombine.high %v1415_v10, %v1419_v44  ;;  %v1279_v2 = vld [vmem:[%s18128_s25 + $0x2058] sm:$0xff]  ;;  %v16827_v55 = vcombine.low %v1415_v10, %v1419_v44 }
 0x76f   : > { %15148 = vmatpush1.bf16.msra.mxu1 %v16851_v16  ;;  %v1283_v62 = vld [vmem:[%s18128_s25 + $0x2078] sm:$0xff] }
 0x770   : > { %15149 = vmatprep.subr.bf16.mxu1 %v16844_v24  ;;  %v1407_v25 = vld [vmem:[%s18128_s25 + $0x2458] sm:$0xff]  ;;  %v16692_v12 = vcombine.high %v1279_v2, %v1283_v62  ;;  %v16691_v46 = vcombine.low %v1279_v2, %v1283_v62 }
 0x771   : > { %15109 = vmatpush1.bf16.msra.mxu0 %v16715_v14  ;;  %v1411_v28 = vld [vmem:[%s18128_s25 + $0x2478] sm:$0xff] }
 0x772   : > { %15110 = vmatprep.subr.bf16.mxu0 %v16708_v4  ;;  %v16820_v31 = vcombine.high %v1407_v25, %v1411_v28  ;;  %v1271_v18 = vld [vmem:[%s18128_s25 + $0x2018] sm:$0xff]  ;;  %v16819_v57 = vcombine.low %v1407_v25, %v1411_v28 }
 0x773   : > { %15150 = vmatpush1.bf16.msra.mxu1 %v16843_v29  ;;  %v1275_v63 = vld [vmem:[%s18128_s25 + $0x2038] sm:$0xff] }
 0x774   : > { %15151 = vmatprep.subr.bf16.mxu1 %v16836_v20  ;;  %v1399_v59 = vld [vmem:[%s18128_s25 + $0x2418] sm:$0xff]  ;;  %v16684_v5 = vcombine.high %v1271_v18, %v1275_v63  ;;  %v16683_v45 = vcombine.low %v1271_v18, %v1275_v63 }
 0x775   : > { %15111 = vmatpush1.bf16.msra.mxu0 %v16707_v48  ;;  %v1403_v52 = vld [vmem:[%s18128_s25 + $0x2438] sm:$0xff] }
 0x776   : > { %15112 = vmatprep.subr.bf16.mxu0 %v16700_v56  ;;  %v16812_v26 = vcombine.high %v1399_v59, %v1403_v52  ;;  %v1391_v58 = vld [vmem:[%s18128_s25 + $0x23d8] sm:$0xff]  ;;  %v16811_v16 = vcombine.low %v1399_v59, %v1403_v52 }
 0x777   : > { %15152 = vmatpush1.bf16.msra.mxu1 %v16835_v40  ;;  %v1395_v9 = vld [vmem:[%s18128_s25 + $0x23f8] sm:$0xff] }
 0x778   : > { %15153 = vmatprep.subr.bf16.mxu1 %v16828_v43  ;;  %v1519_v30 = vld [vmem:[%s18128_s25 + $0x27d8] sm:$0xff]  ;;  %v16804_v34 = vcombine.high %v1391_v58, %v1395_v9  ;;  %v16803_v11 = vcombine.low %v1391_v58, %v1395_v9 }
 0x779   : > { %15113 = vmatpush1.bf16.msra.mxu0 %v16699_v22  ;;  %v1523_v47 = vld [vmem:[%s18128_s25 + $0x27f8] sm:$0xff] }
 0x77a   : > { %15114 = vmatprep.subr.bf16.mxu0 %v16692_v12  ;;  %v16932_v23 = vcombine.high %v1519_v30, %v1523_v47  ;;  %v1383_v24 = vld [vmem:[%s18128_s25 + $0x2398] sm:$0xff]  ;;  %v16931_v14 = vcombine.low %v1519_v30, %v1523_v47 }
 0x77b   : > { %15154 = vmatpush1.bf16.msra.mxu1 %v16827_v55  ;;  %v1387_v39 = vld [vmem:[%s18128_s25 + $0x23b8] sm:$0xff] }
 0x77c   : > { %15155 = vmatprep.subr.bf16.mxu1 %v16820_v31  ;;  %v1511_v41 = vld [vmem:[%s18128_s25 + $0x2798] sm:$0xff]  ;;  %v16796_v29 = vcombine.high %v1383_v24, %v1387_v39  ;;  %v16795_v44 = vcombine.low %v1383_v24, %v1387_v39 }
 0x77d   : > { %15115 = vmatpush1.bf16.msra.mxu0 %v16691_v46  ;;  %v1515_v13 = vld [vmem:[%s18128_s25 + $0x27b8] sm:$0xff] }
 0x77e   : > { %15116 = vmatprep.subr.bf16.mxu0 %v16684_v5  ;;  %v16924_v4 = vcombine.high %v1511_v41, %v1515_v13  ;;  %v1375_v20 = vld [vmem:[%s18128_s25 + $0x2358] sm:$0xff]  ;;  %v16923_v48 = vcombine.low %v1511_v41, %v1515_v13 }
 0x77f   : > { %15156 = vmatpush1.bf16.msra.mxu1 %v16819_v57  ;;  %v1379_v32 = vld [vmem:[%s18128_s25 + $0x2378] sm:$0xff] }
 0x780   : > { %15157 = vmatprep.subr.bf16.mxu1 %v16812_v26  ;;  %v1503_v61 = vld [vmem:[%s18128_s25 + $0x2758] sm:$0xff]  ;;  %v16788_v40 = vcombine.high %v1375_v20, %v1379_v32  ;;  %v16787_v28 = vcombine.low %v1375_v20, %v1379_v32 }
 0x781   : > { %15117 = vmatpush1.bf16.msra.mxu0 %v16683_v45  ;;  %v1507_v10 = vld [vmem:[%s18128_s25 + $0x2778] sm:$0xff] }
 0x782   : > { %15118 = vmatprep.subr.bf16.mxu0 %v16804_v34  ;;  %v16916_v56 = vcombine.high %v1503_v61, %v1507_v10  ;;  %v1367_v43 = vld [vmem:[%s18128_s25 + $0x2318] sm:$0xff]  ;;  %v16915_v22 = vcombine.low %v1503_v61, %v1507_v10 }
 0x783   : > { %15158 = vmatpush1.bf16.msra.mxu1 %v16811_v16  ;;  %v1371_v2 = vld [vmem:[%s18128_s25 + $0x2338] sm:$0xff] }
 0x784   : > { %15159 = vmatprep.subr.bf16.mxu1 %v16932_v23  ;;  %v1495_v62 = vld [vmem:[%s18128_s25 + $0x2718] sm:$0xff]  ;;  %v16780_v55 = vcombine.high %v1367_v43, %v1371_v2  ;;  %v16779_v52 = vcombine.low %v1367_v43, %v1371_v2 }
 0x785   : > { %15119 = vmatpush2.bf16.msra.mxu0 %v16803_v11  ;;  %v1499_v25 = vld [vmem:[%s18128_s25 + $0x2738] sm:$0xff] }
 0x786   : > { %15120 = vmatprep.subr.bf16.mxu0 %v16796_v29  ;;  %v16908_v12 = vcombine.high %v1495_v62, %v1499_v25  ;;  %v1359_v31 = vld [vmem:[%s18128_s25 + $0x22d8] sm:$0xff]  ;;  %v16907_v46 = vcombine.low %v1495_v62, %v1499_v25 }
 0x787   : > { %15160 = vmatpush2.bf16.msra.mxu1 %v16931_v14  ;;  %v1363_v18 = vld [vmem:[%s18128_s25 + $0x22f8] sm:$0xff] }
 0x788   : > { %15161 = vmatprep.subr.bf16.mxu1 %v16924_v4  ;;  %v1487_v63 = vld [vmem:[%s18128_s25 + $0x26d8] sm:$0xff]  ;;  %v16772_v57 = vcombine.high %v1359_v31, %v1363_v18  ;;  %v16771_v47 = vcombine.low %v1359_v31, %v1363_v18 }
 0x789   : > { %15121 = vmatpush2.bf16.msra.mxu0 %v16795_v44  ;;  %v1491_v59 = vld [vmem:[%s18128_s25 + $0x26f8] sm:$0xff] }
 0x78a   : > { %15122 = vmatprep.subr.bf16.mxu0 %v16788_v40  ;;  %v16900_v5 = vcombine.high %v1487_v63, %v1491_v59  ;;  %v1351_v26 = vld [vmem:[%s18128_s25 + $0x2298] sm:$0xff]  ;;  %v16899_v45 = vcombine.low %v1487_v63, %v1491_v59 }
 0x78b   : > { %15162 = vmatpush2.bf16.msra.mxu1 %v16923_v48  ;;  %v1355_v58 = vld [vmem:[%s18128_s25 + $0x22b8] sm:$0xff] }
 0x78c   : > { %15163 = vmatprep.subr.bf16.mxu1 %v16916_v56  ;;  %v1479_v9 = vld [vmem:[%s18128_s25 + $0x2698] sm:$0xff]  ;;  %v16764_v16 = vcombine.high %v1351_v26, %v1355_v58  ;;  %v16763_v13 = vcombine.low %v1351_v26, %v1355_v58 }
 0x78d   : > { %15123 = vmatpush2.bf16.msra.mxu0 %v16787_v28  ;;  %v1483_v30 = vld [vmem:[%s18128_s25 + $0x26b8] sm:$0xff] }
 0x78e   : > { %15124 = vmatprep.subr.bf16.mxu0 %v16780_v55  ;;  %v16892_v34 = vcombine.high %v1479_v9, %v1483_v30  ;;  %v1343_v23 = vld [vmem:[%s18128_s25 + $0x2258] sm:$0xff]  ;;  %v16891_v11 = vcombine.low %v1479_v9, %v1483_v30 }
 0x78f   : > { %15164 = vmatpush2.bf16.msra.mxu1 %v16915_v22  ;;  %v1347_v24 = vld [vmem:[%s18128_s25 + $0x2278] sm:$0xff] }
 0x790   : > { %15165 = vmatprep.subr.bf16.mxu1 %v16908_v12  ;;  %v1471_v39 = vld [vmem:[%s18128_s25 + $0x2658] sm:$0xff]  ;;  %v16756_v14 = vcombine.high %v1343_v23, %v1347_v24  ;;  %v16755_v10 = vcombine.low %v1343_v23, %v1347_v24 }
 0x791   : > { %15125 = vmatpush2.bf16.msra.mxu0 %v16779_v52  ;;  %v1475_v41 = vld [vmem:[%s18128_s25 + $0x2678] sm:$0xff] }
 0x792   : > { %15126 = vmatprep.subr.bf16.mxu0 %v16772_v57  ;;  %v16884_v29 = vcombine.high %v1471_v39, %v1475_v41  ;;  %v1335_v4 = vld [vmem:[%s18128_s25 + $0x2218] sm:$0xff]  ;;  %v16883_v44 = vcombine.low %v1471_v39, %v1475_v41 }
 0x793   : > { %15166 = vmatpush2.bf16.msra.mxu1 %v16907_v46  ;;  %v1339_v20 = vld [vmem:[%s18128_s25 + $0x2238] sm:$0xff] }
 0x794   : > { %15167 = vmatprep.subr.bf16.mxu1 %v16900_v5  ;;  %v1463_v32 = vld [vmem:[%s18128_s25 + $0x2618] sm:$0xff]  ;;  %v16748_v48 = vcombine.high %v1335_v4, %v1339_v20  ;;  %v16747_v25 = vcombine.low %v1335_v4, %v1339_v20 }
 0x795   : > { %15127 = vmatpush2.bf16.msra.mxu0 %v16771_v47  ;;  %v1467_v61 = vld [vmem:[%s18128_s25 + $0x2638] sm:$0xff] }
 0x796   : > { %15128 = vmatprep.subr.bf16.mxu0 %v16764_v16  ;;  %v16876_v40 = vcombine.high %v1463_v32, %v1467_v61  ;;  %v1583_v56 = vld [vmem:[%s18128_s25 + $0x29d8] sm:$0xff]  ;;  %v16875_v28 = vcombine.low %v1463_v32, %v1467_v61 }
 0x797   : > { %15168 = vmatpush2.bf16.msra.mxu1 %v16899_v45  ;;  %v1587_v43 = vld [vmem:[%s18128_s25 + $0x29f8] sm:$0xff] }
 0x798   : > { %15169 = vmatprep.subr.bf16.mxu1 %v16892_v34  ;;  %v1711_v2 = vld [vmem:[%s18128_s25 + $0x2dd8] sm:$0xff]  ;;  %v16996_v22 = vcombine.high %v1583_v56, %v1587_v43  ;;  %v16995_v59 = vcombine.low %v1583_v56, %v1587_v43 }
 0x799   : > { %15129 = vmatpush2.bf16.msra.mxu0 %v16763_v13  ;;  %v1715_v62 = vld [vmem:[%s18128_s25 + $0x2df8] sm:$0xff] }
 0x79a   : > { %15130 = vmatprep.subr.bf16.mxu0 %v16756_v14  ;;  %v17124_v55 = vcombine.high %v1711_v2, %v1715_v62  ;;  %v1575_v12 = vld [vmem:[%s18128_s25 + $0x2998] sm:$0xff]  ;;  %v17123_v52 = vcombine.low %v1711_v2, %v1715_v62 }
 0x79b   : > { %15170 = vmatpush2.bf16.msra.mxu1 %v16891_v11  ;;  %v1579_v31 = vld [vmem:[%s18128_s25 + $0x29b8] sm:$0xff] }
 0x79c   : > { %15171 = vmatprep.subr.bf16.mxu1 %v16884_v29  ;;  %v1703_v18 = vld [vmem:[%s18128_s25 + $0x2d98] sm:$0xff]  ;;  %v16988_v46 = vcombine.high %v1575_v12, %v1579_v31  ;;  %v16987_v16 = vcombine.low %v1575_v12, %v1579_v31 }
 0x79d   : > { %15131 = vmatpush2.bf16.msra.mxu0 %v16755_v10  ;;  %v1707_v63 = vld [vmem:[%s18128_s25 + $0x2db8] sm:$0xff] }
 0x79e   : > { %15132 = vmatprep.subr.bf16.mxu0 %v16748_v48  ;;  %v17116_v57 = vcombine.high %v1703_v18, %v1707_v63  ;;  %v1567_v5 = vld [vmem:[%s18128_s25 + $0x2958] sm:$0xff]  ;;  %v17115_v23 = vcombine.low %v1703_v18, %v1707_v63 }
 0x79f   : > { %15172 = vmatpush2.bf16.msra.mxu1 %v16883_v44  ;;  %v1571_v26 = vld [vmem:[%s18128_s25 + $0x2978] sm:$0xff] }
 0x7a0   : > { %15173 = vmatprep.subr.bf16.mxu1 %v16876_v40  ;;  %v1695_v9 = vld [vmem:[%s18128_s25 + $0x2d58] sm:$0xff]  ;;  %v16980_v24 = vcombine.high %v1567_v5, %v1571_v26 }
 0x7a1   : > { %15133 = vmatpush2.bf16.msra.mxu0 %v16747_v25  ;;  %v1699_v30 = vld [vmem:[%s18128_s25 + $0x2d78] sm:$0xff] }
 0x7a2   : > { %15184 = vmatprep.subr.bf16.mxu0 %v16996_v22  ;;  %v1559_v13 = vld [vmem:[%s18128_s25 + $0x2918] sm:$0xff]  ;;  %v17107_v61 = vcombine.low %v1695_v9, %v1699_v30 }
 0x7a3   : > { %15174 = vmatpush2.bf16.msra.mxu1 %v16875_v28  ;;  %v1563_v11 = vld [vmem:[%s18128_s25 + $0x2938] sm:$0xff] }
 0x7a4   : > { %15225 = vmatprep.subr.bf16.mxu1 %v17124_v55  ;;  %v14890_v58 = vpop.f32.mrf.mxu0  ;;  %15135 = vmatmul.mubr.bf16.vlgmr.msra.gmra.mxu0 %v18607_v50  ;;  %v1687_v14 = vld [vmem:[%s18128_s25 + $0x2d18] sm:$0xff]  ;;  %v16972_v10 = vcombine.high %v1559_v13, %v1563_v11  ;;  %v16971_v43 = vcombine.low %v1559_v13, %v1563_v11 }
 0x7a5   : > { %v14891_v47 = vadd.f32 %v14890_v58, %v20401_v37  ;;  %15185 = vmatpush1.bf16.msra.mxu0 %v16995_v59  ;;  %v17108_v37 = vcombine.high %v1695_v9, %v1699_v30  ;;  %15216 = vmatprep.mubr.bf16.mxu0 %v18614_v0  ;;  %v1691_v29 = vld [vmem:[%s18128_s25 + $0x2d38] sm:$0xff] }
 0x7a6   : > { %v14931_v45 = vpop.f32.mrf.mxu1  ;;  %15176 = vmatmul.mubr.bf16.vlgmr.msra.gmra.mxu1 %v18618_v60  ;;  %v14892_v34 = vpop.f32.mrf.mxu0  ;;  %15186 = vmatprep.subr.bf16.mxu0 %v16988_v46  ;;  %v17100_v44 = vcombine.high %v1687_v14, %v1691_v29  ;;  %v1551_v48 = vld [vmem:[%s18128_s25 + $0x28d8] sm:$0xff]  ;;  %v17099_v2 = vcombine.low %v1687_v14, %v1691_v29 }
 0x7a7   : > { %15226 = vmatpush1.bf16.msra.mxu1 %v17123_v52  ;;  %v20474_v39 = vadd.f32 %v14931_v45, %v14891_v47  ;;  %v14893_v50 = vadd.f32 %v14892_v34, %v20409_v21  ;;  %15257 = vmatprep.mubr.bf16.mxu1 %v18627_v15  ;;  %v16979_v21 = vcombine.low %v1567_v5, %v1571_v26  ;;  %v1555_v15 = vld [vmem:[%s18128_s25 + $0x28f8] sm:$0xff] }
 0x7a8   : > { %v14933_v41 = vpop.f32.mrf.mxu1  ;;  %15227 = vmatprep.subr.bf16.mxu1 %v17116_v57  ;;  %v14894_v60 = vpop.f32.mrf.mxu0  ;;  %v1679_v40 = vld [vmem:[%s18128_s25 + $0x2cd8] sm:$0xff]  ;;  %v16964_v62 = vcombine.high %v1551_v48, %v1555_v15  ;;  %v16963_v31 = vcombine.low %v1551_v48, %v1555_v15 }
 0x7a9   : > { %v20483_v4 = vadd.f32 %v14933_v41, %v14893_v50  ;;  %15187 = vmatpush1.bf16.msra.mxu0 %v16987_v16  ;;  %v1683_v56 = vld [vmem:[%s18128_s25 + $0x2cf8] sm:$0xff] }
 0x7aa   : > { %v14935_v20 = vpop.f32.mrf.mxu1  ;;  %v14895_v32 = vpop.f32.mrf.mxu0  ;;  %15188 = vmatprep.subr.bf16.mxu0 %v16980_v24  ;;  %v17092_v25 = vcombine.high %v1679_v40, %v1683_v56  ;;  %v1543_v28 = vld [vmem:[%s18128_s25 + $0x2898] sm:$0xff]  ;;  %v17091_v18 = vcombine.low %v1679_v40, %v1683_v56 }
 0x7ab   : > { %15228 = vmatpush1.bf16.msra.mxu1 %v17115_v23  ;;  %v1547_v22 = vld [vmem:[%s18128_s25 + $0x28b8] sm:$0xff] }
 0x7ac   : > { %v14936_v0 = vpop.f32.mrf.mxu1  ;;  %15229 = vmatprep.subr.bf16.mxu1 %v17108_v37  ;;  %v1671_v55 = vld [vmem:[%s18128_s25 + $0x2c98] sm:$0xff]  ;;  %v16956_v63 = vcombine.high %v1543_v28, %v1547_v22  ;;  %v16955_v26 = vcombine.low %v1543_v28, %v1547_v22 }
 0x7ad   : > { %15189 = vmatpush1.bf16.msra.mxu0 %v16979_v21  ;;  %v1675_v12 = vld [vmem:[%s18128_s25 + $0x2cb8] sm:$0xff] }
 0x7ae   : > { %15190 = vmatprep.subr.bf16.mxu0 %v16972_v10  ;;  %v17084_v59 = vcombine.high %v1671_v55, %v1675_v12  ;;  %v1535_v52 = vld [vmem:[%s18128_s25 + $0x2858] sm:$0xff]  ;;  %v17083_v58 = vcombine.low %v1671_v55, %v1675_v12 }
 0x7af   : > { %15230 = vmatpush1.bf16.msra.mxu1 %v17107_v61  ;;  %v1539_v46 = vld [vmem:[%s18128_s25 + $0x2878] sm:$0xff] }
 0x7b0   : > { %15231 = vmatprep.subr.bf16.mxu1 %v17100_v44  ;;  %v1663_v57 = vld [vmem:[%s18128_s25 + $0x2c58] sm:$0xff]  ;;  %v16948_v9 = vcombine.high %v1535_v52, %v1539_v46  ;;  %v16947_v23 = vcombine.low %v1535_v52, %v1539_v46 }
 0x7b1   : > { %15191 = vmatpush1.bf16.msra.mxu0 %v16971_v43  ;;  %v1667_v5 = vld [vmem:[%s18128_s25 + $0x2c78] sm:$0xff] }
 0x7b2   : > { %15192 = vmatprep.subr.bf16.mxu0 %v16964_v62  ;;  %v17076_v30 = vcombine.high %v1663_v57, %v1667_v5  ;;  %v1527_v47 = vld [vmem:[%s18128_s25 + $0x2818] sm:$0xff]  ;;  %v17075_v24 = vcombine.low %v1663_v57, %v1667_v5 }
 0x7b3   : > { %15232 = vmatpush1.bf16.msra.mxu1 %v17099_v2  ;;  %v1531_v45 = vld [vmem:[%s18128_s25 + $0x2838] sm:$0xff] }
 0x7b4   : > { %15233 = vmatprep.subr.bf16.mxu1 %v17092_v25  ;;  %v1655_v16 = vld [vmem:[%s18128_s25 + $0x2c18] sm:$0xff]  ;;  %v16940_v50 = vcombine.high %v1527_v47, %v1531_v45  ;;  %v16939_v14 = vcombine.low %v1527_v47, %v1531_v45 }
 0x7b5   : > { %15193 = vmatpush1.bf16.msra.mxu0 %v16963_v31  ;;  %v1659_v34 = vld [vmem:[%s18128_s25 + $0x2c38] sm:$0xff] }
 0x7b6   : > { %15194 = vmatprep.subr.bf16.mxu0 %v16956_v63  ;;  %v17068_v41 = vcombine.high %v1655_v16, %v1659_v34  ;;  %v1647_v37 = vld [vmem:[%s18128_s25 + $0x2bd8] sm:$0xff]  ;;  %v17067_v29 = vcombine.low %v1655_v16, %v1659_v34 }
 0x7b7   : > { %15234 = vmatpush1.bf16.msra.mxu1 %v17091_v18  ;;  %v1651_v13 = vld [vmem:[%s18128_s25 + $0x2bf8] sm:$0xff] }
 0x7b8   : > { %15235 = vmatprep.subr.bf16.mxu1 %v17084_v59  ;;  %v1775_v11 = vld [vmem:[%s18128_s25 + $0x2fd8] sm:$0xff]  ;;  %v17060_v20 = vcombine.high %v1647_v37, %v1651_v13  ;;  %v17059_v44 = vcombine.low %v1647_v37, %v1651_v13 }
 0x7b9   : > { %15195 = vmatpush1.bf16.msra.mxu0 %v16955_v26  ;;  %v1779_v60 = vld [vmem:[%s18128_s25 + $0x2ff8] sm:$0xff] }
 0x7ba   : > { %15196 = vmatprep.subr.bf16.mxu0 %v16948_v9  ;;  %v17188_v21 = vcombine.high %v1775_v11, %v1779_v60  ;;  %v1639_v32 = vld [vmem:[%s18128_s25 + $0x2b98] sm:$0xff]  ;;  %v17187_v48 = vcombine.low %v1775_v11, %v1779_v60 }
 0x7bb   : > { %15236 = vmatpush1.bf16.msra.mxu1 %v17083_v58  ;;  %v1643_v61 = vld [vmem:[%s18128_s25 + $0x2bb8] sm:$0xff] }
 0x7bc   : > { %15237 = vmatprep.subr.bf16.mxu1 %v17076_v30  ;;  %v1767_v10 = vld [vmem:[%s18128_s25 + $0x2f98] sm:$0xff]  ;;  %v17052_v15 = vcombine.high %v1639_v32, %v1643_v61  ;;  %v17051_v25 = vcombine.low %v1639_v32, %v1643_v61 }
 0x7bd   : > { %15197 = vmatpush1.bf16.msra.mxu0 %v16947_v23  ;;  %v1771_v0 = vld [vmem:[%s18128_s25 + $0x2fb8] sm:$0xff] }
 0x7be   : > { %15198 = vmatprep.subr.bf16.mxu0 %v16940_v50  ;;  %v17180_v40 = vcombine.high %v1767_v10, %v1771_v0  ;;  %v1631_v56 = vld [vmem:[%s18128_s25 + $0x2b58] sm:$0xff]  ;;  %v17179_v28 = vcombine.low %v1767_v10, %v1771_v0 }
 0x7bf   : > { %15238 = vmatpush1.bf16.msra.mxu1 %v17075_v24  ;;  %v1635_v43 = vld [vmem:[%s18128_s25 + $0x2b78] sm:$0xff] }
 0x7c0   : > { %15239 = vmatprep.subr.bf16.mxu1 %v17068_v41  ;;  %v1759_v2 = vld [vmem:[%s18128_s25 + $0x2f58] sm:$0xff]  ;;  %v17044_v22 = vcombine.high %v1631_v56, %v1635_v43  ;;  %v17043_v59 = vcombine.low %v1631_v56, %v1635_v43 }
 0x7c1   : > { %15199 = vmatpush1.bf16.msra.mxu0 %v16939_v14  ;;  %v1763_v62 = vld [vmem:[%s18128_s25 + $0x2f78] sm:$0xff] }
 0x7c2   : > { %15200 = vmatprep.subr.bf16.mxu0 %v17060_v20  ;;  %v17172_v55 = vcombine.high %v1759_v2, %v1763_v62  ;;  %v1623_v12 = vld [vmem:[%s18128_s25 + $0x2b18] sm:$0xff]  ;;  %v17171_v52 = vcombine.low %v1759_v2, %v1763_v62 }
 0x7c3   : > { %15240 = vmatpush1.bf16.msra.mxu1 %v17067_v29  ;;  %v1627_v31 = vld [vmem:[%s18128_s25 + $0x2b38] sm:$0xff] }
 0x7c4   : > { %15241 = vmatprep.subr.bf16.mxu1 %v17188_v21  ;;  %v1751_v18 = vld [vmem:[%s18128_s25 + $0x2f18] sm:$0xff]  ;;  %v17036_v46 = vcombine.high %v1623_v12, %v1627_v31  ;;  %v17035_v30 = vcombine.low %v1623_v12, %v1627_v31 }
 0x7c5   : > { %15201 = vmatpush2.bf16.msra.mxu0 %v17059_v44  ;;  %v1755_v63 = vld [vmem:[%s18128_s25 + $0x2f38] sm:$0xff] }
 0x7c6   : > { %15202 = vmatprep.subr.bf16.mxu0 %v17052_v15  ;;  %v17164_v57 = vcombine.high %v1751_v18, %v1755_v63  ;;  %v1615_v5 = vld [vmem:[%s18128_s25 + $0x2ad8] sm:$0xff]  ;;  %v17163_v47 = vcombine.low %v1751_v18, %v1755_v63 }
 0x7c7   : > { %15242 = vmatpush2.bf16.msra.mxu1 %v17187_v48  ;;  %v1619_v26 = vld [vmem:[%s18128_s25 + $0x2af8] sm:$0xff] }
 0x7c8   : > { %15243 = vmatprep.subr.bf16.mxu1 %v17180_v40  ;;  %v1743_v58 = vld [vmem:[%s18128_s25 + $0x2ed8] sm:$0xff]  ;;  %v17028_v45 = vcombine.high %v1615_v5, %v1619_v26  ;;  %v17027_v41 = vcombine.low %v1615_v5, %v1619_v26 }
 0x7c9   : > { %15203 = vmatpush2.bf16.msra.mxu0 %v17051_v25  ;;  %v1747_v9 = vld [vmem:[%s18128_s25 + $0x2ef8] sm:$0xff] }
 0x7ca   : > { %15204 = vmatprep.subr.bf16.mxu0 %v17044_v22  ;;  %v17156_v16 = vcombine.high %v1743_v58, %v1747_v9  ;;  %v1607_v34 = vld [vmem:[%s18128_s25 + $0x2a98] sm:$0xff]  ;;  %v17155_v37 = vcombine.low %v1743_v58, %v1747_v9 }
 0x7cb   : > { %15244 = vmatpush2.bf16.msra.mxu1 %v17179_v28  ;;  %v1611_v23 = vld [vmem:[%s18128_s25 + $0x2ab8] sm:$0xff] }
 0x7cc   : > { %15245 = vmatprep.subr.bf16.mxu1 %v17172_v55  ;;  %v1735_v24 = vld [vmem:[%s18128_s25 + $0x2e98] sm:$0xff]  ;;  %v17020_v13 = vcombine.high %v1607_v34, %v1611_v23  ;;  %v17019_v21 = vcombine.low %v1607_v34, %v1611_v23 }
 0x7cd   : > { %15205 = vmatpush2.bf16.msra.mxu0 %v17043_v59  ;;  %v1739_v50 = vld [vmem:[%s18128_s25 + $0x2eb8] sm:$0xff] }
 0x7ce   : > { %15206 = vmatprep.subr.bf16.mxu0 %v17036_v46  ;;  %v17148_v11 = vcombine.high %v1735_v24, %v1739_v50  ;;  %v1599_v60 = vld [vmem:[%s18128_s25 + $0x2a58] sm:$0xff]  ;;  %v17147_v32 = vcombine.low %v1735_v24, %v1739_v50 }
 0x7cf   : > { %15246 = vmatpush2.bf16.msra.mxu1 %v17171_v52  ;;  %v1603_v14 = vld [vmem:[%s18128_s25 + $0x2a78] sm:$0xff] }
 0x7d0   : > { %15247 = vmatprep.subr.bf16.mxu1 %v17164_v57  ;;  %v1727_v29 = vld [vmem:[%s18128_s25 + $0x2e58] sm:$0xff]  ;;  %v17012_v61 = vcombine.high %v1599_v60, %v1603_v14  ;;  %v17011_v40 = vcombine.low %v1599_v60, %v1603_v14 }
 0x7d1   : > { %15207 = vmatpush2.bf16.msra.mxu0 %v17035_v30  ;;  %v1731_v20 = vld [vmem:[%s18128_s25 + $0x2e78] sm:$0xff] }
 0x7d2   : > { %15208 = vmatprep.subr.bf16.mxu0 %v17028_v45  ;;  %v17140_v10 = vcombine.high %v1727_v29, %v1731_v20  ;;  %v1591_v0 = vld [vmem:[%s18128_s25 + $0x2a18] sm:$0xff]  ;;  %v17139_v56 = vcombine.low %v1727_v29, %v1731_v20 }
 0x7d3   : > { %15248 = vmatpush2.bf16.msra.mxu1 %v17163_v47  ;;  %v1595_v44 = vld [vmem:[%s18128_s25 + $0x2a38] sm:$0xff] }
 0x7d4   : > { %15249 = vmatprep.subr.bf16.mxu1 %v17156_v16  ;;  %v1719_v48 = vld [vmem:[%s18128_s25 + $0x2e18] sm:$0xff]  ;;  %v17004_v43 = vcombine.high %v1591_v0, %v1595_v44  ;;  %v17003_v55 = vcombine.low %v1591_v0, %v1595_v44 }
 0x7d5   : > { %15209 = vmatpush2.bf16.msra.mxu0 %v17027_v41  ;;  %v1723_v15 = vld [vmem:[%s18128_s25 + $0x2e38] sm:$0xff] }
 0x7d6   : > { %15210 = vmatprep.subr.bf16.mxu0 %v17020_v13  ;;  %v17132_v2 = vcombine.high %v1719_v48, %v1723_v15  ;;  %v1839_v62 = vld [vmem:[%s18128_s25 + $0x31d8] sm:$0xff]  ;;  %v17131_v12 = vcombine.low %v1719_v48, %v1723_v15 }
 0x7d7   : > { %15250 = vmatpush2.bf16.msra.mxu1 %v17155_v37  ;;  %v1843_v25 = vld [vmem:[%s18128_s25 + $0x31f8] sm:$0xff] }
 0x7d8   : > { %15251 = vmatprep.subr.bf16.mxu1 %v17148_v11  ;;  %v1967_v28 = vld [vmem:[%s18128_s25 + $0x35d8] sm:$0xff]  ;;  %v17252_v31 = vcombine.high %v1839_v62, %v1843_v25  ;;  %v17251_v57 = vcombine.low %v1839_v62, %v1843_v25 }
 0x7d9   : > { %15211 = vmatpush2.bf16.msra.mxu0 %v17019_v21  ;;  %v1971_v22 = vld [vmem:[%s18128_s25 + $0x35f8] sm:$0xff] }
 0x7da   : > { %15212 = vmatprep.subr.bf16.mxu0 %v17012_v61  ;;  %v17380_v18 = vcombine.high %v1967_v28, %v1971_v22  ;;  %v1831_v63 = vld [vmem:[%s18128_s25 + $0x3198] sm:$0xff]  ;;  %v17379_v5 = vcombine.low %v1967_v28, %v1971_v22 }
 0x7db   : > { %15252 = vmatpush2.bf16.msra.mxu1 %v17147_v32  ;;  %v1835_v59 = vld [vmem:[%s18128_s25 + $0x31b8] sm:$0xff] }
 0x7dc   : > { %15253 = vmatprep.subr.bf16.mxu1 %v17140_v10  ;;  %v1959_v52 = vld [vmem:[%s18128_s25 + $0x3598] sm:$0xff]  ;;  %v17244_v26 = vcombine.high %v1831_v63, %v1835_v59  ;;  %v17243_v24 = vcombine.low %v1831_v63, %v1835_v59 }
 0x7dd   : > { %15213 = vmatpush2.bf16.msra.mxu0 %v17011_v40  ;;  %v1963_v46 = vld [vmem:[%s18128_s25 + $0x35b8] sm:$0xff] }
 0x7de   : > { %15214 = vmatprep.subr.bf16.mxu0 %v17004_v43  ;;  %v17372_v58 = vcombine.high %v1959_v52, %v1963_v46  ;;  %v1823_v9 = vld [vmem:[%s18128_s25 + $0x3158] sm:$0xff]  ;;  %v17371_v41 = vcombine.low %v1959_v52, %v1963_v46 }
 0x7df   : > { %15254 = vmatpush2.bf16.msra.mxu1 %v17139_v56  ;;  %v1827_v30 = vld [vmem:[%s18128_s25 + $0x3178] sm:$0xff] }
 0x7e0   : > { %15255 = vmatprep.subr.bf16.mxu1 %v17132_v2  ;;  %v1951_v45 = vld [vmem:[%s18128_s25 + $0x3558] sm:$0xff]  ;;  %v17236_v37 = vcombine.high %v1823_v9, %v1827_v30 }
 0x7e1   : > { %15215 = vmatpush2.bf16.msra.mxu0 %v17003_v55  ;;  %v1955_v16 = vld [vmem:[%s18128_s25 + $0x3578] sm:$0xff] }
 0x7e2   : > { %15266 = vmatprep.subr.bf16.mxu0 %v17252_v31  ;;  %v1815_v60 = vld [vmem:[%s18128_s25 + $0x3118] sm:$0xff]  ;;  %v17363_v10 = vcombine.low %v1951_v45, %v1955_v16 }
 0x7e3   : > { %15256 = vmatpush2.bf16.msra.mxu1 %v17131_v12  ;;  %v1819_v14 = vld [vmem:[%s18128_s25 + $0x3138] sm:$0xff] }
 0x7e4   : > { %15307 = vmatprep.subr.bf16.mxu1 %v17380_v18  ;;  %v14972_v47 = vpop.f32.mrf.mxu0  ;;  %15217 = vmatmul.mubr.bf16.vlgmr.msra.gmra.mxu0 %v18704_v38  ;;  %v1943_v29 = vld [vmem:[%s18128_s25 + $0x3518] sm:$0xff]  ;;  %v17228_v0 = vcombine.high %v1815_v60, %v1819_v14  ;;  %v17227_v56 = vcombine.low %v1815_v60, %v1819_v14 }
 0x7e5   : > { %v14973_v34 = vadd.f32 %v14972_v47, %v20474_v39  ;;  %15267 = vmatpush1.bf16.msra.mxu0 %v17251_v57  ;;  %v17364_v39 = vcombine.high %v1951_v45, %v1955_v16  ;;  %15298 = vmatprep.mubr.bf16.mxu0 %v18711_v54  ;;  %v1947_v20 = vld [vmem:[%s18128_s25 + $0x3538] sm:$0xff] }
 0x7e6   : > { %v15013_v23 = vpop.f32.mrf.mxu1  ;;  %15258 = vmatmul.mubr.bf16.vlgmr.msra.gmra.mxu1 %v18715_v33  ;;  %v14974_v50 = vpop.f32.mrf.mxu0  ;;  %15268 = vmatprep.subr.bf16.mxu0 %v17244_v26  ;;  %v17356_v44 = vcombine.high %v1943_v29, %v1947_v20  ;;  %v1807_v48 = vld [vmem:[%s18128_s25 + $0x30d8] sm:$0xff]  ;;  %v17355_v43 = vcombine.low %v1943_v29, %v1947_v20 }
 0x7e7   : > { %15308 = vmatpush1.bf16.msra.mxu1 %v17379_v5  ;;  %v20548_v13 = vadd.f32 %v15013_v23, %v14973_v34  ;;  %v14975_v38 = vadd.f32 %v14974_v50, %v20483_v4  ;;  %15339 = vmatprep.mubr.bf16.mxu1 %v18724_v8  ;;  %v17235_v4 = vcombine.low %v1823_v9, %v1827_v30  ;;  %v1811_v8 = vld [vmem:[%s18128_s25 + $0x30f8] sm:$0xff] }
 0x7e8   : > { %v15015_v11 = vpop.f32.mrf.mxu1  ;;  %15309 = vmatprep.subr.bf16.mxu1 %v17372_v58  ;;  %v14976_v33 = vpop.f32.mrf.mxu0  ;;  %v1935_v15 = vld [vmem:[%s18128_s25 + $0x34d8] sm:$0xff]  ;;  %v17220_v2 = vcombine.high %v1807_v48, %v1811_v8  ;;  %v17219_v12 = vcombine.low %v1807_v48, %v1811_v8 }
 0x7e9   : > { %v20557_v21 = vadd.f32 %v15015_v11, %v14975_v38  ;;  %15269 = vmatpush1.bf16.msra.mxu0 %v17243_v24  ;;  %v1939_v40 = vld [vmem:[%s18128_s25 + $0x34f8] sm:$0xff] }
 0x7ea   : > { %v15017_v32 = vpop.f32.mrf.mxu1  ;;  %v14977_v61 = vpop.f32.mrf.mxu0  ;;  %15270 = vmatprep.subr.bf16.mxu0 %v17236_v37  ;;  %v17348_v62 = vcombine.high %v1935_v15, %v1939_v40  ;;  %v1799_v25 = vld [vmem:[%s18128_s25 + $0x3098] sm:$0xff]  ;;  %v17347_v31 = vcombine.low %v1935_v15, %v1939_v40 }
 0x7eb   : > { %15310 = vmatpush1.bf16.msra.mxu1 %v17371_v41  ;;  %v1803_v28 = vld [vmem:[%s18128_s25 + $0x30b8] sm:$0xff] }
 0x7ec   : > { %v15018_v54 = vpop.f32.mrf.mxu1  ;;  %15311 = vmatprep.subr.bf16.mxu1 %v17364_v39  ;;  %v1927_v22 = vld [vmem:[%s18128_s25 + $0x3498] sm:$0xff]  ;;  %v17212_v18 = vcombine.high %v1799_v25, %v1803_v28  ;;  %v17211_v5 = vcombine.low %v1799_v25, %v1803_v28 }
 0x7ed   : > { %15271 = vmatpush1.bf16.msra.mxu0 %v17235_v4  ;;  %v1931_v55 = vld [vmem:[%s18128_s25 + $0x34b8] sm:$0xff] }
 0x7ee   : > { %15272 = vmatprep.subr.bf16.mxu0 %v17228_v0  ;;  %v17340_v63 = vcombine.high %v1927_v22, %v1931_v55  ;;  %v1791_v59 = vld [vmem:[%s18128_s25 + $0x3058] sm:$0xff]  ;;  %v17339_v26 = vcombine.low %v1927_v22, %v1931_v55 }
 0x7ef   : > { %15312 = vmatpush1.bf16.msra.mxu1 %v17363_v10  ;;  %v1795_v52 = vld [vmem:[%s18128_s25 + $0x3078] sm:$0xff] }
 0x7f0   : > { %15313 = vmatprep.subr.bf16.mxu1 %v17356_v44  ;;  %v1919_v46 = vld [vmem:[%s18128_s25 + $0x3458] sm:$0xff]  ;;  %v17204_v58 = vcombine.high %v1791_v59, %v1795_v52  ;;  %v17203_v34 = vcombine.low %v1791_v59, %v1795_v52 }
 0x7f1   : > { %15273 = vmatpush1.bf16.msra.mxu0 %v17227_v56  ;;  %v1923_v57 = vld [vmem:[%s18128_s25 + $0x3478] sm:$0xff] }
 0x7f2   : > { %15274 = vmatprep.subr.bf16.mxu0 %v17220_v2  ;;  %v17332_v9 = vcombine.high %v1919_v46, %v1923_v57  ;;  %v1783_v30 = vld [vmem:[%s18128_s25 + $0x3018] sm:$0xff]  ;;  %v17331_v23 = vcombine.low %v1919_v46, %v1923_v57 }
 0x7f3   : > { %15314 = vmatpush1.bf16.msra.mxu1 %v17355_v43  ;;  %v1787_v47 = vld [vmem:[%s18128_s25 + $0x3038] sm:$0xff] }
 0x7f4   : > { %15315 = vmatprep.subr.bf16.mxu1 %v17348_v62  ;;  %v1911_v45 = vld [vmem:[%s18128_s25 + $0x3418] sm:$0xff]  ;;  %v17196_v24 = vcombine.high %v1783_v30, %v1787_v47  ;;  %v17195_v39 = vcombine.low %v1783_v30, %v1787_v47 }
 0x7f5   : > { %15275 = vmatpush1.bf16.msra.mxu0 %v17219_v12  ;;  %v1915_v16 = vld [vmem:[%s18128_s25 + $0x3438] sm:$0xff] }
 0x7f6   : > { %15276 = vmatprep.subr.bf16.mxu0 %v17212_v18  ;;  %v17324_v50 = vcombine.high %v1911_v45, %v1915_v16  ;;  %v1903_v41 = vld [vmem:[%s18128_s25 + $0x33d8] sm:$0xff]  ;;  %v17323_v60 = vcombine.low %v1911_v45, %v1915_v16 }
 0x7f7   : > { %15316 = vmatpush1.bf16.msra.mxu1 %v17347_v31  ;;  %v1907_v37 = vld [vmem:[%s18128_s25 + $0x33f8] sm:$0xff] }
 0x7f8   : > { %15317 = vmatprep.subr.bf16.mxu1 %v17340_v63  ;;  %v2031_v38 = vld [vmem:[%s18128_s25 + $0x37d8] sm:$0xff]  ;;  %v17316_v14 = vcombine.high %v1903_v41, %v1907_v37  ;;  %v17315_v61 = vcombine.low %v1903_v41, %v1907_v37 }
 0x7f9   : > { %15277 = vmatpush1.bf16.msra.mxu0 %v17211_v5  ;;  %v2035_v11 = vld [vmem:[%s18128_s25 + $0x37f8] sm:$0xff] }
 0x7fa   : > { %15278 = vmatprep.subr.bf16.mxu0 %v17204_v58  ;;  %v17444_v33 = vcombine.high %v2031_v38, %v2035_v11  ;;  %v1895_v29 = vld [vmem:[%s18128_s25 + $0x3398] sm:$0xff]  ;;  %v17443_v10 = vcombine.low %v2031_v38, %v2035_v11 }
 0x7fb   : > { %15318 = vmatpush1.bf16.msra.mxu1 %v17339_v26  ;;  %v1899_v20 = vld [vmem:[%s18128_s25 + $0x33b8] sm:$0xff] }
 0x7fc   : > { %15319 = vmatprep.subr.bf16.mxu1 %v17332_v9  ;;  %v2023_v32 = vld [vmem:[%s18128_s25 + $0x3798] sm:$0xff]  ;;  %v17308_v0 = vcombine.high %v1895_v29, %v1899_v20  ;;  %v17307_v40 = vcombine.low %v1895_v29, %v1899_v20 }
 0x7fd   : > { %15279 = vmatpush1.bf16.msra.mxu0 %v17203_v34  ;;  %v2027_v4 = vld [vmem:[%s18128_s25 + $0x37b8] sm:$0xff] }
 0x7fe   : > { %15280 = vmatprep.subr.bf16.mxu0 %v17196_v24  ;;  %v17436_v54 = vcombine.high %v2023_v32, %v2027_v4  ;;  %v1887_v44 = vld [vmem:[%s18128_s25 + $0x3358] sm:$0xff]  ;;  %v17435_v56 = vcombine.low %v2023_v32, %v2027_v4 }
 0x7ff   : > { %15320 = vmatpush1.bf16.msra.mxu1 %v17331_v23  ;;  %v1891_v48 = vld [vmem:[%s18128_s25 + $0x3378] sm:$0xff] }
 0x800   : > { %15321 = vmatprep.subr.bf16.mxu1 %v17324_v50  ;;  %v2015_v8 = vld [vmem:[%s18128_s25 + $0x3758] sm:$0xff]  ;;  %v17300_v43 = vcombine.high %v1887_v44, %v1891_v48  ;;  %v17299_v55 = vcombine.low %v1887_v44, %v1891_v48 }
 0x801   : > { %15281 = vmatpush1.bf16.msra.mxu0 %v17195_v39  ;;  %v2019_v15 = vld [vmem:[%s18128_s25 + $0x3778] sm:$0xff] }
 0x802   : > { %15282 = vmatprep.subr.bf16.mxu0 %v17316_v14  ;;  %v17428_v2 = vcombine.high %v2015_v8, %v2019_v15  ;;  %v1879_v62 = vld [vmem:[%s18128_s25 + $0x3318] sm:$0xff]  ;;  %v17427_v12 = vcombine.low %v2015_v8, %v2019_v15 }
 0x803   : > { %15322 = vmatpush1.bf16.msra.mxu1 %v17323_v60  ;;  %v1883_v25 = vld [vmem:[%s18128_s25 + $0x3338] sm:$0xff] }
 0x804   : > { %15323 = vmatprep.subr.bf16.mxu1 %v17444_v33  ;;  %v2007_v28 = vld [vmem:[%s18128_s25 + $0x3718] sm:$0xff]  ;;  %v17292_v31 = vcombine.high %v1879_v62, %v1883_v25  ;;  %v17291_v57 = vcombine.low %v1879_v62, %v1883_v25 }
 0x805   : > { %15283 = vmatpush2.bf16.msra.mxu0 %v17315_v61  ;;  %v2011_v22 = vld [vmem:[%s18128_s25 + $0x3738] sm:$0xff] }
 0x806   : > { %15284 = vmatprep.subr.bf16.mxu0 %v17308_v0  ;;  %v17420_v18 = vcombine.high %v2007_v28, %v2011_v22  ;;  %v1871_v63 = vld [vmem:[%s18128_s25 + $0x32d8] sm:$0xff]  ;;  %v17419_v5 = vcombine.low %v2007_v28, %v2011_v22 }
 0x807   : > { %15324 = vmatpush2.bf16.msra.mxu1 %v17443_v10  ;;  %v1875_v59 = vld [vmem:[%s18128_s25 + $0x32f8] sm:$0xff] }
 0x808   : > { %15325 = vmatprep.subr.bf16.mxu1 %v17436_v54  ;;  %v1999_v52 = vld [vmem:[%s18128_s25 + $0x36d8] sm:$0xff]  ;;  %v17284_v26 = vcombine.high %v1871_v63, %v1875_v59  ;;  %v17283_v16 = vcombine.low %v1871_v63, %v1875_v59 }
 0x809   : > { %15285 = vmatpush2.bf16.msra.mxu0 %v17307_v40  ;;  %v2003_v46 = vld [vmem:[%s18128_s25 + $0x36f8] sm:$0xff] }
 0x80a   : > { %15286 = vmatprep.subr.bf16.mxu0 %v17300_v43  ;;  %v17412_v58 = vcombine.high %v1999_v52, %v2003_v46  ;;  %v1863_v9 = vld [vmem:[%s18128_s25 + $0x3298] sm:$0xff]  ;;  %v17411_v34 = vcombine.low %v1999_v52, %v2003_v46 }
 0x80b   : > { %15326 = vmatpush2.bf16.msra.mxu1 %v17435_v56  ;;  %v1867_v30 = vld [vmem:[%s18128_s25 + $0x32b8] sm:$0xff] }
 0x80c   : > { %15327 = vmatprep.subr.bf16.mxu1 %v17428_v2  ;;  %v1991_v47 = vld [vmem:[%s18128_s25 + $0x3698] sm:$0xff]  ;;  %v17276_v23 = vcombine.high %v1863_v9, %v1867_v30  ;;  %v17275_v11 = vcombine.low %v1863_v9, %v1867_v30 }
 0x80d   : > { %15287 = vmatpush2.bf16.msra.mxu0 %v17299_v55  ;;  %v1995_v45 = vld [vmem:[%s18128_s25 + $0x36b8] sm:$0xff] }
 0x80e   : > { %15288 = vmatprep.subr.bf16.mxu0 %v17292_v31  ;;  %v17404_v24 = vcombine.high %v1991_v47, %v1995_v45  ;;  %v1855_v50 = vld [vmem:[%s18128_s25 + $0x3258] sm:$0xff]  ;;  %v17403_v39 = vcombine.low %v1991_v47, %v1995_v45 }
 0x80f   : > { %15328 = vmatpush2.bf16.msra.mxu1 %v17427_v12  ;;  %v1859_v41 = vld [vmem:[%s18128_s25 + $0x3278] sm:$0xff] }
 0x810   : > { %15329 = vmatprep.subr.bf16.mxu1 %v17420_v18  ;;  %v1983_v37 = vld [vmem:[%s18128_s25 + $0x3658] sm:$0xff]  ;;  %v17268_v60 = vcombine.high %v1855_v50, %v1859_v41  ;;  %v17267_v4 = vcombine.low %v1855_v50, %v1859_v41 }
 0x811   : > { %15289 = vmatpush2.bf16.msra.mxu0 %v17291_v57  ;;  %v1987_v38 = vld [vmem:[%s18128_s25 + $0x3678] sm:$0xff] }
 0x812   : > { %15290 = vmatprep.subr.bf16.mxu0 %v17284_v26  ;;  %v17396_v14 = vcombine.high %v1983_v37, %v1987_v38  ;;  %v1847_v33 = vld [vmem:[%s18128_s25 + $0x3218] sm:$0xff]  ;;  %v17395_v61 = vcombine.low %v1983_v37, %v1987_v38 }
 0x813   : > { %15330 = vmatpush2.bf16.msra.mxu1 %v17419_v5  ;;  %v1851_v29 = vld [vmem:[%s18128_s25 + $0x3238] sm:$0xff] }
 0x814   : > { %15331 = vmatprep.subr.bf16.mxu1 %v17412_v58  ;;  %v1975_v20 = vld [vmem:[%s18128_s25 + $0x3618] sm:$0xff]  ;;  %v17260_v10 = vcombine.high %v1847_v33, %v1851_v29  ;;  %v17259_v15 = vcombine.low %v1847_v33, %v1851_v29 }
 0x815   : > { %15291 = vmatpush2.bf16.msra.mxu0 %v17283_v16  ;;  %v1979_v32 = vld [vmem:[%s18128_s25 + $0x3638] sm:$0xff] }
 0x816   : > { %15292 = vmatprep.subr.bf16.mxu0 %v17276_v23  ;;  %v17388_v0 = vcombine.high %v1975_v20, %v1979_v32  ;;  %v2095_v54 = vld [vmem:[%s18128_s25 + $0x39d8] sm:$0xff]  ;;  %v17387_v40 = vcombine.low %v1975_v20, %v1979_v32 }
 0x817   : > { %15332 = vmatpush2.bf16.msra.mxu1 %v17411_v34  ;;  %v2099_v44 = vld [vmem:[%s18128_s25 + $0x39f8] sm:$0xff] }
 0x818   : > { %15333 = vmatprep.subr.bf16.mxu1 %v17404_v24  ;;  %v2223_v48 = vld [vmem:[%s18128_s25 + $0x3dd8] sm:$0xff]  ;;  %v17508_v56 = vcombine.high %v2095_v54, %v2099_v44  ;;  %v17507_v22 = vcombine.low %v2095_v54, %v2099_v44 }
 0x819   : > { %15293 = vmatpush2.bf16.msra.mxu0 %v17275_v11  ;;  %v2227_v8 = vld [vmem:[%s18128_s25 + $0x3df8] sm:$0xff] }
 0x81a   : > { %15294 = vmatprep.subr.bf16.mxu0 %v17268_v60  ;;  %v17636_v43 = vcombine.high %v2223_v48, %v2227_v8  ;;  %v2087_v2 = vld [vmem:[%s18128_s25 + $0x3998] sm:$0xff]  ;;  %v17635_v55 = vcombine.low %v2223_v48, %v2227_v8 }
 0x81b   : > { %15334 = vmatpush2.bf16.msra.mxu1 %v17403_v39  ;;  %v2091_v62 = vld [vmem:[%s18128_s25 + $0x39b8] sm:$0xff] }
 0x81c   : > { %15335 = vmatprep.subr.bf16.mxu1 %v17396_v14  ;;  %v2215_v25 = vld [vmem:[%s18128_s25 + $0x3d98] sm:$0xff]  ;;  %v17500_v12 = vcombine.high %v2087_v2, %v2091_v62  ;;  %v17499_v26 = vcombine.low %v2087_v2, %v2091_v62 }
 0x81d   : > { %15295 = vmatpush2.bf16.msra.mxu0 %v17267_v4  ;;  %v2219_v28 = vld [vmem:[%s18128_s25 + $0x3db8] sm:$0xff] }
 0x81e   : > { %15296 = vmatprep.subr.bf16.mxu0 %v17260_v10  ;;  %v17628_v31 = vcombine.high %v2215_v25, %v2219_v28  ;;  %v2079_v18 = vld [vmem:[%s18128_s25 + $0x3958] sm:$0xff]  ;;  %v17627_v9 = vcombine.low %v2215_v25, %v2219_v28 }
 0x81f   : > { %15336 = vmatpush2.bf16.msra.mxu1 %v17395_v61  ;;  %v2083_v63 = vld [vmem:[%s18128_s25 + $0x3978] sm:$0xff] }
 0x820   : > { %15337 = vmatprep.subr.bf16.mxu1 %v17388_v0  ;;  %v2207_v52 = vld [vmem:[%s18128_s25 + $0x3d58] sm:$0xff]  ;;  %v17492_v30 = vcombine.high %v2079_v18, %v2083_v63 }
 0x821   : > { %15297 = vmatpush2.bf16.msra.mxu0 %v17259_v15  ;;  %v2211_v46 = vld [vmem:[%s18128_s25 + $0x3d78] sm:$0xff] }
 0x822   : > { %15348 = vmatprep.subr.bf16.mxu0 %v17508_v56  ;;  %v2071_v16 = vld [vmem:[%s18128_s25 + $0x3918] sm:$0xff]  ;;  %v17619_v38 = vcombine.low %v2207_v52, %v2211_v46 }
 0x823   : > { %15338 = vmatpush2.bf16.msra.mxu1 %v17387_v40  ;;  %v2075_v34 = vld [vmem:[%s18128_s25 + $0x3938] sm:$0xff] }
 0x824   : > { %15389 = vmatprep.subr.bf16.mxu1 %v17636_v43  ;;  %v15054_v59 = vpop.f32.mrf.mxu0  ;;  %15299 = vmatmul.mubr.bf16.vlgmr.msra.gmra.mxu0 %v18800_v1  ;;  %v2199_v23 = vld [vmem:[%s18128_s25 + $0x3d18] sm:$0xff]  ;;  %v17484_v11 = vcombine.high %v2071_v16, %v2075_v34  ;;  %v17483_v29 = vcombine.low %v2071_v16, %v2075_v34 }
 0x825   : > { %v15055_v57 = vadd.f32 %v15054_v59, %v20548_v13  ;;  %15349 = vmatpush1.bf16.msra.mxu0 %v17507_v22  ;;  %v17620_v13 = vcombine.high %v2207_v52, %v2211_v46  ;;  %15380 = vmatprep.mubr.bf16.mxu0 %v18807_v17  ;;  %v2203_v24 = vld [vmem:[%s18128_s25 + $0x3d38] sm:$0xff] }
 0x826   : > { %v15095_v5 = vpop.f32.mrf.mxu1  ;;  %15340 = vmatmul.mubr.bf16.vlgmr.msra.gmra.mxu1 %v18811_v19  ;;  %v15056_v58 = vpop.f32.mrf.mxu0  ;;  %15350 = vmatprep.subr.bf16.mxu0 %v17500_v12  ;;  %v17612_v39 = vcombine.high %v2199_v23, %v2203_v24  ;;  %v2063_v60 = vld [vmem:[%s18128_s25 + $0x38d8] sm:$0xff]  ;;  %v17611_v20 = vcombine.low %v2199_v23, %v2203_v24 }
 0x827   : > { %15390 = vmatpush1.bf16.msra.mxu1 %v17635_v55  ;;  %v20622_v47 = vadd.f32 %v15095_v5, %v15055_v57  ;;  %v15057_v1 = vadd.f32 %v15056_v58, %v20557_v21  ;;  %15421 = vmatprep.mubr.bf16.mxu1 %v18820_v36  ;;  %v17491_v21 = vcombine.low %v2079_v18, %v2083_v63  ;;  %v2067_v36 = vld [vmem:[%s18128_s25 + $0x38f8] sm:$0xff] }
 0x828   : > { %v15097_v45 = vpop.f32.mrf.mxu1  ;;  %15391 = vmatprep.subr.bf16.mxu1 %v17628_v31  ;;  %v15058_v19 = vpop.f32.mrf.mxu0  ;;  %v2191_v14 = vld [vmem:[%s18128_s25 + $0x3cd8] sm:$0xff]  ;;  %v17476_v32 = vcombine.high %v2063_v60, %v2067_v36  ;;  %v17475_v44 = vcombine.low %v2063_v60, %v2067_v36 }
 0x829   : > { %v20631_v50 = vadd.f32 %v15097_v45, %v15057_v1  ;;  %15351 = vmatpush1.bf16.msra.mxu0 %v17499_v26  ;;  %v2195_v33 = vld [vmem:[%s18128_s25 + $0x3cf8] sm:$0xff] }
 0x82a   : > { %v15099_v41 = vpop.f32.mrf.mxu1  ;;  %v15059_v37 = vpop.f32.mrf.mxu0  ;;  %15352 = vmatprep.subr.bf16.mxu0 %v17492_v30  ;;  %v17604_v4 = vcombine.high %v2191_v14, %v2195_v33  ;;  %v2055_v61 = vld [vmem:[%s18128_s25 + $0x3898] sm:$0xff]  ;;  %v17603_v48 = vcombine.low %v2191_v14, %v2195_v33 }
 0x82b   : > { %15392 = vmatpush1.bf16.msra.mxu1 %v17627_v9  ;;  %v2059_v10 = vld [vmem:[%s18128_s25 + $0x38b8] sm:$0xff] }
 0x82c   : > { %v15100_v17 = vpop.f32.mrf.mxu1  ;;  %15393 = vmatprep.subr.bf16.mxu1 %v17620_v13  ;;  %v2183_v0 = vld [vmem:[%s18128_s25 + $0x3c98] sm:$0xff]  ;;  %v17468_v8 = vcombine.high %v2055_v61, %v2059_v10  ;;  %v17467_v62 = vcombine.low %v2055_v61, %v2059_v10 }
 0x82d   : > { %15353 = vmatpush1.bf16.msra.mxu0 %v17491_v21  ;;  %v2187_v54 = vld [vmem:[%s18128_s25 + $0x3cb8] sm:$0xff] }
 0x82e   : > { %15354 = vmatprep.subr.bf16.mxu0 %v17484_v11  ;;  %v17596_v15 = vcombine.high %v2183_v0, %v2187_v54  ;;  %v2047_v40 = vld [vmem:[%s18128_s25 + $0x3858] sm:$0xff]  ;;  %v17595_v25 = vcombine.low %v2183_v0, %v2187_v54 }
 0x82f   : > { %15394 = vmatpush1.bf16.msra.mxu1 %v17619_v38  ;;  %v2051_v56 = vld [vmem:[%s18128_s25 + $0x3878] sm:$0xff] }
 0x830   : > { %15395 = vmatprep.subr.bf16.mxu1 %v17612_v39  ;;  %v2175_v43 = vld [vmem:[%s18128_s25 + $0x3c58] sm:$0xff]  ;;  %v17460_v28 = vcombine.high %v2047_v40, %v2051_v56  ;;  %v17459_v63 = vcombine.low %v2047_v40, %v2051_v56 }
 0x831   : > { %15355 = vmatpush1.bf16.msra.mxu0 %v17483_v29  ;;  %v2179_v2 = vld [vmem:[%s18128_s25 + $0x3c78] sm:$0xff] }
 0x832   : > { %15356 = vmatprep.subr.bf16.mxu0 %v17476_v32  ;;  %v17588_v22 = vcombine.high %v2175_v43, %v2179_v2  ;;  %v2039_v55 = vld [vmem:[%s18128_s25 + $0x3818] sm:$0xff]  ;;  %v17587_v59 = vcombine.low %v2175_v43, %v2179_v2 }
 0x833   : > { %15396 = vmatpush1.bf16.msra.mxu1 %v17611_v20  ;;  %v2043_v12 = vld [vmem:[%s18128_s25 + $0x3838] sm:$0xff] }
 0x834   : > { %15397 = vmatprep.subr.bf16.mxu1 %v17604_v4  ;;  %v2167_v31 = vld [vmem:[%s18128_s25 + $0x3c18] sm:$0xff]  ;;  %v17452_v52 = vcombine.high %v2039_v55, %v2043_v12  ;;  %v17451_v9 = vcombine.low %v2039_v55, %v2043_v12 }
 0x835   : > { %15357 = vmatpush1.bf16.msra.mxu0 %v17475_v44  ;;  %v2171_v18 = vld [vmem:[%s18128_s25 + $0x3c38] sm:$0xff] }
 0x836   : > { %15358 = vmatprep.subr.bf16.mxu0 %v17468_v8  ;;  %v17580_v46 = vcombine.high %v2167_v31, %v2171_v18  ;;  %v2159_v57 = vld [vmem:[%s18128_s25 + $0x3bd8] sm:$0xff]  ;;  %v17579_v30 = vcombine.low %v2167_v31, %v2171_v18 }
 0x837   : > { %15398 = vmatpush1.bf16.msra.mxu1 %v17603_v48  ;;  %v2163_v5 = vld [vmem:[%s18128_s25 + $0x3bf8] sm:$0xff] }
 0x838   : > { %15399 = vmatprep.subr.bf16.mxu1 %v17596_v15  ;;  %v2287_v26 = vld [vmem:[%s18128_s25 + $0x3fd8] sm:$0xff]  ;;  %v17572_v1 = vcombine.high %v2159_v57, %v2163_v5  ;;  %v17571_v23 = vcombine.low %v2159_v57, %v2163_v5 }
 0x839   : > { %15359 = vmatpush1.bf16.msra.mxu0 %v17467_v62  ;;  %v2291_v58 = vld [vmem:[%s18128_s25 + $0x3ff8] sm:$0xff] }
 0x83a   : > { %15360 = vmatprep.subr.bf16.mxu0 %v17460_v28  ;;  %v17700_v45 = vcombine.high %v2287_v26, %v2291_v58  ;;  %v2151_v13 = vld [vmem:[%s18128_s25 + $0x3b98] sm:$0xff]  ;;  %v17699_v24 = vcombine.low %v2287_v26, %v2291_v58 }
 0x83b   : > { %15400 = vmatpush1.bf16.msra.mxu1 %v17595_v25  ;;  %v2155_v16 = vld [vmem:[%s18128_s25 + $0x3bb8] sm:$0xff] }
 0x83c   : > { %15401 = vmatprep.subr.bf16.mxu1 %v17588_v22  ;;  %v2279_v34 = vld [vmem:[%s18128_s25 + $0x3f98] sm:$0xff]  ;;  %v17564_v41 = vcombine.high %v2151_v13, %v2155_v16  ;;  %v17563_v39 = vcombine.low %v2151_v13, %v2155_v16 }
 0x83d   : > { %15361 = vmatpush1.bf16.msra.mxu0 %v17459_v63  ;;  %v2283_v19 = vld [vmem:[%s18128_s25 + $0x3fb8] sm:$0xff] }
 0x83e   : > { %15362 = vmatprep.subr.bf16.mxu0 %v17452_v52  ;;  %v17692_v21 = vcombine.high %v2279_v34, %v2283_v19  ;;  %v2143_v37 = vld [vmem:[%s18128_s25 + $0x3b58] sm:$0xff]  ;;  %v17691_v60 = vcombine.low %v2279_v34, %v2283_v19 }
 0x83f   : > { %15402 = vmatpush1.bf16.msra.mxu1 %v17587_v59  ;;  %v2147_v38 = vld [vmem:[%s18128_s25 + $0x3b78] sm:$0xff] }
 0x840   : > { %15403 = vmatprep.subr.bf16.mxu1 %v17580_v46  ;;  %v2271_v11 = vld [vmem:[%s18128_s25 + $0x3f58] sm:$0xff]  ;;  %v17556_v36 = vcombine.high %v2143_v37, %v2147_v38  ;;  %v17555_v4 = vcombine.low %v2143_v37, %v2147_v38 }
 0x841   : > { %15363 = vmatpush1.bf16.msra.mxu0 %v17451_v9  ;;  %v2275_v17 = vld [vmem:[%s18128_s25 + $0x3f78] sm:$0xff] }
 0x842   : > { %15364 = vmatprep.subr.bf16.mxu0 %v17572_v1  ;;  %v17684_v14 = vcombine.high %v2271_v11, %v2275_v17  ;;  %v2135_v33 = vld [vmem:[%s18128_s25 + $0x3b18] sm:$0xff]  ;;  %v17683_v61 = vcombine.low %v2271_v11, %v2275_v17 }
 0x843   : > { %15404 = vmatpush1.bf16.msra.mxu1 %v17579_v30  ;;  %v2139_v29 = vld [vmem:[%s18128_s25 + $0x3b38] sm:$0xff] }
 0x844   : > { %15405 = vmatprep.subr.bf16.mxu1 %v17700_v45  ;;  %v2263_v20 = vld [vmem:[%s18128_s25 + $0x3f18] sm:$0xff]  ;;  %v17548_v10 = vcombine.high %v2135_v33, %v2139_v29  ;;  %v17547_v15 = vcombine.low %v2135_v33, %v2139_v29 }
 0x845   : > { %15365 = vmatpush2.bf16.msra.mxu0 %v17571_v23  ;;  %v2267_v32 = vld [vmem:[%s18128_s25 + $0x3f38] sm:$0xff] }
 0x846   : > { %15366 = vmatprep.subr.bf16.mxu0 %v17564_v41  ;;  %v17676_v0 = vcombine.high %v2263_v20, %v2267_v32  ;;  %v2127_v54 = vld [vmem:[%s18128_s25 + $0x3ad8] sm:$0xff]  ;;  %v17675_v40 = vcombine.low %v2263_v20, %v2267_v32 }
 0x847   : > { %15406 = vmatpush2.bf16.msra.mxu1 %v17699_v24  ;;  %v2131_v44 = vld [vmem:[%s18128_s25 + $0x3af8] sm:$0xff] }
 0x848   : > { %15407 = vmatprep.subr.bf16.mxu1 %v17692_v21  ;;  %v2255_v48 = vld [vmem:[%s18128_s25 + $0x3ed8] sm:$0xff]  ;;  %v17540_v56 = vcombine.high %v2127_v54, %v2131_v44  ;;  %v17539_v22 = vcombine.low %v2127_v54, %v2131_v44 }
 0x849   : > { %15367 = vmatpush2.bf16.msra.mxu0 %v17563_v39  ;;  %v2259_v8 = vld [vmem:[%s18128_s25 + $0x3ef8] sm:$0xff] }
 0x84a   : > { %15368 = vmatprep.subr.bf16.mxu0 %v17556_v36  ;;  %v17668_v43 = vcombine.high %v2255_v48, %v2259_v8  ;;  %v2119_v2 = vld [vmem:[%s18128_s25 + $0x3a98] sm:$0xff]  ;;  %v17667_v55 = vcombine.low %v2255_v48, %v2259_v8 }
 0x84b   : > { %15408 = vmatpush2.bf16.msra.mxu1 %v17691_v60  ;;  %v2123_v62 = vld [vmem:[%s18128_s25 + $0x3ab8] sm:$0xff] }
 0x84c   : > { %15409 = vmatprep.subr.bf16.mxu1 %v17684_v14  ;;  %v2247_v25 = vld [vmem:[%s18128_s25 + $0x3e98] sm:$0xff]  ;;  %v17532_v12 = vcombine.high %v2119_v2, %v2123_v62  ;;  %v17531_v46 = vcombine.low %v2119_v2, %v2123_v62 }
 0x84d   : > { %15369 = vmatpush2.bf16.msra.mxu0 %v17555_v4  ;;  %v2251_v28 = vld [vmem:[%s18128_s25 + $0x3eb8] sm:$0xff] }
 0x84e   : > { %15370 = vmatprep.subr.bf16.mxu0 %v17548_v10  ;;  %v17660_v31 = vcombine.high %v2247_v25, %v2251_v28  ;;  %v2111_v18 = vld [vmem:[%s18128_s25 + $0x3a58] sm:$0xff]  ;;  %v17659_v57 = vcombine.low %v2247_v25, %v2251_v28 }
 0x84f   : > { %15410 = vmatpush2.bf16.msra.mxu1 %v17683_v61  ;;  %v2115_v63 = vld [vmem:[%s18128_s25 + $0x3a78] sm:$0xff] }
 0x850   : > { %15411 = vmatprep.subr.bf16.mxu1 %v17676_v0  ;;  %v2239_v59 = vld [vmem:[%s18128_s25 + $0x3e58] sm:$0xff]  ;;  %v17524_v5 = vcombine.high %v2111_v18, %v2115_v63  ;;  %v17523_v45 = vcombine.low %v2111_v18, %v2115_v63 }
 0x851   : > { %15371 = vmatpush2.bf16.msra.mxu0 %v17547_v15  ;;  %v2243_v52 = vld [vmem:[%s18128_s25 + $0x3e78] sm:$0xff] }
 0x852   : > { %15372 = vmatprep.subr.bf16.mxu0 %v17540_v56  ;;  %v17652_v26 = vcombine.high %v2239_v59, %v2243_v52  ;;  %v2103_v58 = vld [vmem:[%s18128_s25 + $0x3a18] sm:$0xff]  ;;  %v17651_v13 = vcombine.low %v2239_v59, %v2243_v52 }
 0x853   : > { %15412 = vmatpush2.bf16.msra.mxu1 %v17675_v40  ;;  %v2107_v9 = vld [vmem:[%s18128_s25 + $0x3a38] sm:$0xff] }
 0x854   : > { %15413 = vmatprep.subr.bf16.mxu1 %v17668_v43  ;;  %v2231_v30 = vld [vmem:[%s18128_s25 + $0x3e18] sm:$0xff]  ;;  %v17516_v16 = vcombine.high %v2103_v58, %v2107_v9  ;;  %v17515_v19 = vcombine.low %v2103_v58, %v2107_v9 }
 0x855   : > { %15373 = vmatpush2.bf16.msra.mxu0 %v17539_v22  ;;  %v2235_v1 = vld [vmem:[%s18128_s25 + $0x3e38] sm:$0xff] }
 0x856   : > { %15374 = vmatprep.subr.bf16.mxu0 %v17532_v12  ;;  %v17644_v34 = vcombine.high %v2231_v30, %v2235_v1  ;;  %v17643_v23 = vcombine.low %v2231_v30, %v2235_v1 }
 0x857   : > { %15414 = vmatpush2.bf16.msra.mxu1 %v17667_v55 }
 0x858   : > { %15415 = vmatprep.subr.bf16.mxu1 %v17660_v31 }
 0x859   : > { %15375 = vmatpush2.bf16.msra.mxu0 %v17531_v46 }
 0x85a   : > { %15376 = vmatprep.subr.bf16.mxu0 %v17524_v5 }
 0x85b   : > { %15416 = vmatpush2.bf16.msra.mxu1 %v17659_v57 }
 0x85c   : > { %15417 = vmatprep.subr.bf16.mxu1 %v17652_v26 }
 0x85d   : > { %15377 = vmatpush2.bf16.msra.mxu0 %v17523_v45 }
 0x85e   : > { %15378 = vmatprep.subr.bf16.mxu0 %v17516_v16  ;;  %v15494_v16 = vrot.slane %v17703_v35, %v18163_v53 }
 0x85f   : > { %15418 = vmatpush2.bf16.msra.mxu1 %v17651_v13 }
 0x860   : > { %15419 = vmatprep.subr.bf16.mxu1 %v17644_v34 }
 0x861   : > { %15379 = vmatpush2.bf16.msra.mxu0 %v17515_v19 }
 0x863   : > { %15420 = vmatpush2.bf16.msra.mxu1 %v17643_v23  ;;  %v15510_v23 = vrot.slane %v15502_v27, %v18163_v53 }
 0x864   : > { %v15136_v24 = vpop.f32.mrf.mxu0  ;;  %15381 = vmatmul.mubr.bf16.vlgmr.msra.gmra.mxu0 %v18889_v51 }
 0x865   : > { %v15137_v41 = vadd.f32 %v15136_v24, %v20622_v47 }
 0x866   : > { %v15177_v21 = vpop.f32.mrf.mxu1  ;;  %15422 = vmatmul.mubr.bf16.vlgmr.msra.gmra.mxu1 %v18897_v6  ;;  %v15138_v37 = vpop.f32.mrf.mxu0 }
 0x867   : > { %v15178_v38 = vadd.f32 %v15177_v21, %v15137_v41  ;;  %v15139_v11 = vadd.f32 %v15138_v37, %v20631_v50 }
 0x868   : > { %v15179_v17 = vpop.f32.mrf.mxu1  ;;  %v15140_v39 = vpop.f32.mrf.mxu0 }
 0x869   : > { %v15180_v60 = vadd.f32 %v15179_v17, %v15139_v11 }
 0x86a   : > { %v15181_v36 = vpop.f32.mrf.mxu1  ;;  %v15141_v14 = vpop.f32.mrf.mxu0 }
 0x86c   : > { %v15182_v33 = vpop.f32.mrf.mxu1 }
 0x8a4   : > { %v15218_v29 = vpop.f32.mrf.mxu0 }
 0x8a5   : > { %v15219_v20 = vadd.f32 %v15218_v29, %v15178_v38 }
 0x8a6   : > { %v15259_v32 = vpop.f32.mrf.mxu1  ;;  %v15220_v4 = vpop.f32.mrf.mxu0 }
 0x8a7   : > { %v15260_v51 = vadd.f32 %v15259_v32, %v15219_v20  ;;  %v15221_v61 = vadd.f32 %v15220_v4, %v15180_v60 }
 0x8a8   : > { %v15261_v47 = vpop.f32.mrf.mxu1  ;;  %v15222_v10 = vpop.f32.mrf.mxu0 }
 0x8a9   : > { %v15262_v0 = vadd.f32 %v15261_v47, %v15221_v61 }
 0x8aa   : > { %v15263_v6 = vpop.f32.mrf.mxu1  ;;  %v15223_v54 = vpop.f32.mrf.mxu0 }
 0x8ac   : > { %v15264_v44 = vpop.f32.mrf.mxu1 }
 0x8e4   : > { %v15300_v48 = vpop.f32.mrf.mxu0 }
 0x8e5   : > { %v15301_v62 = vadd.f32 %v15300_v48, %v15260_v51 }
 0x8e6   : > { %v15341_v50 = vpop.f32.mrf.mxu1  ;;  %v15302_v8 = vpop.f32.mrf.mxu0 }
 0x8e7   : > { %v15303_v25 = vadd.f32 %v15302_v8, %v15262_v0  ;;  %v15342_v28 = vadd.f32 %v15341_v50, %v15301_v62 }
 0x8e8   : > { %v15343_v15 = vpop.f32.mrf.mxu1  ;;  %v15304_v40 = vpop.f32.mrf.mxu0 }
 0x8e9   : > { %v15344_v55 = vadd.f32 %v15343_v15, %v15303_v25 }
 0x8ea   : > { %v15345_v56 = vpop.f32.mrf.mxu1  ;;  %v15305_v43 = vpop.f32.mrf.mxu0 }
 0x8ec   : > { %v15346_v2 = vpop.f32.mrf.mxu1 }
 0x924   : > { %v15382_v22 = vpop.f32.mrf.mxu0 }
 0x925   : > { %v15383_v12 = vadd.f32 %v15382_v22, %v15342_v28 }
 0x926   : > { %v15423_v31 = vpop.f32.mrf.mxu1  ;;  %v15384_v18 = vpop.f32.mrf.mxu0 }
 0x927   : > { %v15424_v63 = vadd.f32 %v15423_v31, %v15383_v12  ;;  %v15385_v59 = vadd.f32 %v15384_v18, %v15344_v55 }
 0x928   : > { %v15425_v52 = vpop.f32.mrf.mxu1  ;;  %v15386_v46 = vpop.f32.mrf.mxu0 }
 0x929   : > { %v15444_v57 = vmul.f32 0.2, %v15424_v63  ;;  %v15426_v5 = vadd.f32 %v15425_v52, %v15385_v59  ;;  %vm15436_vm6 = vcmp.gt.f32.partialorder %v15424_v63, 0.0 }
 0x92a   : > { %v15427_v26 = vpop.f32.mrf.mxu1  ;;  %v15387_v58 = vpop.f32.mrf.mxu0 }
 0x92b   : > { %vm15437_vm7 = vcmp.gt.f32.partialorder %v15426_v5, 0.0  ;;  %v15445_v9 = vmul.f32 0.2, %v15426_v5  ;;  %v15452_v1 = vsel %vm15436_vm6, %v15424_v63, %v15444_v57 }
 0x92c   : > { %v15428_v30 = vpop.f32.mrf.mxu1 }
 0x92d   : > { %v15453_v45 = vsel %vm15437_vm7, %v15426_v5, %v15445_v9 }
 0x92e   : > { %v17704_v13 = vpack.c.bf16 %v15453_v45, %v15452_v1 }
 0x930   : > { %v15501_v34 = vrot.slane %v17704_v13, %v18163_v53 }
 0x932   : > { %v15503_v19 = vcombine.low %v15494_v16, %v15501_v34 }
 0x934   : > { %v15517_v24 = vrot.slane %v15503_v19, %v18163_v53 }
 0x936   : > { %v15518_v41 = vcombine.low %v15510_v23, %v15517_v24 }
 0x938   : > { %15520 = vst [vmem:[%s236_s10] sm:$0xff] %v15518_v41 }
 0x939   : > { %17881 = shalt.err (!%p17878_p1)
}
 0x93a   : > { %s17882_s20 = scalar_lea.hbm %s15534_s8, 128  ;;  %s17886_s29 = scalar_lea.hbm %s20735_s3, 256 }
 0x93b   : > { %p17883_p7 = scmp.ne.s32.totalorder %s15534_s8, %s17882_s20  ;;  %p17887_p3 = scmp.lt.s32.totalorder %s15534_s8, %s20735_s3 }
 0x93c   : > { %p17888_p4 = scmp.lt.s32.totalorder %s17886_s29, %s17882_s20 }
 0x93d   : > { %p17884_p11 = pnand %p17883_p7, %p20749_p5 }
 0x93e   : > { %p17889_p6 = por %p17888_p4, %p17887_p3 }
 0x93f   : > { %p17885_p8 = pneg %p17884_p11 }
 0x941   : > { %p17890_p9 = pnand %p17889_p6, %p17885_p8 }
 0x943   : > { %17893 = shalt.err (!%p17890_p9)
}
 0x944   : > { %17721 = dma.vmem_to_hbm [thread:$0]  (%p20749_p5), %s15537_s18, 128, %s15534_s8, %s15522_s9  }
 0x945 PF: > { %s15548_s30 = sand.u32 1, %s17924_s12   ;;  %p20750_p12 = scmp.ne.s32.totalorder %s20743_s28, 0 }
 0x946   : > { %p20751_p0 = scmp.ge.s32.totalorder %s17936_s15, 2  ;;  %s15549_s27 = scalar_lea.sflag [#allocation4], %s15548_s30 }
 0x948   : > { %p17735_p10 = pnand %p20751_p0, %p20750_p12 }
 0x94a   : > { %p17736_p2 = pneg %p17735_p10 }
 0x94c   : > { %17919 = dma.done.wait (%p17736_p2), %s15549_s27, 128  }
 0x94d   : > { %17921 = vsyncadd (%p17736_p2), %s15549_s27, 4294967168  ;;  %p17_p13 = scmp.ge.s32.totalorder %s17987_s16, 4   ;;  %s20752_s12 = smov %s17928_s13 }
 0x94e   : > { %s20753_s13 = smov %s17932_s14  ;;  %s20754_s14 = smov %s17998_s19 }
 0x94f   : > { %s20755_s15 = smov %s17987_s16  ;;  %19 = sbr.rel (!%p17_p13) target bundleno = 6 (0x6), region = 93 }
 0x954   :  { %15554 = vsyncpa [#allocation3], 1 }
 0x955   :  { %15556 = vsyncpa [#allocation3 + $0x1], 1 }
 0x956   :  { %15557 = vsyncpa [#allocation6], 1 }
 0x957   :  { %15559 = vsyncpa [#allocation6 + $0x1], 1 }
 0x958   :  { %15560 = vsyncpa [#allocation4], 1 }
 0x959   :  { %15562 = vsyncpa [#allocation4 + $0x1], 1 }

</bundles_post_ra>
